<compile_context>
chip_gen: v5e
topology: v5e:2x2
jax: 0.10.0
libtpu: 0.0.40
codegen_flags: <defaults>
</compile_context>

<pallas_src>
import jax
import jax.numpy as jnp
import numpy as np
from jax.experimental import pallas as pl
from jax.experimental.pallas import tpu as pltpu

LANE = 128          # lane width: all channel dims are padded to this
NUM_ACTIONS = 3


# ----------------------------- Pallas kernels ------------------------------ #

def _conv_pool_relu_kernel(p00_ref, p01_ref, p10_ref, p11_ref, w_ref, b_ref, o_ref):
    """Fused conv (patch matmul) + bias + 2x2 maxpool + ReLU.

    p??_ref: im2col patches of one pooling corner, (B*Hp*Wp, K).
    w_ref:   (K, 128) prepared weight.   b_ref: (1, 128).
    max over the four corner matmuls == MaxPool2d(2) on the conv output;
    the shared bias and the ReLU commute with that max.
    """
    w = w_ref[...]
    acc = jnp.dot(p00_ref[...], w, preferred_element_type=jnp.float32)
    acc = jnp.maximum(acc, jnp.dot(p01_ref[...], w, preferred_element_type=jnp.float32))
    acc = jnp.maximum(acc, jnp.dot(p10_ref[...], w, preferred_element_type=jnp.float32))
    acc = jnp.maximum(acc, jnp.dot(p11_ref[...], w, preferred_element_type=jnp.float32))
    o_ref[...] = jnp.maximum(acc + b_ref[...], 0.0).astype(o_ref.dtype)


def _tail_kernel(p00_ref, p01_ref, p10_ref, p11_ref,
                 w3_ref, b3_ref, w4_ref, b4_ref, w5_ref, b5_ref, o_ref):
    """conv3 + bias + pool + ReLU (spatial -> 1x1) fused with fc4 + ReLU + fc5."""
    w3 = w3_ref[...]
    acc = jnp.dot(p00_ref[...], w3, preferred_element_type=jnp.float32)
    acc = jnp.maximum(acc, jnp.dot(p01_ref[...], w3, preferred_element_type=jnp.float32))
    acc = jnp.maximum(acc, jnp.dot(p10_ref[...], w3, preferred_element_type=jnp.float32))
    acc = jnp.maximum(acc, jnp.dot(p11_ref[...], w3, preferred_element_type=jnp.float32))
    h = jnp.maximum(acc + b3_ref[...], 0.0)                      # (B, 128), spatial 1x1
    h = jnp.maximum(
        jnp.dot(h, w4_ref[...], preferred_element_type=jnp.float32) + b4_ref[...], 0.0)
    o_ref[...] = (jnp.dot(h, w5_ref[...], preferred_element_type=jnp.float32)
                  + b5_ref[...]).astype(o_ref.dtype)


def _vmem_specs(n):
    return [pl.BlockSpec(memory_space=pltpu.MemorySpace.VMEM)] * n


def conv_pool_relu(corners, w, b):
    mp = corners[0].shape[0]
    n = w.shape[1]
    return pl.pallas_call(
        _conv_pool_relu_kernel,
        out_shape=jax.ShapeDtypeStruct((mp, n), jnp.float32),
        in_specs=_vmem_specs(6),
        out_specs=pl.BlockSpec(memory_space=pltpu.MemorySpace.VMEM),
    )(*corners, w, b)


def conv_tail(corners, w3, b3, w4, b4, w5, b5):
    mp = corners[0].shape[0]
    n = w5.shape[1]
    return pl.pallas_call(
        _tail_kernel,
        out_shape=jax.ShapeDtypeStruct((mp, n), jnp.float32),
        in_specs=_vmem_specs(10),
        out_specs=pl.BlockSpec(memory_space=pltpu.MemorySpace.VMEM),
    )(*corners, w3, b3, w4, b4, w5, b5)


# ------------------------------- JAX glue ---------------------------------- #

def _pool_corner_patches(x_nhwc, kh, kw, stride, pad):
    """im2col patches for the 4 corners of the 2x2 maxpool over the conv output.

    Returns ([4 x (B*Hp*Wp, kh*kw*C)], Hp, Wp).  Feature order is (kh, kw, C),
    matching the prepared weight layout.  Pure XLA glue on tiny tensors.
    """
    B, H, W, C = x_nhwc.shape
    xp = jnp.pad(x_nhwc, ((0, 0), (pad, pad), (pad, pad), (0, 0)))
    Ho = (H + 2 * pad - kh) // stride + 1
    Wo = (W + 2 * pad - kw) // stride + 1
    Hp, Wp = Ho // 2, Wo // 2            # MaxPool2d(2) floor-crops odd dims
    s2 = 2 * stride
    corners = []
    for p in (0, 1):
        for q in (0, 1):
            taps = []
            for i in range(kh):
                for j in range(kw):
                    r0 = p * stride + i
                    c0 = q * stride + j
                    taps.append(xp[:, r0:r0 + s2 * (Hp - 1) + 1:s2,
                                      c0:c0 + s2 * (Wp - 1) + 1:s2, :])
            patch = jnp.concatenate(taps, axis=-1)       # (B, Hp, Wp, kh*kw*C)
            corners.append(patch.reshape(B * Hp * Wp, kh * kw * C))
    return corners, Hp, Wp


def convnn_forward(x_nchw, prep):
    B = x_nchw.shape[0]
    x = jnp.transpose(x_nchw, (0, 2, 3, 1))                  # NCHW -> NHWC, once
    c, Hp, Wp = _pool_corner_patches(x, 8, 8, 4, 2)          # conv1 geometry
    x = conv_pool_relu(c, prep["w1"], prep["b1"]).reshape(B, Hp, Wp, LANE)
    c, Hp, Wp = _pool_corner_patches(x, 4, 4, 2, 1)          # conv2
    x = conv_pool_relu(c, prep["w2"], prep["b2"]).reshape(B, Hp, Wp, LANE)
    c, Hp, Wp = _pool_corner_patches(x, 3, 3, 1, 1)          # conv3 (-> 1x1 spatial)
    # Spatial is 1x1 here, so torch's .view(B, -1) is just the channel vector and
    # conv3 + fc4 + fc5 fuse into one kernel.  (Fragile if input resolution changes.)
    out = conv_tail(c, prep["w3"], prep["b3"], prep["w4"], prep["b4"],
                    prep["w5"], prep["b5"])                  # (B, 128) lane-dense
    return out[:, :NUM_ACTIONS]


# -------------------------- parameter preparation --------------------------- #

def _pad_axis(a, axis, size):
    if a.shape[axis] >= size:
        return a
    widths = [(0, 0)] * a.ndim
    widths[axis] = (0, size - a.shape[axis])
    return jnp.pad(a, widths)


def prepare_params(p):
    """One-time weight reorder/zero-pad: NHWC patch order + lane-dense (128) channels."""
    def conv_w(w, cin_target):
        w = jnp.transpose(w, (2, 3, 1, 0))        # (Cout,Cin,kh,kw) -> (kh,kw,Cin,Cout)
        w = _pad_axis(w, 2, cin_target)           # pad Cin to match (padded) activation
        w = _pad_axis(w, 3, LANE)                 # pad Cout -> lane-dense output
        kh, kw = w.shape[0], w.shape[1]
        return w.reshape(kh * kw * cin_target, LANE)

    def bias(b):
        return _pad_axis(b, 0, LANE).reshape(1, LANE)

    def fc_w(w):                                  # torch (out,in) -> (in_pad, out_pad)
        return _pad_axis(_pad_axis(w.T, 0, LANE), 1, LANE)

    return {
        "w1": conv_w(p["w1"], p["w1"].shape[1]), "b1": bias(p["b1"]),   # Cin=4 (real input)
        "w2": conv_w(p["w2"], LANE),             "b2": bias(p["b2"]),
        "w3": conv_w(p["w3"], LANE),             "b3": bias(p["b3"]),
        "w4": fc_w(p["w4"]),                     "b4": bias(p["b4"]),
        "w5": fc_w(p["w5"]),                     "b5": bias(p["b5"]),
    }


def init_params(key):
    """Deterministic init mimicking torch's uniform(-1/sqrt(fan_in), 1/sqrt(fan_in))."""
    def uni(k, shape, fan_in):
        bound = 1.0 / np.sqrt(fan_in)
        return jax.random.uniform(k, shape, jnp.float32, -bound, bound)

    ks = jax.random.split(key, 10)
    return {
        "w1": uni(ks[0], (32, 4, 8, 8), 4 * 8 * 8),   "b1": uni(ks[1], (32,), 4 * 8 * 8),
        "w2": uni(ks[2], (64, 32, 4, 4), 32 * 4 * 4), "b2": uni(ks[3], (64,), 32 * 4 * 4),
        "w3": uni(ks[4], (64, 64, 3, 3), 64 * 3 * 3), "b3": uni(ks[5], (64,), 64 * 3 * 3),
        "w4": uni(ks[6], (32, 64), 64),               "b4": uni(ks[7], (32,), 64),
        "w5": uni(ks[8], (3, 32), 32),                "b5": uni(ks[9], (3,), 32),
    }


def ref_forward(x, p):
    """Pure-JAX (XLA) reference used only to validate the Pallas path."""
    def conv(x, w, b, stride, pad):
        y = jax.lax.conv_general_dilated(
            x, w, (stride, stride), [(pad, pad), (pad, pad)],
            dimension_numbers=("NCHW", "OIHW", "NCHW"))
        return y + b[None, :, None, None]

    def maxpool2(x):
        B, C, H, W = x.shape
        Ho, Wo = H // 2, W // 2
        return x[:, :, :2 * Ho, :2 * Wo].reshape(B, C, Ho, 2, Wo, 2).max(axis=(3, 5))

    x = jnp.maximum(maxpool2(conv(x, p["w1"], p["b1"], 4, 2)), 0.0)
    x = jnp.maximum(maxpool2(conv(x, p["w2"], p["b2"], 2, 1)), 0.0)
    x = jnp.maximum(maxpool2(conv(x, p["w3"], p["b3"], 1, 1)), 0.0)
    x = x.reshape(x.shape[0], -1)
    x = jnp.maximum(x @ p["w4"].T + p["b4"], 0.0)
    return x @ p["w5"].T + p["b5"]


# ---------------------------------- main ------------------------------------ #

if __name__ == "__main__":
    key = jax.random.PRNGKey(0)
    kx, kp = jax.random.split(key)
    # batch=2, 4 stacked frames, 84x84 (the spatial size fc4's 64-feature input implies).
    x = jax.random.uniform(kx, (2, 4, 84, 84), jnp.float32, -0.5, 0.5)
    params = init_params(kp)
    prep = prepare_params(params)          # one-time weight reorder / lane padding

    out = jax.block_until_ready(jax.jit(convnn_forward)(x, prep))
    ref = jax.block_until_ready(ref_forward(x, params))

    assert out.shape == (2, NUM_ACTIONS), out.shape
    np.testing.assert_allclose(np.asarray(out), np.asarray(ref), rtol=5e-2, atol=5e-2)
    print("KERNEL_OK")
</pallas_src>

<mosaic_0001>
module attributes {stable_mosaic.version = 11 : i64} {
  func.func @_conv_pool_relu_kernel(%arg0: memref<200x256xf32, #tpu.memory_space<vmem>>, %arg1: memref<200x256xf32, #tpu.memory_space<vmem>>, %arg2: memref<200x256xf32, #tpu.memory_space<vmem>>, %arg3: memref<200x256xf32, #tpu.memory_space<vmem>>, %arg4: memref<256x128xf32, #tpu.memory_space<vmem>>, %arg5: memref<1x128xf32, #tpu.memory_space<vmem>>, %arg6: memref<200x128xf32, #tpu.memory_space<vmem>>) attributes {dimension_semantics = [], scalar_prefetch = 0 : i64, scratch_operands = 0 : i64, tpu.core_type = #tpu.core_type<tc>} {
    %c0 = arith.constant 0 : index
    %c0_0 = arith.constant 0 : index
    %0 = vector.load %arg4[%c0, %c0_0] : memref<256x128xf32, #tpu.memory_space<vmem>>, vector<256x128xf32>
    %c0_1 = arith.constant 0 : index
    %c0_2 = arith.constant 0 : index
    %1 = vector.load %arg0[%c0_1, %c0_2] : memref<200x256xf32, #tpu.memory_space<vmem>>, vector<200x256xf32>
    %cst = arith.constant dense<0.000000e+00> : vector<200x128xf32>
    %2 = tpu.matmul %1, %0, %cst {dimension_numbers = #tpu.dot_dimension_numbers<[1], [0], [0], [1], [0, 0, 1, 1], [], []>} : vector<200x256xf32>, vector<256x128xf32>, vector<200x128xf32> -> vector<200x128xf32>
    %c0_3 = arith.constant 0 : index
    %c0_4 = arith.constant 0 : index
    %3 = vector.load %arg1[%c0_3, %c0_4] : memref<200x256xf32, #tpu.memory_space<vmem>>, vector<200x256xf32>
    %cst_5 = arith.constant dense<0.000000e+00> : vector<200x128xf32>
    %4 = tpu.matmul %3, %0, %cst_5 {dimension_numbers = #tpu.dot_dimension_numbers<[1], [0], [0], [1], [0, 0, 1, 1], [], []>} : vector<200x256xf32>, vector<256x128xf32>, vector<200x128xf32> -> vector<200x128xf32>
    %5 = arith.maximumf %2, %4 : vector<200x128xf32>
    %c0_6 = arith.constant 0 : index
    %c0_7 = arith.constant 0 : index
    %6 = vector.load %arg2[%c0_6, %c0_7] : memref<200x256xf32, #tpu.memory_space<vmem>>, vector<200x256xf32>
    %cst_8 = arith.constant dense<0.000000e+00> : vector<200x128xf32>
    %7 = tpu.matmul %6, %0, %cst_8 {dimension_numbers = #tpu.dot_dimension_numbers<[1], [0], [0], [1], [0, 0, 1, 1], [], []>} : vector<200x256xf32>, vector<256x128xf32>, vector<200x128xf32> -> vector<200x128xf32>
    %8 = arith.maximumf %5, %7 : vector<200x128xf32>
    %c0_9 = arith.constant 0 : index
    %c0_10 = arith.constant 0 : index
    %9 = vector.load %arg3[%c0_9, %c0_10] : memref<200x256xf32, #tpu.memory_space<vmem>>, vector<200x256xf32>
    %cst_11 = arith.constant dense<0.000000e+00> : vector<200x128xf32>
    %10 = tpu.matmul %9, %0, %cst_11 {dimension_numbers = #tpu.dot_dimension_numbers<[1], [0], [0], [1], [0, 0, 1, 1], [], []>} : vector<200x256xf32>, vector<256x128xf32>, vector<200x128xf32> -> vector<200x128xf32>
    %11 = arith.maximumf %8, %10 : vector<200x128xf32>
    %c0_12 = arith.constant 0 : index
    %c0_13 = arith.constant 0 : index
    %12 = vector.load %arg5[%c0_12, %c0_13] : memref<1x128xf32, #tpu.memory_space<vmem>>, vector<1x128xf32>
    %13 = vector.broadcast %12 : vector<1x128xf32> to vector<200x128xf32>
    %14 = arith.addf %11, %13 : vector<200x128xf32>
    %cst_14 = arith.constant 0.000000e+00 : f32
    %15 = vector.broadcast %cst_14 : f32 to vector<200x128xf32>
    %16 = arith.maximumf %14, %15 : vector<200x128xf32>
    %c0_15 = arith.constant 0 : index
    %c0_16 = arith.constant 0 : index
    %17 = vector.load %arg6[%c0_15, %c0_16] : memref<200x128xf32, #tpu.memory_space<vmem>>, vector<200x128xf32>
    tpu.vector_store %arg6[%c0_15, %c0_16], %16 {strides = array<i32>} : memref<200x128xf32, #tpu.memory_space<vmem>>, vector<200x128xf32>,
    return
  }
}

module attributes {stable_mosaic.version = 11 : i64} {
  func.func @_conv_pool_relu_kernel(%arg0: memref<8x2048xf32, #tpu.memory_space<vmem>>, %arg1: memref<8x2048xf32, #tpu.memory_space<vmem>>, %arg2: memref<8x2048xf32, #tpu.memory_space<vmem>>, %arg3: memref<8x2048xf32, #tpu.memory_space<vmem>>, %arg4: memref<2048x128xf32, #tpu.memory_space<vmem>>, %arg5: memref<1x128xf32, #tpu.memory_space<vmem>>, %arg6: memref<8x128xf32, #tpu.memory_space<vmem>>) attributes {dimension_semantics = [], scalar_prefetch = 0 : i64, scratch_operands = 0 : i64, tpu.core_type = #tpu.core_type<tc>} {
    %c0 = arith.constant 0 : index
    %c0_0 = arith.constant 0 : index
    %0 = vector.load %arg4[%c0, %c0_0] : memref<2048x128xf32, #tpu.memory_space<vmem>>, vector<2048x128xf32>
    %c0_1 = arith.constant 0 : index
    %c0_2 = arith.constant 0 : index
    %1 = vector.load %arg0[%c0_1, %c0_2] : memref<8x2048xf32, #tpu.memory_space<vmem>>, vector<8x2048xf32>
    %cst = arith.constant dense<0.000000e+00> : vector<8x128xf32>
    %2 = tpu.matmul %1, %0, %cst {dimension_numbers = #tpu.dot_dimension_numbers<[1], [0], [0], [1], [0, 0, 1, 1], [], []>} : vector<8x2048xf32>, vector<2048x128xf32>, vector<8x128xf32> -> vector<8x128xf32>
    %c0_3 = arith.constant 0 : index
    %c0_4 = arith.constant 0 : index
    %3 = vector.load %arg1[%c0_3, %c0_4] : memref<8x2048xf32, #tpu.memory_space<vmem>>, vector<8x2048xf32>
    %cst_5 = arith.constant dense<0.000000e+00> : vector<8x128xf32>
    %4 = tpu.matmul %3, %0, %cst_5 {dimension_numbers = #tpu.dot_dimension_numbers<[1], [0], [0], [1], [0, 0, 1, 1], [], []>} : vector<8x2048xf32>, vector<2048x128xf32>, vector<8x128xf32> -> vector<8x128xf32>
    %5 = arith.maximumf %2, %4 : vector<8x128xf32>
    %c0_6 = arith.constant 0 : index
    %c0_7 = arith.constant 0 : index
    %6 = vector.load %arg2[%c0_6, %c0_7] : memref<8x2048xf32, #tpu.memory_space<vmem>>, vector<8x2048xf32>
    %cst_8 = arith.constant dense<0.000000e+00> : vector<8x128xf32>
    %7 = tpu.matmul %6, %0, %cst_8 {dimension_numbers = #tpu.dot_dimension_numbers<[1], [0], [0], [1], [0, 0, 1, 1], [], []>} : vector<8x2048xf32>, vector<2048x128xf32>, vector<8x128xf32> -> vector<8x128xf32>
    %8 = arith.maximumf %5, %7 : vector<8x128xf32>
    %c0_9 = arith.constant 0 : index
    %c0_10 = arith.constant 0 : index
    %9 = vector.load %arg3[%c0_9, %c0_10] : memref<8x2048xf32, #tpu.memory_space<vmem>>, vector<8x2048xf32>
    %cst_11 = arith.constant dense<0.000000e+00> : vector<8x128xf32>
    %10 = tpu.matmul %9, %0, %cst_11 {dimension_numbers = #tpu.dot_dimension_numbers<[1], [0], [0], [1], [0, 0, 1, 1], [], []>} : vector<8x2048xf32>, vector<2048x128xf32>, vector<8x128xf32> -> vector<8x128xf32>
    %11 = arith.maximumf %8, %10 : vector<8x128xf32>
    %c0_12 = arith.constant 0 : index
    %c0_13 = arith.constant 0 : index
    %12 = vector.load %arg5[%c0_12, %c0_13] : memref<1x128xf32, #tpu.memory_space<vmem>>, vector<1x128xf32>
    %13 = vector.broadcast %12 : vector<1x128xf32> to vector<8x128xf32>
    %14 = arith.addf %11, %13 : vector<8x128xf32>
    %cst_14 = arith.constant 0.000000e+00 : f32
    %15 = vector.broadcast %cst_14 : f32 to vector<8x128xf32>
    %16 = arith.maximumf %14, %15 : vector<8x128xf32>
    %c0_15 = arith.constant 0 : index
    %c0_16 = arith.constant 0 : index
    %17 = vector.load %arg6[%c0_15, %c0_16] : memref<8x128xf32, #tpu.memory_space<vmem>>, vector<8x128xf32>
    tpu.vector_store %arg6[%c0_15, %c0_16], %16 {strides = array<i32>} : memref<8x128xf32, #tpu.memory_space<vmem>>, vector<8x128xf32>,
    return
  }
}

module attributes {stable_mosaic.version = 11 : i64} {
  func.func @_tail_kernel(%arg0: memref<2x1152xf32, #tpu.memory_space<vmem>>, %arg1: memref<2x1152xf32, #tpu.memory_space<vmem>>, %arg2: memref<2x1152xf32, #tpu.memory_space<vmem>>, %arg3: memref<2x1152xf32, #tpu.memory_space<vmem>>, %arg4: memref<1152x128xf32, #tpu.memory_space<vmem>>, %arg5: memref<1x128xf32, #tpu.memory_space<vmem>>, %arg6: memref<128x128xf32, #tpu.memory_space<vmem>>, %arg7: memref<1x128xf32, #tpu.memory_space<vmem>>, %arg8: memref<128x128xf32, #tpu.memory_space<vmem>>, %arg9: memref<1x128xf32, #tpu.memory_space<vmem>>, %arg10: memref<2x128xf32, #tpu.memory_space<vmem>>) attributes {dimension_semantics = [], scalar_prefetch = 0 : i64, scratch_operands = 0 : i64, tpu.core_type = #tpu.core_type<tc>} {
    %c0 = arith.constant 0 : index
    %c0_0 = arith.constant 0 : index
    %0 = vector.load %arg4[%c0, %c0_0] : memref<1152x128xf32, #tpu.memory_space<vmem>>, vector<1152x128xf32>
    %c0_1 = arith.constant 0 : index
    %c0_2 = arith.constant 0 : index
    %1 = vector.load %arg0[%c0_1, %c0_2] : memref<2x1152xf32, #tpu.memory_space<vmem>>, vector<2x1152xf32>
    %cst = arith.constant dense<0.000000e+00> : vector<2x128xf32>
    %2 = tpu.matmul %1, %0, %cst {dimension_numbers = #tpu.dot_dimension_numbers<[1], [0], [0], [1], [0, 0, 1, 1], [], []>} : vector<2x1152xf32>, vector<1152x128xf32>, vector<2x128xf32> -> vector<2x128xf32>
    %c0_3 = arith.constant 0 : index
    %c0_4 = arith.constant 0 : index
    %3 = vector.load %arg1[%c0_3, %c0_4] : memref<2x1152xf32, #tpu.memory_space<vmem>>, vector<2x1152xf32>
    %cst_5 = arith.constant dense<0.000000e+00> : vector<2x128xf32>
    %4 = tpu.matmul %3, %0, %cst_5 {dimension_numbers = #tpu.dot_dimension_numbers<[1], [0], [0], [1], [0, 0, 1, 1], [], []>} : vector<2x1152xf32>, vector<1152x128xf32>, vector<2x128xf32> -> vector<2x128xf32>
    %5 = arith.maximumf %2, %4 : vector<2x128xf32>
    %c0_6 = arith.constant 0 : index
    %c0_7 = arith.constant 0 : index
    %6 = vector.load %arg2[%c0_6, %c0_7] : memref<2x1152xf32, #tpu.memory_space<vmem>>, vector<2x1152xf32>
    %cst_8 = arith.constant dense<0.000000e+00> : vector<2x128xf32>
    %7 = tpu.matmul %6, %0, %cst_8 {dimension_numbers = #tpu.dot_dimension_numbers<[1], [0], [0], [1], [0, 0, 1, 1], [], []>} : vector<2x1152xf32>, vector<1152x128xf32>, vector<2x128xf32> -> vector<2x128xf32>
    %8 = arith.maximumf %5, %7 : vector<2x128xf32>
    %c0_9 = arith.constant 0 : index
    %c0_10 = arith.constant 0 : index
    %9 = vector.load %arg3[%c0_9, %c0_10] : memref<2x1152xf32, #tpu.memory_space<vmem>>, vector<2x1152xf32>
    %cst_11 = arith.constant dense<0.000000e+00> : vector<2x128xf32>
    %10 = tpu.matmul %9, %0, %cst_11 {dimension_numbers = #tpu.dot_dimension_numbers<[1], [0], [0], [1], [0, 0, 1, 1], [], []>} : vector<2x1152xf32>, vector<1152x128xf32>, vector<2x128xf32> -> vector<2x128xf32>
    %11 = arith.maximumf %8, %10 : vector<2x128xf32>
    %c0_12 = arith.constant 0 : index
    %c0_13 = arith.constant 0 : index
    %12 = vector.load %arg5[%c0_12, %c0_13] : memref<1x128xf32, #tpu.memory_space<vmem>>, vector<1x128xf32>
    %13 = vector.broadcast %12 : vector<1x128xf32> to vector<2x128xf32>
    %14 = arith.addf %11, %13 : vector<2x128xf32>
    %cst_14 = arith.constant 0.000000e+00 : f32
    %15 = vector.broadcast %cst_14 : f32 to vector<2x128xf32>
    %16 = arith.maximumf %14, %15 : vector<2x128xf32>
    %c0_15 = arith.constant 0 : index
    %c0_16 = arith.constant 0 : index
    %17 = vector.load %arg6[%c0_15, %c0_16] : memref<128x128xf32, #tpu.memory_space<vmem>>, vector<128x128xf32>
    %cst_17 = arith.constant dense<0.000000e+00> : vector<2x128xf32>
    %18 = tpu.matmul %16, %17, %cst_17 {dimension_numbers = #tpu.dot_dimension_numbers<[1], [0], [0], [1], [0, 0, 1, 1], [], []>} : vector<2x128xf32>, vector<128x128xf32>, vector<2x128xf32> -> vector<2x128xf32>
    %c0_18 = arith.constant 0 : index
    %c0_19 = arith.constant 0 : index
    %19 = vector.load %arg7[%c0_18, %c0_19] : memref<1x128xf32, #tpu.memory_space<vmem>>, vector<1x128xf32>
    %20 = vector.broadcast %19 : vector<1x128xf32> to vector<2x128xf32>
    %21 = arith.addf %18, %20 : vector<2x128xf32>
    %cst_20 = arith.constant 0.000000e+00 : f32
    %22 = vector.broadcast %cst_20 : f32 to vector<2x128xf32>
    %23 = arith.maximumf %21, %22 : vector<2x128xf32>
    %c0_21 = arith.constant 0 : index
    %c0_22 = arith.constant 0 : index
    %24 = vector.load %arg8[%c0_21, %c0_22] : memref<128x128xf32, #tpu.memory_space<vmem>>, vector<128x128xf32>
    %cst_23 = arith.constant dense<0.000000e+00> : vector<2x128xf32>
    %25 = tpu.matmul %23, %24, %cst_23 {dimension_numbers = #tpu.dot_dimension_numbers<[1], [0], [0], [1], [0, 0, 1, 1], [], []>} : vector<2x128xf32>, vector<128x128xf32>, vector<2x128xf32> -> vector<2x128xf32>
    %c0_24 = arith.constant 0 : index
    %c0_25 = arith.constant 0 : index
    %26 = vector.load %arg9[%c0_24, %c0_25] : memref<1x128xf32, #tpu.memory_space<vmem>>, vector<1x128xf32>
    %27 = vector.broadcast %26 : vector<1x128xf32> to vector<2x128xf32>
    %28 = arith.addf %25, %27 : vector<2x128xf32>
    %c0_26 = arith.constant 0 : index
    %c0_27 = arith.constant 0 : index
    %29 = vector.load %arg10[%c0_26, %c0_27] : memref<2x128xf32, #tpu.memory_space<vmem>>, vector<2x128xf32>
    tpu.vector_store %arg10[%c0_26, %c0_27], %28 {strides = array<i32>} : memref<2x128xf32, #tpu.memory_space<vmem>>, vector<2x128xf32>,
    return
  }
}

</mosaic_0001>

<bundles_post_ra>
// kernel: convnn_forward.3
= control target key start
LH: loop header
LB: loop body
LE: loop exit
PB: predicated region body
PF: predicated region fallthrough
CT: control target
= control target key end

     0   :  { %s2403_s4 = inlined_call_operand.vmem [shape: f32[256,128], index: 4, kind: input, shape index: {}]   ;;  %s2404_s0 = inlined_call_operand.vmem [shape: f32[200,256], index: 0, kind: input, shape index: {}]   ;;  %s2405_s1 = inlined_call_operand.vmem [shape: f32[200,256], index: 1, kind: input, shape index: {}]   ;;  %s2406_s2 = inlined_call_operand.vmem [shape: f32[200,256], index: 2, kind: input, shape index: {}]   ;;  %s2407_s3 = inlined_call_operand.vmem [shape: f32[200,256], index: 3, kind: input, shape index: {}]   ;;  %s2408_s5 = inlined_call_operand.vmem [shape: f32[1,128], index: 5, kind: input, shape index: {}]   ;;  %s2409_s6 = inlined_call_operand.vmem [shape: f32[200,128], index: 6, kind: output, shape index: {}]  }
   0x1   :  { %v1188_v0 = vld [vmem:[%s2403_s4 + $0x78] sm:$0xff]  ;;  %v1198_v2 = vld [vmem:[%s2403_s4 + $0x70] sm:$0xff]  ;;  %v1212_v4 = vld [vmem:[%s2403_s4 + $0x68] sm:$0xff] }
   0x2   :  { %v1193_v1 = vld [vmem:[%s2403_s4 + $0xf8] sm:$0xff]  ;;  %105 = vmatpush.msra.mxu0 %v1188_v0  ;;  %v1205_v3 = vld [vmem:[%s2403_s4 + $0xf0] sm:$0xff]  ;;  %339 = vmatpush.msra.mxu2 %v1188_v0  ;;  %v1217_v5 = vld [vmem:[%s2403_s4 + $0xe8] sm:$0xff] }
   0x3   :  { %197 = vmatpush.msra.mxu1 %v1193_v1  ;;  %431 = vmatpush.msra.mxu3 %v1193_v1  ;;  %v1226_v6 = vld [vmem:[%s2403_s4 + $0x60] sm:$0xff]  ;;  %v1240_v8 = vld [vmem:[%s2403_s4 + $0x58] sm:$0xff]  ;;  %v1254_v10 = vld [vmem:[%s2403_s4 + $0x50] sm:$0xff] }
   0x4   :  { %106 = vmatpush.msra.mxu0 %v1198_v2  ;;  %340 = vmatpush.msra.mxu2 %v1198_v2  ;;  %v1231_v7 = vld [vmem:[%s2403_s4 + $0xe0] sm:$0xff]  ;;  %v1245_v9 = vld [vmem:[%s2403_s4 + $0xd8] sm:$0xff]  ;;  %v1259_v11 = vld [vmem:[%s2403_s4 + $0xd0] sm:$0xff] }
   0x5   :  { %198 = vmatpush.msra.mxu1 %v1205_v3  ;;  %432 = vmatpush.msra.mxu3 %v1205_v3  ;;  %v1268_v12 = vld [vmem:[%s2403_s4 + $0x48] sm:$0xff]  ;;  %v1282_v14 = vld [vmem:[%s2403_s4 + $0x40] sm:$0xff]  ;;  %v1296_v16 = vld [vmem:[%s2403_s4 + $0x38] sm:$0xff] }
   0x6   :  { %107 = vmatpush.msra.mxu0 %v1212_v4  ;;  %341 = vmatpush.msra.mxu2 %v1212_v4  ;;  %v1273_v13 = vld [vmem:[%s2403_s4 + $0xc8] sm:$0xff]  ;;  %v1287_v15 = vld [vmem:[%s2403_s4 + $0xc0] sm:$0xff]  ;;  %v1301_v17 = vld [vmem:[%s2403_s4 + $0xb8] sm:$0xff] }
   0x7   :  { %199 = vmatpush.msra.mxu1 %v1217_v5  ;;  %433 = vmatpush.msra.mxu3 %v1217_v5  ;;  %v1310_v18 = vld [vmem:[%s2403_s4 + $0x30] sm:$0xff]  ;;  %v1324_v20 = vld [vmem:[%s2403_s4 + $0x28] sm:$0xff]  ;;  %v1338_v22 = vld [vmem:[%s2403_s4 + $0x20] sm:$0xff] }
   0x8   :  { %108 = vmatpush.msra.mxu0 %v1226_v6  ;;  %342 = vmatpush.msra.mxu2 %v1226_v6  ;;  %v1315_v19 = vld [vmem:[%s2403_s4 + $0xb0] sm:$0xff]  ;;  %v1329_v21 = vld [vmem:[%s2403_s4 + $0xa8] sm:$0xff]  ;;  %v1343_v23 = vld [vmem:[%s2403_s4 + $0xa0] sm:$0xff] }
   0x9   :  { %200 = vmatpush.msra.mxu1 %v1231_v7  ;;  %434 = vmatpush.msra.mxu3 %v1231_v7  ;;  %v1352_v24 = vld [vmem:[%s2403_s4 + $0x18] sm:$0xff]  ;;  %v1366_v26 = vld [vmem:[%s2403_s4 + $0x10] sm:$0xff]  ;;  %v1380_v28 = vld [vmem:[%s2403_s4 + $0x8] sm:$0xff] }
   0xa   :  { %109 = vmatpush.msra.mxu0 %v1240_v8  ;;  %343 = vmatpush.msra.mxu2 %v1240_v8  ;;  %v1357_v25 = vld [vmem:[%s2403_s4 + $0x98] sm:$0xff]  ;;  %v1371_v27 = vld [vmem:[%s2403_s4 + $0x90] sm:$0xff]  ;;  %v1385_v29 = vld [vmem:[%s2403_s4 + $0x88] sm:$0xff] }
   0xb   :  { %201 = vmatpush.msra.mxu1 %v1245_v9  ;;  %435 = vmatpush.msra.mxu3 %v1245_v9  ;;  %v1394_v30 = vld [vmem:[%s2403_s4] sm:$0xff]  ;;  %v56_v33 = vld [vmem:[%s2404_s0 + $0x8] sm:$0xff]  ;;  %v57_v36 = vld [vmem:[%s2404_s0 + $0x10] sm:$0xff] }
   0xc   :  { %110 = vmatpush.msra.mxu0 %v1254_v10  ;;  %344 = vmatpush.msra.mxu2 %v1254_v10  ;;  %v1399_v31 = vld [vmem:[%s2403_s4 + $0x80] sm:$0xff]  ;;  %v290_v35 = vld [vmem:[%s2405_s1 + $0x8] sm:$0xff]  ;;  %v58_v37 = vld [vmem:[%s2404_s0 + $0x18] sm:$0xff] }
   0xd   :  { %202 = vmatpush.msra.mxu1 %v1259_v11  ;;  %436 = vmatpush.msra.mxu3 %v1259_v11  ;;  %v55_v32 = vld [vmem:[%s2404_s0] sm:$0xff]  ;;  %v291_v38 = vld [vmem:[%s2405_s1 + $0x10] sm:$0xff]  ;;  %v292_v39 = vld [vmem:[%s2405_s1 + $0x18] sm:$0xff] }
   0xe   :  { %111 = vmatpush.msra.mxu0 %v1268_v12  ;;  %345 = vmatpush.msra.mxu2 %v1268_v12  ;;  %v289_v34 = vld [vmem:[%s2405_s1] sm:$0xff]  ;;  %v60_v41 = vld [vmem:[%s2404_s0 + $0x28] sm:$0xff]  ;;  %v61_v44 = vld [vmem:[%s2404_s0 + $0x30] sm:$0xff] }
   0xf   :  { %203 = vmatpush.msra.mxu1 %v1273_v13  ;;  %437 = vmatpush.msra.mxu3 %v1273_v13  ;;  %v59_v40 = vld [vmem:[%s2404_s0 + $0x20] sm:$0xff]  ;;  %v294_v43 = vld [vmem:[%s2405_s1 + $0x28] sm:$0xff]  ;;  %v62_v45 = vld [vmem:[%s2404_s0 + $0x38] sm:$0xff] }
  0x10   :  { %112 = vmatpush.msra.mxu0 %v1282_v14  ;;  %346 = vmatpush.msra.mxu2 %v1282_v14  ;;  %v293_v42 = vld [vmem:[%s2405_s1 + $0x20] sm:$0xff]  ;;  %v295_v46 = vld [vmem:[%s2405_s1 + $0x30] sm:$0xff]  ;;  %v296_v47 = vld [vmem:[%s2405_s1 + $0x38] sm:$0xff] }
  0x11   :  { %204 = vmatpush.msra.mxu1 %v1287_v15  ;;  %438 = vmatpush.msra.mxu3 %v1287_v15  ;;  %v63_v48 = vld [vmem:[%s2404_s0 + $0x40] sm:$0xff]  ;;  %v64_v49 = vld [vmem:[%s2404_s0 + $0x48] sm:$0xff]  ;;  %v65_v52 = vld [vmem:[%s2404_s0 + $0x50] sm:$0xff] }
  0x12   :  { %113 = vmatpush.msra.mxu0 %v1296_v16  ;;  %347 = vmatpush.msra.mxu2 %v1296_v16  ;;  %v297_v50 = vld [vmem:[%s2405_s1 + $0x40] sm:$0xff]  ;;  %v298_v51 = vld [vmem:[%s2405_s1 + $0x48] sm:$0xff]  ;;  %v66_v53 = vld [vmem:[%s2404_s0 + $0x58] sm:$0xff] }
  0x13   :  { %205 = vmatpush.msra.mxu1 %v1301_v17  ;;  %439 = vmatpush.msra.mxu3 %v1301_v17  ;;  %v299_v54 = vld [vmem:[%s2405_s1 + $0x50] sm:$0xff]  ;;  %v300_v55 = vld [vmem:[%s2405_s1 + $0x58] sm:$0xff]  ;;  %v67_v56 = vld [vmem:[%s2404_s0 + $0x60] sm:$0xff] }
  0x14   :  { %114 = vmatpush.msra.mxu0 %v1310_v18  ;;  %348 = vmatpush.msra.mxu2 %v1310_v18  ;;  %v68_v57 = vld [vmem:[%s2404_s0 + $0x68] sm:$0xff]  ;;  %v301_v58 = vld [vmem:[%s2405_s1 + $0x60] sm:$0xff]  ;;  %v69_v60 = vld [vmem:[%s2404_s0 + $0x70] sm:$0xff] }
  0x15   :  { %206 = vmatpush.msra.mxu1 %v1315_v19  ;;  %440 = vmatpush.msra.mxu3 %v1315_v19  ;;  %v302_v59 = vld [vmem:[%s2405_s1 + $0x68] sm:$0xff]  ;;  %v70_v61 = vld [vmem:[%s2404_s0 + $0x78] sm:$0xff]  ;;  %v303_v62 = vld [vmem:[%s2405_s1 + $0x70] sm:$0xff] }
  0x16   :  { %115 = vmatpush.msra.mxu0 %v1324_v20  ;;  %349 = vmatpush.msra.mxu2 %v1324_v20  ;;  %v304_v63 = vld [vmem:[%s2405_s1 + $0x78] sm:$0xff] }
  0x17   :  { %207 = vmatpush.msra.mxu1 %v1329_v21  ;;  %441 = vmatpush.msra.mxu3 %v1329_v21 }
  0x18   :  { %116 = vmatpush.msra.mxu0 %v1338_v22  ;;  %350 = vmatpush.msra.mxu2 %v1338_v22 }
  0x19   :  { %208 = vmatpush.msra.mxu1 %v1343_v23  ;;  %442 = vmatpush.msra.mxu3 %v1343_v23 }
  0x1a   :  { %117 = vmatpush.msra.mxu0 %v1352_v24  ;;  %351 = vmatpush.msra.mxu2 %v1352_v24 }
  0x1b   :  { %209 = vmatpush.msra.mxu1 %v1357_v25  ;;  %443 = vmatpush.msra.mxu3 %v1357_v25 }
  0x1c   :  { %118 = vmatpush.msra.mxu0 %v1366_v26  ;;  %352 = vmatpush.msra.mxu2 %v1366_v26 }
  0x1d   :  { %210 = vmatpush.msra.mxu1 %v1371_v27  ;;  %444 = vmatpush.msra.mxu3 %v1371_v27 }
  0x1e   :  { %119 = vmatpush.msra.mxu0 %v1380_v28  ;;  %353 = vmatpush.msra.mxu2 %v1380_v28 }
  0x1f   :  { %211 = vmatpush.msra.mxu1 %v1385_v29  ;;  %445 = vmatpush.msra.mxu3 %v1385_v29 }
  0x20   :  { %120 = vmatpush.msra.mxu0 %v1394_v30  ;;  %354 = vmatpush.msra.mxu2 %v1394_v30 }
  0x21   :  { %212 = vmatpush.msra.mxu1 %v1399_v31  ;;  %446 = vmatpush.msra.mxu3 %v1399_v31 }
  0x22   :  { %121 = vmatmul.f32.vlgmr.msra.gmra.mxu0 %v55_v32  ;;  %213 = vmatmul.f32.vlgmr.msra.gmra.mxu1 %v56_v33 }
  0x23   :  { %355 = vmatmul.f32.vlgmr.msra.gmra.mxu2 %v289_v34  ;;  %447 = vmatmul.f32.vlgmr.msra.gmra.mxu3 %v290_v35  ;;  %v87_v34 = vld [vmem:[%s2404_s0 + $0x100] sm:$0xff]  ;;  %v88_v35 = vld [vmem:[%s2404_s0 + $0x108] sm:$0xff] }
  0x24   :  { %857 = vmatpush.msrb.mxu2 %v1188_v0  ;;  %949 = vmatpush.msrb.mxu3 %v1193_v1 }
  0x25   :  { %598 = vmatpush.msrb.mxu0 %v1188_v0  ;;  %690 = vmatpush.msrb.mxu1 %v1193_v1  ;;  %v71_v0 = vld [vmem:[%s2404_s0 + $0x80] sm:$0xff]  ;;  %v72_v1 = vld [vmem:[%s2404_s0 + $0x88] sm:$0xff] }
  0x26   :  { %858 = vmatpush.msrb.mxu2 %v1198_v2  ;;  %950 = vmatpush.msrb.mxu3 %v1205_v3 }
  0x27   :  { %599 = vmatpush.msrb.mxu0 %v1198_v2  ;;  %691 = vmatpush.msrb.mxu1 %v1205_v3  ;;  %v305_v2 = vld [vmem:[%s2405_s1 + $0x80] sm:$0xff]  ;;  %v306_v3 = vld [vmem:[%s2405_s1 + $0x88] sm:$0xff] }
  0x28   :  { %859 = vmatpush.msrb.mxu2 %v1212_v4  ;;  %951 = vmatpush.msrb.mxu3 %v1217_v5 }
  0x29   :  { %600 = vmatpush.msrb.mxu0 %v1212_v4  ;;  %692 = vmatpush.msrb.mxu1 %v1217_v5  ;;  %v73_v4 = vld [vmem:[%s2404_s0 + $0x90] sm:$0xff]  ;;  %v74_v5 = vld [vmem:[%s2404_s0 + $0x98] sm:$0xff] }
  0x2a   :  { %124 = vmatmul.f32.gmra.mxu0 %v57_v36  ;;  %216 = vmatmul.f32.gmra.mxu1 %v58_v37  ;;  %v321_v36 = vld [vmem:[%s2405_s1 + $0x100] sm:$0xff]  ;;  %v322_v37 = vld [vmem:[%s2405_s1 + $0x108] sm:$0xff] }
  0x2b   :  { %358 = vmatmul.f32.gmra.mxu2 %v291_v38  ;;  %450 = vmatmul.f32.gmra.mxu3 %v292_v39 }
  0x2c   :  { %860 = vmatpush.msrb.mxu2 %v1226_v6  ;;  %952 = vmatpush.msrb.mxu3 %v1231_v7 }
  0x2d   :  { %601 = vmatpush.msrb.mxu0 %v1226_v6  ;;  %693 = vmatpush.msrb.mxu1 %v1231_v7  ;;  %v307_v6 = vld [vmem:[%s2405_s1 + $0x90] sm:$0xff]  ;;  %v308_v7 = vld [vmem:[%s2405_s1 + $0x98] sm:$0xff] }
  0x2e   :  { %861 = vmatpush.msrb.mxu2 %v1240_v8  ;;  %953 = vmatpush.msrb.mxu3 %v1245_v9 }
  0x2f   :  { %602 = vmatpush.msrb.mxu0 %v1240_v8  ;;  %694 = vmatpush.msrb.mxu1 %v1245_v9  ;;  %v75_v8 = vld [vmem:[%s2404_s0 + $0xa0] sm:$0xff]  ;;  %v76_v9 = vld [vmem:[%s2404_s0 + $0xa8] sm:$0xff] }
  0x30   :  { %862 = vmatpush.msrb.mxu2 %v1254_v10  ;;  %954 = vmatpush.msrb.mxu3 %v1259_v11 }
  0x31   :  { %603 = vmatpush.msrb.mxu0 %v1254_v10  ;;  %695 = vmatpush.msrb.mxu1 %v1259_v11  ;;  %v309_v10 = vld [vmem:[%s2405_s1 + $0xa0] sm:$0xff]  ;;  %v310_v11 = vld [vmem:[%s2405_s1 + $0xa8] sm:$0xff] }
  0x32   :  { %127 = vmatmul.f32.gmra.mxu0 %v59_v40  ;;  %219 = vmatmul.f32.gmra.mxu1 %v60_v41 }
  0x33   :  { %361 = vmatmul.f32.gmra.mxu2 %v293_v42  ;;  %453 = vmatmul.f32.gmra.mxu3 %v294_v43  ;;  %v89_v43 = vld [vmem:[%s2404_s0 + $0x110] sm:$0xff] }
  0x34   :  { %863 = vmatpush.msrb.mxu2 %v1268_v12  ;;  %955 = vmatpush.msrb.mxu3 %v1273_v13 }
  0x35   :  { %604 = vmatpush.msrb.mxu0 %v1268_v12  ;;  %696 = vmatpush.msrb.mxu1 %v1273_v13  ;;  %v77_v12 = vld [vmem:[%s2404_s0 + $0xb0] sm:$0xff]  ;;  %v78_v13 = vld [vmem:[%s2404_s0 + $0xb8] sm:$0xff] }
  0x36   :  { %864 = vmatpush.msrb.mxu2 %v1282_v14  ;;  %956 = vmatpush.msrb.mxu3 %v1287_v15 }
  0x37   :  { %605 = vmatpush.msrb.mxu0 %v1282_v14  ;;  %697 = vmatpush.msrb.mxu1 %v1287_v15  ;;  %v311_v14 = vld [vmem:[%s2405_s1 + $0xb0] sm:$0xff]  ;;  %v312_v15 = vld [vmem:[%s2405_s1 + $0xb8] sm:$0xff] }
  0x38   :  { %865 = vmatpush.msrb.mxu2 %v1296_v16  ;;  %957 = vmatpush.msrb.mxu3 %v1301_v17 }
  0x39   :  { %606 = vmatpush.msrb.mxu0 %v1296_v16  ;;  %698 = vmatpush.msrb.mxu1 %v1301_v17  ;;  %v79_v16 = vld [vmem:[%s2404_s0 + $0xc0] sm:$0xff]  ;;  %v80_v17 = vld [vmem:[%s2404_s0 + $0xc8] sm:$0xff] }
  0x3a   :  { %130 = vmatmul.f32.gmra.mxu0 %v61_v44  ;;  %222 = vmatmul.f32.gmra.mxu1 %v62_v45  ;;  %v90_v44 = vld [vmem:[%s2404_s0 + $0x118] sm:$0xff]  ;;  %v323_v45 = vld [vmem:[%s2405_s1 + $0x110] sm:$0xff] }
  0x3b   :  { %364 = vmatmul.f32.gmra.mxu2 %v295_v46  ;;  %456 = vmatmul.f32.gmra.mxu3 %v296_v47  ;;  %v324_v46 = vld [vmem:[%s2405_s1 + $0x118] sm:$0xff] }
  0x3c   :  { %866 = vmatpush.msrb.mxu2 %v1310_v18  ;;  %958 = vmatpush.msrb.mxu3 %v1315_v19 }
  0x3d   :  { %607 = vmatpush.msrb.mxu0 %v1310_v18  ;;  %699 = vmatpush.msrb.mxu1 %v1315_v19  ;;  %v313_v18 = vld [vmem:[%s2405_s1 + $0xc0] sm:$0xff]  ;;  %v314_v19 = vld [vmem:[%s2405_s1 + $0xc8] sm:$0xff] }
  0x3e   :  { %867 = vmatpush.msrb.mxu2 %v1324_v20  ;;  %959 = vmatpush.msrb.mxu3 %v1329_v21 }
  0x3f   :  { %608 = vmatpush.msrb.mxu0 %v1324_v20  ;;  %700 = vmatpush.msrb.mxu1 %v1329_v21  ;;  %v81_v20 = vld [vmem:[%s2404_s0 + $0xd0] sm:$0xff]  ;;  %v82_v21 = vld [vmem:[%s2404_s0 + $0xd8] sm:$0xff] }
  0x40   :  { %868 = vmatpush.msrb.mxu2 %v1338_v22  ;;  %960 = vmatpush.msrb.mxu3 %v1343_v23 }
  0x41   :  { %609 = vmatpush.msrb.mxu0 %v1338_v22  ;;  %701 = vmatpush.msrb.mxu1 %v1343_v23  ;;  %v315_v22 = vld [vmem:[%s2405_s1 + $0xd0] sm:$0xff]  ;;  %v316_v23 = vld [vmem:[%s2405_s1 + $0xd8] sm:$0xff] }
  0x42   :  { %133 = vmatmul.f32.gmra.mxu0 %v63_v48  ;;  %225 = vmatmul.f32.gmra.mxu1 %v64_v49 }
  0x43   :  { %367 = vmatmul.f32.gmra.mxu2 %v297_v50  ;;  %459 = vmatmul.f32.gmra.mxu3 %v298_v51 }
  0x44   :  { %869 = vmatpush.msrb.mxu2 %v1352_v24  ;;  %961 = vmatpush.msrb.mxu3 %v1357_v25 }
  0x45   :  { %610 = vmatpush.msrb.mxu0 %v1352_v24  ;;  %702 = vmatpush.msrb.mxu1 %v1357_v25  ;;  %v83_v24 = vld [vmem:[%s2404_s0 + $0xe0] sm:$0xff]  ;;  %v84_v25 = vld [vmem:[%s2404_s0 + $0xe8] sm:$0xff] }
  0x46   :  { %870 = vmatpush.msrb.mxu2 %v1366_v26  ;;  %962 = vmatpush.msrb.mxu3 %v1371_v27 }
  0x47   :  { %611 = vmatpush.msrb.mxu0 %v1366_v26  ;;  %703 = vmatpush.msrb.mxu1 %v1371_v27  ;;  %v317_v26 = vld [vmem:[%s2405_s1 + $0xe0] sm:$0xff]  ;;  %v318_v27 = vld [vmem:[%s2405_s1 + $0xe8] sm:$0xff] }
  0x48   :  { %871 = vmatpush.msrb.mxu2 %v1380_v28  ;;  %963 = vmatpush.msrb.mxu3 %v1385_v29 }
  0x49   :  { %612 = vmatpush.msrb.mxu0 %v1380_v28  ;;  %704 = vmatpush.msrb.mxu1 %v1385_v29  ;;  %v85_v28 = vld [vmem:[%s2404_s0 + $0xf0] sm:$0xff]  ;;  %v86_v29 = vld [vmem:[%s2404_s0 + $0xf8] sm:$0xff] }
  0x4a   :  { %136 = vmatmul.f32.gmra.mxu0 %v65_v52  ;;  %228 = vmatmul.f32.gmra.mxu1 %v66_v53  ;;  %v91_v52 = vld [vmem:[%s2404_s0 + $0x120] sm:$0xff]  ;;  %v92_v53 = vld [vmem:[%s2404_s0 + $0x128] sm:$0xff] }
  0x4b   :  { %370 = vmatmul.f32.gmra.mxu2 %v299_v54  ;;  %462 = vmatmul.f32.gmra.mxu3 %v300_v55  ;;  %v325_v54 = vld [vmem:[%s2405_s1 + $0x120] sm:$0xff]  ;;  %v326_v55 = vld [vmem:[%s2405_s1 + $0x128] sm:$0xff] }
  0x4c   :  { %872 = vmatpush.msrb.mxu2 %v1394_v30  ;;  %964 = vmatpush.msrb.mxu3 %v1399_v31 }
  0x4d   :  { %613 = vmatpush.msrb.mxu0 %v1394_v30  ;;  %705 = vmatpush.msrb.mxu1 %v1399_v31  ;;  %v319_v30 = vld [vmem:[%s2405_s1 + $0xf0] sm:$0xff]  ;;  %v320_v31 = vld [vmem:[%s2405_s1 + $0xf8] sm:$0xff] }
  0x52   :  { %139 = vmatmul.f32.gmra.mxu0 %v67_v56  ;;  %231 = vmatmul.f32.gmra.mxu1 %v68_v57 }
  0x53   :  { %373 = vmatmul.f32.gmra.mxu2 %v301_v58  ;;  %465 = vmatmul.f32.gmra.mxu3 %v302_v59 }
  0x5a   :  { %142 = vmatmul.f32.gmra.mxu0 %v69_v60  ;;  %234 = vmatmul.f32.gmra.mxu1 %v70_v61  ;;  %v93_v61 = vld [vmem:[%s2404_s0 + $0x130] sm:$0xff] }
  0x5b   :  { %376 = vmatmul.f32.gmra.mxu2 %v303_v62  ;;  %468 = vmatmul.f32.gmra.mxu3 %v304_v63  ;;  %v94_v62 = vld [vmem:[%s2404_s0 + $0x138] sm:$0xff]  ;;  %v327_v63 = vld [vmem:[%s2405_s1 + $0x130] sm:$0xff] }
  0x62   :  { %145 = vmatmul.f32.gmra.mxu0 %v71_v0  ;;  %237 = vmatmul.f32.gmra.mxu1 %v72_v1  ;;  %v328_v0 = vld [vmem:[%s2405_s1 + $0x138] sm:$0xff] }
  0x63   :  { %379 = vmatmul.f32.gmra.mxu2 %v305_v2  ;;  %471 = vmatmul.f32.gmra.mxu3 %v306_v3 }
  0x6a   :  { %148 = vmatmul.f32.gmra.mxu0 %v73_v4  ;;  %240 = vmatmul.f32.gmra.mxu1 %v74_v5 }
  0x6b   :  { %382 = vmatmul.f32.gmra.mxu2 %v307_v6  ;;  %474 = vmatmul.f32.gmra.mxu3 %v308_v7  ;;  %v95_v6 = vld [vmem:[%s2404_s0 + $0x140] sm:$0xff]  ;;  %v96_v7 = vld [vmem:[%s2404_s0 + $0x148] sm:$0xff] }
  0x72   :  { %151 = vmatmul.f32.gmra.mxu0 %v75_v8  ;;  %243 = vmatmul.f32.gmra.mxu1 %v76_v9  ;;  %v329_v8 = vld [vmem:[%s2405_s1 + $0x140] sm:$0xff]  ;;  %v330_v9 = vld [vmem:[%s2405_s1 + $0x148] sm:$0xff] }
  0x73   :  { %385 = vmatmul.f32.gmra.mxu2 %v309_v10  ;;  %477 = vmatmul.f32.gmra.mxu3 %v310_v11 }
  0x7a   :  { %154 = vmatmul.f32.gmra.mxu0 %v77_v12  ;;  %246 = vmatmul.f32.gmra.mxu1 %v78_v13 }
  0x7b   :  { %388 = vmatmul.f32.gmra.mxu2 %v311_v14  ;;  %480 = vmatmul.f32.gmra.mxu3 %v312_v15  ;;  %v97_v15 = vld [vmem:[%s2404_s0 + $0x150] sm:$0xff] }
  0x82   :  { %157 = vmatmul.f32.gmra.mxu0 %v79_v16  ;;  %249 = vmatmul.f32.gmra.mxu1 %v80_v17  ;;  %v98_v16 = vld [vmem:[%s2404_s0 + $0x158] sm:$0xff]  ;;  %v331_v17 = vld [vmem:[%s2405_s1 + $0x150] sm:$0xff] }
  0x83   :  { %391 = vmatmul.f32.gmra.mxu2 %v313_v18  ;;  %483 = vmatmul.f32.gmra.mxu3 %v314_v19  ;;  %v332_v18 = vld [vmem:[%s2405_s1 + $0x158] sm:$0xff] }
  0x8a   :  { %160 = vmatmul.f32.gmra.mxu0 %v81_v20  ;;  %252 = vmatmul.f32.gmra.mxu1 %v82_v21 }
  0x8b   :  { %394 = vmatmul.f32.gmra.mxu2 %v315_v22  ;;  %486 = vmatmul.f32.gmra.mxu3 %v316_v23 }
  0x92   :  { %163 = vmatmul.f32.gmra.mxu0 %v83_v24  ;;  %255 = vmatmul.f32.gmra.mxu1 %v84_v25  ;;  %v99_v24 = vld [vmem:[%s2404_s0 + $0x160] sm:$0xff]  ;;  %v100_v25 = vld [vmem:[%s2404_s0 + $0x168] sm:$0xff] }
  0x93   :  { %397 = vmatmul.f32.gmra.mxu2 %v317_v26  ;;  %489 = vmatmul.f32.gmra.mxu3 %v318_v27  ;;  %v333_v26 = vld [vmem:[%s2405_s1 + $0x160] sm:$0xff]  ;;  %v334_v27 = vld [vmem:[%s2405_s1 + $0x168] sm:$0xff] }
  0x9a   :  { %166 = vmatmul.f32.gmra.mxu0 %v85_v28  ;;  %258 = vmatmul.f32.gmra.mxu1 %v86_v29 }
  0x9b   :  { %400 = vmatmul.f32.gmra.mxu2 %v319_v30  ;;  %492 = vmatmul.f32.gmra.mxu3 %v320_v31 }
  0x9f   :  { %v1665_v32 = vpop.f32.mrf.mxu0  ;;  %v1667_v33 = vpop.f32.mrf.mxu1 }
  0xa2   :  { %169 = vmatmul.f32.gmra.mxu0 %v87_v34  ;;  %261 = vmatmul.f32.gmra.mxu1 %v88_v35  ;;  %v101_v35 = vld [vmem:[%s2404_s0 + $0x170] sm:$0xff] }
  0xa3   :  { %403 = vmatmul.f32.gmra.mxu2 %v321_v36  ;;  %495 = vmatmul.f32.gmra.mxu3 %v322_v37  ;;  %v102_v36 = vld [vmem:[%s2404_s0 + $0x178] sm:$0xff]  ;;  %v335_v37 = vld [vmem:[%s2405_s1 + $0x170] sm:$0xff] }
  0xa6   :  { %v356_v38 = vpop.f32.mrf.mxu2  ;;  %v448_v39 = vpop.f32.mrf.mxu3 }
  0xa7   :  { %v1681_v40 = vadd.f32 %v448_v39, %v356_v38  ;;  %v1683_v41 = vpop.f32.mrf.mxu0  ;;  %v1685_v42 = vpop.f32.mrf.mxu1  ;;  %v336_v38 = vld [vmem:[%s2405_s1 + $0x178] sm:$0xff] }
  0xaa   :  { %172 = vmatmul.f32.gmra.mxu0 %v89_v43  ;;  %264 = vmatmul.f32.gmra.mxu1 %v90_v44 }
  0xab   :  { %406 = vmatmul.f32.gmra.mxu2 %v323_v45  ;;  %498 = vmatmul.f32.gmra.mxu3 %v324_v46 }
  0xae   :  { %v359_v47 = vpop.f32.mrf.mxu2  ;;  %v451_v48 = vpop.f32.mrf.mxu3 }
  0xaf   :  { %v1699_v49 = vadd.f32 %v451_v48, %v359_v47  ;;  %v1701_v50 = vpop.f32.mrf.mxu0  ;;  %v1703_v51 = vpop.f32.mrf.mxu1  ;;  %v103_v47 = vld [vmem:[%s2404_s0 + $0x180] sm:$0xff]  ;;  %v104_v48 = vld [vmem:[%s2404_s0 + $0x188] sm:$0xff] }
  0xb2   :  { %175 = vmatmul.f32.gmra.mxu0 %v91_v52  ;;  %267 = vmatmul.f32.gmra.mxu1 %v92_v53  ;;  %v337_v52 = vld [vmem:[%s2405_s1 + $0x180] sm:$0xff]  ;;  %v338_v53 = vld [vmem:[%s2405_s1 + $0x188] sm:$0xff] }
  0xb3   :  { %409 = vmatmul.f32.gmra.mxu2 %v325_v54  ;;  %501 = vmatmul.f32.gmra.mxu3 %v326_v55 }
  0xb6   :  { %v362_v56 = vpop.f32.mrf.mxu2  ;;  %v454_v57 = vpop.f32.mrf.mxu3 }
  0xb7   :  { %v1717_v58 = vadd.f32 %v454_v57, %v362_v56  ;;  %v1719_v59 = vpop.f32.mrf.mxu0  ;;  %v1721_v60 = vpop.f32.mrf.mxu1 }
  0xba   :  { %178 = vmatmul.f32.gmra.mxu0 %v93_v61  ;;  %270 = vmatmul.f32.gmra.mxu1 %v94_v62  ;;  %v548_v62 = vld [vmem:[%s2406_s2] sm:$0xff] }
  0xbb   :  { %412 = vmatmul.f32.gmra.mxu2 %v327_v63  ;;  %504 = vmatmul.f32.gmra.mxu3 %v328_v0  ;;  %v549_v63 = vld [vmem:[%s2406_s2 + $0x8] sm:$0xff]  ;;  %v807_v0 = vld [vmem:[%s2407_s3] sm:$0xff] }
  0xbe   :  { %v365_v1 = vpop.f32.mrf.mxu2  ;;  %v457_v2 = vpop.f32.mrf.mxu3 }
  0xbf   :  { %v1735_v3 = vadd.f32 %v457_v2, %v365_v1  ;;  %v1737_v4 = vpop.f32.mrf.mxu0  ;;  %v1739_v5 = vpop.f32.mrf.mxu1  ;;  %v808_v1 = vld [vmem:[%s2407_s3 + $0x8] sm:$0xff] }
  0xc2   :  { %181 = vmatmul.f32.gmra.mxu0 %v95_v6  ;;  %273 = vmatmul.f32.gmra.mxu1 %v96_v7 }
  0xc3   :  { %415 = vmatmul.f32.gmra.mxu2 %v329_v8  ;;  %507 = vmatmul.f32.gmra.mxu3 %v330_v9 }
  0xc6   :  { %v368_v10 = vpop.f32.mrf.mxu2  ;;  %v460_v11 = vpop.f32.mrf.mxu3 }
  0xc7   :  { %v1753_v12 = vadd.f32 %v460_v11, %v368_v10  ;;  %v1755_v13 = vpop.f32.mrf.mxu0  ;;  %v1757_v14 = vpop.f32.mrf.mxu1  ;;  %v550_v10 = vld [vmem:[%s2406_s2 + $0x10] sm:$0xff]  ;;  %v551_v11 = vld [vmem:[%s2406_s2 + $0x18] sm:$0xff] }
  0xca   :  { %184 = vmatmul.f32.gmra.mxu0 %v97_v15  ;;  %276 = vmatmul.f32.gmra.mxu1 %v98_v16  ;;  %v809_v15 = vld [vmem:[%s2407_s3 + $0x10] sm:$0xff]  ;;  %v810_v16 = vld [vmem:[%s2407_s3 + $0x18] sm:$0xff] }
  0xcb   :  { %418 = vmatmul.f32.gmra.mxu2 %v331_v17  ;;  %510 = vmatmul.f32.gmra.mxu3 %v332_v18 }
  0xce   :  { %v371_v19 = vpop.f32.mrf.mxu2  ;;  %v463_v20 = vpop.f32.mrf.mxu3 }
  0xcf   :  { %v1771_v21 = vadd.f32 %v463_v20, %v371_v19  ;;  %v1773_v22 = vpop.f32.mrf.mxu0  ;;  %v1775_v23 = vpop.f32.mrf.mxu1 }
  0xd2   :  { %187 = vmatmul.f32.gmra.mxu0 %v99_v24  ;;  %279 = vmatmul.f32.gmra.mxu1 %v100_v25  ;;  %v552_v25 = vld [vmem:[%s2406_s2 + $0x20] sm:$0xff] }
  0xd3   :  { %421 = vmatmul.f32.gmra.mxu2 %v333_v26  ;;  %513 = vmatmul.f32.gmra.mxu3 %v334_v27  ;;  %v553_v26 = vld [vmem:[%s2406_s2 + $0x28] sm:$0xff]  ;;  %v811_v27 = vld [vmem:[%s2407_s3 + $0x20] sm:$0xff] }
  0xd6   :  { %v374_v28 = vpop.f32.mrf.mxu2  ;;  %v466_v29 = vpop.f32.mrf.mxu3 }
  0xd7   :  { %v1789_v30 = vadd.f32 %v466_v29, %v374_v28  ;;  %v1791_v31 = vpop.f32.mrf.mxu0  ;;  %v1793_v34 = vpop.f32.mrf.mxu1  ;;  %v812_v28 = vld [vmem:[%s2407_s3 + $0x28] sm:$0xff] }
  0xda   :  { %190 = vmatmul.f32.gmra.mxu0 %v101_v35  ;;  %282 = vmatmul.f32.gmra.mxu1 %v102_v36 }
  0xdb   :  { %424 = vmatmul.f32.gmra.mxu2 %v335_v37  ;;  %516 = vmatmul.f32.gmra.mxu3 %v336_v38 }
  0xde   :  { %v377_v39 = vpop.f32.mrf.mxu2  ;;  %v469_v43 = vpop.f32.mrf.mxu3 }
  0xdf   :  { %v1807_v44 = vadd.f32 %v469_v43, %v377_v39  ;;  %v1809_v45 = vpop.f32.mrf.mxu0  ;;  %v1811_v46 = vpop.f32.mrf.mxu1  ;;  %v554_v39 = vld [vmem:[%s2406_s2 + $0x30] sm:$0xff]  ;;  %v555_v43 = vld [vmem:[%s2406_s2 + $0x38] sm:$0xff] }
  0xe2   :  { %193 = vmatmul.f32.gmra.mxu0 %v103_v47  ;;  %285 = vmatmul.f32.gmra.mxu1 %v104_v48  ;;  %v813_v47 = vld [vmem:[%s2407_s3 + $0x30] sm:$0xff]  ;;  %v814_v48 = vld [vmem:[%s2407_s3 + $0x38] sm:$0xff] }
  0xe3   :  { %427 = vmatmul.f32.gmra.mxu2 %v337_v52  ;;  %519 = vmatmul.f32.gmra.mxu3 %v338_v53 }
  0xe6   :  { %v380_v54 = vpop.f32.mrf.mxu2  ;;  %v472_v55 = vpop.f32.mrf.mxu3 }
  0xe7   :  { %v1825_v56 = vadd.f32 %v472_v55, %v380_v54  ;;  %v1827_v57 = vpop.f32.mrf.mxu0  ;;  %v1829_v61 = vpop.f32.mrf.mxu1 }
  0xea   :  { %614 = vmatmul.f32.vlgmr.msrb.gmra.mxu0 %v548_v62  ;;  %706 = vmatmul.f32.vlgmr.msrb.gmra.mxu1 %v549_v63  ;;  %v556_v63 = vld [vmem:[%s2406_s2 + $0x40] sm:$0xff] }
  0xeb   :  { %873 = vmatmul.f32.vlgmr.msrb.gmra.mxu2 %v807_v0  ;;  %965 = vmatmul.f32.vlgmr.msrb.gmra.mxu3 %v808_v1  ;;  %v557_v0 = vld [vmem:[%s2406_s2 + $0x48] sm:$0xff]  ;;  %v815_v1 = vld [vmem:[%s2407_s3 + $0x40] sm:$0xff] }
  0xee   :  { %v383_v2 = vpop.f32.mrf.mxu2  ;;  %v475_v6 = vpop.f32.mrf.mxu3 }
  0xef   :  { %v1843_v7 = vadd.f32 %v475_v6, %v383_v2  ;;  %v1845_v8 = vpop.f32.mrf.mxu0  ;;  %v1847_v9 = vpop.f32.mrf.mxu1  ;;  %v816_v2 = vld [vmem:[%s2407_s3 + $0x48] sm:$0xff] }
  0xf2   :  { %617 = vmatmul.f32.gmra.mxu0 %v550_v10  ;;  %709 = vmatmul.f32.gmra.mxu1 %v551_v11 }
  0xf3   :  { %876 = vmatmul.f32.gmra.mxu2 %v809_v15  ;;  %968 = vmatmul.f32.gmra.mxu3 %v810_v16 }
  0xf6   :  { %v386_v17 = vpop.f32.mrf.mxu2  ;;  %v478_v18 = vpop.f32.mrf.mxu3 }
  0xf7   :  { %v1861_v19 = vadd.f32 %v478_v18, %v386_v17  ;;  %v1863_v20 = vpop.f32.mrf.mxu0  ;;  %v1865_v24 = vpop.f32.mrf.mxu1  ;;  %v558_v17 = vld [vmem:[%s2406_s2 + $0x50] sm:$0xff]  ;;  %v559_v18 = vld [vmem:[%s2406_s2 + $0x58] sm:$0xff] }
  0xfa   :  { %620 = vmatmul.f32.gmra.mxu0 %v552_v25  ;;  %712 = vmatmul.f32.gmra.mxu1 %v553_v26  ;;  %v817_v25 = vld [vmem:[%s2407_s3 + $0x50] sm:$0xff]  ;;  %v818_v26 = vld [vmem:[%s2407_s3 + $0x58] sm:$0xff] }
  0xfb   :  { %879 = vmatmul.f32.gmra.mxu2 %v811_v27  ;;  %971 = vmatmul.f32.gmra.mxu3 %v812_v28 }
  0xfe   :  { %v389_v29 = vpop.f32.mrf.mxu2  ;;  %v481_v35 = vpop.f32.mrf.mxu3 }
  0xff   :  { %v1879_v36 = vadd.f32 %v481_v35, %v389_v29  ;;  %v1881_v37 = vpop.f32.mrf.mxu0  ;;  %v1883_v38 = vpop.f32.mrf.mxu1 }
 0x102   :  { %623 = vmatmul.f32.gmra.mxu0 %v554_v39  ;;  %715 = vmatmul.f32.gmra.mxu1 %v555_v43  ;;  %v560_v43 = vld [vmem:[%s2406_s2 + $0x60] sm:$0xff] }
 0x103   :  { %882 = vmatmul.f32.gmra.mxu2 %v813_v47  ;;  %974 = vmatmul.f32.gmra.mxu3 %v814_v48  ;;  %v561_v47 = vld [vmem:[%s2406_s2 + $0x68] sm:$0xff]  ;;  %v819_v48 = vld [vmem:[%s2407_s3 + $0x60] sm:$0xff] }
 0x106   :  { %v392_v52 = vpop.f32.mrf.mxu2  ;;  %v484_v53 = vpop.f32.mrf.mxu3 }
 0x107   :  { %v1897_v54 = vadd.f32 %v484_v53, %v392_v52  ;;  %v1899_v55 = vpop.f32.mrf.mxu0  ;;  %v1901_v62 = vpop.f32.mrf.mxu1  ;;  %v820_v52 = vld [vmem:[%s2407_s3 + $0x68] sm:$0xff] }
 0x10a   :  { %626 = vmatmul.f32.gmra.mxu0 %v556_v63  ;;  %718 = vmatmul.f32.gmra.mxu1 %v557_v0 }
 0x10b   :  { %885 = vmatmul.f32.gmra.mxu2 %v815_v1  ;;  %977 = vmatmul.f32.gmra.mxu3 %v816_v2 }
 0x10e   :  { %v395_v6 = vpop.f32.mrf.mxu2  ;;  %v487_v10 = vpop.f32.mrf.mxu3 }
 0x10f   :  { %v1915_v11 = vadd.f32 %v487_v10, %v395_v6  ;;  %v1917_v15 = vpop.f32.mrf.mxu0  ;;  %v1919_v16 = vpop.f32.mrf.mxu1  ;;  %v562_v6 = vld [vmem:[%s2406_s2 + $0x70] sm:$0xff]  ;;  %v563_v10 = vld [vmem:[%s2406_s2 + $0x78] sm:$0xff] }
 0x112   :  { %629 = vmatmul.f32.gmra.mxu0 %v558_v17  ;;  %721 = vmatmul.f32.gmra.mxu1 %v559_v18  ;;  %v821_v17 = vld [vmem:[%s2407_s3 + $0x70] sm:$0xff]  ;;  %v822_v18 = vld [vmem:[%s2407_s3 + $0x78] sm:$0xff] }
 0x113   :  { %888 = vmatmul.f32.gmra.mxu2 %v817_v25  ;;  %980 = vmatmul.f32.gmra.mxu3 %v818_v26 }
 0x116   :  { %v398_v27 = vpop.f32.mrf.mxu2  ;;  %v490_v28 = vpop.f32.mrf.mxu3 }
 0x117   :  { %v1933_v29 = vadd.f32 %v490_v28, %v398_v27  ;;  %v1935_v35 = vpop.f32.mrf.mxu0  ;;  %v1937_v39 = vpop.f32.mrf.mxu1 }
 0x11a   :  { %632 = vmatmul.f32.gmra.mxu0 %v560_v43  ;;  %724 = vmatmul.f32.gmra.mxu1 %v561_v47  ;;  %v564_v47 = vld [vmem:[%s2406_s2 + $0x80] sm:$0xff] }
 0x11b   :  { %891 = vmatmul.f32.gmra.mxu2 %v819_v48  ;;  %983 = vmatmul.f32.gmra.mxu3 %v820_v52  ;;  %v565_v48 = vld [vmem:[%s2406_s2 + $0x88] sm:$0xff]  ;;  %v823_v52 = vld [vmem:[%s2407_s3 + $0x80] sm:$0xff] }
 0x11e   :  { %v401_v53 = vpop.f32.mrf.mxu2  ;;  %v493_v63 = vpop.f32.mrf.mxu3 }
 0x11f   :  { %v1951_v0 = vadd.f32 %v493_v63, %v401_v53  ;;  %v1953_v1 = vpop.f32.mrf.mxu0  ;;  %v1955_v2 = vpop.f32.mrf.mxu1  ;;  %v824_v53 = vld [vmem:[%s2407_s3 + $0x88] sm:$0xff] }
 0x120   :  { %2410 = vst [vmem:[#allocation2_spill] sm:$0xff] %v1955_v2 }
 0x122   :  { %635 = vmatmul.f32.gmra.mxu0 %v562_v6  ;;  %727 = vmatmul.f32.gmra.mxu1 %v563_v10 }
 0x123   :  { %894 = vmatmul.f32.gmra.mxu2 %v821_v17  ;;  %986 = vmatmul.f32.gmra.mxu3 %v822_v18 }
 0x126   :  { %v404_v25 = vpop.f32.mrf.mxu2  ;;  %v496_v26 = vpop.f32.mrf.mxu3 }
 0x127   :  { %v1969_v27 = vadd.f32 %v496_v26, %v404_v25  ;;  %v1971_v28 = vpop.f32.mrf.mxu0  ;;  %v1973_v43 = vpop.f32.mrf.mxu1  ;;  %v566_v25 = vld [vmem:[%s2406_s2 + $0x90] sm:$0xff]  ;;  %v567_v26 = vld [vmem:[%s2406_s2 + $0x98] sm:$0xff] }
 0x128   :  { %2412 = vst [vmem:[#allocation4_spill] sm:$0xff] %v1971_v28 }
 0x129   :  { %2411 = vst [vmem:[#allocation3_spill] sm:$0xff] %v1969_v27  ;;  %v2133_v27 = vld [vmem:[%s2408_s5] ss:$0 sm:$0xff] }
 0x12a   :  { %2413 = vst [vmem:[#allocation5_spill] sm:$0xff] %v1973_v43  ;;  %638 = vmatmul.f32.gmra.mxu0 %v564_v47  ;;  %730 = vmatmul.f32.gmra.mxu1 %v565_v48  ;;  %v825_v47 = vld [vmem:[%s2407_s3 + $0x90] sm:$0xff]  ;;  %v826_v48 = vld [vmem:[%s2407_s3 + $0x98] sm:$0xff] }
 0x12b   :  { %897 = vmatmul.f32.gmra.mxu2 %v823_v52  ;;  %989 = vmatmul.f32.gmra.mxu3 %v824_v53 }
 0x12e   :  { %v407_v63 = vpop.f32.mrf.mxu2  ;;  %v499_v6 = vpop.f32.mrf.mxu3 }
 0x12f   :  { %v1987_v10 = vadd.f32 %v499_v6, %v407_v63  ;;  %v1989_v17 = vpop.f32.mrf.mxu0  ;;  %v1991_v18 = vpop.f32.mrf.mxu1 }
 0x130   :  { %2415 = vst [vmem:[#allocation7_spill] sm:$0xff] %v1989_v17  ;;  %v568_v17 = vld [vmem:[%s2406_s2 + $0xa0] sm:$0xff] }
 0x131   :  { %2414 = vst [vmem:[#allocation6_spill] sm:$0xff] %v1987_v10  ;;  %v569_v10 = vld [vmem:[%s2406_s2 + $0xa8] sm:$0xff] }
 0x132   :  { %2416 = vst [vmem:[#allocation8_spill] sm:$0xff] %v1991_v18  ;;  %641 = vmatmul.f32.gmra.mxu0 %v566_v25  ;;  %733 = vmatmul.f32.gmra.mxu1 %v567_v26  ;;  %v827_v25 = vld [vmem:[%s2407_s3 + $0xa0] sm:$0xff]  ;;  %v828_v26 = vld [vmem:[%s2407_s3 + $0xa8] sm:$0xff] }
 0x133   :  { %900 = vmatmul.f32.gmra.mxu2 %v825_v47  ;;  %992 = vmatmul.f32.gmra.mxu3 %v826_v48 }
 0x136   :  { %v410_v52 = vpop.f32.mrf.mxu2  ;;  %v502_v53 = vpop.f32.mrf.mxu3 }
 0x137   :  { %v2005_v63 = vadd.f32 %v502_v53, %v410_v52  ;;  %v2007_v6 = vpop.f32.mrf.mxu0  ;;  %v2009_v18 = vpop.f32.mrf.mxu1 }
 0x138   :  { %2418 = vst [vmem:[#allocation10_spill] sm:$0xff] %v2007_v6  ;;  %v570_v6 = vld [vmem:[%s2406_s2 + $0xb0] sm:$0xff] }
 0x139   :  { %2417 = vst [vmem:[#allocation9_spill] sm:$0xff] %v2005_v63  ;;  %v571_v63 = vld [vmem:[%s2406_s2 + $0xb8] sm:$0xff] }
 0x13a   :  { %2419 = vst [vmem:[#allocation11_spill] sm:$0xff] %v2009_v18  ;;  %644 = vmatmul.f32.gmra.mxu0 %v568_v17  ;;  %736 = vmatmul.f32.gmra.mxu1 %v569_v10  ;;  %v829_v10 = vld [vmem:[%s2407_s3 + $0xb0] sm:$0xff]  ;;  %v830_v17 = vld [vmem:[%s2407_s3 + $0xb8] sm:$0xff] }
 0x13b   :  { %903 = vmatmul.f32.gmra.mxu2 %v827_v25  ;;  %995 = vmatmul.f32.gmra.mxu3 %v828_v26 }
 0x13e   :  { %v413_v47 = vpop.f32.mrf.mxu2  ;;  %v505_v48 = vpop.f32.mrf.mxu3 }
 0x13f   :  { %v2023_v52 = vadd.f32 %v505_v48, %v413_v47  ;;  %v2025_v53 = vpop.f32.mrf.mxu0  ;;  %v2027_v18 = vpop.f32.mrf.mxu1 }
 0x140   :  { %2421 = vst [vmem:[#allocation13_spill] sm:$0xff] %v2025_v53  ;;  %v572_v53 = vld [vmem:[%s2406_s2 + $0xc0] sm:$0xff] }
 0x141   :  { %2420 = vst [vmem:[#allocation12_spill] sm:$0xff] %v2023_v52  ;;  %v573_v52 = vld [vmem:[%s2406_s2 + $0xc8] sm:$0xff] }
 0x142   :  { %2422 = vst [vmem:[#allocation14_spill] sm:$0xff] %v2027_v18  ;;  %647 = vmatmul.f32.gmra.mxu0 %v570_v6  ;;  %739 = vmatmul.f32.gmra.mxu1 %v571_v63  ;;  %v831_v63 = vld [vmem:[%s2407_s3 + $0xc0] sm:$0xff]  ;;  %v832_v6 = vld [vmem:[%s2407_s3 + $0xc8] sm:$0xff] }
 0x143   :  { %906 = vmatmul.f32.gmra.mxu2 %v829_v10  ;;  %998 = vmatmul.f32.gmra.mxu3 %v830_v17 }
 0x146   :  { %v416_v25 = vpop.f32.mrf.mxu2  ;;  %v508_v26 = vpop.f32.mrf.mxu3 }
 0x147   :  { %v2041_v47 = vadd.f32 %v508_v26, %v416_v25  ;;  %v2043_v48 = vpop.f32.mrf.mxu0  ;;  %v2045_v18 = vpop.f32.mrf.mxu1 }
 0x148   :  { %2424 = vst [vmem:[#allocation16_spill] sm:$0xff] %v2043_v48  ;;  %v574_v48 = vld [vmem:[%s2406_s2 + $0xd0] sm:$0xff] }
 0x149   :  { %2423 = vst [vmem:[#allocation15_spill] sm:$0xff] %v2041_v47  ;;  %v575_v47 = vld [vmem:[%s2406_s2 + $0xd8] sm:$0xff] }
 0x14a   :  { %2425 = vst [vmem:[#allocation17_spill] sm:$0xff] %v2045_v18  ;;  %650 = vmatmul.f32.gmra.mxu0 %v572_v53  ;;  %742 = vmatmul.f32.gmra.mxu1 %v573_v52  ;;  %v833_v52 = vld [vmem:[%s2407_s3 + $0xd0] sm:$0xff]  ;;  %v834_v53 = vld [vmem:[%s2407_s3 + $0xd8] sm:$0xff] }
 0x14b   :  { %909 = vmatmul.f32.gmra.mxu2 %v831_v63  ;;  %1001 = vmatmul.f32.gmra.mxu3 %v832_v6 }
 0x14e   :  { %v419_v10 = vpop.f32.mrf.mxu2  ;;  %v511_v17 = vpop.f32.mrf.mxu3 }
 0x14f   :  { %v2059_v25 = vadd.f32 %v511_v17, %v419_v10  ;;  %v2061_v26 = vpop.f32.mrf.mxu0  ;;  %v2063_v18 = vpop.f32.mrf.mxu1 }
 0x150   :  { %2427 = vst [vmem:[#allocation19_spill] sm:$0xff] %v2061_v26  ;;  %v576_v26 = vld [vmem:[%s2406_s2 + $0xe0] sm:$0xff] }
 0x151   :  { %2426 = vst [vmem:[#allocation18_spill] sm:$0xff] %v2059_v25  ;;  %v577_v25 = vld [vmem:[%s2406_s2 + $0xe8] sm:$0xff] }
 0x152   :  { %2428 = vst [vmem:[#allocation20_spill] sm:$0xff] %v2063_v18  ;;  %653 = vmatmul.f32.gmra.mxu0 %v574_v48  ;;  %745 = vmatmul.f32.gmra.mxu1 %v575_v47  ;;  %v835_v47 = vld [vmem:[%s2407_s3 + $0xe0] sm:$0xff]  ;;  %v836_v48 = vld [vmem:[%s2407_s3 + $0xe8] sm:$0xff] }
 0x153   :  { %912 = vmatmul.f32.gmra.mxu2 %v833_v52  ;;  %1004 = vmatmul.f32.gmra.mxu3 %v834_v53 }
 0x156   :  { %v422_v63 = vpop.f32.mrf.mxu2  ;;  %v514_v6 = vpop.f32.mrf.mxu3 }
 0x157   :  { %v2077_v10 = vadd.f32 %v514_v6, %v422_v63  ;;  %v2079_v17 = vpop.f32.mrf.mxu0  ;;  %v2081_v18 = vpop.f32.mrf.mxu1 }
 0x158   :  { %2430 = vst [vmem:[#allocation22_spill] sm:$0xff] %v2079_v17  ;;  %v578_v17 = vld [vmem:[%s2406_s2 + $0xf0] sm:$0xff] }
 0x159   :  { %2429 = vst [vmem:[#allocation21_spill] sm:$0xff] %v2077_v10  ;;  %v579_v10 = vld [vmem:[%s2406_s2 + $0xf8] sm:$0xff] }
 0x15a   :  { %2431 = vst [vmem:[#allocation23_spill] sm:$0xff] %v2081_v18  ;;  %656 = vmatmul.f32.gmra.mxu0 %v576_v26  ;;  %748 = vmatmul.f32.gmra.mxu1 %v577_v25  ;;  %v837_v25 = vld [vmem:[%s2407_s3 + $0xf0] sm:$0xff]  ;;  %v838_v26 = vld [vmem:[%s2407_s3 + $0xf8] sm:$0xff] }
 0x15b   :  { %915 = vmatmul.f32.gmra.mxu2 %v835_v47  ;;  %1007 = vmatmul.f32.gmra.mxu3 %v836_v48 }
 0x15e   :  { %v425_v52 = vpop.f32.mrf.mxu2  ;;  %v517_v53 = vpop.f32.mrf.mxu3 }
 0x15f   :  { %v2095_v63 = vadd.f32 %v517_v53, %v425_v52  ;;  %v2097_v6 = vpop.f32.mrf.mxu0  ;;  %v2099_v18 = vpop.f32.mrf.mxu1 }
 0x160   :  { %2433 = vst [vmem:[#allocation25_spill] sm:$0xff] %v2097_v6  ;;  %v580_v6 = vld [vmem:[%s2406_s2 + $0x100] sm:$0xff] }
 0x161   :  { %2432 = vst [vmem:[#allocation24_spill] sm:$0xff] %v2095_v63  ;;  %v581_v63 = vld [vmem:[%s2406_s2 + $0x108] sm:$0xff] }
 0x162   :  { %2434 = vst [vmem:[#allocation26_spill] sm:$0xff] %v2099_v18  ;;  %659 = vmatmul.f32.gmra.mxu0 %v578_v17  ;;  %751 = vmatmul.f32.gmra.mxu1 %v579_v10  ;;  %v839_v10 = vld [vmem:[%s2407_s3 + $0x100] sm:$0xff]  ;;  %v840_v17 = vld [vmem:[%s2407_s3 + $0x108] sm:$0xff] }
 0x163   :  { %918 = vmatmul.f32.gmra.mxu2 %v837_v25  ;;  %1010 = vmatmul.f32.gmra.mxu3 %v838_v26  ;;  %v215_v25 = vadd.f32 %v1667_v33, %v1665_v32  ;;  %v582_v32 = vld [vmem:[%s2406_s2 + $0x110] sm:$0xff]  ;;  %v583_v33 = vld [vmem:[%s2406_s2 + $0x118] sm:$0xff] }
 0x166   :  { %v428_v47 = vpop.f32.mrf.mxu2  ;;  %v520_v48 = vpop.f32.mrf.mxu3 }
 0x167   :  { %v2113_v52 = vadd.f32 %v520_v48, %v428_v47  ;;  %v615_v53 = vpop.f32.mrf.mxu0  ;;  %v707_v18 = vpop.f32.mrf.mxu1  ;;  %v523_v47 = vmax.f32 %v215_v25, %v1681_v40  ;;  %v841_v40 = vld [vmem:[%s2407_s3 + $0x110] sm:$0xff] }
 0x168   :  { %v708_v26 = vadd.f32 %v707_v18, %v615_v53  ;;  %v842_v18 = vld [vmem:[%s2407_s3 + $0x118] sm:$0xff] }
 0x169   :  { %2435 = vst [vmem:[#allocation27_spill] sm:$0xff] %v2113_v52 }
 0x16a   :  { %662 = vmatmul.f32.gmra.mxu0 %v580_v6  ;;  %754 = vmatmul.f32.gmra.mxu1 %v581_v63  ;;  %v782_v43 = vmax.f32 %v523_v47, %v708_v26 }
 0x16b   :  { %921 = vmatmul.f32.gmra.mxu2 %v839_v10  ;;  %1013 = vmatmul.f32.gmra.mxu3 %v840_v17 }
 0x16e   :  { %v874_v48 = vpop.f32.mrf.mxu2  ;;  %v966_v52 = vpop.f32.mrf.mxu3 }
 0x16f   :  { %v967_v28 = vadd.f32 %v966_v52, %v874_v48  ;;  %v618_v2 = vpop.f32.mrf.mxu0  ;;  %v710_v6 = vpop.f32.mrf.mxu1  ;;  %v218_v52 = vadd.f32 %v1685_v42, %v1683_v41  ;;  %v584_v41 = vld [vmem:[%s2406_s2 + $0x120] sm:$0xff]  ;;  %v585_v42 = vld [vmem:[%s2406_s2 + $0x128] sm:$0xff] }
 0x170   :  { %v711_v10 = vadd.f32 %v710_v6, %v618_v2  ;;  %v844_v2 = vld [vmem:[%s2407_s3 + $0x128] sm:$0xff] }
 0x171   :  { %v1041_v63 = vmax.f32 %v782_v43, %v967_v28  ;;  %v524_v17 = vmax.f32 %v218_v52, %v1699_v49  ;;  %v843_v49 = vld [vmem:[%s2407_s3 + $0x120] sm:$0xff] }
 0x172   :  { %665 = vmatmul.f32.gmra.mxu0 %v582_v32  ;;  %757 = vmatmul.f32.gmra.mxu1 %v583_v33  ;;  %v221_v33 = vadd.f32 %v1703_v51, %v1701_v50  ;;  %v586_v50 = vld [vmem:[%s2406_s2 + $0x130] sm:$0xff]  ;;  %v587_v51 = vld [vmem:[%s2406_s2 + $0x138] sm:$0xff] }
 0x173   :  { %v1070_v53 = vadd.f32 %v2133_v27, %v1041_v63  ;;  %924 = vmatmul.f32.gmra.mxu2 %v841_v40  ;;  %1016 = vmatmul.f32.gmra.mxu3 %v842_v18  ;;  %v783_v28 = vmax.f32 %v524_v17, %v711_v10 }
 0x174   :  { %v525_v63 = vmax.f32 %v221_v33, %v1717_v58  ;;  %v845_v58 = vld [vmem:[%s2407_s3 + $0x130] sm:$0xff] }
 0x175   :  { %v1095_v25 = vmax.f32 %v1070_v53, 0.0 }
 0x176   :  { %v877_v26 = vpop.f32.mrf.mxu2  ;;  %v969_v47 = vpop.f32.mrf.mxu3 }
 0x177   :  { %1120 = vst [vmem:[%s2409_s6] sm:$0xff] %v1095_v25  ;;  %v970_v43 = vadd.f32 %v969_v47, %v877_v26  ;;  %v621_v48 = vpop.f32.mrf.mxu0  ;;  %v713_v32 = vpop.f32.mrf.mxu1 }
 0x178   :  { %v714_v18 = vadd.f32 %v713_v32, %v621_v48  ;;  %v224_v48 = vadd.f32 %v1721_v60, %v1719_v59  ;;  %v588_v59 = vld [vmem:[%s2406_s2 + $0x140] sm:$0xff]  ;;  %v589_v60 = vld [vmem:[%s2406_s2 + $0x148] sm:$0xff] }
 0x179   :  { %v1042_v6 = vmax.f32 %v783_v28, %v970_v43  ;;  %v846_v28 = vld [vmem:[%s2407_s3 + $0x138] sm:$0xff] }
 0x17a   :  { %668 = vmatmul.f32.gmra.mxu0 %v584_v41  ;;  %760 = vmatmul.f32.gmra.mxu1 %v585_v42  ;;  %v784_v17 = vmax.f32 %v525_v63, %v714_v18  ;;  %v526_v42 = vmax.f32 %v224_v48, %v1735_v3  ;;  %v847_v3 = vld [vmem:[%s2407_s3 + $0x140] sm:$0xff] }
 0x17b   :  { %v1071_v40 = vadd.f32 %v2133_v27, %v1042_v6  ;;  %927 = vmatmul.f32.gmra.mxu2 %v843_v49  ;;  %1019 = vmatmul.f32.gmra.mxu3 %v844_v2 }
 0x17d   :  { %v1096_v52 = vmax.f32 %v1071_v40, 0.0 }
 0x17e   :  { %v880_v53 = vpop.f32.mrf.mxu2  ;;  %v972_v10 = vpop.f32.mrf.mxu3 }
 0x17f   :  { %1121 = vst [vmem:[%s2409_s6 + $0x8] sm:$0xff] %v1096_v52  ;;  %v973_v25 = vadd.f32 %v972_v10, %v880_v53  ;;  %v624_v26 = vpop.f32.mrf.mxu0  ;;  %v716_v47 = vpop.f32.mrf.mxu1  ;;  %v848_v52 = vld [vmem:[%s2407_s3 + $0x148] sm:$0xff]  ;;  %v227_v10 = vadd.f32 %v1739_v5, %v1737_v4  ;;  %v590_v4 = vld [vmem:[%s2406_s2 + $0x150] sm:$0xff]  ;;  %v591_v5 = vld [vmem:[%s2406_s2 + $0x158] sm:$0xff] }
 0x180   :  { %v717_v41 = vadd.f32 %v716_v47, %v624_v26 }
 0x181   :  { %v1043_v43 = vmax.f32 %v784_v17, %v973_v25  ;;  %v527_v26 = vmax.f32 %v227_v10, %v1753_v12  ;;  %v849_v12 = vld [vmem:[%s2407_s3 + $0x150] sm:$0xff]  ;;  %v233_v10 = vadd.f32 %v1775_v23, %v1773_v22  ;;  %v595_v23 = vld [vmem:[%s2406_s2 + $0x178] sm:$0xff] }
 0x182   :  { %671 = vmatmul.f32.gmra.mxu0 %v586_v50  ;;  %763 = vmatmul.f32.gmra.mxu1 %v587_v51  ;;  %v785_v33 = vmax.f32 %v526_v42, %v717_v41  ;;  %v230_v42 = vadd.f32 %v1757_v14, %v1755_v13  ;;  %v592_v13 = vld [vmem:[%s2406_s2 + $0x160] sm:$0xff]  ;;  %v593_v14 = vld [vmem:[%s2406_s2 + $0x168] sm:$0xff]  ;;  %v594_v22 = vld [vmem:[%s2406_s2 + $0x170] sm:$0xff] }
 0x183   :  { %v1072_v32 = vadd.f32 %v2133_v27, %v1043_v43  ;;  %930 = vmatmul.f32.gmra.mxu2 %v845_v58  ;;  %1022 = vmatmul.f32.gmra.mxu3 %v846_v28 }
 0x185   :  { %v1097_v49 = vmax.f32 %v1072_v32, 0.0  ;;  %v850_v32 = vld [vmem:[%s2407_s3 + $0x158] sm:$0xff] }
 0x186   :  { %v883_v2 = vpop.f32.mrf.mxu2  ;;  %v975_v6 = vpop.f32.mrf.mxu3 }
 0x187   :  { %1122 = vst [vmem:[%s2409_s6 + $0x10] sm:$0xff] %v1097_v49  ;;  %v976_v40 = vadd.f32 %v975_v6, %v883_v2  ;;  %v627_v18 = vpop.f32.mrf.mxu0  ;;  %v719_v63 = vpop.f32.mrf.mxu1  ;;  %v528_v6 = vmax.f32 %v230_v42, %v1771_v21  ;;  %v851_v21 = vld [vmem:[%s2407_s3 + $0x160] sm:$0xff] }
 0x188   :  { %v720_v25 = vadd.f32 %v719_v63, %v627_v18 }
 0x189   :  { %v1044_v53 = vmax.f32 %v785_v33, %v976_v40 }
 0x18a   :  { %674 = vmatmul.f32.gmra.mxu0 %v588_v59  ;;  %766 = vmatmul.f32.gmra.mxu1 %v589_v60  ;;  %v786_v58 = vmax.f32 %v527_v26, %v720_v25  ;;  %v529_v26 = vmax.f32 %v233_v10, %v1789_v30  ;;  %v853_v30 = vld [vmem:[%s2407_s3 + $0x170] sm:$0xff] }
 0x18b   :  { %v1073_v17 = vadd.f32 %v2133_v27, %v1044_v53  ;;  %933 = vmatmul.f32.gmra.mxu2 %v847_v3  ;;  %1025 = vmatmul.f32.gmra.mxu3 %v848_v52  ;;  %v852_v52 = vld [vmem:[%s2407_s3 + $0x168] sm:$0xff] }
 0x18d   :  { %v1098_v47 = vmax.f32 %v1073_v17, 0.0 }
 0x18e   :  { %v886_v50 = vpop.f32.mrf.mxu2  ;;  %v978_v51 = vpop.f32.mrf.mxu3 }
 0x18f   :  { %1123 = vst [vmem:[%s2409_s6 + $0x18] sm:$0xff] %v1098_v47  ;;  %v979_v28 = vadd.f32 %v978_v51, %v886_v50  ;;  %v630_v43 = vpop.f32.mrf.mxu0  ;;  %v722_v48 = vpop.f32.mrf.mxu1 }
 0x190   :  { %v723_v2 = vadd.f32 %v722_v48, %v630_v43 }
 0x191   :  { %v1045_v41 = vmax.f32 %v786_v58, %v979_v28 }
 0x192   :  { %677 = vmatmul.f32.gmra.mxu0 %v590_v4  ;;  %769 = vmatmul.f32.gmra.mxu1 %v591_v5  ;;  %v787_v63 = vmax.f32 %v528_v6, %v723_v2  ;;  %v854_v4 = vld [vmem:[%s2407_s3 + $0x178] sm:$0xff] }
 0x193   :  { %v1074_v49 = vadd.f32 %v2133_v27, %v1045_v41  ;;  %936 = vmatmul.f32.gmra.mxu2 %v849_v12  ;;  %1028 = vmatmul.f32.gmra.mxu3 %v850_v32  ;;  %v236_v12 = vadd.f32 %v1793_v34, %v1791_v31  ;;  %v596_v31 = vld [vmem:[%s2406_s2 + $0x180] sm:$0xff]  ;;  %v597_v34 = vld [vmem:[%s2406_s2 + $0x188] sm:$0xff] }
 0x195   :  { %v1099_v33 = vmax.f32 %v1074_v49, 0.0  ;;  %v530_v42 = vmax.f32 %v236_v12, %v1807_v44  ;;  %v855_v44 = vld [vmem:[%s2407_s3 + $0x180] sm:$0xff] }
 0x196   :  { %v889_v40 = vpop.f32.mrf.mxu2  ;;  %v981_v18 = vpop.f32.mrf.mxu3 }
 0x197   :  { %1124 = vst [vmem:[%s2409_s6 + $0x20] sm:$0xff] %v1099_v33  ;;  %v982_v59 = vadd.f32 %v981_v18, %v889_v40  ;;  %v633_v60 = vpop.f32.mrf.mxu0  ;;  %v725_v3 = vpop.f32.mrf.mxu1 }
 0x198   :  { %v726_v25 = vadd.f32 %v725_v3, %v633_v60  ;;  %v239_v3 = vadd.f32 %v1811_v46, %v1809_v45  ;;  %v242_v45 = vadd.f32 %v1829_v61, %v1827_v57  ;;  %v245_v57 = vadd.f32 %v1847_v9, %v1845_v8 }
 0x199   :  { %v1046_v53 = vmax.f32 %v787_v63, %v982_v59  ;;  %v856_v59 = vld [vmem:[%s2407_s3 + $0x188] sm:$0xff]  ;;  %v248_v8 = vadd.f32 %v1865_v24, %v1863_v20  ;;  %v251_v20 = vadd.f32 %v1883_v38, %v1881_v37  ;;  %v254_v37 = vadd.f32 %v1901_v62, %v1899_v55 }
 0x19a   :  { %680 = vmatmul.f32.gmra.mxu0 %v592_v13  ;;  %772 = vmatmul.f32.gmra.mxu1 %v593_v14  ;;  %v788_v58 = vmax.f32 %v529_v26, %v726_v25  ;;  %v257_v55 = vadd.f32 %v1919_v16, %v1917_v15  ;;  %v260_v15 = vadd.f32 %v1937_v39, %v1935_v35 }
 0x19b   :  { %v1075_v17 = vadd.f32 %v2133_v27, %v1046_v53  ;;  %939 = vmatmul.f32.gmra.mxu2 %v851_v21  ;;  %1031 = vmatmul.f32.gmra.mxu3 %v852_v52  ;;  %v531_v21 = vmax.f32 %v239_v3, %v1825_v56  ;;  %v532_v56 = vmax.f32 %v242_v45, %v1843_v7 }
 0x19c   :  { %v533_v7 = vmax.f32 %v245_v57, %v1861_v19  ;;  %v534_v19 = vmax.f32 %v248_v8, %v1879_v36  ;;  %v535_v36 = vmax.f32 %v251_v20, %v1897_v54  ;;  %v536_v54 = vmax.f32 %v254_v37, %v1915_v11  ;;  %v2438_v20 = vld [vmem:[#allocation4_spill] sm:$0xff] }
 0x19d   :  { %v1100_v47 = vmax.f32 %v1075_v17, 0.0  ;;  %v537_v11 = vmax.f32 %v257_v55, %v1933_v29  ;;  %v538_v29 = vmax.f32 %v260_v15, %v1951_v0 }
 0x19e   :  { %v892_v50 = vpop.f32.mrf.mxu2  ;;  %v984_v51 = vpop.f32.mrf.mxu3 }
 0x19f   :  { %1125 = vst [vmem:[%s2409_s6 + $0x28] sm:$0xff] %v1100_v47  ;;  %v985_v28 = vadd.f32 %v984_v51, %v892_v50  ;;  %v636_v43 = vpop.f32.mrf.mxu0  ;;  %v728_v48 = vpop.f32.mrf.mxu1 }
 0x1a0   :  { %v729_v41 = vadd.f32 %v728_v48, %v636_v43 }
 0x1a1   :  { %v1047_v5 = vmax.f32 %v788_v58, %v985_v28 }
 0x1a2   :  { %683 = vmatmul.f32.gmra.mxu0 %v594_v22  ;;  %775 = vmatmul.f32.gmra.mxu1 %v595_v23  ;;  %v789_v33 = vmax.f32 %v530_v42, %v729_v41 }
 0x1a3   :  { %v1076_v32 = vadd.f32 %v2133_v27, %v1047_v5  ;;  %942 = vmatmul.f32.gmra.mxu2 %v853_v30  ;;  %1034 = vmatmul.f32.gmra.mxu3 %v854_v4 }
 0x1a5   :  { %v1101_v49 = vmax.f32 %v1076_v32, 0.0 }
 0x1a6   :  { %v895_v2 = vpop.f32.mrf.mxu2  ;;  %v987_v6 = vpop.f32.mrf.mxu3 }
 0x1a7   :  { %1126 = vst [vmem:[%s2409_s6 + $0x30] sm:$0xff] %v1101_v49  ;;  %v988_v40 = vadd.f32 %v987_v6, %v895_v2  ;;  %v639_v18 = vpop.f32.mrf.mxu0  ;;  %v731_v63 = vpop.f32.mrf.mxu1 }
 0x1a8   :  { %v732_v14 = vadd.f32 %v731_v63, %v639_v18 }
 0x1a9   :  { %v1048_v60 = vmax.f32 %v789_v33, %v988_v40 }
 0x1aa   :  { %686 = vmatmul.f32.gmra.mxu0 %v596_v31  ;;  %778 = vmatmul.f32.gmra.mxu1 %v597_v34  ;;  %v790_v17 = vmax.f32 %v531_v21, %v732_v14 }
 0x1ab   :  { %v1077_v13 = vadd.f32 %v2133_v27, %v1048_v60  ;;  %945 = vmatmul.f32.gmra.mxu2 %v855_v44  ;;  %1037 = vmatmul.f32.gmra.mxu3 %v856_v59 }
 0x1ad   :  { %v1102_v52 = vmax.f32 %v1077_v13, 0.0 }
 0x1ae   :  { %v898_v53 = vpop.f32.mrf.mxu2  ;;  %v990_v10 = vpop.f32.mrf.mxu3 }
 0x1af   :  { %1127 = vst [vmem:[%s2409_s6 + $0x38] sm:$0xff] %v1102_v52  ;;  %v991_v25 = vadd.f32 %v990_v10, %v898_v53  ;;  %v642_v26 = vpop.f32.mrf.mxu0  ;;  %v734_v47 = vpop.f32.mrf.mxu1 }
 0x1b0   :  { %v735_v51 = vadd.f32 %v734_v47, %v642_v26 }
 0x1b1   :  { %v1049_v50 = vmax.f32 %v790_v17, %v991_v25 }
 0x1b2   :  { %v791_v48 = vmax.f32 %v532_v56, %v735_v51 }
 0x1b3   :  { %v1078_v46 = vadd.f32 %v2133_v27, %v1049_v50 }
 0x1b5   :  { %v1103_v58 = vmax.f32 %v1078_v46, 0.0 }
 0x1b6   :  { %v901_v28 = vpop.f32.mrf.mxu2  ;;  %v993_v43 = vpop.f32.mrf.mxu3 }
 0x1b7   :  { %1128 = vst [vmem:[%s2409_s6 + $0x40] sm:$0xff] %v1103_v58  ;;  %v994_v22 = vadd.f32 %v993_v43, %v901_v28  ;;  %v645_v23 = vpop.f32.mrf.mxu0  ;;  %v737_v30 = vpop.f32.mrf.mxu1 }
 0x1b8   :  { %v738_v5 = vadd.f32 %v737_v30, %v645_v23 }
 0x1b9   :  { %v1050_v4 = vmax.f32 %v791_v48, %v994_v22 }
 0x1ba   :  { %v792_v42 = vmax.f32 %v533_v7, %v738_v5 }
 0x1bb   :  { %v1079_v61 = vadd.f32 %v2133_v27, %v1050_v4 }
 0x1bd   :  { %v1104_v12 = vmax.f32 %v1079_v61, 0.0 }
 0x1be   :  { %v904_v32 = vpop.f32.mrf.mxu2  ;;  %v996_v41 = vpop.f32.mrf.mxu3 }
 0x1bf   :  { %1129 = vst [vmem:[%s2409_s6 + $0x48] sm:$0xff] %v1104_v12  ;;  %v997_v49 = vadd.f32 %v996_v41, %v904_v32  ;;  %v648_v2 = vpop.f32.mrf.mxu0  ;;  %v740_v6 = vpop.f32.mrf.mxu1 }
 0x1c0   :  { %v741_v40 = vadd.f32 %v740_v6, %v648_v2 }
 0x1c1   :  { %v1051_v33 = vmax.f32 %v792_v42, %v997_v49 }
 0x1c2   :  { %v793_v34 = vmax.f32 %v534_v19, %v741_v40  ;;  %v2437_v19 = vld [vmem:[#allocation3_spill] sm:$0xff] }
 0x1c3   :  { %v1080_v9 = vadd.f32 %v2133_v27, %v1051_v33 }
 0x1c5   :  { %v1105_v18 = vmax.f32 %v1080_v9, 0.0  ;;  %v2436_v9 = vld [vmem:[#allocation2_spill] sm:$0xff] }
 0x1c6   :  { %v907_v63 = vpop.f32.mrf.mxu2  ;;  %v999_v31 = vpop.f32.mrf.mxu3  ;;  %v263_v35 = vadd.f32 %v2436_v9, %v1953_v1 }
 0x1c7   :  { %1130 = vst [vmem:[%s2409_s6 + $0x50] sm:$0xff] %v1105_v18  ;;  %v1000_v44 = vadd.f32 %v999_v31, %v907_v63  ;;  %v651_v59 = vpop.f32.mrf.mxu0  ;;  %v743_v60 = vpop.f32.mrf.mxu1 }
 0x1c8   :  { %v744_v13 = vadd.f32 %v743_v60, %v651_v59  ;;  %v539_v0 = vmax.f32 %v263_v35, %v2437_v19  ;;  %v2449_v35 = vld [vmem:[#allocation15_spill] sm:$0xff] }
 0x1c9   :  { %v1052_v3 = vmax.f32 %v793_v34, %v1000_v44 }
 0x1ca   :  { %v794_v53 = vmax.f32 %v535_v36, %v744_v13 }
 0x1cb   :  { %v1081_v24 = vadd.f32 %v2133_v27, %v1052_v3 }
 0x1cd   :  { %v1106_v14 = vmax.f32 %v1081_v24, 0.0  ;;  %v2439_v24 = vld [vmem:[#allocation5_spill] sm:$0xff] }
 0x1ce   :  { %v910_v21 = vpop.f32.mrf.mxu2  ;;  %v1002_v52 = vpop.f32.mrf.mxu3  ;;  %v266_v1 = vadd.f32 %v2439_v24, %v2438_v20 }
 0x1cf   :  { %1131 = vst [vmem:[%s2409_s6 + $0x58] sm:$0xff] %v1106_v14  ;;  %v1003_v10 = vadd.f32 %v1002_v52, %v910_v21  ;;  %v654_v17 = vpop.f32.mrf.mxu0  ;;  %v746_v25 = vpop.f32.mrf.mxu1  ;;  %v2440_v14 = vld [vmem:[#allocation6_spill] sm:$0xff] }
 0x1d0   :  { %v747_v47 = vadd.f32 %v746_v25, %v654_v17  ;;  %v540_v21 = vmax.f32 %v266_v1, %v2440_v14  ;;  %v2452_v1 = vld [vmem:[#allocation18_spill] sm:$0xff] }
 0x1d1   :  { %v1053_v26 = vmax.f32 %v794_v53, %v1003_v10 }
 0x1d2   :  { %v795_v51 = vmax.f32 %v536_v54, %v747_v47  ;;  %v2441_v47 = vld [vmem:[#allocation7_spill] sm:$0xff]  ;;  %v2442_v54 = vld [vmem:[#allocation8_spill] sm:$0xff] }
 0x1d3   :  { %v1082_v38 = vadd.f32 %v2133_v27, %v1053_v26 }
 0x1d5   :  { %v1107_v50 = vmax.f32 %v1082_v38, 0.0 }
 0x1d6   :  { %v913_v45 = vpop.f32.mrf.mxu2  ;;  %v1005_v46 = vpop.f32.mrf.mxu3 }
 0x1d7   :  { %1132 = vst [vmem:[%s2409_s6 + $0x60] sm:$0xff] %v1107_v50  ;;  %v1006_v56 = vadd.f32 %v1005_v46, %v913_v45  ;;  %v657_v58 = vpop.f32.mrf.mxu0  ;;  %v749_v28 = vpop.f32.mrf.mxu1  ;;  %v269_v50 = vadd.f32 %v2442_v54, %v2441_v47 }
 0x1d8   :  { %v750_v48 = vadd.f32 %v749_v28, %v657_v58 }
 0x1d9   :  { %v1054_v43 = vmax.f32 %v795_v51, %v1006_v56  ;;  %v2443_v51 = vld [vmem:[#allocation9_spill] sm:$0xff] }
 0x1da   :  { %v796_v4 = vmax.f32 %v537_v11, %v750_v48  ;;  %v541_v56 = vmax.f32 %v269_v50, %v2443_v51  ;;  %v2455_v50 = vld [vmem:[#allocation21_spill] sm:$0xff] }
 0x1db   :  { %v1083_v62 = vadd.f32 %v2133_v27, %v1054_v43 }
 0x1dd   :  { %v1108_v22 = vmax.f32 %v1083_v62, 0.0 }
 0x1de   :  { %v916_v23 = vpop.f32.mrf.mxu2  ;;  %v1008_v30 = vpop.f32.mrf.mxu3 }
 0x1df   :  { %1133 = vst [vmem:[%s2409_s6 + $0x68] sm:$0xff] %v1108_v22  ;;  %v1009_v57 = vadd.f32 %v1008_v30, %v916_v23  ;;  %v660_v61 = vpop.f32.mrf.mxu0  ;;  %v752_v5 = vpop.f32.mrf.mxu1  ;;  %v2444_v23 = vld [vmem:[#allocation10_spill] sm:$0xff]  ;;  %v2445_v30 = vld [vmem:[#allocation11_spill] sm:$0xff] }
 0x1e0   :  { %v753_v12 = vadd.f32 %v752_v5, %v660_v61  ;;  %v2446_v5 = vld [vmem:[#allocation12_spill] sm:$0xff] }
 0x1e1   :  { %v1055_v7 = vmax.f32 %v796_v4, %v1009_v57  ;;  %v272_v4 = vadd.f32 %v2445_v30, %v2444_v23 }
 0x1e2   :  { %v797_v49 = vmax.f32 %v538_v29, %v753_v12 }
 0x1e3   :  { %v1084_v16 = vadd.f32 %v2133_v27, %v1055_v7  ;;  %v542_v7 = vmax.f32 %v272_v4, %v2446_v5  ;;  %v2458_v4 = vld [vmem:[#allocation24_spill] sm:$0xff] }
 0x1e5   :  { %v1109_v32 = vmax.f32 %v1084_v16, 0.0 }
 0x1e6   :  { %v919_v41 = vpop.f32.mrf.mxu2  ;;  %v1011_v42 = vpop.f32.mrf.mxu3 }
 0x1e7   :  { %1134 = vst [vmem:[%s2409_s6 + $0x70] sm:$0xff] %v1109_v32  ;;  %v1012_v2 = vadd.f32 %v1011_v42, %v919_v41  ;;  %v663_v6 = vpop.f32.mrf.mxu0  ;;  %v755_v33 = vpop.f32.mrf.mxu1 }
 0x1e8   :  { %v756_v40 = vadd.f32 %v755_v33, %v663_v6  ;;  %v2448_v6 = vld [vmem:[#allocation14_spill] sm:$0xff] }
 0x1e9   :  { %v1056_v8 = vmax.f32 %v797_v49, %v1012_v2  ;;  %v2447_v2 = vld [vmem:[#allocation13_spill] sm:$0xff] }
 0x1ea   :  { %v798_v34 = vmax.f32 %v539_v0, %v756_v40  ;;  %v275_v33 = vadd.f32 %v2448_v6, %v2447_v2 }
 0x1eb   :  { %v1085_v39 = vadd.f32 %v2133_v27, %v1056_v8 }
 0x1ed   :  { %v1110_v18 = vmax.f32 %v1085_v39, 0.0  ;;  %v543_v39 = vmax.f32 %v275_v33, %v2449_v35  ;;  %v2461_v33 = vld [vmem:[#allocation27_spill] sm:$0xff] }
 0x1ee   :  { %v922_v63 = vpop.f32.mrf.mxu2  ;;  %v1014_v31 = vpop.f32.mrf.mxu3 }
 0x1ef   :  { %1135 = vst [vmem:[%s2409_s6 + $0x78] sm:$0xff] %v1110_v18  ;;  %v1015_v44 = vadd.f32 %v1014_v31, %v922_v63  ;;  %v666_v59 = vpop.f32.mrf.mxu0  ;;  %v758_v60 = vpop.f32.mrf.mxu1 }
 0x1f0   :  { %v759_v36 = vadd.f32 %v758_v60, %v666_v59  ;;  %v2450_v59 = vld [vmem:[#allocation16_spill] sm:$0xff]  ;;  %v2451_v60 = vld [vmem:[#allocation17_spill] sm:$0xff] }
 0x1f1   :  { %v1057_v3 = vmax.f32 %v798_v34, %v1015_v44 }
 0x1f2   :  { %v799_v17 = vmax.f32 %v540_v21, %v759_v36 }
 0x1f3   :  { %v1086_v13 = vadd.f32 %v2133_v27, %v1057_v3  ;;  %v278_v3 = vadd.f32 %v2451_v60, %v2450_v59 }
 0x1f5   :  { %v1111_v52 = vmax.f32 %v1086_v13, 0.0  ;;  %v544_v13 = vmax.f32 %v278_v3, %v2452_v1 }
 0x1f6   :  { %v925_v53 = vpop.f32.mrf.mxu2  ;;  %v1017_v10 = vpop.f32.mrf.mxu3 }
 0x1f7   :  { %1136 = vst [vmem:[%s2409_s6 + $0x80] sm:$0xff] %v1111_v52  ;;  %v1018_v25 = vadd.f32 %v1017_v10, %v925_v53  ;;  %v669_v26 = vpop.f32.mrf.mxu0  ;;  %v761_v37 = vpop.f32.mrf.mxu1 }
 0x1f8   :  { %v762_v46 = vadd.f32 %v761_v37, %v669_v26  ;;  %v2453_v26 = vld [vmem:[#allocation19_spill] sm:$0xff]  ;;  %v2454_v37 = vld [vmem:[#allocation20_spill] sm:$0xff] }
 0x1f9   :  { %v1058_v38 = vmax.f32 %v799_v17, %v1018_v25 }
 0x1fa   :  { %v800_v55 = vmax.f32 %v541_v56, %v762_v46 }
 0x1fb   :  { %v1087_v45 = vadd.f32 %v2133_v27, %v1058_v38  ;;  %v281_v38 = vadd.f32 %v2454_v37, %v2453_v26 }
 0x1fd   :  { %v1112_v58 = vmax.f32 %v1087_v45, 0.0  ;;  %v545_v45 = vmax.f32 %v281_v38, %v2455_v50 }
 0x1fe   :  { %v928_v28 = vpop.f32.mrf.mxu2  ;;  %v1020_v43 = vpop.f32.mrf.mxu3 }
 0x1ff   :  { %1137 = vst [vmem:[%s2409_s6 + $0x88] sm:$0xff] %v1112_v58  ;;  %v1021_v62 = vadd.f32 %v1020_v43, %v928_v28  ;;  %v672_v48 = vpop.f32.mrf.mxu0  ;;  %v764_v11 = vpop.f32.mrf.mxu1 }
 0x200   :  { %v765_v61 = vadd.f32 %v764_v11, %v672_v48  ;;  %v2456_v48 = vld [vmem:[#allocation22_spill] sm:$0xff]  ;;  %v2457_v11 = vld [vmem:[#allocation23_spill] sm:$0xff] }
 0x201   :  { %v1059_v22 = vmax.f32 %v800_v55, %v1021_v62 }
 0x202   :  { %v801_v29 = vmax.f32 %v542_v7, %v765_v61 }
 0x203   :  { %v1088_v57 = vadd.f32 %v2133_v27, %v1059_v22  ;;  %v284_v22 = vadd.f32 %v2457_v11, %v2456_v48 }
 0x205   :  { %v1113_v15 = vmax.f32 %v1088_v57, 0.0  ;;  %v546_v57 = vmax.f32 %v284_v22, %v2458_v4 }
 0x206   :  { %v931_v16 = vpop.f32.mrf.mxu2  ;;  %v1023_v12 = vpop.f32.mrf.mxu3 }
 0x207   :  { %1138 = vst [vmem:[%s2409_s6 + $0x90] sm:$0xff] %v1113_v15  ;;  %v1024_v32 = vadd.f32 %v1023_v12, %v931_v16  ;;  %v675_v41 = vpop.f32.mrf.mxu0  ;;  %v767_v42 = vpop.f32.mrf.mxu1 }
 0x208   :  { %v768_v9 = vadd.f32 %v767_v42, %v675_v41  ;;  %v2459_v41 = vld [vmem:[#allocation25_spill] sm:$0xff]  ;;  %v2460_v42 = vld [vmem:[#allocation26_spill] sm:$0xff] }
 0x209   :  { %v1060_v49 = vmax.f32 %v801_v29, %v1024_v32 }
 0x20a   :  { %v802_v18 = vmax.f32 %v543_v39, %v768_v9 }
 0x20b   :  { %v1089_v8 = vadd.f32 %v2133_v27, %v1060_v49  ;;  %v287_v49 = vadd.f32 %v2460_v42, %v2459_v41 }
 0x20d   :  { %v1114_v40 = vmax.f32 %v1089_v8, 0.0  ;;  %v547_v8 = vmax.f32 %v287_v49, %v2461_v33 }
 0x20e   :  { %v934_v19 = vpop.f32.mrf.mxu2  ;;  %v1026_v0 = vpop.f32.mrf.mxu3 }
 0x20f   :  { %1139 = vst [vmem:[%s2409_s6 + $0x98] sm:$0xff] %v1114_v40  ;;  %v1027_v63 = vadd.f32 %v1026_v0, %v934_v19  ;;  %v678_v31 = vpop.f32.mrf.mxu0  ;;  %v770_v34 = vpop.f32.mrf.mxu1 }
 0x210   :  { %v771_v24 = vadd.f32 %v770_v34, %v678_v31 }
 0x211   :  { %v1061_v44 = vmax.f32 %v802_v18, %v1027_v63 }
 0x212   :  { %v803_v52 = vmax.f32 %v544_v13, %v771_v24 }
 0x213   :  { %v1090_v20 = vadd.f32 %v2133_v27, %v1061_v44 }
 0x215   :  { %v1115_v36 = vmax.f32 %v1090_v20, 0.0 }
 0x216   :  { %v937_v14 = vpop.f32.mrf.mxu2  ;;  %v1029_v21 = vpop.f32.mrf.mxu3 }
 0x217   :  { %1140 = vst [vmem:[%s2409_s6 + $0xa0] sm:$0xff] %v1115_v36  ;;  %v1030_v53 = vadd.f32 %v1029_v21, %v937_v14  ;;  %v681_v10 = vpop.f32.mrf.mxu0  ;;  %v773_v17 = vpop.f32.mrf.mxu1 }
 0x218   :  { %v774_v54 = vadd.f32 %v773_v17, %v681_v10 }
 0x219   :  { %v1062_v25 = vmax.f32 %v803_v52, %v1030_v53 }
 0x21a   :  { %v804_v58 = vmax.f32 %v545_v45, %v774_v54 }
 0x21b   :  { %v1091_v47 = vadd.f32 %v2133_v27, %v1062_v25 }
 0x21d   :  { %v1116_v46 = vmax.f32 %v1091_v47, 0.0 }
 0x21e   :  { %v940_v51 = vpop.f32.mrf.mxu2  ;;  %v1032_v56 = vpop.f32.mrf.mxu3 }
 0x21f   :  { %1141 = vst [vmem:[%s2409_s6 + $0xa8] sm:$0xff] %v1116_v46  ;;  %v1033_v28 = vadd.f32 %v1032_v56, %v940_v51  ;;  %v684_v43 = vpop.f32.mrf.mxu0  ;;  %v776_v55 = vpop.f32.mrf.mxu1 }
 0x220   :  { %v777_v30 = vadd.f32 %v776_v55, %v684_v43 }
 0x221   :  { %v1063_v62 = vmax.f32 %v804_v58, %v1033_v28 }
 0x222   :  { %v805_v15 = vmax.f32 %v546_v57, %v777_v30 }
 0x223   :  { %v1092_v23 = vadd.f32 %v2133_v27, %v1063_v62 }
 0x225   :  { %v1117_v61 = vmax.f32 %v1092_v23, 0.0 }
 0x226   :  { %v943_v5 = vpop.f32.mrf.mxu2  ;;  %v1035_v7 = vpop.f32.mrf.mxu3 }
 0x227   :  { %1142 = vst [vmem:[%s2409_s6 + $0xb0] sm:$0xff] %v1117_v61  ;;  %v1036_v16 = vadd.f32 %v1035_v7, %v943_v5  ;;  %v687_v12 = vpop.f32.mrf.mxu0  ;;  %v779_v29 = vpop.f32.mrf.mxu1 }
 0x228   :  { %v780_v6 = vadd.f32 %v779_v29, %v687_v12 }
 0x229   :  { %v1064_v32 = vmax.f32 %v805_v15, %v1036_v16 }
 0x22a   :  { %v806_v40 = vmax.f32 %v547_v8, %v780_v6 }
 0x22b   :  { %v1093_v2 = vadd.f32 %v2133_v27, %v1064_v32 }
 0x22d   :  { %v1118_v9 = vmax.f32 %v1093_v2, 0.0 }
 0x22e   :  { %v946_v35 = vpop.f32.mrf.mxu2  ;;  %v1038_v39 = vpop.f32.mrf.mxu3 }
 0x22f   :  { %1143 = vst [vmem:[%s2409_s6 + $0xb8] sm:$0xff] %v1118_v9  ;;  %v1039_v19 = vadd.f32 %v1038_v39, %v946_v35 }
 0x231   :  { %v1065_v0 = vmax.f32 %v806_v40, %v1039_v19 }
 0x233   :  { %v1094_v18 = vadd.f32 %v2133_v27, %v1065_v0 }
 0x235   :  { %v1119_v63 = vmax.f32 %v1094_v18, 0.0 }
 0x237   :  { %1144 = vst [vmem:[%s2409_s6 + $0xc0] sm:$0xff] %v1119_v63 }

// kernel: convnn_forward.4
= control target key start
LH: loop header
LB: loop body
LE: loop exit
PB: predicated region body
PF: predicated region fallthrough
CT: control target
= control target key end

     0   :  { %s5723_s4 = inlined_call_operand.vmem [shape: f32[2048,128], index: 4, kind: input, shape index: {}]   ;;  %s5724_s0 = inlined_call_operand.vmem [shape: f32[8,2048], index: 0, kind: input, shape index: {}]   ;;  %s5725_s1 = inlined_call_operand.vmem [shape: f32[8,2048], index: 1, kind: input, shape index: {}]   ;;  %s5726_s2 = inlined_call_operand.vmem [shape: f32[8,2048], index: 2, kind: input, shape index: {}]   ;;  %s5727_s3 = inlined_call_operand.vmem [shape: f32[8,2048], index: 3, kind: input, shape index: {}]   ;;  %s5728_s5 = inlined_call_operand.vmem [shape: f32[1,128], index: 5, kind: input, shape index: {}]   ;;  %s5729_s6 = inlined_call_operand.vmem [shape: f32[8,128], index: 6, kind: output, shape index: {}]  }
   0x1   :  { %v38_v0 = vld [vmem:[%s5723_s4 + $0x78] sm:$0xff]  ;;  %v37_v2 = vld [vmem:[%s5723_s4 + $0x70] sm:$0xff]  ;;  %v36_v6 = vld [vmem:[%s5723_s4 + $0x68] sm:$0xff] }
   0x2   :  { %v70_v1 = vld [vmem:[%s5723_s4 + $0x178] sm:$0xff]  ;;  %295 = vmatpush.msra.mxu0 %v38_v0  ;;  %v69_v4 = vld [vmem:[%s5723_s4 + $0x170] sm:$0xff]  ;;  %v68_v8 = vld [vmem:[%s5723_s4 + $0x168] sm:$0xff] }
   0x3   :  { %335 = vmatpush.msra.mxu2 %v70_v1  ;;  %v54_v3 = vld [vmem:[%s5723_s4 + $0xf8] sm:$0xff]  ;;  %v53_v7 = vld [vmem:[%s5723_s4 + $0xf0] sm:$0xff]  ;;  %v52_v10 = vld [vmem:[%s5723_s4 + $0xe8] sm:$0xff] }
   0x4   :  { %v86_v5 = vld [vmem:[%s5723_s4 + $0x1f8] sm:$0xff]  ;;  %315 = vmatpush.msra.mxu1 %v54_v3  ;;  %296 = vmatpush.msra.mxu0 %v37_v2  ;;  %v85_v9 = vld [vmem:[%s5723_s4 + $0x1f0] sm:$0xff]  ;;  %v35_v11 = vld [vmem:[%s5723_s4 + $0x60] sm:$0xff] }
   0x5   :  { %355 = vmatpush.msra.mxu3 %v86_v5  ;;  %336 = vmatpush.msra.mxu2 %v69_v4  ;;  %v67_v12 = vld [vmem:[%s5723_s4 + $0x160] sm:$0xff]  ;;  %v84_v13 = vld [vmem:[%s5723_s4 + $0x1e8] sm:$0xff]  ;;  %v34_v16 = vld [vmem:[%s5723_s4 + $0x58] sm:$0xff] }
   0x6   :  { %316 = vmatpush.msra.mxu1 %v53_v7  ;;  %297 = vmatpush.msra.mxu0 %v36_v6  ;;  %v51_v14 = vld [vmem:[%s5723_s4 + $0xe0] sm:$0xff]  ;;  %v66_v17 = vld [vmem:[%s5723_s4 + $0x158] sm:$0xff]  ;;  %v33_v20 = vld [vmem:[%s5723_s4 + $0x50] sm:$0xff] }
   0x7   :  { %356 = vmatpush.msra.mxu3 %v85_v9  ;;  %337 = vmatpush.msra.mxu2 %v68_v8  ;;  %v83_v15 = vld [vmem:[%s5723_s4 + $0x1e0] sm:$0xff]  ;;  %v50_v18 = vld [vmem:[%s5723_s4 + $0xd8] sm:$0xff]  ;;  %v65_v21 = vld [vmem:[%s5723_s4 + $0x150] sm:$0xff] }
   0x8   :  { %317 = vmatpush.msra.mxu1 %v52_v10  ;;  %298 = vmatpush.msra.mxu0 %v35_v11  ;;  %v82_v19 = vld [vmem:[%s5723_s4 + $0x1d8] sm:$0xff]  ;;  %v49_v22 = vld [vmem:[%s5723_s4 + $0xd0] sm:$0xff]  ;;  %v32_v24 = vld [vmem:[%s5723_s4 + $0x48] sm:$0xff] }
   0x9   :  { %357 = vmatpush.msra.mxu3 %v84_v13  ;;  %338 = vmatpush.msra.mxu2 %v67_v12  ;;  %v81_v23 = vld [vmem:[%s5723_s4 + $0x1d0] sm:$0xff]  ;;  %v64_v25 = vld [vmem:[%s5723_s4 + $0x148] sm:$0xff]  ;;  %v31_v28 = vld [vmem:[%s5723_s4 + $0x40] sm:$0xff] }
   0xa   :  { %318 = vmatpush.msra.mxu1 %v51_v14  ;;  %299 = vmatpush.msra.mxu0 %v34_v16  ;;  %v48_v26 = vld [vmem:[%s5723_s4 + $0xc8] sm:$0xff]  ;;  %v63_v29 = vld [vmem:[%s5723_s4 + $0x140] sm:$0xff]  ;;  %v30_v32 = vld [vmem:[%s5723_s4 + $0x38] sm:$0xff] }
   0xb   :  { %358 = vmatpush.msra.mxu3 %v83_v15  ;;  %339 = vmatpush.msra.mxu2 %v66_v17  ;;  %v80_v27 = vld [vmem:[%s5723_s4 + $0x1c8] sm:$0xff]  ;;  %v47_v30 = vld [vmem:[%s5723_s4 + $0xc0] sm:$0xff]  ;;  %v62_v33 = vld [vmem:[%s5723_s4 + $0x138] sm:$0xff] }
   0xc   :  { %319 = vmatpush.msra.mxu1 %v50_v18  ;;  %300 = vmatpush.msra.mxu0 %v33_v20  ;;  %v79_v31 = vld [vmem:[%s5723_s4 + $0x1c0] sm:$0xff]  ;;  %v46_v34 = vld [vmem:[%s5723_s4 + $0xb8] sm:$0xff]  ;;  %v2079_v36 = vld [vmem:[%s5723_s4 + $0x30] sm:$0xff] }
   0xd   :  { %359 = vmatpush.msra.mxu3 %v82_v19  ;;  %340 = vmatpush.msra.mxu2 %v65_v21  ;;  %v78_v35 = vld [vmem:[%s5723_s4 + $0x1b8] sm:$0xff]  ;;  %v61_v37 = vld [vmem:[%s5723_s4 + $0x130] sm:$0xff]  ;;  %v2093_v40 = vld [vmem:[%s5723_s4 + $0x28] sm:$0xff] }
   0xe   :  { %320 = vmatpush.msra.mxu1 %v49_v22  ;;  %301 = vmatpush.msra.mxu0 %v32_v24  ;;  %v45_v38 = vld [vmem:[%s5723_s4 + $0xb0] sm:$0xff]  ;;  %v2098_v41 = vld [vmem:[%s5723_s4 + $0x128] sm:$0xff]  ;;  %v2114_v44 = vld [vmem:[%s5723_s4 + $0x20] sm:$0xff] }
   0xf   :  { %360 = vmatpush.msra.mxu3 %v81_v23  ;;  %341 = vmatpush.msra.mxu2 %v64_v25  ;;  %v77_v39 = vld [vmem:[%s5723_s4 + $0x1b0] sm:$0xff]  ;;  %v2104_v42 = vld [vmem:[%s5723_s4 + $0xa8] sm:$0xff]  ;;  %v2119_v45 = vld [vmem:[%s5723_s4 + $0x120] sm:$0xff] }
  0x10   :  { %321 = vmatpush.msra.mxu1 %v48_v26  ;;  %302 = vmatpush.msra.mxu0 %v31_v28  ;;  %v2109_v43 = vld [vmem:[%s5723_s4 + $0x1a8] sm:$0xff]  ;;  %v2126_v46 = vld [vmem:[%s5723_s4 + $0xa0] sm:$0xff]  ;;  %v2138_v48 = vld [vmem:[%s5723_s4 + $0x18] sm:$0xff] }
  0x11   :  { %361 = vmatpush.msra.mxu3 %v80_v27  ;;  %342 = vmatpush.msra.mxu2 %v63_v29  ;;  %v2131_v47 = vld [vmem:[%s5723_s4 + $0x1a0] sm:$0xff]  ;;  %v2143_v49 = vld [vmem:[%s5723_s4 + $0x118] sm:$0xff]  ;;  %v2162_v52 = vld [vmem:[%s5723_s4 + $0x10] sm:$0xff] }
  0x12   :  { %322 = vmatpush.msra.mxu1 %v47_v30  ;;  %303 = vmatpush.msra.mxu0 %v30_v32  ;;  %v2150_v50 = vld [vmem:[%s5723_s4 + $0x98] sm:$0xff]  ;;  %v2167_v53 = vld [vmem:[%s5723_s4 + $0x110] sm:$0xff]  ;;  %v2186_v56 = vld [vmem:[%s5723_s4 + $0x8] sm:$0xff] }
  0x13   :  { %362 = vmatpush.msra.mxu3 %v79_v31  ;;  %343 = vmatpush.msra.mxu2 %v62_v33  ;;  %v2155_v51 = vld [vmem:[%s5723_s4 + $0x198] sm:$0xff]  ;;  %v2174_v54 = vld [vmem:[%s5723_s4 + $0x90] sm:$0xff]  ;;  %v2191_v57 = vld [vmem:[%s5723_s4 + $0x108] sm:$0xff] }
  0x14   :  { %323 = vmatpush.msra.mxu1 %v46_v34  ;;  %304 = vmatpush.msra.mxu0 %v2079_v36  ;;  %v2179_v55 = vld [vmem:[%s5723_s4 + $0x190] sm:$0xff]  ;;  %v2198_v58 = vld [vmem:[%s5723_s4 + $0x88] sm:$0xff]  ;;  %v2210_v60 = vld [vmem:[%s5723_s4] sm:$0xff] }
  0x15   :  { %363 = vmatpush.msra.mxu3 %v78_v35  ;;  %344 = vmatpush.msra.mxu2 %v61_v37  ;;  %v2203_v59 = vld [vmem:[%s5723_s4 + $0x188] sm:$0xff]  ;;  %v2215_v61 = vld [vmem:[%s5723_s4 + $0x100] sm:$0xff]  ;;  %v2222_v62 = vld [vmem:[%s5723_s4 + $0x278] sm:$0xff] }
  0x16   :  { %324 = vmatpush.msra.mxu1 %v45_v38  ;;  %305 = vmatpush.msra.mxu0 %v2093_v40  ;;  %v2227_v63 = vld [vmem:[%s5723_s4 + $0x378] sm:$0xff]  ;;  %v2234_v0 = vld [vmem:[%s5723_s4 + $0x80] sm:$0xff]  ;;  %v2246_v2 = vld [vmem:[%s5723_s4 + $0x270] sm:$0xff] }
  0x17   :  { %364 = vmatpush.msra.mxu3 %v77_v39  ;;  %345 = vmatpush.msra.mxu2 %v2098_v41  ;;  %v2239_v1 = vld [vmem:[%s5723_s4 + $0x180] sm:$0xff]  ;;  %v2251_v3 = vld [vmem:[%s5723_s4 + $0x2f8] sm:$0xff]  ;;  %v2258_v4 = vld [vmem:[%s5723_s4 + $0x370] sm:$0xff] }
  0x18   :  { %325 = vmatpush.msra.mxu1 %v2104_v42  ;;  %306 = vmatpush.msra.mxu0 %v2114_v44  ;;  %v2263_v5 = vld [vmem:[%s5723_s4 + $0x3f8] sm:$0xff]  ;;  %v2270_v6 = vld [vmem:[%s5723_s4 + $0x268] sm:$0xff]  ;;  %v2275_v7 = vld [vmem:[%s5723_s4 + $0x2f0] sm:$0xff] }
  0x19   :  { %365 = vmatpush.msra.mxu3 %v2109_v43  ;;  %346 = vmatpush.msra.mxu2 %v2119_v45  ;;  %v2282_v8 = vld [vmem:[%s5723_s4 + $0x368] sm:$0xff]  ;;  %v2287_v9 = vld [vmem:[%s5723_s4 + $0x3f0] sm:$0xff]  ;;  %v2294_v10 = vld [vmem:[%s5723_s4 + $0x260] sm:$0xff] }
  0x1a   :  { %326 = vmatpush.msra.mxu1 %v2126_v46  ;;  %307 = vmatpush.msra.mxu0 %v2138_v48  ;;  %v2299_v11 = vld [vmem:[%s5723_s4 + $0x2e8] sm:$0xff]  ;;  %v2306_v12 = vld [vmem:[%s5723_s4 + $0x360] sm:$0xff]  ;;  %v2318_v14 = vld [vmem:[%s5723_s4 + $0x258] sm:$0xff] }
  0x1b   :  { %366 = vmatpush.msra.mxu3 %v2131_v47  ;;  %347 = vmatpush.msra.mxu2 %v2143_v49  ;;  %v2311_v13 = vld [vmem:[%s5723_s4 + $0x3e8] sm:$0xff]  ;;  %v2323_v15 = vld [vmem:[%s5723_s4 + $0x2e0] sm:$0xff]  ;;  %v2330_v16 = vld [vmem:[%s5723_s4 + $0x358] sm:$0xff] }
  0x1c   :  { %327 = vmatpush.msra.mxu1 %v2150_v50  ;;  %308 = vmatpush.msra.mxu0 %v2162_v52  ;;  %v2335_v17 = vld [vmem:[%s5723_s4 + $0x3e0] sm:$0xff]  ;;  %v2342_v18 = vld [vmem:[%s5723_s4 + $0x250] sm:$0xff]  ;;  %v2347_v19 = vld [vmem:[%s5723_s4 + $0x2d8] sm:$0xff] }
  0x1d   :  { %367 = vmatpush.msra.mxu3 %v2155_v51  ;;  %348 = vmatpush.msra.mxu2 %v2167_v53  ;;  %v2354_v20 = vld [vmem:[%s5723_s4 + $0x350] sm:$0xff]  ;;  %v2359_v21 = vld [vmem:[%s5723_s4 + $0x3d8] sm:$0xff]  ;;  %v2366_v22 = vld [vmem:[%s5723_s4 + $0x248] sm:$0xff] }
  0x1e   :  { %328 = vmatpush.msra.mxu1 %v2174_v54  ;;  %309 = vmatpush.msra.mxu0 %v2186_v56  ;;  %v2371_v23 = vld [vmem:[%s5723_s4 + $0x2d0] sm:$0xff]  ;;  %v2378_v24 = vld [vmem:[%s5723_s4 + $0x348] sm:$0xff]  ;;  %v2390_v26 = vld [vmem:[%s5723_s4 + $0x240] sm:$0xff] }
  0x1f   :  { %368 = vmatpush.msra.mxu3 %v2179_v55  ;;  %349 = vmatpush.msra.mxu2 %v2191_v57  ;;  %v2383_v25 = vld [vmem:[%s5723_s4 + $0x3d0] sm:$0xff]  ;;  %v2395_v27 = vld [vmem:[%s5723_s4 + $0x2c8] sm:$0xff]  ;;  %v2402_v28 = vld [vmem:[%s5723_s4 + $0x340] sm:$0xff] }
  0x20   :  { %329 = vmatpush.msra.mxu1 %v2198_v58  ;;  %310 = vmatpush.msra.mxu0 %v2210_v60  ;;  %v2407_v29 = vld [vmem:[%s5723_s4 + $0x3c8] sm:$0xff]  ;;  %v2414_v30 = vld [vmem:[%s5723_s4 + $0x238] sm:$0xff]  ;;  %v2419_v31 = vld [vmem:[%s5723_s4 + $0x2c0] sm:$0xff] }
  0x21   :  { %369 = vmatpush.msra.mxu3 %v2203_v59  ;;  %350 = vmatpush.msra.mxu2 %v2215_v61  ;;  %6079 = vst [vmem:[#allocation2_spill] sm:$0xff] %v2414_v30  ;;  %v2426_v32 = vld [vmem:[%s5723_s4 + $0x338] sm:$0xff]  ;;  %v2431_v33 = vld [vmem:[%s5723_s4 + $0x3c0] sm:$0xff]  ;;  %v2438_v34 = vld [vmem:[%s5723_s4 + $0x230] sm:$0xff] }
  0x22   :  { %375 = vmatpush.msrb.mxu0 %v2222_v62  ;;  %330 = vmatpush.msra.mxu1 %v2234_v0  ;;  %6080 = vst [vmem:[#allocation3_spill] sm:$0xff] %v2419_v31  ;;  %v2443_v35 = vld [vmem:[%s5723_s4 + $0x2b8] sm:$0xff]  ;;  %v2450_v37 = vld [vmem:[%s5723_s4 + $0x330] sm:$0xff]  ;;  %v2462_v39 = vld [vmem:[%s5723_s4 + $0x228] sm:$0xff] }
  0x23   :  { %415 = vmatpush.msrb.mxu2 %v2227_v63  ;;  %370 = vmatpush.msra.mxu3 %v2239_v1  ;;  %6081 = vst [vmem:[#allocation4_spill] sm:$0xff] %v2426_v32  ;;  %v2455_v38 = vld [vmem:[%s5723_s4 + $0x3b8] sm:$0xff] }
  0x24   :  { %376 = vmatpush.msrb.mxu0 %v2246_v2  ;;  %395 = vmatpush.msrb.mxu1 %v2251_v3  ;;  %6082 = vst [vmem:[#allocation5_spill] sm:$0xff] %v2431_v33 }
  0x25   :  { %416 = vmatpush.msrb.mxu2 %v2258_v4  ;;  %435 = vmatpush.msrb.mxu3 %v2263_v5  ;;  %6083 = vst [vmem:[#allocation6_spill] sm:$0xff] %v2438_v34 }
  0x26   :  { %377 = vmatpush.msrb.mxu0 %v2270_v6  ;;  %396 = vmatpush.msrb.mxu1 %v2275_v7  ;;  %6084 = vst [vmem:[#allocation7_spill] sm:$0xff] %v2443_v35 }
  0x27   :  { %417 = vmatpush.msrb.mxu2 %v2282_v8  ;;  %436 = vmatpush.msrb.mxu3 %v2287_v9  ;;  %6085 = vst [vmem:[#allocation8_spill] sm:$0xff] %v2450_v37 }
  0x28   :  { %378 = vmatpush.msrb.mxu0 %v2294_v10  ;;  %397 = vmatpush.msrb.mxu1 %v2299_v11  ;;  %6086 = vst [vmem:[#allocation9_spill] sm:$0xff] %v2455_v38 }
  0x29   :  { %418 = vmatpush.msrb.mxu2 %v2306_v12  ;;  %437 = vmatpush.msrb.mxu3 %v2311_v13  ;;  %6087 = vst [vmem:[#allocation10_spill] sm:$0xff] %v2462_v39 }
  0x2a   :  { %379 = vmatpush.msrb.mxu0 %v2318_v14  ;;  %398 = vmatpush.msrb.mxu1 %v2323_v15 }
  0x2b   :  { %419 = vmatpush.msrb.mxu2 %v2330_v16  ;;  %438 = vmatpush.msrb.mxu3 %v2335_v17 }
  0x2c   :  { %380 = vmatpush.msrb.mxu0 %v2342_v18  ;;  %399 = vmatpush.msrb.mxu1 %v2347_v19 }
  0x2d   :  { %420 = vmatpush.msrb.mxu2 %v2354_v20  ;;  %439 = vmatpush.msrb.mxu3 %v2359_v21 }
  0x2e   :  { %381 = vmatpush.msrb.mxu0 %v2366_v22  ;;  %400 = vmatpush.msrb.mxu1 %v2371_v23 }
  0x2f   :  { %421 = vmatpush.msrb.mxu2 %v2378_v24  ;;  %440 = vmatpush.msrb.mxu3 %v2383_v25 }
  0x30   :  { %382 = vmatpush.msrb.mxu0 %v2390_v26  ;;  %401 = vmatpush.msrb.mxu1 %v2395_v27 }
  0x31   :  { %422 = vmatpush.msrb.mxu2 %v2402_v28  ;;  %441 = vmatpush.msrb.mxu3 %v2407_v29 }
  0x32   :  { %383 = vmatpush.msrb.mxu0 %v2414_v30  ;;  %402 = vmatpush.msrb.mxu1 %v2419_v31  ;;  %v2467_v31 = vld [vmem:[%s5723_s4 + $0x2b0] sm:$0xff]  ;;  %v2592_v30 = vld [vmem:[%s5723_s4 + $0x288] sm:$0xff] }
  0x33   :  { %423 = vmatpush.msrb.mxu2 %v2426_v32  ;;  %442 = vmatpush.msrb.mxu3 %v2431_v33  ;;  %6088 = vst [vmem:[#allocation11_spill] sm:$0xff] %v2467_v31  ;;  %v2474_v32 = vld [vmem:[%s5723_s4 + $0x328] sm:$0xff]  ;;  %v2479_v33 = vld [vmem:[%s5723_s4 + $0x3b0] sm:$0xff] }
  0x34   :  { %384 = vmatpush.msrb.mxu0 %v2438_v34  ;;  %403 = vmatpush.msrb.mxu1 %v2443_v35  ;;  %6089 = vst [vmem:[#allocation12_spill] sm:$0xff] %v2474_v32  ;;  %v2486_v34 = vld [vmem:[%s5723_s4 + $0x220] sm:$0xff]  ;;  %v2491_v35 = vld [vmem:[%s5723_s4 + $0x2a8] sm:$0xff] }
  0x35   :  { %6090 = vst [vmem:[#allocation13_spill] sm:$0xff] %v2479_v33  ;;  %424 = vmatpush.msrb.mxu2 %v2450_v37  ;;  %443 = vmatpush.msrb.mxu3 %v2455_v38  ;;  %v2498_v37 = vld [vmem:[%s5723_s4 + $0x320] sm:$0xff]  ;;  %v2503_v38 = vld [vmem:[%s5723_s4 + $0x3a8] sm:$0xff] }
  0x36   :  { %6091 = vst [vmem:[#allocation14_spill] sm:$0xff] %v2486_v34  ;;  %385 = vmatpush.msrb.mxu0 %v2462_v39  ;;  %404 = vmatpush.msrb.mxu1 %v2467_v31  ;;  %v2510_v39 = vld [vmem:[%s5723_s4 + $0x218] sm:$0xff]  ;;  %v2515_v31 = vld [vmem:[%s5723_s4 + $0x2a0] sm:$0xff] }
  0x37   :  { %6092 = vst [vmem:[#allocation15_spill] sm:$0xff] %v2491_v35  ;;  %425 = vmatpush.msrb.mxu2 %v2474_v32  ;;  %444 = vmatpush.msrb.mxu3 %v2479_v33  ;;  %v2522_v32 = vld [vmem:[%s5723_s4 + $0x318] sm:$0xff]  ;;  %v2527_v33 = vld [vmem:[%s5723_s4 + $0x3a0] sm:$0xff] }
  0x38   :  { %6093 = vst [vmem:[#allocation16_spill] sm:$0xff] %v2498_v37  ;;  %386 = vmatpush.msrb.mxu0 %v2486_v34  ;;  %405 = vmatpush.msrb.mxu1 %v2491_v35  ;;  %v2534_v34 = vld [vmem:[%s5723_s4 + $0x210] sm:$0xff]  ;;  %v2539_v35 = vld [vmem:[%s5723_s4 + $0x298] sm:$0xff] }
  0x39   :  { %6094 = vst [vmem:[#allocation17_spill] sm:$0xff] %v2503_v38  ;;  %426 = vmatpush.msrb.mxu2 %v2498_v37  ;;  %445 = vmatpush.msrb.mxu3 %v2503_v38  ;;  %v2546_v37 = vld [vmem:[%s5723_s4 + $0x310] sm:$0xff]  ;;  %v2551_v38 = vld [vmem:[%s5723_s4 + $0x398] sm:$0xff] }
  0x3a   :  { %6095 = vst [vmem:[#allocation18_spill] sm:$0xff] %v2510_v39  ;;  %387 = vmatpush.msrb.mxu0 %v2510_v39  ;;  %406 = vmatpush.msrb.mxu1 %v2515_v31  ;;  %v2558_v39 = vld [vmem:[%s5723_s4 + $0x208] sm:$0xff] }
  0x3b   :  { %6096 = vst [vmem:[#allocation19_spill] sm:$0xff] %v2515_v31  ;;  %427 = vmatpush.msrb.mxu2 %v2522_v32  ;;  %446 = vmatpush.msrb.mxu3 %v2527_v33  ;;  %v2563_v31 = vld [vmem:[%s5723_s4 + $0x290] sm:$0xff] }
  0x3c   :  { %6097 = vst [vmem:[#allocation20_spill] sm:$0xff] %v2522_v32  ;;  %388 = vmatpush.msrb.mxu0 %v2534_v34  ;;  %407 = vmatpush.msrb.mxu1 %v2539_v35  ;;  %v2570_v32 = vld [vmem:[%s5723_s4 + $0x308] sm:$0xff] }
  0x3d   :  { %6098 = vst [vmem:[#allocation21_spill] sm:$0xff] %v2527_v33  ;;  %v2575_v33 = vld [vmem:[%s5723_s4 + $0x390] sm:$0xff]  ;;  %428 = vmatpush.msrb.mxu2 %v2546_v37  ;;  %447 = vmatpush.msrb.mxu3 %v2551_v38 }
  0x3e   :  { %6099 = vst [vmem:[#allocation22_spill] sm:$0xff] %v2534_v34  ;;  %v281_v34 = vld [vmem:[%s5724_s0 + $0x10] sm:$0xff]  ;;  %389 = vmatpush.msrb.mxu0 %v2558_v39  ;;  %408 = vmatpush.msrb.mxu1 %v2563_v31 }
  0x3f   :  { %6100 = vst [vmem:[#allocation23_spill] sm:$0xff] %v2539_v35  ;;  %v2585_v35 = vld [vmem:[%s5723_s4 + $0x200] sm:$0xff]  ;;  %429 = vmatpush.msrb.mxu2 %v2570_v32  ;;  %448 = vmatpush.msrb.mxu3 %v2575_v33 }
  0x40   :  { %6101 = vst [vmem:[#allocation24_spill] sm:$0xff] %v2546_v37  ;;  %351 = vmatmul.f32.vlgmr.msra.gmra.mxu2 %v281_v34  ;;  %390 = vmatpush.msrb.mxu0 %v2585_v35  ;;  %v282_v37 = vld [vmem:[%s5724_s0 + $0x18] sm:$0xff]  ;;  %v2628_v34 = vld [vmem:[%s5723_s4 + $0x280] sm:$0xff] }
  0x41   :  { %6102 = vst [vmem:[#allocation25_spill] sm:$0xff] %v2551_v38  ;;  %v2597_v38 = vld [vmem:[%s5723_s4 + $0x300] sm:$0xff]  ;;  %409 = vmatpush.msrb.mxu1 %v2592_v30  ;;  %371 = vmatmul.f32.vlgmr.msra.gmra.mxu3 %v282_v37  ;;  %v2655_v37 = vld [vmem:[%s5723_s4 + $0x570] sm:$0xff] }
  0x42   :  { %6103 = vst [vmem:[#allocation26_spill] sm:$0xff] %v2558_v39  ;;  %v2604_v39 = vld [vmem:[%s5723_s4 + $0x388] sm:$0xff]  ;;  %430 = vmatpush.msrb.mxu2 %v2597_v38 }
  0x43   :  { %6104 = vst [vmem:[#allocation27_spill] sm:$0xff] %v2563_v31  ;;  %v279_v31 = vld [vmem:[%s5724_s0] sm:$0xff]  ;;  %449 = vmatpush.msrb.mxu3 %v2604_v39  ;;  %410 = vmatpush.msrb.mxu1 %v2628_v34 }
  0x44   :  { %6105 = vst [vmem:[#allocation28_spill] sm:$0xff] %v2570_v32  ;;  %v2623_v32 = vld [vmem:[%s5723_s4 + $0x578] sm:$0xff]  ;;  %311 = vmatmul.f32.vlgmr.msra.gmra.mxu0 %v279_v31 }
  0x45   :  { %6106 = vst [vmem:[#allocation29_spill] sm:$0xff] %v2575_v33  ;;  %v2616_v33 = vld [vmem:[%s5723_s4 + $0x478] sm:$0xff]  ;;  %495 = vmatpush.msra.mxu2 %v2623_v32 }
  0x46   :  { %6107 = vst [vmem:[#allocation30_spill] sm:$0xff] %v2585_v35  ;;  %v2634_v35 = vld [vmem:[%s5723_s4 + $0x380] sm:$0xff]  ;;  %455 = vmatpush.msra.mxu0 %v2616_v33  ;;  %v2648_v31 = vld [vmem:[%s5723_s4 + $0x4f8] sm:$0xff] }
  0x47   :  { %6108 = vst [vmem:[#allocation31_spill] sm:$0xff] %v2592_v30  ;;  %v2643_v30 = vld [vmem:[%s5723_s4 + $0x470] sm:$0xff]  ;;  %450 = vmatpush.msrb.mxu3 %v2634_v35  ;;  %496 = vmatpush.msra.mxu2 %v2655_v37 }
  0x48   :  { %6109 = vst [vmem:[#allocation32_spill] sm:$0xff] %v2597_v38  ;;  %v280_v38 = vld [vmem:[%s5724_s0 + $0x8] sm:$0xff]  ;;  %456 = vmatpush.msra.mxu0 %v2643_v30 }
  0x49   :  { %6110 = vst [vmem:[#allocation33_spill] sm:$0xff] %v2604_v39  ;;  %331 = vmatmul.f32.vlgmr.msra.gmra.mxu1 %v280_v38  ;;  %v2666_v39 = vld [vmem:[%s5723_s4 + $0x468] sm:$0xff]  ;;  %v2683_v38 = vld [vmem:[%s5723_s4 + $0x5f0] sm:$0xff] }
  0x4a   :  { %6111 = vst [vmem:[#allocation34_spill] sm:$0xff] %v2616_v33  ;;  %v2660_v33 = vld [vmem:[%s5723_s4 + $0x5f8] sm:$0xff]  ;;  %475 = vmatpush.msra.mxu1 %v2648_v31  ;;  %457 = vmatpush.msra.mxu0 %v2666_v39 }
  0x4b   :  { %6112 = vst [vmem:[#allocation35_spill] sm:$0xff] %v2623_v32  ;;  %v2678_v32 = vld [vmem:[%s5723_s4 + $0x568] sm:$0xff]  ;;  %515 = vmatpush.msra.mxu3 %v2660_v33 }
  0x4c   :  { %6113 = vst [vmem:[#allocation36_spill] sm:$0xff] %v2628_v34  ;;  %v2671_v34 = vld [vmem:[%s5723_s4 + $0x4f0] sm:$0xff]  ;;  %497 = vmatpush.msra.mxu2 %v2678_v32 }
  0x4d   :  { %6114 = vst [vmem:[#allocation37_spill] sm:$0xff] %v2634_v35  ;;  %476 = vmatpush.msra.mxu1 %v2671_v34  ;;  %v2700_v35 = vld [vmem:[%s5723_s4 + $0x4e8] sm:$0xff]  ;;  %516 = vmatpush.msra.mxu3 %v2683_v38 }
  0x4e   :  { %6115 = vst [vmem:[#allocation38_spill] sm:$0xff] %v2643_v30  ;;  %v285_v30 = vld [vmem:[%s5724_s0 + $0x30] sm:$0xff] }
  0x4f   :  { %6116 = vst [vmem:[#allocation39_spill] sm:$0xff] %v2648_v31  ;;  %v2693_v31 = vld [vmem:[%s5723_s4 + $0x460] sm:$0xff]  ;;  %431 = vmatmul.f32.vlgmr.msrb.gmra.mxu2 %v285_v30  ;;  %477 = vmatpush.msra.mxu1 %v2700_v35  ;;  %v2736_v30 = vld [vmem:[%s5723_s4 + $0x558] sm:$0xff] }
  0x50   :  { %6117 = vst [vmem:[#allocation40_spill] sm:$0xff] %v2655_v37  ;;  %458 = vmatpush.msra.mxu0 %v2693_v31  ;;  %v286_v37 = vld [vmem:[%s5724_s0 + $0x38] sm:$0xff] }
  0x51   :  { %6118 = vst [vmem:[#allocation41_spill] sm:$0xff] %v2660_v33  ;;  %v2705_v33 = vld [vmem:[%s5723_s4 + $0x560] sm:$0xff]  ;;  %451 = vmatmul.f32.vlgmr.msrb.gmra.mxu3 %v286_v37  ;;  %v2763_v37 = vld [vmem:[%s5723_s4 + $0x550] sm:$0xff] }
  0x52   :  { %6119 = vst [vmem:[#allocation42_spill] sm:$0xff] %v2666_v39  ;;  %v2712_v39 = vld [vmem:[%s5723_s4 + $0x5e8] sm:$0xff]  ;;  %498 = vmatpush.msra.mxu2 %v2705_v33 }
  0x53   :  { %6120 = vst [vmem:[#allocation43_spill] sm:$0xff] %v2671_v34  ;;  %v283_v34 = vld [vmem:[%s5724_s0 + $0x20] sm:$0xff]  ;;  %517 = vmatpush.msra.mxu3 %v2712_v39 }
  0x54   :  { %6121 = vst [vmem:[#allocation44_spill] sm:$0xff] %v2678_v32  ;;  %v2731_v32 = vld [vmem:[%s5723_s4 + $0x4e0] sm:$0xff]  ;;  %391 = vmatmul.f32.vlgmr.msrb.gmra.mxu0 %v283_v34  ;;  %v2756_v34 = vld [vmem:[%s5723_s4 + $0x4d8] sm:$0xff]  ;;  %499 = vmatpush.msra.mxu2 %v2736_v30 }
  0x55   :  { %6122 = vst [vmem:[#allocation45_spill] sm:$0xff] %v2683_v38  ;;  %v2724_v38 = vld [vmem:[%s5723_s4 + $0x458] sm:$0xff]  ;;  %478 = vmatpush.msra.mxu1 %v2731_v32 }
  0x56   :  { %6123 = vst [vmem:[#allocation46_spill] sm:$0xff] %v2693_v31  ;;  %v2742_v31 = vld [vmem:[%s5723_s4 + $0x5e0] sm:$0xff]  ;;  %459 = vmatpush.msra.mxu0 %v2724_v38  ;;  %500 = vmatpush.msra.mxu2 %v2763_v37 }
  0x57   :  { %6124 = vst [vmem:[#allocation47_spill] sm:$0xff] %v2700_v35  ;;  %v2751_v35 = vld [vmem:[%s5723_s4 + $0x450] sm:$0xff]  ;;  %518 = vmatpush.msra.mxu3 %v2742_v31  ;;  %479 = vmatpush.msra.mxu1 %v2756_v34 }
  0x58   :  { %6125 = vst [vmem:[#allocation48_spill] sm:$0xff] %v2705_v33  ;;  %v284_v33 = vld [vmem:[%s5724_s0 + $0x28] sm:$0xff]  ;;  %460 = vmatpush.msra.mxu0 %v2751_v35 }
  0x59   :  { %6126 = vst [vmem:[#allocation49_spill] sm:$0xff] %v2712_v39  ;;  %411 = vmatmul.f32.vlgmr.msrb.gmra.mxu1 %v284_v33  ;;  %v2774_v39 = vld [vmem:[%s5723_s4 + $0x448] sm:$0xff]  ;;  %v2791_v33 = vld [vmem:[%s5723_s4 + $0x5d0] sm:$0xff] }
  0x5a   :  { %6127 = vst [vmem:[#allocation50_spill] sm:$0xff] %v2724_v38  ;;  %v2768_v38 = vld [vmem:[%s5723_s4 + $0x5d8] sm:$0xff]  ;;  %461 = vmatpush.msra.mxu0 %v2774_v39 }
  0x5b   :  { %6128 = vst [vmem:[#allocation51_spill] sm:$0xff] %v2731_v32  ;;  %v2786_v32 = vld [vmem:[%s5723_s4 + $0x548] sm:$0xff]  ;;  %519 = vmatpush.msra.mxu3 %v2768_v38 }
  0x5c   :  { %6129 = vst [vmem:[#allocation52_spill] sm:$0xff] %v2736_v30  ;;  %v2779_v30 = vld [vmem:[%s5723_s4 + $0x4d0] sm:$0xff]  ;;  %501 = vmatpush.msra.mxu2 %v2786_v32 }
  0x5d   :  { %6130 = vst [vmem:[#allocation53_spill] sm:$0xff] %v2742_v31  ;;  %480 = vmatpush.msra.mxu1 %v2779_v30  ;;  %520 = vmatpush.msra.mxu3 %v2791_v33  ;;  %v3022_v31 = vld [vmem:[%s5723_s4 + $0x678] sm:$0xff] }
  0x5e   :  { %6131 = vst [vmem:[#allocation54_spill] sm:$0xff] %v2751_v35  ;;  %v2798_v35 = vld [vmem:[%s5723_s4 + $0x440] sm:$0xff] }
  0x5f   :  { %6132 = vst [vmem:[#allocation55_spill] sm:$0xff] %v2756_v34  ;;  %v2803_v34 = vld [vmem:[%s5723_s4 + $0x4c8] sm:$0xff]  ;;  %462 = vmatpush.msra.mxu0 %v2798_v35 }
  0x60   :  { %6133 = vst [vmem:[#allocation56_spill] sm:$0xff] %v2763_v37  ;;  %v2810_v37 = vld [vmem:[%s5723_s4 + $0x540] sm:$0xff]  ;;  %481 = vmatpush.msra.mxu1 %v2803_v34 }
  0x61   :  { %6134 = vst [vmem:[#allocation57_spill] sm:$0xff] %v2768_v38  ;;  %v2815_v38 = vld [vmem:[%s5723_s4 + $0x5c8] sm:$0xff]  ;;  %502 = vmatpush.msra.mxu2 %v2810_v37 }
  0x62   :  { %6135 = vst [vmem:[#allocation58_spill] sm:$0xff] %v2774_v39  ;;  %v2822_v39 = vld [vmem:[%s5723_s4 + $0x438] sm:$0xff]  ;;  %521 = vmatpush.msra.mxu3 %v2815_v38 }
  0x63   :  { %6136 = vst [vmem:[#allocation59_spill] sm:$0xff] %v2779_v30  ;;  %v2827_v30 = vld [vmem:[%s5723_s4 + $0x4c0] sm:$0xff]  ;;  %463 = vmatpush.msra.mxu0 %v2822_v39 }
  0x64   :  { %6137 = vst [vmem:[#allocation60_spill] sm:$0xff] %v2786_v32  ;;  %v2834_v32 = vld [vmem:[%s5723_s4 + $0x538] sm:$0xff]  ;;  %482 = vmatpush.msra.mxu1 %v2827_v30 }
  0x65   :  { %6138 = vst [vmem:[#allocation61_spill] sm:$0xff] %v2791_v33  ;;  %v2839_v33 = vld [vmem:[%s5723_s4 + $0x5c0] sm:$0xff]  ;;  %503 = vmatpush.msra.mxu2 %v2834_v32 }
  0x66   :  { %6139 = vst [vmem:[#allocation62_spill] sm:$0xff] %v2798_v35  ;;  %v2846_v35 = vld [vmem:[%s5723_s4 + $0x430] sm:$0xff]  ;;  %522 = vmatpush.msra.mxu3 %v2839_v33 }
  0x67   :  { %6140 = vst [vmem:[#allocation63_spill] sm:$0xff] %v2803_v34  ;;  %v2851_v34 = vld [vmem:[%s5723_s4 + $0x4b8] sm:$0xff]  ;;  %464 = vmatpush.msra.mxu0 %v2846_v35 }
  0x68   :  { %6141 = vst [vmem:[#allocation64_spill] sm:$0xff] %v2810_v37  ;;  %v2858_v37 = vld [vmem:[%s5723_s4 + $0x530] sm:$0xff]  ;;  %483 = vmatpush.msra.mxu1 %v2851_v34 }
  0x69   :  { %6142 = vst [vmem:[#allocation65_spill] sm:$0xff] %v2815_v38  ;;  %v2863_v38 = vld [vmem:[%s5723_s4 + $0x5b8] sm:$0xff]  ;;  %504 = vmatpush.msra.mxu2 %v2858_v37 }
  0x6a   :  { %6143 = vst [vmem:[#allocation66_spill] sm:$0xff] %v2822_v39  ;;  %v2870_v39 = vld [vmem:[%s5723_s4 + $0x428] sm:$0xff]  ;;  %523 = vmatpush.msra.mxu3 %v2863_v38 }
  0x6b   :  { %6144 = vst [vmem:[#allocation67_spill] sm:$0xff] %v2827_v30  ;;  %v2875_v30 = vld [vmem:[%s5723_s4 + $0x4b0] sm:$0xff]  ;;  %465 = vmatpush.msra.mxu0 %v2870_v39 }
  0x6c   :  { %6145 = vst [vmem:[#allocation68_spill] sm:$0xff] %v2834_v32  ;;  %v2882_v32 = vld [vmem:[%s5723_s4 + $0x528] sm:$0xff]  ;;  %484 = vmatpush.msra.mxu1 %v2875_v30 }
  0x6d   :  { %6146 = vst [vmem:[#allocation69_spill] sm:$0xff] %v2839_v33  ;;  %v2887_v33 = vld [vmem:[%s5723_s4 + $0x5b0] sm:$0xff]  ;;  %505 = vmatpush.msra.mxu2 %v2882_v32 }
  0x6e   :  { %6147 = vst [vmem:[#allocation70_spill] sm:$0xff] %v2846_v35  ;;  %v2894_v35 = vld [vmem:[%s5723_s4 + $0x420] sm:$0xff]  ;;  %524 = vmatpush.msra.mxu3 %v2887_v33 }
  0x6f   :  { %6148 = vst [vmem:[#allocation71_spill] sm:$0xff] %v2851_v34  ;;  %v2899_v34 = vld [vmem:[%s5723_s4 + $0x4a8] sm:$0xff]  ;;  %466 = vmatpush.msra.mxu0 %v2894_v35 }
  0x70   :  { %6149 = vst [vmem:[#allocation72_spill] sm:$0xff] %v2858_v37  ;;  %v2906_v37 = vld [vmem:[%s5723_s4 + $0x520] sm:$0xff]  ;;  %485 = vmatpush.msra.mxu1 %v2899_v34 }
  0x71   :  { %6150 = vst [vmem:[#allocation73_spill] sm:$0xff] %v2863_v38  ;;  %v2911_v38 = vld [vmem:[%s5723_s4 + $0x5a8] sm:$0xff]  ;;  %506 = vmatpush.msra.mxu2 %v2906_v37 }
  0x72   :  { %6151 = vst [vmem:[#allocation74_spill] sm:$0xff] %v2870_v39  ;;  %v2918_v39 = vld [vmem:[%s5723_s4 + $0x418] sm:$0xff]  ;;  %525 = vmatpush.msra.mxu3 %v2911_v38 }
  0x73   :  { %6152 = vst [vmem:[#allocation75_spill] sm:$0xff] %v2875_v30  ;;  %v2923_v30 = vld [vmem:[%s5723_s4 + $0x4a0] sm:$0xff]  ;;  %467 = vmatpush.msra.mxu0 %v2918_v39 }
  0x74   :  { %6153 = vst [vmem:[#allocation76_spill] sm:$0xff] %v2882_v32  ;;  %v2930_v32 = vld [vmem:[%s5723_s4 + $0x518] sm:$0xff]  ;;  %486 = vmatpush.msra.mxu1 %v2923_v30 }
  0x75   :  { %6154 = vst [vmem:[#allocation77_spill] sm:$0xff] %v2887_v33  ;;  %v2935_v33 = vld [vmem:[%s5723_s4 + $0x5a0] sm:$0xff]  ;;  %507 = vmatpush.msra.mxu2 %v2930_v32 }
  0x76   :  { %6155 = vst [vmem:[#allocation78_spill] sm:$0xff] %v2894_v35  ;;  %v2942_v35 = vld [vmem:[%s5723_s4 + $0x410] sm:$0xff]  ;;  %526 = vmatpush.msra.mxu3 %v2935_v33 }
  0x77   :  { %6156 = vst [vmem:[#allocation79_spill] sm:$0xff] %v2899_v34  ;;  %v2947_v34 = vld [vmem:[%s5723_s4 + $0x498] sm:$0xff]  ;;  %468 = vmatpush.msra.mxu0 %v2942_v35 }
  0x78   :  { %6157 = vst [vmem:[#allocation80_spill] sm:$0xff] %v2906_v37  ;;  %v2954_v37 = vld [vmem:[%s5723_s4 + $0x510] sm:$0xff]  ;;  %487 = vmatpush.msra.mxu1 %v2947_v34 }
  0x79   :  { %6158 = vst [vmem:[#allocation81_spill] sm:$0xff] %v2911_v38  ;;  %v2959_v38 = vld [vmem:[%s5723_s4 + $0x598] sm:$0xff]  ;;  %508 = vmatpush.msra.mxu2 %v2954_v37 }
  0x7a   :  { %6159 = vst [vmem:[#allocation82_spill] sm:$0xff] %v2918_v39  ;;  %v2966_v39 = vld [vmem:[%s5723_s4 + $0x408] sm:$0xff]  ;;  %527 = vmatpush.msra.mxu3 %v2959_v38 }
  0x7b   :  { %6160 = vst [vmem:[#allocation83_spill] sm:$0xff] %v2923_v30  ;;  %v2971_v30 = vld [vmem:[%s5723_s4 + $0x490] sm:$0xff]  ;;  %469 = vmatpush.msra.mxu0 %v2966_v39 }
  0x7c   :  { %6161 = vst [vmem:[#allocation84_spill] sm:$0xff] %v2930_v32  ;;  %v2978_v32 = vld [vmem:[%s5723_s4 + $0x508] sm:$0xff]  ;;  %488 = vmatpush.msra.mxu1 %v2971_v30 }
  0x7d   :  { %6162 = vst [vmem:[#allocation85_spill] sm:$0xff] %v2935_v33  ;;  %v2983_v33 = vld [vmem:[%s5723_s4 + $0x590] sm:$0xff]  ;;  %509 = vmatpush.msra.mxu2 %v2978_v32 }
  0x7e   :  { %6163 = vst [vmem:[#allocation86_spill] sm:$0xff] %v2942_v35  ;;  %v2990_v35 = vld [vmem:[%s5723_s4 + $0x400] sm:$0xff]  ;;  %528 = vmatpush.msra.mxu3 %v2983_v33 }
  0x7f   :  { %6164 = vst [vmem:[#allocation87_spill] sm:$0xff] %v2947_v34  ;;  %v2995_v34 = vld [vmem:[%s5723_s4 + $0x488] sm:$0xff]  ;;  %470 = vmatpush.msra.mxu0 %v2990_v35 }
  0x80   :  { %6165 = vst [vmem:[#allocation88_spill] sm:$0xff] %v2954_v37  ;;  %v3002_v37 = vld [vmem:[%s5723_s4 + $0x500] sm:$0xff]  ;;  %489 = vmatpush.msra.mxu1 %v2995_v34 }
  0x81   :  { %6166 = vst [vmem:[#allocation89_spill] sm:$0xff] %v2959_v38  ;;  %v3007_v38 = vld [vmem:[%s5723_s4 + $0x588] sm:$0xff]  ;;  %510 = vmatpush.msra.mxu2 %v3002_v37  ;;  %535 = vmatpush.msrb.mxu0 %v3022_v31 }
  0x82   :  { %6167 = vst [vmem:[#allocation90_spill] sm:$0xff] %v2966_v39  ;;  %v287_v39 = vld [vmem:[%s5724_s0 + $0x40] sm:$0xff]  ;;  %529 = vmatpush.msra.mxu3 %v3007_v38 }
  0x83   :  { %6168 = vst [vmem:[#allocation91_spill] sm:$0xff] %v2971_v30  ;;  %v289_v30 = vld [vmem:[%s5724_s0 + $0x50] sm:$0xff]  ;;  %471 = vmatmul.f32.vlgmr.msra.gmra.mxu0 %v287_v39  ;;  %v3057_v39 = vld [vmem:[%s5723_s4 + $0x6f8] sm:$0xff] }
  0x84   :  { %6169 = vst [vmem:[#allocation92_spill] sm:$0xff] %v2978_v32  ;;  %511 = vmatmul.f32.vlgmr.msra.gmra.mxu2 %v289_v30  ;;  %v288_v32 = vld [vmem:[%s5724_s0 + $0x48] sm:$0xff]  ;;  %v3064_v30 = vld [vmem:[%s5723_s4 + $0x770] sm:$0xff] }
  0x85   :  { %6170 = vst [vmem:[#allocation93_spill] sm:$0xff] %v2983_v33  ;;  %v3027_v33 = vld [vmem:[%s5723_s4 + $0x778] sm:$0xff] }
  0x86   :  { %6171 = vst [vmem:[#allocation94_spill] sm:$0xff] %v2990_v35  ;;  %v3034_v35 = vld [vmem:[%s5723_s4 + $0x480] sm:$0xff]  ;;  %575 = vmatpush.msrb.mxu2 %v3027_v33 }
  0x87   :  { %6172 = vst [vmem:[#allocation95_spill] sm:$0xff] %v2995_v34  ;;  %v3039_v34 = vld [vmem:[%s5723_s4 + $0x580] sm:$0xff]  ;;  %490 = vmatpush.msra.mxu1 %v3034_v35 }
  0x88   :  { %6173 = vst [vmem:[#allocation96_spill] sm:$0xff] %v3002_v37  ;;  %v3052_v37 = vld [vmem:[%s5723_s4 + $0x670] sm:$0xff]  ;;  %530 = vmatpush.msra.mxu3 %v3039_v34  ;;  %491 = vmatmul.f32.vlgmr.msra.gmra.mxu1 %v288_v32 }
  0x89   :  { %6174 = vst [vmem:[#allocation97_spill] sm:$0xff] %v3007_v38  ;;  %v290_v38 = vld [vmem:[%s5724_s0 + $0x58] sm:$0xff]  ;;  %536 = vmatpush.msrb.mxu0 %v3052_v37  ;;  %555 = vmatpush.msrb.mxu1 %v3057_v39  ;;  %v3091_v32 = vld [vmem:[%s5723_s4 + $0x7f0] sm:$0xff] }
  0x8a   :  { %6175 = vst [vmem:[#allocation98_spill] sm:$0xff] %v3022_v31  ;;  %531 = vmatmul.f32.vlgmr.msra.gmra.mxu3 %v290_v38  ;;  %v3074_v31 = vld [vmem:[%s5723_s4 + $0x668] sm:$0xff]  ;;  %576 = vmatpush.msrb.mxu2 %v3064_v30  ;;  %v3098_v38 = vld [vmem:[%s5723_s4 + $0x660] sm:$0xff] }
  0x8b   :  { %6176 = vst [vmem:[#allocation99_spill] sm:$0xff] %v3027_v33  ;;  %v3069_v33 = vld [vmem:[%s5723_s4 + $0x7f8] sm:$0xff]  ;;  %537 = vmatpush.msrb.mxu0 %v3074_v31 }
  0x8c   :  { %6177 = vst [vmem:[#allocation100_spill] sm:$0xff] %v3034_v35  ;;  %v3086_v35 = vld [vmem:[%s5723_s4 + $0x768] sm:$0xff]  ;;  %595 = vmatpush.msrb.mxu3 %v3069_v33 }
  0x8d   :  { %6178 = vst [vmem:[#allocation101_spill] sm:$0xff] %v3039_v34  ;;  %v3079_v34 = vld [vmem:[%s5723_s4 + $0x6f0] sm:$0xff]  ;;  %577 = vmatpush.msrb.mxu2 %v3086_v35  ;;  %538 = vmatpush.msrb.mxu0 %v3098_v38 }
  0x8e   :  { %6179 = vst [vmem:[#allocation102_spill] sm:$0xff] %v3057_v39  ;;  %v3103_v39 = vld [vmem:[%s5723_s4 + $0x6e8] sm:$0xff]  ;;  %556 = vmatpush.msrb.mxu1 %v3079_v34  ;;  %596 = vmatpush.msrb.mxu3 %v3091_v32 }
  0x8f   :  { %6180 = vst [vmem:[#allocation103_spill] sm:$0xff] %v3064_v30  ;;  %v3110_v30 = vld [vmem:[%s5723_s4 + $0x760] sm:$0xff] }
  0x90   :  { %6181 = vst [vmem:[#allocation104_spill] sm:$0xff] %v3069_v33  ;;  %v3115_v33 = vld [vmem:[%s5723_s4 + $0x7e8] sm:$0xff]  ;;  %557 = vmatpush.msrb.mxu1 %v3103_v39  ;;  %578 = vmatpush.msrb.mxu2 %v3110_v30 }
  0x91   :  { %6182 = vst [vmem:[#allocation105_spill] sm:$0xff] %v3074_v31  ;;  %v3122_v31 = vld [vmem:[%s5723_s4 + $0x658] sm:$0xff]  ;;  %597 = vmatpush.msrb.mxu3 %v3115_v33 }
  0x92   :  { %6183 = vst [vmem:[#allocation106_spill] sm:$0xff] %v3079_v34  ;;  %v3127_v34 = vld [vmem:[%s5723_s4 + $0x6e0] sm:$0xff]  ;;  %539 = vmatpush.msrb.mxu0 %v3122_v31 }
  0x93   :  { %6184 = vst [vmem:[#allocation107_spill] sm:$0xff] %v3086_v35  ;;  %v3134_v35 = vld [vmem:[%s5723_s4 + $0x758] sm:$0xff]  ;;  %558 = vmatpush.msrb.mxu1 %v3127_v34 }
  0x94   :  { %6185 = vst [vmem:[#allocation108_spill] sm:$0xff] %v3091_v32  ;;  %v3139_v32 = vld [vmem:[%s5723_s4 + $0x7e0] sm:$0xff]  ;;  %579 = vmatpush.msrb.mxu2 %v3134_v35 }
  0x95   :  { %6186 = vst [vmem:[#allocation109_spill] sm:$0xff] %v3098_v38  ;;  %v3146_v38 = vld [vmem:[%s5723_s4 + $0x650] sm:$0xff]  ;;  %598 = vmatpush.msrb.mxu3 %v3139_v32 }
  0x96   :  { %6187 = vst [vmem:[#allocation110_spill] sm:$0xff] %v3103_v39  ;;  %v3151_v39 = vld [vmem:[%s5723_s4 + $0x6d8] sm:$0xff]  ;;  %540 = vmatpush.msrb.mxu0 %v3146_v38 }
  0x97   :  { %6188 = vst [vmem:[#allocation111_spill] sm:$0xff] %v3110_v30  ;;  %v3158_v30 = vld [vmem:[%s5723_s4 + $0x750] sm:$0xff]  ;;  %559 = vmatpush.msrb.mxu1 %v3151_v39 }
  0x98   :  { %6189 = vst [vmem:[#allocation112_spill] sm:$0xff] %v3115_v33  ;;  %v3163_v33 = vld [vmem:[%s5723_s4 + $0x7d8] sm:$0xff]  ;;  %580 = vmatpush.msrb.mxu2 %v3158_v30 }
  0x99   :  { %6190 = vst [vmem:[#allocation113_spill] sm:$0xff] %v3122_v31  ;;  %v3170_v31 = vld [vmem:[%s5723_s4 + $0x648] sm:$0xff]  ;;  %599 = vmatpush.msrb.mxu3 %v3163_v33 }
  0x9a   :  { %6191 = vst [vmem:[#allocation114_spill] sm:$0xff] %v3127_v34  ;;  %v3175_v34 = vld [vmem:[%s5723_s4 + $0x6d0] sm:$0xff]  ;;  %541 = vmatpush.msrb.mxu0 %v3170_v31 }
  0x9b   :  { %6192 = vst [vmem:[#allocation115_spill] sm:$0xff] %v3134_v35  ;;  %v3182_v35 = vld [vmem:[%s5723_s4 + $0x748] sm:$0xff]  ;;  %560 = vmatpush.msrb.mxu1 %v3175_v34 }
  0x9c   :  { %6193 = vst [vmem:[#allocation116_spill] sm:$0xff] %v3139_v32  ;;  %v3187_v32 = vld [vmem:[%s5723_s4 + $0x7d0] sm:$0xff]  ;;  %581 = vmatpush.msrb.mxu2 %v3182_v35 }
  0x9d   :  { %6194 = vst [vmem:[#allocation117_spill] sm:$0xff] %v3146_v38  ;;  %v3194_v38 = vld [vmem:[%s5723_s4 + $0x640] sm:$0xff]  ;;  %600 = vmatpush.msrb.mxu3 %v3187_v32 }
  0x9e   :  { %6195 = vst [vmem:[#allocation118_spill] sm:$0xff] %v3151_v39  ;;  %v3199_v39 = vld [vmem:[%s5723_s4 + $0x6c8] sm:$0xff]  ;;  %542 = vmatpush.msrb.mxu0 %v3194_v38 }
  0x9f   :  { %6196 = vst [vmem:[#allocation119_spill] sm:$0xff] %v3158_v30  ;;  %v3206_v30 = vld [vmem:[%s5723_s4 + $0x740] sm:$0xff]  ;;  %561 = vmatpush.msrb.mxu1 %v3199_v39 }
  0xa0   :  { %6197 = vst [vmem:[#allocation120_spill] sm:$0xff] %v3163_v33  ;;  %v3211_v33 = vld [vmem:[%s5723_s4 + $0x7c8] sm:$0xff]  ;;  %582 = vmatpush.msrb.mxu2 %v3206_v30 }
  0xa1   :  { %6198 = vst [vmem:[#allocation121_spill] sm:$0xff] %v3170_v31  ;;  %v3218_v31 = vld [vmem:[%s5723_s4 + $0x638] sm:$0xff]  ;;  %601 = vmatpush.msrb.mxu3 %v3211_v33 }
  0xa2   :  { %6199 = vst [vmem:[#allocation122_spill] sm:$0xff] %v3175_v34  ;;  %v3223_v34 = vld [vmem:[%s5723_s4 + $0x6c0] sm:$0xff]  ;;  %543 = vmatpush.msrb.mxu0 %v3218_v31 }
  0xa3   :  { %6200 = vst [vmem:[#allocation123_spill] sm:$0xff] %v3182_v35  ;;  %v3230_v35 = vld [vmem:[%s5723_s4 + $0x738] sm:$0xff]  ;;  %562 = vmatpush.msrb.mxu1 %v3223_v34 }
  0xa4   :  { %6201 = vst [vmem:[#allocation124_spill] sm:$0xff] %v3187_v32  ;;  %v3235_v32 = vld [vmem:[%s5723_s4 + $0x7c0] sm:$0xff]  ;;  %583 = vmatpush.msrb.mxu2 %v3230_v35 }
  0xa5   :  { %6202 = vst [vmem:[#allocation125_spill] sm:$0xff] %v3194_v38  ;;  %v3242_v38 = vld [vmem:[%s5723_s4 + $0x630] sm:$0xff]  ;;  %602 = vmatpush.msrb.mxu3 %v3235_v32 }
  0xa6   :  { %6203 = vst [vmem:[#allocation126_spill] sm:$0xff] %v3199_v39  ;;  %v3247_v39 = vld [vmem:[%s5723_s4 + $0x6b8] sm:$0xff]  ;;  %544 = vmatpush.msrb.mxu0 %v3242_v38 }
  0xa7   :  { %6204 = vst [vmem:[#allocation127_spill] sm:$0xff] %v3206_v30  ;;  %v3254_v30 = vld [vmem:[%s5723_s4 + $0x730] sm:$0xff]  ;;  %563 = vmatpush.msrb.mxu1 %v3247_v39 }
  0xa8   :  { %6205 = vst [vmem:[#allocation128_spill] sm:$0xff] %v3211_v33  ;;  %v3259_v33 = vld [vmem:[%s5723_s4 + $0x7b8] sm:$0xff]  ;;  %584 = vmatpush.msrb.mxu2 %v3254_v30 }
  0xa9   :  { %6206 = vst [vmem:[#allocation129_spill] sm:$0xff] %v3218_v31  ;;  %v3266_v31 = vld [vmem:[%s5723_s4 + $0x628] sm:$0xff]  ;;  %603 = vmatpush.msrb.mxu3 %v3259_v33 }
  0xaa   :  { %6207 = vst [vmem:[#allocation130_spill] sm:$0xff] %v3223_v34  ;;  %v3271_v34 = vld [vmem:[%s5723_s4 + $0x6b0] sm:$0xff]  ;;  %545 = vmatpush.msrb.mxu0 %v3266_v31 }
  0xab   :  { %6208 = vst [vmem:[#allocation131_spill] sm:$0xff] %v3230_v35  ;;  %v3278_v35 = vld [vmem:[%s5723_s4 + $0x728] sm:$0xff]  ;;  %564 = vmatpush.msrb.mxu1 %v3271_v34 }
  0xac   :  { %6209 = vst [vmem:[#allocation132_spill] sm:$0xff] %v3235_v32  ;;  %v3283_v32 = vld [vmem:[%s5723_s4 + $0x7b0] sm:$0xff]  ;;  %585 = vmatpush.msrb.mxu2 %v3278_v35 }
  0xad   :  { %6210 = vst [vmem:[#allocation133_spill] sm:$0xff] %v3242_v38  ;;  %v3290_v38 = vld [vmem:[%s5723_s4 + $0x620] sm:$0xff]  ;;  %604 = vmatpush.msrb.mxu3 %v3283_v32 }
  0xae   :  { %6211 = vst [vmem:[#allocation134_spill] sm:$0xff] %v3247_v39  ;;  %v3295_v39 = vld [vmem:[%s5723_s4 + $0x6a8] sm:$0xff]  ;;  %546 = vmatpush.msrb.mxu0 %v3290_v38 }
  0xaf   :  { %6212 = vst [vmem:[#allocation135_spill] sm:$0xff] %v3254_v30  ;;  %v3302_v30 = vld [vmem:[%s5723_s4 + $0x720] sm:$0xff]  ;;  %565 = vmatpush.msrb.mxu1 %v3295_v39 }
  0xb0   :  { %6213 = vst [vmem:[#allocation136_spill] sm:$0xff] %v3259_v33  ;;  %v3307_v33 = vld [vmem:[%s5723_s4 + $0x7a8] sm:$0xff]  ;;  %586 = vmatpush.msrb.mxu2 %v3302_v30 }
  0xb1   :  { %6214 = vst [vmem:[#allocation137_spill] sm:$0xff] %v3266_v31  ;;  %v3314_v31 = vld [vmem:[%s5723_s4 + $0x618] sm:$0xff]  ;;  %605 = vmatpush.msrb.mxu3 %v3307_v33 }
  0xb2   :  { %6215 = vst [vmem:[#allocation138_spill] sm:$0xff] %v3271_v34  ;;  %v3319_v34 = vld [vmem:[%s5723_s4 + $0x6a0] sm:$0xff]  ;;  %547 = vmatpush.msrb.mxu0 %v3314_v31 }
  0xb3   :  { %6216 = vst [vmem:[#allocation139_spill] sm:$0xff] %v3278_v35  ;;  %v3326_v35 = vld [vmem:[%s5723_s4 + $0x718] sm:$0xff]  ;;  %566 = vmatpush.msrb.mxu1 %v3319_v34 }
  0xb4   :  { %6217 = vst [vmem:[#allocation140_spill] sm:$0xff] %v3283_v32  ;;  %v3331_v32 = vld [vmem:[%s5723_s4 + $0x7a0] sm:$0xff]  ;;  %587 = vmatpush.msrb.mxu2 %v3326_v35 }
  0xb5   :  { %6218 = vst [vmem:[#allocation141_spill] sm:$0xff] %v3290_v38  ;;  %v3338_v38 = vld [vmem:[%s5723_s4 + $0x610] sm:$0xff]  ;;  %606 = vmatpush.msrb.mxu3 %v3331_v32 }
  0xb6   :  { %6219 = vst [vmem:[#allocation142_spill] sm:$0xff] %v3295_v39  ;;  %v3343_v39 = vld [vmem:[%s5723_s4 + $0x698] sm:$0xff]  ;;  %548 = vmatpush.msrb.mxu0 %v3338_v38 }
  0xb7   :  { %6220 = vst [vmem:[#allocation143_spill] sm:$0xff] %v3302_v30  ;;  %v3350_v30 = vld [vmem:[%s5723_s4 + $0x710] sm:$0xff]  ;;  %567 = vmatpush.msrb.mxu1 %v3343_v39 }
  0xb8   :  { %6221 = vst [vmem:[#allocation144_spill] sm:$0xff] %v3307_v33  ;;  %v3355_v33 = vld [vmem:[%s5723_s4 + $0x798] sm:$0xff]  ;;  %588 = vmatpush.msrb.mxu2 %v3350_v30 }
  0xb9   :  { %6222 = vst [vmem:[#allocation145_spill] sm:$0xff] %v3314_v31  ;;  %v3362_v31 = vld [vmem:[%s5723_s4 + $0x608] sm:$0xff]  ;;  %607 = vmatpush.msrb.mxu3 %v3355_v33 }
  0xba   :  { %6223 = vst [vmem:[#allocation146_spill] sm:$0xff] %v3319_v34  ;;  %v3367_v34 = vld [vmem:[%s5723_s4 + $0x690] sm:$0xff]  ;;  %549 = vmatpush.msrb.mxu0 %v3362_v31 }
  0xbb   :  { %6224 = vst [vmem:[#allocation147_spill] sm:$0xff] %v3326_v35  ;;  %v3374_v35 = vld [vmem:[%s5723_s4 + $0x708] sm:$0xff]  ;;  %568 = vmatpush.msrb.mxu1 %v3367_v34 }
  0xbc   :  { %6225 = vst [vmem:[#allocation148_spill] sm:$0xff] %v3331_v32  ;;  %v3379_v32 = vld [vmem:[%s5723_s4 + $0x790] sm:$0xff]  ;;  %589 = vmatpush.msrb.mxu2 %v3374_v35 }
  0xbd   :  { %6226 = vst [vmem:[#allocation149_spill] sm:$0xff] %v3338_v38  ;;  %v3386_v38 = vld [vmem:[%s5723_s4 + $0x600] sm:$0xff]  ;;  %608 = vmatpush.msrb.mxu3 %v3379_v32 }
  0xbe   :  { %6227 = vst [vmem:[#allocation150_spill] sm:$0xff] %v3343_v39  ;;  %v3391_v39 = vld [vmem:[%s5723_s4 + $0x688] sm:$0xff]  ;;  %550 = vmatpush.msrb.mxu0 %v3386_v38 }
  0xbf   :  { %6228 = vst [vmem:[#allocation151_spill] sm:$0xff] %v3350_v30  ;;  %v3398_v30 = vld [vmem:[%s5723_s4 + $0x700] sm:$0xff]  ;;  %569 = vmatpush.msrb.mxu1 %v3391_v39 }
  0xc0   :  { %6229 = vst [vmem:[#allocation152_spill] sm:$0xff] %v3355_v33  ;;  %v3403_v33 = vld [vmem:[%s5723_s4 + $0x788] sm:$0xff]  ;;  %590 = vmatpush.msrb.mxu2 %v3398_v30 }
  0xc1   :  { %6230 = vst [vmem:[#allocation153_spill] sm:$0xff] %v3362_v31  ;;  %v291_v31 = vld [vmem:[%s5724_s0 + $0x60] sm:$0xff]  ;;  %609 = vmatpush.msrb.mxu3 %v3403_v33 }
  0xc2   :  { %6231 = vst [vmem:[#allocation154_spill] sm:$0xff] %v3367_v34  ;;  %v293_v34 = vld [vmem:[%s5724_s0 + $0x70] sm:$0xff]  ;;  %551 = vmatmul.f32.vlgmr.msrb.gmra.mxu0 %v291_v31  ;;  %v3442_v31 = vld [vmem:[%s5723_s4 + $0x178] sm:$0xff] }
  0xc3   :  { %6232 = vst [vmem:[#allocation155_spill] sm:$0xff] %v3374_v35  ;;  %v3425_v35 = vld [vmem:[%s5723_s4 + $0x780] sm:$0xff]  ;;  %591 = vmatmul.f32.vlgmr.msrb.gmra.mxu2 %v293_v34  ;;  %v3450_v34 = vld [vmem:[%s5723_s4 + $0x70] sm:$0xff] }
  0xc4   :  { %6233 = vst [vmem:[#allocation156_spill] sm:$0xff] %v3379_v32  ;;  %v3420_v32 = vld [vmem:[%s5723_s4 + $0x680] sm:$0xff]  ;;  %671 = vmatpush.msra.mxu2 %v3442_v31  ;;  %610 = vmatpush.msrb.mxu3 %v3425_v35 }
  0xc5   :  { %6234 = vst [vmem:[#allocation157_spill] sm:$0xff] %v3391_v39  ;;  %v292_v39 = vld [vmem:[%s5724_s0 + $0x68] sm:$0xff]  ;;  %570 = vmatpush.msrb.mxu1 %v3420_v32 }
  0xc6   :  { %6235 = vst [vmem:[#allocation158_spill] sm:$0xff] %v3398_v30  ;;  %v3436_v30 = vld [vmem:[%s5723_s4 + $0x78] sm:$0xff]  ;;  %571 = vmatmul.f32.vlgmr.msrb.gmra.mxu1 %v292_v39  ;;  %v3474_v39 = vld [vmem:[%s5723_s4 + $0x68] sm:$0xff] }
  0xc7   :  { %6236 = vst [vmem:[#allocation159_spill] sm:$0xff] %v3403_v33  ;;  %v294_v33 = vld [vmem:[%s5724_s0 + $0x78] sm:$0xff]  ;;  %631 = vmatpush.msra.mxu0 %v3436_v30 }
  0xc8   :  { %6237 = vst [vmem:[#allocation160_spill] sm:$0xff] %v3425_v35  ;;  %611 = vmatmul.f32.vlgmr.msrb.gmra.mxu3 %v294_v33  ;;  %v3462_v35 = vld [vmem:[%s5723_s4 + $0x170] sm:$0xff]  ;;  %v3468_v33 = vld [vmem:[%s5723_s4 + $0x1f8] sm:$0xff] }
  0xc9   :  { %6238 = vst [vmem:[#allocation161_spill] sm:$0xff] %v3436_v30  ;;  %632 = vmatpush.msra.mxu0 %v3450_v34  ;;  %v3456_v30 = vld [vmem:[%s5723_s4 + $0xf8] sm:$0xff]  ;;  %672 = vmatpush.msra.mxu2 %v3462_v35 }
  0xca   :  { %6239 = vst [vmem:[#allocation162_spill] sm:$0xff] %v3456_v30  ;;  %651 = vmatpush.msra.mxu1 %v3456_v30  ;;  %691 = vmatpush.msra.mxu3 %v3468_v33  ;;  %v3480_v30 = vld [vmem:[%s5723_s4 + $0xf0] sm:$0xff] }
  0xcb   :  { %6240 = vst [vmem:[#allocation163_spill] sm:$0xff] %v3462_v35  ;;  %633 = vmatpush.msra.mxu0 %v3474_v39  ;;  %v3486_v35 = vld [vmem:[%s5723_s4 + $0x168] sm:$0xff] }
  0xcc   :  { %6241 = vst [vmem:[#allocation164_spill] sm:$0xff] %v3468_v33  ;;  %652 = vmatpush.msra.mxu1 %v3480_v30  ;;  %673 = vmatpush.msra.mxu2 %v3486_v35  ;;  %v3492_v33 = vld [vmem:[%s5723_s4 + $0x1f0] sm:$0xff] }
  0xcd   :  { %6242 = vst [vmem:[#allocation165_spill] sm:$0xff] %v3474_v39  ;;  %692 = vmatpush.msra.mxu3 %v3492_v33  ;;  %v3498_v39 = vld [vmem:[%s5723_s4 + $0x60] sm:$0xff] }
  0xce   :  { %6243 = vst [vmem:[#allocation166_spill] sm:$0xff] %v3480_v30  ;;  %634 = vmatpush.msra.mxu0 %v3498_v39  ;;  %v3504_v30 = vld [vmem:[%s5723_s4 + $0xe8] sm:$0xff] }
  0xcf   :  { %6244 = vst [vmem:[#allocation167_spill] sm:$0xff] %v3486_v35  ;;  %653 = vmatpush.msra.mxu1 %v3504_v30  ;;  %v3510_v35 = vld [vmem:[%s5723_s4 + $0x160] sm:$0xff] }
  0xd0   :  { %6245 = vst [vmem:[#allocation168_spill] sm:$0xff] %v3492_v33  ;;  %674 = vmatpush.msra.mxu2 %v3510_v35  ;;  %v3516_v33 = vld [vmem:[%s5723_s4 + $0x1e8] sm:$0xff] }
  0xd1   :  { %6246 = vst [vmem:[#allocation169_spill] sm:$0xff] %v3498_v39  ;;  %693 = vmatpush.msra.mxu3 %v3516_v33  ;;  %v3522_v39 = vld [vmem:[%s5723_s4 + $0x58] sm:$0xff] }
  0xd2   :  { %6247 = vst [vmem:[#allocation170_spill] sm:$0xff] %v3504_v30  ;;  %635 = vmatpush.msra.mxu0 %v3522_v39  ;;  %v3528_v30 = vld [vmem:[%s5723_s4 + $0xe0] sm:$0xff] }
  0xd3   :  { %6248 = vst [vmem:[#allocation171_spill] sm:$0xff] %v3510_v35  ;;  %654 = vmatpush.msra.mxu1 %v3528_v30  ;;  %v3534_v35 = vld [vmem:[%s5723_s4 + $0x158] sm:$0xff] }
  0xd4   :  { %6249 = vst [vmem:[#allocation172_spill] sm:$0xff] %v3516_v33  ;;  %675 = vmatpush.msra.mxu2 %v3534_v35  ;;  %v3540_v33 = vld [vmem:[%s5723_s4 + $0x1e0] sm:$0xff] }
  0xd5   :  { %6250 = vst [vmem:[#allocation173_spill] sm:$0xff] %v3522_v39  ;;  %694 = vmatpush.msra.mxu3 %v3540_v33  ;;  %v3546_v39 = vld [vmem:[%s5723_s4 + $0x50] sm:$0xff] }
  0xd6   :  { %6251 = vst [vmem:[#allocation174_spill] sm:$0xff] %v3528_v30  ;;  %636 = vmatpush.msra.mxu0 %v3546_v39  ;;  %v3552_v30 = vld [vmem:[%s5723_s4 + $0xd8] sm:$0xff] }
  0xd7   :  { %6252 = vst [vmem:[#allocation175_spill] sm:$0xff] %v3534_v35  ;;  %655 = vmatpush.msra.mxu1 %v3552_v30  ;;  %v3558_v35 = vld [vmem:[%s5723_s4 + $0x150] sm:$0xff] }
  0xd8   :  { %6253 = vst [vmem:[#allocation176_spill] sm:$0xff] %v3540_v33  ;;  %676 = vmatpush.msra.mxu2 %v3558_v35  ;;  %v3564_v33 = vld [vmem:[%s5723_s4 + $0x1d8] sm:$0xff] }
  0xd9   :  { %6254 = vst [vmem:[#allocation177_spill] sm:$0xff] %v3546_v39  ;;  %695 = vmatpush.msra.mxu3 %v3564_v33  ;;  %v3570_v39 = vld [vmem:[%s5723_s4 + $0x48] sm:$0xff] }
  0xda   :  { %6255 = vst [vmem:[#allocation178_spill] sm:$0xff] %v3552_v30  ;;  %637 = vmatpush.msra.mxu0 %v3570_v39  ;;  %v3576_v30 = vld [vmem:[%s5723_s4 + $0xd0] sm:$0xff] }
  0xdb   :  { %6256 = vst [vmem:[#allocation179_spill] sm:$0xff] %v3558_v35  ;;  %656 = vmatpush.msra.mxu1 %v3576_v30  ;;  %v3582_v35 = vld [vmem:[%s5723_s4 + $0x148] sm:$0xff] }
  0xdc   :  { %6257 = vst [vmem:[#allocation180_spill] sm:$0xff] %v3564_v33  ;;  %677 = vmatpush.msra.mxu2 %v3582_v35  ;;  %v3588_v33 = vld [vmem:[%s5723_s4 + $0x1d0] sm:$0xff] }
  0xdd   :  { %6258 = vst [vmem:[#allocation181_spill] sm:$0xff] %v3570_v39  ;;  %696 = vmatpush.msra.mxu3 %v3588_v33  ;;  %v3594_v39 = vld [vmem:[%s5723_s4 + $0x40] sm:$0xff] }
  0xde   :  { %6259 = vst [vmem:[#allocation182_spill] sm:$0xff] %v3576_v30  ;;  %638 = vmatpush.msra.mxu0 %v3594_v39  ;;  %v3600_v30 = vld [vmem:[%s5723_s4 + $0xc8] sm:$0xff] }
  0xdf   :  { %6260 = vst [vmem:[#allocation183_spill] sm:$0xff] %v3582_v35  ;;  %657 = vmatpush.msra.mxu1 %v3600_v30  ;;  %v3606_v35 = vld [vmem:[%s5723_s4 + $0x140] sm:$0xff] }
  0xe0   :  { %6261 = vst [vmem:[#allocation184_spill] sm:$0xff] %v3588_v33  ;;  %678 = vmatpush.msra.mxu2 %v3606_v35  ;;  %v3612_v33 = vld [vmem:[%s5723_s4 + $0x1c8] sm:$0xff] }
  0xe1   :  { %6262 = vst [vmem:[#allocation185_spill] sm:$0xff] %v3594_v39  ;;  %697 = vmatpush.msra.mxu3 %v3612_v33  ;;  %v3618_v39 = vld [vmem:[%s5723_s4 + $0x38] sm:$0xff] }
  0xe2   :  { %6263 = vst [vmem:[#allocation186_spill] sm:$0xff] %v3600_v30  ;;  %639 = vmatpush.msra.mxu0 %v3618_v39  ;;  %v3624_v30 = vld [vmem:[%s5723_s4 + $0xc0] sm:$0xff] }
  0xe3   :  { %6264 = vst [vmem:[#allocation187_spill] sm:$0xff] %v3606_v35  ;;  %658 = vmatpush.msra.mxu1 %v3624_v30  ;;  %v3630_v35 = vld [vmem:[%s5723_s4 + $0x138] sm:$0xff] }
  0xe4   :  { %6265 = vst [vmem:[#allocation188_spill] sm:$0xff] %v3612_v33  ;;  %679 = vmatpush.msra.mxu2 %v3630_v35  ;;  %v3636_v33 = vld [vmem:[%s5723_s4 + $0x1c0] sm:$0xff]  ;;  %640 = vmatpush.msra.mxu0 %v2079_v36  ;;  %v3662_v36 = vld [vmem:[%s5723_s4 + $0xb0] sm:$0xff] }
  0xe5   :  { %6266 = vst [vmem:[#allocation189_spill] sm:$0xff] %v3624_v30  ;;  %698 = vmatpush.msra.mxu3 %v3636_v33  ;;  %v3643_v30 = vld [vmem:[%s5723_s4 + $0xb8] sm:$0xff] }
  0xe6   :  { %6267 = vst [vmem:[#allocation190_spill] sm:$0xff] %v3630_v35  ;;  %659 = vmatpush.msra.mxu1 %v3643_v30  ;;  %v3649_v35 = vld [vmem:[%s5723_s4 + $0x130] sm:$0xff]  ;;  %641 = vmatpush.msra.mxu0 %v2093_v40  ;;  %v6270_v40 = vld [vmem:[#allocation2_spill] sm:$0xff] }
  0xe7   :  { %6268 = vst [vmem:[#allocation191_spill] sm:$0xff] %v3636_v33  ;;  %680 = vmatpush.msra.mxu2 %v3649_v35  ;;  %v3655_v33 = vld [vmem:[%s5723_s4 + $0x1b8] sm:$0xff] }
  0xe8   :  { %6269 = vst [vmem:[#allocation192_spill] sm:$0xff] %v3649_v35  ;;  %699 = vmatpush.msra.mxu3 %v3655_v33  ;;  %660 = vmatpush.msra.mxu1 %v3662_v36  ;;  %v3669_v35 = vld [vmem:[%s5723_s4 + $0x1b0] sm:$0xff] }
  0xe9   :  { %681 = vmatpush.msra.mxu2 %v2098_v41  ;;  %642 = vmatpush.msra.mxu0 %v2114_v44  ;;  %v6271_v41 = vld [vmem:[#allocation3_spill] sm:$0xff]  ;;  %v6274_v44 = vld [vmem:[#allocation6_spill] sm:$0xff] }
  0xea   :  { %700 = vmatpush.msra.mxu3 %v3669_v35  ;;  %661 = vmatpush.msra.mxu1 %v2104_v42  ;;  %v6272_v42 = vld [vmem:[#allocation4_spill] sm:$0xff] }
  0xeb   :  { %682 = vmatpush.msra.mxu2 %v2119_v45  ;;  %643 = vmatpush.msra.mxu0 %v2138_v48  ;;  %v6275_v45 = vld [vmem:[#allocation7_spill] sm:$0xff]  ;;  %v6278_v48 = vld [vmem:[#allocation10_spill] sm:$0xff] }
  0xec   :  { %701 = vmatpush.msra.mxu3 %v2109_v43  ;;  %662 = vmatpush.msra.mxu1 %v2126_v46  ;;  %v6273_v43 = vld [vmem:[#allocation5_spill] sm:$0xff]  ;;  %v6276_v46 = vld [vmem:[#allocation8_spill] sm:$0xff] }
  0xed   :  { %683 = vmatpush.msra.mxu2 %v2143_v49  ;;  %644 = vmatpush.msra.mxu0 %v2162_v52  ;;  %v6279_v49 = vld [vmem:[#allocation11_spill] sm:$0xff]  ;;  %v312_v52 = vpop.f32.mrf.mxu0 }
  0xee   :  { %702 = vmatpush.msra.mxu3 %v2131_v47  ;;  %663 = vmatpush.msra.mxu1 %v2150_v50  ;;  %v6277_v47 = vld [vmem:[#allocation9_spill] sm:$0xff]  ;;  %v6280_v50 = vld [vmem:[#allocation12_spill] sm:$0xff] }
  0xef   :  { %684 = vmatpush.msra.mxu2 %v2167_v53  ;;  %645 = vmatpush.msra.mxu0 %v2186_v56  ;;  %v6282_v53 = vld [vmem:[#allocation14_spill] sm:$0xff]  ;;  %v6285_v56 = vld [vmem:[#allocation17_spill] sm:$0xff] }
  0xf0   :  { %703 = vmatpush.msra.mxu3 %v2155_v51  ;;  %664 = vmatpush.msra.mxu1 %v2174_v54  ;;  %v6281_v51 = vld [vmem:[#allocation13_spill] sm:$0xff]  ;;  %v6283_v54 = vld [vmem:[#allocation15_spill] sm:$0xff] }
  0xf1   :  { %685 = vmatpush.msra.mxu2 %v2191_v57  ;;  %646 = vmatpush.msra.mxu0 %v2210_v60  ;;  %v6286_v57 = vld [vmem:[#allocation18_spill] sm:$0xff]  ;;  %v6288_v60 = vld [vmem:[#allocation20_spill] sm:$0xff] }
  0xf2   :  { %704 = vmatpush.msra.mxu3 %v2179_v55  ;;  %665 = vmatpush.msra.mxu1 %v2198_v58  ;;  %v6284_v55 = vld [vmem:[#allocation16_spill] sm:$0xff]  ;;  %v6287_v58 = vld [vmem:[#allocation19_spill] sm:$0xff] }
  0xf3   :  { %686 = vmatpush.msra.mxu2 %v2215_v61  ;;  %711 = vmatpush.msrb.mxu0 %v2222_v62  ;;  %v6289_v61 = vld [vmem:[#allocation21_spill] sm:$0xff] }
  0xf4   :  { %705 = vmatpush.msra.mxu3 %v2203_v59  ;;  %666 = vmatpush.msra.mxu1 %v2234_v0  ;;  %v332_v59 = vpop.f32.mrf.mxu1  ;;  %v6290_v0 = vld [vmem:[#allocation22_spill] sm:$0xff] }
  0xf5   :  { %751 = vmatpush.msrb.mxu2 %v2227_v63  ;;  %712 = vmatpush.msrb.mxu0 %v2246_v2  ;;  %v333_v62 = vadd.f32 %v332_v59, %v312_v52  ;;  %v352_v63 = vpop.f32.mrf.mxu2  ;;  %v6292_v2 = vld [vmem:[#allocation24_spill] sm:$0xff]  ;;  %v622_v52 = vld [vmem:[%s5725_s1 + $0x38] sm:$0xff] }
  0xf6   :  { %706 = vmatpush.msra.mxu3 %v2239_v1  ;;  %731 = vmatpush.msrb.mxu1 %v2251_v3  ;;  %v6291_v1 = vld [vmem:[#allocation23_spill] sm:$0xff]  ;;  %v6293_v3 = vld [vmem:[#allocation25_spill] sm:$0xff]  ;;  %v6320_v59 = vld [vmem:[#allocation52_spill] sm:$0xff] }
  0xf7   :  { %752 = vmatpush.msrb.mxu2 %v2258_v4  ;;  %713 = vmatpush.msrb.mxu0 %v2270_v6  ;;  %v617_v4 = vld [vmem:[%s5725_s1 + $0x10] sm:$0xff]  ;;  %v6294_v6 = vld [vmem:[#allocation26_spill] sm:$0xff] }
  0xf8   :  { %771 = vmatpush.msrb.mxu3 %v2263_v5  ;;  %732 = vmatpush.msrb.mxu1 %v2275_v7  ;;  %v353_v5 = vadd.f32 %v352_v63, %v333_v62  ;;  %v6295_v7 = vld [vmem:[#allocation27_spill] sm:$0xff]  ;;  %v6324_v63 = vld [vmem:[#allocation56_spill] sm:$0xff] }
  0xf9   :  { %753 = vmatpush.msrb.mxu2 %v2282_v8  ;;  %714 = vmatpush.msrb.mxu0 %v2294_v10  ;;  %v372_v8 = vpop.f32.mrf.mxu3  ;;  %v6297_v10 = vld [vmem:[#allocation29_spill] sm:$0xff]  ;;  %v6323_v62 = vld [vmem:[#allocation55_spill] sm:$0xff] }
  0xfa   :  { %772 = vmatpush.msrb.mxu3 %v2287_v9  ;;  %733 = vmatpush.msrb.mxu1 %v2299_v11  ;;  %v6296_v9 = vld [vmem:[#allocation28_spill] sm:$0xff]  ;;  %v615_v11 = vld [vmem:[%s5725_s1] sm:$0xff] }
  0xfb   :  { %754 = vmatpush.msrb.mxu2 %v2306_v12  ;;  %715 = vmatpush.msrb.mxu0 %v2318_v14  ;;  %v373_v12 = vadd.f32 %v372_v8, %v353_v5  ;;  %v618_v14 = vld [vmem:[%s5725_s1 + $0x18] sm:$0xff]  ;;  %v6330_v5 = vld [vmem:[#allocation62_spill] sm:$0xff] }
  0xfc   :  { %773 = vmatpush.msrb.mxu3 %v2311_v13  ;;  %734 = vmatpush.msrb.mxu1 %v2323_v15  ;;  %v6298_v13 = vld [vmem:[#allocation30_spill] sm:$0xff]  ;;  %v6299_v15 = vld [vmem:[#allocation31_spill] sm:$0xff]  ;;  %v6333_v8 = vld [vmem:[#allocation65_spill] sm:$0xff] }
  0xfd   :  { %755 = vmatpush.msrb.mxu2 %v2330_v16  ;;  %716 = vmatpush.msrb.mxu0 %v2342_v18  ;;  %v6300_v16 = vld [vmem:[#allocation32_spill] sm:$0xff]  ;;  %v6301_v18 = vld [vmem:[#allocation33_spill] sm:$0xff] }
  0xfe   :  { %774 = vmatpush.msrb.mxu3 %v2335_v17  ;;  %735 = vmatpush.msrb.mxu1 %v2347_v19  ;;  %v392_v17 = vpop.f32.mrf.mxu0  ;;  %v616_v19 = vld [vmem:[%s5725_s1 + $0x8] sm:$0xff] }
  0xff   :  { %756 = vmatpush.msrb.mxu2 %v2354_v20  ;;  %717 = vmatpush.msrb.mxu0 %v2366_v22  ;;  %v393_v20 = vadd.f32 %v392_v17, %v373_v12  ;;  %v6303_v22 = vld [vmem:[#allocation35_spill] sm:$0xff]  ;;  %v6337_v12 = vld [vmem:[#allocation69_spill] sm:$0xff]  ;;  %v6342_v17 = vld [vmem:[#allocation74_spill] sm:$0xff] }
 0x100   :  { %775 = vmatpush.msrb.mxu3 %v2359_v21  ;;  %736 = vmatpush.msrb.mxu1 %v2371_v23  ;;  %v6302_v21 = vld [vmem:[#allocation34_spill] sm:$0xff]  ;;  %v6304_v23 = vld [vmem:[#allocation36_spill] sm:$0xff] }
 0x101   :  { %757 = vmatpush.msrb.mxu2 %v2378_v24  ;;  %718 = vmatpush.msrb.mxu0 %v2390_v26  ;;  %v412_v24 = vpop.f32.mrf.mxu1 }
 0x102   :  { %776 = vmatpush.msrb.mxu3 %v2383_v25  ;;  %737 = vmatpush.msrb.mxu1 %v2395_v27  ;;  %v6305_v25 = vld [vmem:[#allocation37_spill] sm:$0xff]  ;;  %v413_v26 = vadd.f32 %v412_v24, %v393_v20  ;;  %v432_v27 = vpop.f32.mrf.mxu2 }
 0x103   :  { %758 = vmatpush.msrb.mxu2 %v2402_v28  ;;  %719 = vmatpush.msrb.mxu0 %v6270_v40  ;;  %v6306_v28 = vld [vmem:[#allocation38_spill] sm:$0xff]  ;;  %v6308_v40 = vld [vmem:[#allocation40_spill] sm:$0xff]  ;;  %v6345_v20 = vld [vmem:[#allocation77_spill] sm:$0xff] }
 0x104   :  { %777 = vmatpush.msrb.mxu3 %v2407_v29  ;;  %738 = vmatpush.msrb.mxu1 %v6271_v41  ;;  %v6307_v29 = vld [vmem:[#allocation39_spill] sm:$0xff]  ;;  %v6309_v41 = vld [vmem:[#allocation41_spill] sm:$0xff] }
 0x105   :  { %759 = vmatpush.msrb.mxu2 %v6272_v42  ;;  %720 = vmatpush.msrb.mxu0 %v6274_v44  ;;  %v621_v42 = vld [vmem:[%s5725_s1 + $0x30] sm:$0xff]  ;;  %v6310_v44 = vld [vmem:[#allocation42_spill] sm:$0xff] }
 0x106   :  { %778 = vmatpush.msrb.mxu3 %v6273_v43  ;;  %739 = vmatpush.msrb.mxu1 %v6275_v45  ;;  %v433_v43 = vadd.f32 %v432_v27, %v413_v26  ;;  %v6311_v45 = vld [vmem:[#allocation43_spill] sm:$0xff]  ;;  %v6349_v26 = vld [vmem:[#allocation81_spill] sm:$0xff]  ;;  %v6350_v27 = vld [vmem:[#allocation82_spill] sm:$0xff] }
 0x107   :  { %760 = vmatpush.msrb.mxu2 %v6276_v46  ;;  %721 = vmatpush.msrb.mxu0 %v6278_v48  ;;  %v452_v46 = vpop.f32.mrf.mxu3  ;;  %v6313_v48 = vld [vmem:[#allocation45_spill] sm:$0xff] }
 0x108   :  { %779 = vmatpush.msrb.mxu3 %v6277_v47  ;;  %740 = vmatpush.msrb.mxu1 %v6279_v49  ;;  %v6312_v47 = vld [vmem:[#allocation44_spill] sm:$0xff]  ;;  %v619_v49 = vld [vmem:[%s5725_s1 + $0x20] sm:$0xff] }
 0x109   :  { %761 = vmatpush.msrb.mxu2 %v6280_v50  ;;  %722 = vmatpush.msrb.mxu0 %v6282_v53  ;;  %v453_v50 = vadd.f32 %v452_v46, %v433_v43  ;;  %v6315_v53 = vld [vmem:[#allocation47_spill] sm:$0xff]  ;;  %v6354_v43 = vld [vmem:[#allocation86_spill] sm:$0xff]  ;;  %v6357_v46 = vld [vmem:[#allocation89_spill] sm:$0xff] }
 0x10a   :  { %780 = vmatpush.msrb.mxu3 %v6281_v51  ;;  %741 = vmatpush.msrb.mxu1 %v6283_v54  ;;  %v6314_v51 = vld [vmem:[#allocation46_spill] sm:$0xff]  ;;  %v6316_v54 = vld [vmem:[#allocation48_spill] sm:$0xff] }
 0x10b   :  { %762 = vmatpush.msrb.mxu2 %v6284_v55  ;;  %723 = vmatpush.msrb.mxu0 %v6286_v57  ;;  %v6317_v55 = vld [vmem:[#allocation49_spill] sm:$0xff]  ;;  %v6318_v57 = vld [vmem:[#allocation50_spill] sm:$0xff] }
 0x10c   :  { %781 = vmatpush.msrb.mxu3 %v6285_v56  ;;  %742 = vmatpush.msrb.mxu1 %v6287_v58  ;;  %v620_v56 = vld [vmem:[%s5725_s1 + $0x28] sm:$0xff] }
 0x10d   :  { %763 = vmatpush.msrb.mxu2 %v6288_v60  ;;  %724 = vmatpush.msrb.mxu0 %v6290_v0  ;;  %v6319_v58 = vld [vmem:[#allocation51_spill] sm:$0xff]  ;;  %v6321_v60 = vld [vmem:[#allocation53_spill] sm:$0xff] }
 0x10e   :  { %782 = vmatpush.msrb.mxu3 %v6289_v61  ;;  %743 = vmatpush.msrb.mxu1 %v6291_v1  ;;  %v6322_v61 = vld [vmem:[#allocation54_spill] sm:$0xff]  ;;  %v6325_v0 = vld [vmem:[#allocation57_spill] sm:$0xff] }
 0x10f   :  { %764 = vmatpush.msrb.mxu2 %v6292_v2  ;;  %725 = vmatpush.msrb.mxu0 %v6294_v6  ;;  %v6326_v1 = vld [vmem:[#allocation58_spill] sm:$0xff]  ;;  %v6327_v2 = vld [vmem:[#allocation59_spill] sm:$0xff] }
 0x110   :  { %783 = vmatpush.msrb.mxu3 %v6293_v3  ;;  %744 = vmatpush.msrb.mxu1 %v6295_v7  ;;  %v6328_v3 = vld [vmem:[#allocation60_spill] sm:$0xff]  ;;  %v6331_v6 = vld [vmem:[#allocation63_spill] sm:$0xff] }
 0x111   :  { %765 = vmatpush.msrb.mxu2 %v6296_v9  ;;  %726 = vmatpush.msrb.mxu0 %v6298_v13  ;;  %v6332_v7 = vld [vmem:[#allocation64_spill] sm:$0xff]  ;;  %v6334_v9 = vld [vmem:[#allocation66_spill] sm:$0xff] }
 0x112   :  { %784 = vmatpush.msrb.mxu3 %v6297_v10  ;;  %687 = vmatmul.f32.vlgmr.msra.gmra.mxu2 %v617_v4  ;;  %v6329_v4 = vld [vmem:[#allocation61_spill] sm:$0xff]  ;;  %v6335_v10 = vld [vmem:[#allocation67_spill] sm:$0xff]  ;;  %v6338_v13 = vld [vmem:[#allocation70_spill] sm:$0xff] }
 0x113   :  { %745 = vmatpush.msrb.mxu1 %v6299_v15  ;;  %766 = vmatpush.msrb.mxu2 %v6300_v16  ;;  %v6340_v15 = vld [vmem:[#allocation72_spill] sm:$0xff]  ;;  %v6341_v16 = vld [vmem:[#allocation73_spill] sm:$0xff] }
 0x114   :  { %785 = vmatpush.msrb.mxu3 %v6301_v18  ;;  %647 = vmatmul.f32.vlgmr.msra.gmra.mxu0 %v615_v11  ;;  %v6336_v11 = vld [vmem:[#allocation68_spill] sm:$0xff]  ;;  %v6343_v18 = vld [vmem:[#allocation75_spill] sm:$0xff] }
 0x115   :  { %707 = vmatmul.f32.vlgmr.msra.gmra.mxu3 %v618_v14  ;;  %791 = vmatpush.msra.mxu0 %v6302_v21  ;;  %v6339_v14 = vld [vmem:[#allocation71_spill] sm:$0xff]  ;;  %v472_v21 = vpop.f32.mrf.mxu0 }
 0x116   :  { %831 = vmatpush.msra.mxu2 %v6303_v22  ;;  %746 = vmatpush.msrb.mxu1 %v6304_v23  ;;  %v6346_v22 = vld [vmem:[#allocation78_spill] sm:$0xff]  ;;  %v6347_v23 = vld [vmem:[#allocation79_spill] sm:$0xff]  ;;  %v473_v24 = vadd.f32 %v472_v21, %v453_v50  ;;  %v6389_v21 = vld [vmem:[#allocation121_spill] sm:$0xff] }
 0x117   :  { %786 = vmatpush.msrb.mxu3 %v6305_v25  ;;  %667 = vmatmul.f32.vlgmr.msra.gmra.mxu1 %v616_v19  ;;  %v6344_v19 = vld [vmem:[#allocation76_spill] sm:$0xff] }
 0x118   :  { %792 = vmatpush.msra.mxu0 %v6306_v28  ;;  %811 = vmatpush.msra.mxu1 %v6307_v29  ;;  %v6348_v25 = vld [vmem:[#allocation80_spill] sm:$0xff]  ;;  %v6351_v28 = vld [vmem:[#allocation83_spill] sm:$0xff]  ;;  %v492_v29 = vpop.f32.mrf.mxu1 }
 0x119   :  { %832 = vmatpush.msra.mxu2 %v6308_v40  ;;  %851 = vmatpush.msra.mxu3 %v6309_v41  ;;  %v6352_v40 = vld [vmem:[#allocation84_spill] sm:$0xff]  ;;  %v6353_v41 = vld [vmem:[#allocation85_spill] sm:$0xff] }
 0x11a   :  { %793 = vmatpush.msra.mxu0 %v6310_v44  ;;  %812 = vmatpush.msra.mxu1 %v6311_v45  ;;  %v6355_v44 = vld [vmem:[#allocation87_spill] sm:$0xff]  ;;  %v6356_v45 = vld [vmem:[#allocation88_spill] sm:$0xff] }
 0x11b   :  { %833 = vmatpush.msra.mxu2 %v6312_v47  ;;  %852 = vmatpush.msra.mxu3 %v6313_v48  ;;  %v512_v47 = vpop.f32.mrf.mxu2  ;;  %v6358_v48 = vld [vmem:[#allocation90_spill] sm:$0xff] }
 0x11c   :  { %767 = vmatmul.f32.vlgmr.msrb.gmra.mxu2 %v621_v42  ;;  %794 = vmatpush.msra.mxu0 %v6314_v51  ;;  %v493_v42 = vadd.f32 %v492_v29, %v473_v24  ;;  %v6360_v51 = vld [vmem:[#allocation92_spill] sm:$0xff]  ;;  %v6397_v29 = vld [vmem:[#allocation129_spill] sm:$0xff] }
 0x11d   :  { %813 = vmatpush.msra.mxu1 %v6315_v53  ;;  %834 = vmatpush.msra.mxu2 %v6316_v54  ;;  %v623_v53 = vld [vmem:[%s5725_s1 + $0x40] sm:$0xff]  ;;  %v625_v54 = vld [vmem:[%s5725_s1 + $0x50] sm:$0xff] }
 0x11e   :  { %853 = vmatpush.msra.mxu3 %v6317_v55  ;;  %727 = vmatmul.f32.vlgmr.msrb.gmra.mxu0 %v619_v49  ;;  %v6359_v49 = vld [vmem:[#allocation91_spill] sm:$0xff]  ;;  %v513_v50 = vadd.f32 %v512_v47, %v493_v42  ;;  %v6362_v55 = vld [vmem:[#allocation94_spill] sm:$0xff]  ;;  %v6392_v24 = vld [vmem:[#allocation124_spill] sm:$0xff] }
 0x11f   :  { %787 = vmatmul.f32.vlgmr.msrb.gmra.mxu3 %v622_v52  ;;  %795 = vmatpush.msra.mxu0 %v6318_v57  ;;  %v6361_v52 = vld [vmem:[#allocation93_spill] sm:$0xff]  ;;  %v532_v57 = vpop.f32.mrf.mxu3  ;;  %v6400_v42 = vld [vmem:[#allocation132_spill] sm:$0xff] }
 0x120   :  { %814 = vmatpush.msra.mxu1 %v6319_v58  ;;  %835 = vmatpush.msra.mxu2 %v6320_v59  ;;  %v6364_v58 = vld [vmem:[#allocation96_spill] sm:$0xff]  ;;  %v6365_v59 = vld [vmem:[#allocation97_spill] sm:$0xff] }
 0x121   :  { %854 = vmatpush.msra.mxu3 %v6321_v60  ;;  %747 = vmatmul.f32.vlgmr.msrb.gmra.mxu1 %v620_v56  ;;  %v6363_v56 = vld [vmem:[#allocation95_spill] sm:$0xff]  ;;  %v533_v60 = vadd.f32 %v532_v57, %v513_v50  ;;  %v6405_v47 = vld [vmem:[#allocation137_spill] sm:$0xff]  ;;  %v6408_v50 = vld [vmem:[#allocation140_spill] sm:$0xff] }
 0x122   :  { %796 = vmatpush.msra.mxu0 %v6322_v61  ;;  %815 = vmatpush.msra.mxu1 %v6323_v62  ;;  %v624_v61 = vld [vmem:[%s5725_s1 + $0x48] sm:$0xff]  ;;  %v626_v62 = vld [vmem:[%s5725_s1 + $0x58] sm:$0xff] }
 0x123   :  { %836 = vmatpush.msra.mxu2 %v6324_v63  ;;  %855 = vmatpush.msra.mxu3 %v6325_v0  ;;  %v6366_v63 = vld [vmem:[#allocation98_spill] sm:$0xff]  ;;  %v6367_v0 = vld [vmem:[#allocation99_spill] sm:$0xff]  ;;  %v6413_v57 = vld [vmem:[#allocation145_spill] sm:$0xff] }
 0x124   :  { %797 = vmatpush.msra.mxu0 %v6326_v1  ;;  %816 = vmatpush.msra.mxu1 %v6327_v2  ;;  %v6368_v1 = vld [vmem:[#allocation100_spill] sm:$0xff]  ;;  %v6369_v2 = vld [vmem:[#allocation101_spill] sm:$0xff] }
 0x125   :  { %837 = vmatpush.msra.mxu2 %v6328_v3  ;;  %856 = vmatpush.msra.mxu3 %v6329_v4  ;;  %v6370_v3 = vld [vmem:[#allocation102_spill] sm:$0xff]  ;;  %v6371_v4 = vld [vmem:[#allocation103_spill] sm:$0xff] }
 0x126   :  { %798 = vmatpush.msra.mxu0 %v6330_v5  ;;  %817 = vmatpush.msra.mxu1 %v6331_v6  ;;  %v6372_v5 = vld [vmem:[#allocation104_spill] sm:$0xff]  ;;  %v6373_v6 = vld [vmem:[#allocation105_spill] sm:$0xff] }
 0x127   :  { %838 = vmatpush.msra.mxu2 %v6332_v7  ;;  %857 = vmatpush.msra.mxu3 %v6333_v8  ;;  %v6374_v7 = vld [vmem:[#allocation106_spill] sm:$0xff]  ;;  %v6375_v8 = vld [vmem:[#allocation107_spill] sm:$0xff] }
 0x128   :  { %799 = vmatpush.msra.mxu0 %v6334_v9  ;;  %818 = vmatpush.msra.mxu1 %v6335_v10  ;;  %v6376_v9 = vld [vmem:[#allocation108_spill] sm:$0xff]  ;;  %v6377_v10 = vld [vmem:[#allocation109_spill] sm:$0xff] }
 0x129   :  { %839 = vmatpush.msra.mxu2 %v6336_v11  ;;  %858 = vmatpush.msra.mxu3 %v6337_v12  ;;  %v6378_v11 = vld [vmem:[#allocation110_spill] sm:$0xff]  ;;  %v6379_v12 = vld [vmem:[#allocation111_spill] sm:$0xff] }
 0x12a   :  { %800 = vmatpush.msra.mxu0 %v6338_v13  ;;  %819 = vmatpush.msra.mxu1 %v6339_v14  ;;  %v6381_v13 = vld [vmem:[#allocation113_spill] sm:$0xff]  ;;  %v6382_v14 = vld [vmem:[#allocation114_spill] sm:$0xff] }
 0x12b   :  { %840 = vmatpush.msra.mxu2 %v6340_v15  ;;  %859 = vmatpush.msra.mxu3 %v6341_v16  ;;  %v6383_v15 = vld [vmem:[#allocation115_spill] sm:$0xff]  ;;  %v6384_v16 = vld [vmem:[#allocation116_spill] sm:$0xff] }
 0x12c   :  { %801 = vmatpush.msra.mxu0 %v6342_v17  ;;  %820 = vmatpush.msra.mxu1 %v6343_v18  ;;  %v6385_v17 = vld [vmem:[#allocation117_spill] sm:$0xff]  ;;  %v6386_v18 = vld [vmem:[#allocation118_spill] sm:$0xff] }
 0x12d   :  { %841 = vmatpush.msra.mxu2 %v6344_v19  ;;  %860 = vmatpush.msra.mxu3 %v6345_v20  ;;  %v6387_v19 = vld [vmem:[#allocation119_spill] sm:$0xff]  ;;  %v6388_v20 = vld [vmem:[#allocation120_spill] sm:$0xff] }
 0x12e   :  { %802 = vmatpush.msra.mxu0 %v6346_v22  ;;  %821 = vmatpush.msra.mxu1 %v6347_v23  ;;  %v6390_v22 = vld [vmem:[#allocation122_spill] sm:$0xff]  ;;  %v6391_v23 = vld [vmem:[#allocation123_spill] sm:$0xff] }
 0x12f   :  { %842 = vmatpush.msra.mxu2 %v6348_v25  ;;  %861 = vmatpush.msra.mxu3 %v6349_v26  ;;  %v6393_v25 = vld [vmem:[#allocation125_spill] sm:$0xff]  ;;  %v6394_v26 = vld [vmem:[#allocation126_spill] sm:$0xff] }
 0x130   :  { %803 = vmatpush.msra.mxu0 %v6350_v27  ;;  %822 = vmatpush.msra.mxu1 %v6351_v28  ;;  %v6395_v27 = vld [vmem:[#allocation127_spill] sm:$0xff]  ;;  %v6396_v28 = vld [vmem:[#allocation128_spill] sm:$0xff] }
 0x131   :  { %843 = vmatpush.msra.mxu2 %v6352_v40  ;;  %862 = vmatpush.msra.mxu3 %v6353_v41  ;;  %v6398_v40 = vld [vmem:[#allocation130_spill] sm:$0xff]  ;;  %v6399_v41 = vld [vmem:[#allocation131_spill] sm:$0xff] }
 0x132   :  { %804 = vmatpush.msra.mxu0 %v6354_v43  ;;  %823 = vmatpush.msra.mxu1 %v6355_v44  ;;  %v6401_v43 = vld [vmem:[#allocation133_spill] sm:$0xff]  ;;  %v6402_v44 = vld [vmem:[#allocation134_spill] sm:$0xff] }
 0x133   :  { %844 = vmatpush.msra.mxu2 %v6356_v45  ;;  %863 = vmatpush.msra.mxu3 %v6357_v46  ;;  %v6403_v45 = vld [vmem:[#allocation135_spill] sm:$0xff]  ;;  %v6404_v46 = vld [vmem:[#allocation136_spill] sm:$0xff] }
 0x134   :  { %805 = vmatpush.msra.mxu0 %v6358_v48  ;;  %824 = vmatpush.msra.mxu1 %v6359_v49  ;;  %v6406_v48 = vld [vmem:[#allocation138_spill] sm:$0xff]  ;;  %v6407_v49 = vld [vmem:[#allocation139_spill] sm:$0xff] }
 0x135   :  { %845 = vmatpush.msra.mxu2 %v6360_v51  ;;  %864 = vmatpush.msra.mxu3 %v6361_v52  ;;  %v6409_v52 = vld [vmem:[#allocation141_spill] sm:$0xff] }
 0x136   :  { %806 = vmatpush.msra.mxu0 %v6362_v55  ;;  %825 = vmatpush.msra.mxu1 %v6363_v56  ;;  %v6411_v55 = vld [vmem:[#allocation143_spill] sm:$0xff]  ;;  %v6412_v56 = vld [vmem:[#allocation144_spill] sm:$0xff] }
 0x137   :  { %846 = vmatpush.msra.mxu2 %v6364_v58  ;;  %865 = vmatpush.msra.mxu3 %v6365_v59  ;;  %v6414_v58 = vld [vmem:[#allocation146_spill] sm:$0xff] }
 0x138   :  { %807 = vmatmul.f32.vlgmr.msra.gmra.mxu0 %v623_v53  ;;  %847 = vmatmul.f32.vlgmr.msra.gmra.mxu2 %v625_v54  ;;  %v6410_v53 = vld [vmem:[#allocation142_spill] sm:$0xff] }
 0x139   :  { %871 = vmatpush.msrb.mxu0 %v6366_v63  ;;  %911 = vmatpush.msrb.mxu2 %v6367_v0  ;;  %v6417_v63 = vld [vmem:[#allocation149_spill] sm:$0xff]  ;;  %v6418_v0 = vld [vmem:[#allocation150_spill] sm:$0xff] }
 0x13a   :  { %826 = vmatpush.msra.mxu1 %v6368_v1  ;;  %866 = vmatpush.msra.mxu3 %v6369_v2  ;;  %v6419_v2 = vld [vmem:[#allocation151_spill] sm:$0xff] }
 0x13b   :  { %827 = vmatmul.f32.vlgmr.msra.gmra.mxu1 %v624_v61  ;;  %867 = vmatmul.f32.vlgmr.msra.gmra.mxu3 %v626_v62  ;;  %v6415_v61 = vld [vmem:[#allocation147_spill] sm:$0xff]  ;;  %v6416_v62 = vld [vmem:[#allocation148_spill] sm:$0xff] }
 0x13c   :  { %872 = vmatpush.msrb.mxu0 %v3052_v37  ;;  %891 = vmatpush.msrb.mxu1 %v6370_v3  ;;  %v6380_v37 = vld [vmem:[#allocation112_spill] sm:$0xff] }
 0x13d   :  { %912 = vmatpush.msrb.mxu2 %v6371_v4  ;;  %931 = vmatpush.msrb.mxu3 %v6372_v5  ;;  %v6421_v4 = vld [vmem:[#allocation153_spill] sm:$0xff]  ;;  %v6422_v5 = vld [vmem:[#allocation154_spill] sm:$0xff] }
 0x13e   :  { %873 = vmatpush.msrb.mxu0 %v6373_v6  ;;  %892 = vmatpush.msrb.mxu1 %v6374_v7  ;;  %v6423_v7 = vld [vmem:[#allocation155_spill] sm:$0xff] }
 0x13f   :  { %913 = vmatpush.msrb.mxu2 %v6375_v8  ;;  %932 = vmatpush.msrb.mxu3 %v6376_v9  ;;  %v552_v51 = vpop.f32.mrf.mxu0  ;;  %v6424_v8 = vld [vmem:[#allocation156_spill] sm:$0xff]  ;;  %v627_v9 = vld [vmem:[%s5725_s1 + $0x60] sm:$0xff] }
 0x140   :  { %874 = vmatpush.msrb.mxu0 %v6377_v10  ;;  %893 = vmatpush.msrb.mxu1 %v6378_v11  ;;  %v553_v54 = vadd.f32 %v552_v51, %v533_v60  ;;  %v6420_v60 = vld [vmem:[#allocation152_spill] sm:$0xff]  ;;  %v6425_v11 = vld [vmem:[#allocation157_spill] sm:$0xff] }
 0x141   :  { %914 = vmatpush.msrb.mxu2 %v6379_v12  ;;  %933 = vmatpush.msrb.mxu3 %v6380_v37  ;;  %v629_v10 = vld [vmem:[%s5725_s1 + $0x70] sm:$0xff]  ;;  %v6426_v37 = vld [vmem:[#allocation158_spill] sm:$0xff] }
 0x142   :  { %875 = vmatpush.msrb.mxu0 %v6381_v13  ;;  %894 = vmatpush.msrb.mxu1 %v6382_v14  ;;  %v6427_v13 = vld [vmem:[#allocation159_spill] sm:$0xff]  ;;  %v6457_v51 = vld [vmem:[#allocation188_spill] sm:$0xff] }
 0x143   :  { %915 = vmatpush.msrb.mxu2 %v6383_v15  ;;  %934 = vmatpush.msrb.mxu3 %v6384_v16  ;;  %v572_v59 = vpop.f32.mrf.mxu1  ;;  %v628_v15 = vld [vmem:[%s5725_s1 + $0x68] sm:$0xff]  ;;  %v630_v16 = vld [vmem:[%s5725_s1 + $0x78] sm:$0xff] }
 0x144   :  { %876 = vmatpush.msrb.mxu0 %v6385_v17  ;;  %895 = vmatpush.msrb.mxu1 %v6386_v18  ;;  %v573_v1 = vadd.f32 %v572_v59, %v553_v54  ;;  %v6430_v17 = vld [vmem:[#allocation160_spill] sm:$0xff]  ;;  %v6431_v18 = vld [vmem:[#allocation162_spill] sm:$0xff]  ;;  %v6460_v54 = vld [vmem:[#allocation191_spill] sm:$0xff] }
 0x145   :  { %916 = vmatpush.msrb.mxu2 %v6387_v19  ;;  %935 = vmatpush.msrb.mxu3 %v6388_v20  ;;  %v6432_v19 = vld [vmem:[#allocation163_spill] sm:$0xff]  ;;  %v6433_v20 = vld [vmem:[#allocation164_spill] sm:$0xff]  ;;  %v4026_v59 = vld [vmem:[%s5723_s4 + $0xa0] sm:$0xff] }
 0x146   :  { %877 = vmatpush.msrb.mxu0 %v6389_v21  ;;  %896 = vmatpush.msrb.mxu1 %v6390_v22  ;;  %v592_v3 = vpop.f32.mrf.mxu2  ;;  %v6434_v21 = vld [vmem:[#allocation165_spill] sm:$0xff]  ;;  %v6435_v22 = vld [vmem:[#allocation166_spill] sm:$0xff] }
 0x147   :  { %917 = vmatpush.msrb.mxu2 %v6391_v23  ;;  %936 = vmatpush.msrb.mxu3 %v6392_v24  ;;  %v593_v6 = vadd.f32 %v592_v3, %v573_v1  ;;  %v6436_v23 = vld [vmem:[#allocation167_spill] sm:$0xff]  ;;  %v6439_v24 = vld [vmem:[#allocation170_spill] sm:$0xff]  ;;  %v4056_v1 = vld [vmem:[%s5723_s4 + $0x110] sm:$0xff] }
 0x148   :  { %878 = vmatpush.msrb.mxu0 %v6393_v25  ;;  %897 = vmatpush.msrb.mxu1 %v6394_v26  ;;  %v6440_v25 = vld [vmem:[#allocation171_spill] sm:$0xff]  ;;  %v6442_v26 = vld [vmem:[#allocation173_spill] sm:$0xff]  ;;  %v4074_v3 = vld [vmem:[%s5723_s4 + $0x90] sm:$0xff] }
 0x149   :  { %918 = vmatpush.msrb.mxu2 %v6395_v27  ;;  %937 = vmatpush.msrb.mxu3 %v6396_v28  ;;  %v6443_v27 = vld [vmem:[#allocation174_spill] sm:$0xff]  ;;  %v6444_v28 = vld [vmem:[#allocation175_spill] sm:$0xff] }
 0x14a   :  { %879 = vmatpush.msrb.mxu0 %v6397_v29  ;;  %898 = vmatpush.msrb.mxu1 %v6398_v40  ;;  %v6445_v29 = vld [vmem:[#allocation176_spill] sm:$0xff]  ;;  %v6446_v40 = vld [vmem:[#allocation177_spill] sm:$0xff] }
 0x14b   :  { %919 = vmatpush.msrb.mxu2 %v6399_v41  ;;  %938 = vmatpush.msrb.mxu3 %v6400_v42  ;;  %v612_v12 = vpop.f32.mrf.mxu3  ;;  %v6447_v41 = vld [vmem:[#allocation178_spill] sm:$0xff]  ;;  %v6448_v42 = vld [vmem:[#allocation179_spill] sm:$0xff] }
 0x14c   :  { %880 = vmatpush.msrb.mxu0 %v6401_v43  ;;  %899 = vmatpush.msrb.mxu1 %v6402_v44  ;;  %v3926_v14 = vadd.f32 %v612_v12, %v593_v6  ;;  %v6449_v43 = vld [vmem:[#allocation180_spill] sm:$0xff]  ;;  %v6450_v44 = vld [vmem:[#allocation181_spill] sm:$0xff]  ;;  %v4092_v6 = vld [vmem:[%s5723_s4] sm:$0xff] }
 0x14d   :  { %920 = vmatpush.msrb.mxu2 %v6403_v45  ;;  %939 = vmatpush.msrb.mxu3 %v6404_v46  ;;  %v6451_v45 = vld [vmem:[#allocation182_spill] sm:$0xff]  ;;  %v6452_v46 = vld [vmem:[#allocation183_spill] sm:$0xff] }
 0x14e   :  { %881 = vmatpush.msrb.mxu0 %v6405_v47  ;;  %900 = vmatpush.msrb.mxu1 %v6406_v48  ;;  %6428 = vst [vmem:[#allocation2_spill] sm:$0xff] %v3926_v14  ;;  %v6453_v47 = vld [vmem:[#allocation184_spill] sm:$0xff]  ;;  %v6454_v48 = vld [vmem:[#allocation185_spill] sm:$0xff]  ;;  %v4128_v12 = vld [vmem:[%s5723_s4 + $0x80] sm:$0xff] }
 0x14f   :  { %921 = vmatpush.msrb.mxu2 %v6407_v49  ;;  %940 = vmatpush.msrb.mxu3 %v6408_v50  ;;  %v6455_v49 = vld [vmem:[#allocation186_spill] sm:$0xff]  ;;  %v6456_v50 = vld [vmem:[#allocation187_spill] sm:$0xff] }
 0x150   :  { %882 = vmatpush.msrb.mxu0 %v6409_v52  ;;  %901 = vmatpush.msrb.mxu1 %v6410_v53  ;;  %v6458_v52 = vld [vmem:[#allocation189_spill] sm:$0xff]  ;;  %v6459_v53 = vld [vmem:[#allocation190_spill] sm:$0xff]  ;;  %v4356_v14 = vld [vmem:[%s5723_s4 + $0x228] sm:$0xff] }
 0x151   :  { %922 = vmatpush.msrb.mxu2 %v6411_v55  ;;  %941 = vmatpush.msrb.mxu3 %v6412_v56  ;;  %v3973_v55 = vld [vmem:[%s5723_s4 + $0x30] sm:$0xff]  ;;  %6468 = vst [vmem:[#allocation9_spill] sm:$0xff] %v4356_v14 }
 0x152   :  { %883 = vmatpush.msrb.mxu0 %v6413_v57  ;;  %902 = vmatpush.msrb.mxu1 %v6414_v58  ;;  %v6461_v56 = vld [vmem:[#allocation192_spill] sm:$0xff]  ;;  %v3989_v57 = vld [vmem:[%s5723_s4 + $0x128] sm:$0xff]  ;;  %v4020_v58 = vld [vmem:[%s5723_s4 + $0x18] sm:$0xff] }
 0x153   :  { %923 = vmatpush.msrb.mxu2 %v6415_v61  ;;  %942 = vmatpush.msrb.mxu3 %v6416_v62  ;;  %v4032_v61 = vld [vmem:[%s5723_s4 + $0x118] sm:$0xff]  ;;  %v4038_v62 = vld [vmem:[%s5723_s4 + $0x1a0] sm:$0xff] }
 0x154   :  { %884 = vmatpush.msrb.mxu0 %v6417_v63  ;;  %903 = vmatpush.msrb.mxu1 %v6418_v0  ;;  %v4044_v63 = vld [vmem:[%s5723_s4 + $0x10] sm:$0xff]  ;;  %v4050_v0 = vld [vmem:[%s5723_s4 + $0x98] sm:$0xff] }
 0x155   :  { %924 = vmatpush.msrb.mxu2 %v6419_v2  ;;  %943 = vmatpush.msrb.mxu3 %v6420_v60  ;;  %v4062_v2 = vld [vmem:[%s5723_s4 + $0x198] sm:$0xff]  ;;  %v4068_v60 = vld [vmem:[%s5723_s4 + $0x8] sm:$0xff] }
 0x156   :  { %885 = vmatpush.msrb.mxu0 %v6421_v4  ;;  %904 = vmatpush.msrb.mxu1 %v6422_v5  ;;  %v4080_v4 = vld [vmem:[%s5723_s4 + $0x108] sm:$0xff]  ;;  %v4086_v5 = vld [vmem:[%s5723_s4 + $0x190] sm:$0xff] }
 0x157   :  { %925 = vmatpush.msrb.mxu2 %v6423_v7  ;;  %944 = vmatpush.msrb.mxu3 %v6424_v8  ;;  %v4098_v7 = vld [vmem:[%s5723_s4 + $0x88] sm:$0xff]  ;;  %v4104_v8 = vld [vmem:[%s5723_s4 + $0x100] sm:$0xff] }
 0x158   :  { %886 = vmatpush.msrb.mxu0 %v3386_v38  ;;  %905 = vmatpush.msrb.mxu1 %v6425_v11  ;;  %v6429_v38 = vld [vmem:[#allocation161_spill] sm:$0xff] }
 0x159   :  { %926 = vmatpush.msrb.mxu2 %v6426_v37  ;;  %945 = vmatpush.msrb.mxu3 %v6427_v13  ;;  %v4122_v11 = vld [vmem:[%s5723_s4 + $0x378] sm:$0xff]  ;;  %v4134_v37 = vld [vmem:[%s5723_s4 + $0x180] sm:$0xff]  ;;  %v4140_v13 = vld [vmem:[%s5723_s4 + $0x270] sm:$0xff] }
 0x15a   :  { %887 = vmatmul.f32.vlgmr.msrb.gmra.mxu0 %v627_v9  ;;  %927 = vmatmul.f32.vlgmr.msrb.gmra.mxu2 %v629_v10  ;;  %v4110_v9 = vld [vmem:[%s5723_s4 + $0x188] sm:$0xff]  ;;  %v4116_v10 = vld [vmem:[%s5723_s4 + $0x278] sm:$0xff] }
 0x15b   :  { %968 = vmatpush.msra.mxu0 %v6429_v38  ;;  %1008 = vmatpush.msra.mxu2 %v3442_v31  ;;  %v6437_v31 = vld [vmem:[#allocation168_spill] sm:$0xff]  ;;  %v4158_v38 = vld [vmem:[%s5723_s4 + $0x3f8] sm:$0xff] }
 0x15c   :  { %906 = vmatpush.msrb.mxu1 %v3420_v32  ;;  %946 = vmatpush.msrb.mxu3 %v6430_v17  ;;  %v6438_v32 = vld [vmem:[#allocation169_spill] sm:$0xff]  ;;  %v4164_v17 = vld [vmem:[%s5723_s4 + $0x268] sm:$0xff] }
 0x15d   :  { %907 = vmatmul.f32.vlgmr.msrb.gmra.mxu1 %v628_v15  ;;  %947 = vmatmul.f32.vlgmr.msrb.gmra.mxu3 %v630_v16  ;;  %v4146_v15 = vld [vmem:[%s5723_s4 + $0x2f8] sm:$0xff]  ;;  %v4152_v16 = vld [vmem:[%s5723_s4 + $0x370] sm:$0xff] }
 0x15e   :  { %969 = vmatpush.msra.mxu0 %v3450_v34  ;;  %988 = vmatpush.msra.mxu1 %v6431_v18  ;;  %v6441_v34 = vld [vmem:[#allocation172_spill] sm:$0xff] }
 0x15f   :  { %1009 = vmatpush.msra.mxu2 %v6432_v19  ;;  %1028 = vmatpush.msra.mxu3 %v6433_v20  ;;  %v4170_v18 = vld [vmem:[%s5723_s4 + $0x2f0] sm:$0xff]  ;;  %v4176_v19 = vld [vmem:[%s5723_s4 + $0x368] sm:$0xff] }
 0x160   :  { %970 = vmatpush.msra.mxu0 %v6434_v21  ;;  %989 = vmatpush.msra.mxu1 %v6435_v22  ;;  %v4182_v20 = vld [vmem:[%s5723_s4 + $0x3f0] sm:$0xff]  ;;  %v4188_v21 = vld [vmem:[%s5723_s4 + $0x260] sm:$0xff]  ;;  %v4194_v22 = vld [vmem:[%s5723_s4 + $0x2e8] sm:$0xff] }
 0x161   :  { %1010 = vmatpush.msra.mxu2 %v6436_v23  ;;  %1029 = vmatpush.msra.mxu3 %v6437_v31  ;;  %v4200_v23 = vld [vmem:[%s5723_s4 + $0x360] sm:$0xff]  ;;  %v4206_v31 = vld [vmem:[%s5723_s4 + $0x3e8] sm:$0xff] }
 0x162   :  { %971 = vmatpush.msra.mxu0 %v6438_v32  ;;  %990 = vmatpush.msra.mxu1 %v6439_v24  ;;  %v4212_v32 = vld [vmem:[%s5723_s4 + $0x258] sm:$0xff]  ;;  %v4218_v24 = vld [vmem:[%s5723_s4 + $0x2e0] sm:$0xff] }
 0x163   :  { %1011 = vmatpush.msra.mxu2 %v6440_v25  ;;  %1030 = vmatpush.msra.mxu3 %v6441_v34  ;;  %v4224_v25 = vld [vmem:[%s5723_s4 + $0x358] sm:$0xff]  ;;  %v4230_v34 = vld [vmem:[%s5723_s4 + $0x3e0] sm:$0xff] }
 0x164   :  { %972 = vmatpush.msra.mxu0 %v6442_v26  ;;  %991 = vmatpush.msra.mxu1 %v6443_v27  ;;  %v4236_v26 = vld [vmem:[%s5723_s4 + $0x250] sm:$0xff]  ;;  %v4242_v27 = vld [vmem:[%s5723_s4 + $0x2d8] sm:$0xff] }
 0x165   :  { %1012 = vmatpush.msra.mxu2 %v6444_v28  ;;  %1031 = vmatpush.msra.mxu3 %v6445_v29  ;;  %v4248_v28 = vld [vmem:[%s5723_s4 + $0x350] sm:$0xff]  ;;  %v4254_v29 = vld [vmem:[%s5723_s4 + $0x3d8] sm:$0xff] }
 0x166   :  { %973 = vmatpush.msra.mxu0 %v6446_v40  ;;  %992 = vmatpush.msra.mxu1 %v6447_v41  ;;  %v4260_v40 = vld [vmem:[%s5723_s4 + $0x248] sm:$0xff]  ;;  %v4266_v41 = vld [vmem:[%s5723_s4 + $0x2d0] sm:$0xff] }
 0x167   :  { %1013 = vmatpush.msra.mxu2 %v6448_v42  ;;  %1032 = vmatpush.msra.mxu3 %v6449_v43  ;;  %v4272_v42 = vld [vmem:[%s5723_s4 + $0x348] sm:$0xff]  ;;  %v4278_v43 = vld [vmem:[%s5723_s4 + $0x3d0] sm:$0xff] }
 0x168   :  { %974 = vmatpush.msra.mxu0 %v6450_v44  ;;  %993 = vmatpush.msra.mxu1 %v6451_v45  ;;  %v4284_v44 = vld [vmem:[%s5723_s4 + $0x240] sm:$0xff]  ;;  %v4290_v45 = vld [vmem:[%s5723_s4 + $0x2c8] sm:$0xff] }
 0x169   :  { %1014 = vmatpush.msra.mxu2 %v6452_v46  ;;  %1033 = vmatpush.msra.mxu3 %v6453_v47  ;;  %v4296_v46 = vld [vmem:[%s5723_s4 + $0x340] sm:$0xff]  ;;  %v4302_v47 = vld [vmem:[%s5723_s4 + $0x3c8] sm:$0xff] }
 0x16a   :  { %975 = vmatpush.msra.mxu0 %v6454_v48  ;;  %994 = vmatpush.msra.mxu1 %v6455_v49  ;;  %v4308_v48 = vld [vmem:[%s5723_s4 + $0x238] sm:$0xff]  ;;  %v4314_v49 = vld [vmem:[%s5723_s4 + $0x2c0] sm:$0xff] }
 0x16b   :  { %1015 = vmatpush.msra.mxu2 %v6456_v50  ;;  %1034 = vmatpush.msra.mxu3 %v6457_v51  ;;  %v4320_v50 = vld [vmem:[%s5723_s4 + $0x338] sm:$0xff]  ;;  %v4326_v51 = vld [vmem:[%s5723_s4 + $0x3c0] sm:$0xff] }
 0x16c   :  { %976 = vmatpush.msra.mxu0 %v3618_v39  ;;  %995 = vmatpush.msra.mxu1 %v6458_v52  ;;  %v3982_v39 = vld [vmem:[%s5723_s4 + $0x28] sm:$0xff]  ;;  %6462 = vst [vmem:[#allocation3_spill] sm:$0xff] %v4320_v50  ;;  %v4332_v52 = vld [vmem:[%s5723_s4 + $0x230] sm:$0xff] }
 0x16d   :  { %1016 = vmatpush.msra.mxu2 %v6459_v53  ;;  %1035 = vmatpush.msra.mxu3 %v6460_v54  ;;  %6463 = vst [vmem:[#allocation4_spill] sm:$0xff] %v4326_v51  ;;  %v4338_v53 = vld [vmem:[%s5723_s4 + $0x2b8] sm:$0xff]  ;;  %v4344_v54 = vld [vmem:[%s5723_s4 + $0x330] sm:$0xff] }
 0x16e   :  { %977 = vmatpush.msra.mxu0 %v3973_v55  ;;  %996 = vmatpush.msra.mxu1 %v3643_v30  ;;  %v3996_v30 = vld [vmem:[%s5723_s4 + $0x20] sm:$0xff]  ;;  %6464 = vst [vmem:[#allocation5_spill] sm:$0xff] %v4332_v52 }
 0x16f   :  { %1017 = vmatpush.msra.mxu2 %v6461_v56  ;;  %1036 = vmatpush.msra.mxu3 %v3655_v33  ;;  %v4002_v33 = vld [vmem:[%s5723_s4 + $0xa8] sm:$0xff]  ;;  %6465 = vst [vmem:[#allocation6_spill] sm:$0xff] %v4338_v53  ;;  %v4350_v56 = vld [vmem:[%s5723_s4 + $0x3b8] sm:$0xff] }
 0x170   :  { %978 = vmatpush.msra.mxu0 %v3982_v39  ;;  %997 = vmatpush.msra.mxu1 %v3662_v36  ;;  %v4008_v36 = vld [vmem:[%s5723_s4 + $0x120] sm:$0xff]  ;;  %6466 = vst [vmem:[#allocation7_spill] sm:$0xff] %v4344_v54 }
 0x171   :  { %1018 = vmatpush.msra.mxu2 %v3989_v57  ;;  %1037 = vmatpush.msra.mxu3 %v3669_v35  ;;  %v4014_v35 = vld [vmem:[%s5723_s4 + $0x1a8] sm:$0xff]  ;;  %6467 = vst [vmem:[#allocation8_spill] sm:$0xff] %v4350_v56 }
 0x172   :  { %979 = vmatpush.msra.mxu0 %v3996_v30  ;;  %998 = vmatpush.msra.mxu1 %v4002_v33 }
 0x173   :  { %1019 = vmatpush.msra.mxu2 %v4008_v36  ;;  %1038 = vmatpush.msra.mxu3 %v4014_v35 }
 0x174   :  { %980 = vmatpush.msra.mxu0 %v4020_v58  ;;  %999 = vmatpush.msra.mxu1 %v4026_v59 }
 0x175   :  { %1020 = vmatpush.msra.mxu2 %v4032_v61  ;;  %1039 = vmatpush.msra.mxu3 %v4038_v62 }
 0x176   :  { %981 = vmatpush.msra.mxu0 %v4044_v63  ;;  %1000 = vmatpush.msra.mxu1 %v4050_v0 }
 0x177   :  { %1021 = vmatpush.msra.mxu2 %v4056_v1  ;;  %1040 = vmatpush.msra.mxu3 %v4062_v2 }
 0x178   :  { %982 = vmatpush.msra.mxu0 %v4068_v60  ;;  %1001 = vmatpush.msra.mxu1 %v4074_v3 }
 0x179   :  { %1022 = vmatpush.msra.mxu2 %v4080_v4  ;;  %1041 = vmatpush.msra.mxu3 %v4086_v5 }
 0x17a   :  { %983 = vmatpush.msra.mxu0 %v4092_v6  ;;  %1002 = vmatpush.msra.mxu1 %v4098_v7 }
 0x17b   :  { %1023 = vmatpush.msra.mxu2 %v4104_v8  ;;  %1042 = vmatpush.msra.mxu3 %v4110_v9 }
 0x17c   :  { %1048 = vmatpush.msrb.mxu0 %v4116_v10  ;;  %1003 = vmatpush.msra.mxu1 %v4128_v12 }
 0x17d   :  { %1088 = vmatpush.msrb.mxu2 %v4122_v11  ;;  %1043 = vmatpush.msra.mxu3 %v4134_v37 }
 0x17e   :  { %1049 = vmatpush.msrb.mxu0 %v4140_v13  ;;  %1068 = vmatpush.msrb.mxu1 %v4146_v15 }
 0x17f   :  { %1089 = vmatpush.msrb.mxu2 %v4152_v16  ;;  %1108 = vmatpush.msrb.mxu3 %v4158_v38 }
 0x180   :  { %1050 = vmatpush.msrb.mxu0 %v4164_v17  ;;  %1069 = vmatpush.msrb.mxu1 %v4170_v18 }
 0x181   :  { %1090 = vmatpush.msrb.mxu2 %v4176_v19  ;;  %1109 = vmatpush.msrb.mxu3 %v4182_v20 }
 0x182   :  { %1051 = vmatpush.msrb.mxu0 %v4188_v21  ;;  %1070 = vmatpush.msrb.mxu1 %v4194_v22 }
 0x183   :  { %1091 = vmatpush.msrb.mxu2 %v4200_v23  ;;  %1110 = vmatpush.msrb.mxu3 %v4206_v31 }
 0x184   :  { %1052 = vmatpush.msrb.mxu0 %v4212_v32  ;;  %1071 = vmatpush.msrb.mxu1 %v4218_v24 }
 0x185   :  { %1092 = vmatpush.msrb.mxu2 %v4224_v25  ;;  %1111 = vmatpush.msrb.mxu3 %v4230_v34 }
 0x186   :  { %1053 = vmatpush.msrb.mxu0 %v4236_v26  ;;  %1072 = vmatpush.msrb.mxu1 %v4242_v27 }
 0x187   :  { %1093 = vmatpush.msrb.mxu2 %v4248_v28  ;;  %1112 = vmatpush.msrb.mxu3 %v4254_v29 }
 0x188   :  { %1054 = vmatpush.msrb.mxu0 %v4260_v40  ;;  %1073 = vmatpush.msrb.mxu1 %v4266_v41 }
 0x189   :  { %1094 = vmatpush.msrb.mxu2 %v4272_v42  ;;  %1113 = vmatpush.msrb.mxu3 %v4278_v43 }
 0x18a   :  { %1055 = vmatpush.msrb.mxu0 %v4284_v44  ;;  %1074 = vmatpush.msrb.mxu1 %v4290_v45 }
 0x18b   :  { %1095 = vmatpush.msrb.mxu2 %v4296_v46  ;;  %1114 = vmatpush.msrb.mxu3 %v4302_v47 }
 0x18c   :  { %1056 = vmatpush.msrb.mxu0 %v4308_v48  ;;  %1075 = vmatpush.msrb.mxu1 %v4314_v49 }
 0x18d   :  { %1096 = vmatpush.msrb.mxu2 %v4320_v50  ;;  %1115 = vmatpush.msrb.mxu3 %v4326_v51  ;;  %v953_v51 = vld [vmem:[%s5726_s2 + $0x8] sm:$0xff]  ;;  %v1893_v50 = vld [vmem:[%s5723_s4 + $0x178] sm:$0xff] }
 0x18e   :  { %1057 = vmatpush.msrb.mxu0 %v4332_v52  ;;  %1076 = vmatpush.msrb.mxu1 %v4338_v53  ;;  %v4362_v53 = vld [vmem:[%s5723_s4 + $0x2b0] sm:$0xff] }
 0x18f   :  { %1097 = vmatpush.msrb.mxu2 %v4344_v54  ;;  %1116 = vmatpush.msrb.mxu3 %v4350_v56  ;;  %6469 = vst [vmem:[#allocation10_spill] sm:$0xff] %v4362_v53  ;;  %v4368_v54 = vld [vmem:[%s5723_s4 + $0x328] sm:$0xff]  ;;  %v4374_v56 = vld [vmem:[%s5723_s4 + $0x3b0] sm:$0xff] }
 0x190   :  { %1058 = vmatpush.msrb.mxu0 %v4356_v14  ;;  %1077 = vmatpush.msrb.mxu1 %v4362_v53  ;;  %6470 = vst [vmem:[#allocation11_spill] sm:$0xff] %v4368_v54  ;;  %v4380_v14 = vld [vmem:[%s5723_s4 + $0x220] sm:$0xff]  ;;  %v4386_v53 = vld [vmem:[%s5723_s4 + $0x2a8] sm:$0xff]  ;;  %v4473_v52 = vld [vmem:[%s5723_s4 + $0x390] sm:$0xff] }
 0x191   :  { %1098 = vmatpush.msrb.mxu2 %v4368_v54  ;;  %6471 = vst [vmem:[#allocation12_spill] sm:$0xff] %v4374_v56  ;;  %1117 = vmatpush.msrb.mxu3 %v4374_v56  ;;  %v4392_v54 = vld [vmem:[%s5723_s4 + $0x320] sm:$0xff]  ;;  %v4398_v56 = vld [vmem:[%s5723_s4 + $0x3a8] sm:$0xff] }
 0x192   :  { %6472 = vst [vmem:[#allocation13_spill] sm:$0xff] %v4380_v14  ;;  %1059 = vmatpush.msrb.mxu0 %v4380_v14  ;;  %1078 = vmatpush.msrb.mxu1 %v4386_v53  ;;  %v4404_v14 = vld [vmem:[%s5723_s4 + $0x218] sm:$0xff] }
 0x193   :  { %6473 = vst [vmem:[#allocation14_spill] sm:$0xff] %v4386_v53  ;;  %1099 = vmatpush.msrb.mxu2 %v4392_v54  ;;  %1118 = vmatpush.msrb.mxu3 %v4398_v56  ;;  %v4410_v53 = vld [vmem:[%s5723_s4 + $0x2a0] sm:$0xff] }
 0x194   :  { %6474 = vst [vmem:[#allocation15_spill] sm:$0xff] %v4392_v54  ;;  %1060 = vmatpush.msrb.mxu0 %v4404_v14  ;;  %1079 = vmatpush.msrb.mxu1 %v4410_v53  ;;  %v4416_v54 = vld [vmem:[%s5723_s4 + $0x318] sm:$0xff] }
 0x195   :  { %6475 = vst [vmem:[#allocation16_spill] sm:$0xff] %v4398_v56  ;;  %1100 = vmatpush.msrb.mxu2 %v4416_v54  ;;  %v4422_v56 = vld [vmem:[%s5723_s4 + $0x3a0] sm:$0xff]  ;;  %1004 = vmatmul.f32.vlgmr.msra.gmra.mxu1 %v953_v51  ;;  %v4554_v51 = vld [vmem:[%s5723_s4 + $0x5f8] sm:$0xff] }
 0x196   :  { %6476 = vst [vmem:[#allocation17_spill] sm:$0xff] %v4404_v14  ;;  %1119 = vmatpush.msrb.mxu3 %v4422_v56  ;;  %v4428_v14 = vld [vmem:[%s5723_s4 + $0x210] sm:$0xff] }
 0x197   :  { %6477 = vst [vmem:[#allocation18_spill] sm:$0xff] %v4410_v53  ;;  %1061 = vmatpush.msrb.mxu0 %v4428_v14  ;;  %v4434_v53 = vld [vmem:[%s5723_s4 + $0x298] sm:$0xff] }
 0x198   :  { %6478 = vst [vmem:[#allocation19_spill] sm:$0xff] %v4416_v54  ;;  %1080 = vmatpush.msrb.mxu1 %v4434_v53  ;;  %v4440_v54 = vld [vmem:[%s5723_s4 + $0x310] sm:$0xff] }
 0x199   :  { %6479 = vst [vmem:[#allocation20_spill] sm:$0xff] %v4422_v56  ;;  %1101 = vmatpush.msrb.mxu2 %v4440_v54  ;;  %v4446_v56 = vld [vmem:[%s5723_s4 + $0x398] sm:$0xff] }
 0x19a   :  { %6480 = vst [vmem:[#allocation21_spill] sm:$0xff] %v4428_v14  ;;  %1120 = vmatpush.msrb.mxu3 %v4446_v56  ;;  %v954_v14 = vld [vmem:[%s5726_s2 + $0x10] sm:$0xff] }
 0x19b   :  { %6481 = vst [vmem:[#allocation22_spill] sm:$0xff] %v4434_v53  ;;  %v4455_v53 = vld [vmem:[%s5723_s4 + $0x208] sm:$0xff]  ;;  %1024 = vmatmul.f32.vlgmr.msra.gmra.mxu2 %v954_v14  ;;  %v4497_v14 = vld [vmem:[%s5723_s4 + $0x300] sm:$0xff] }
 0x19c   :  { %6482 = vst [vmem:[#allocation23_spill] sm:$0xff] %v4440_v54  ;;  %1062 = vmatpush.msrb.mxu0 %v4455_v53  ;;  %v4461_v54 = vld [vmem:[%s5723_s4 + $0x290] sm:$0xff]  ;;  %1121 = vmatpush.msrb.mxu3 %v4473_v52 }
 0x19d   :  { %6483 = vst [vmem:[#allocation24_spill] sm:$0xff] %v4446_v56  ;;  %1081 = vmatpush.msrb.mxu1 %v4461_v54  ;;  %v4467_v56 = vld [vmem:[%s5723_s4 + $0x308] sm:$0xff] }
 0x19e   :  { %6484 = vst [vmem:[#allocation25_spill] sm:$0xff] %v4455_v53  ;;  %1102 = vmatpush.msrb.mxu2 %v4467_v56  ;;  %v952_v53 = vld [vmem:[%s5726_s2] sm:$0xff] }
 0x19f   :  { %6485 = vst [vmem:[#allocation26_spill] sm:$0xff] %v4461_v54  ;;  %v4482_v54 = vld [vmem:[%s5723_s4 + $0x200] sm:$0xff]  ;;  %984 = vmatmul.f32.vlgmr.msra.gmra.mxu0 %v952_v53 }
 0x1a0   :  { %6486 = vst [vmem:[#allocation27_spill] sm:$0xff] %v4467_v56  ;;  %1063 = vmatpush.msrb.mxu0 %v4482_v54  ;;  %v955_v56 = vld [vmem:[%s5726_s2 + $0x18] sm:$0xff]  ;;  %1103 = vmatpush.msrb.mxu2 %v4497_v14  ;;  %v4524_v53 = vld [vmem:[%s5723_s4 + $0x280] sm:$0xff] }
 0x1a1   :  { %6487 = vst [vmem:[#allocation28_spill] sm:$0xff] %v4473_v52  ;;  %v4491_v52 = vld [vmem:[%s5723_s4 + $0x288] sm:$0xff]  ;;  %1044 = vmatmul.f32.vlgmr.msra.gmra.mxu3 %v955_v56  ;;  %v4530_v56 = vld [vmem:[%s5723_s4 + $0x380] sm:$0xff] }
 0x1a2   :  { %6488 = vst [vmem:[#allocation29_spill] sm:$0xff] %v4482_v54  ;;  %1082 = vmatpush.msrb.mxu1 %v4491_v52  ;;  %v4503_v54 = vld [vmem:[%s5723_s4 + $0x388] sm:$0xff] }
 0x1a3   :  { %6489 = vst [vmem:[#allocation30_spill] sm:$0xff] %v4491_v52  ;;  %1122 = vmatpush.msrb.mxu3 %v4503_v54  ;;  %v4512_v52 = vld [vmem:[%s5723_s4 + $0x478] sm:$0xff] }
 0x1a4   :  { %6490 = vst [vmem:[#allocation31_spill] sm:$0xff] %v4497_v14  ;;  %1128 = vmatpush.msra.mxu0 %v4512_v52  ;;  %v4518_v14 = vld [vmem:[%s5723_s4 + $0x578] sm:$0xff]  ;;  %1083 = vmatpush.msrb.mxu1 %v4524_v53 }
 0x1a5   :  { %6491 = vst [vmem:[#allocation32_spill] sm:$0xff] %v4503_v54  ;;  %1168 = vmatpush.msra.mxu2 %v4518_v14  ;;  %1123 = vmatpush.msrb.mxu3 %v4530_v56  ;;  %v957_v54 = vld [vmem:[%s5726_s2 + $0x28] sm:$0xff] }
 0x1a6   :  { %6492 = vst [vmem:[#allocation33_spill] sm:$0xff] %v4512_v52  ;;  %v4536_v52 = vld [vmem:[%s5723_s4 + $0x470] sm:$0xff]  ;;  %1084 = vmatmul.f32.vlgmr.msrb.gmra.mxu1 %v957_v54  ;;  %v4662_v54 = vld [vmem:[%s5723_s4 + $0x5d8] sm:$0xff] }
 0x1a7   :  { %6493 = vst [vmem:[#allocation34_spill] sm:$0xff] %v4518_v14  ;;  %1129 = vmatpush.msra.mxu0 %v4536_v52  ;;  %v4542_v14 = vld [vmem:[%s5723_s4 + $0x4f8] sm:$0xff]  ;;  %1188 = vmatpush.msra.mxu3 %v4554_v51 }
 0x1a8   :  { %6494 = vst [vmem:[#allocation35_spill] sm:$0xff] %v4524_v53  ;;  %1148 = vmatpush.msra.mxu1 %v4542_v14  ;;  %v4548_v53 = vld [vmem:[%s5723_s4 + $0x570] sm:$0xff] }
 0x1a9   :  { %6495 = vst [vmem:[#allocation36_spill] sm:$0xff] %v4530_v56  ;;  %1169 = vmatpush.msra.mxu2 %v4548_v53  ;;  %v4581_v56 = vld [vmem:[%s5723_s4 + $0x5f0] sm:$0xff] }
 0x1aa   :  { %6496 = vst [vmem:[#allocation37_spill] sm:$0xff] %v4536_v52  ;;  %v958_v52 = vld [vmem:[%s5726_s2 + $0x30] sm:$0xff]  ;;  %1189 = vmatpush.msra.mxu3 %v4581_v56 }
 0x1ab   :  { %6497 = vst [vmem:[#allocation38_spill] sm:$0xff] %v4542_v14  ;;  %v4563_v14 = vld [vmem:[%s5723_s4 + $0x468] sm:$0xff]  ;;  %1104 = vmatmul.f32.vlgmr.msrb.gmra.mxu2 %v958_v52  ;;  %v4605_v52 = vld [vmem:[%s5723_s4 + $0x560] sm:$0xff] }
 0x1ac   :  { %6498 = vst [vmem:[#allocation39_spill] sm:$0xff] %v4548_v53  ;;  %1130 = vmatpush.msra.mxu0 %v4563_v14  ;;  %v4569_v53 = vld [vmem:[%s5723_s4 + $0x4f0] sm:$0xff] }
 0x1ad   :  { %6499 = vst [vmem:[#allocation40_spill] sm:$0xff] %v4554_v51  ;;  %1149 = vmatpush.msra.mxu1 %v4569_v53  ;;  %v4575_v51 = vld [vmem:[%s5723_s4 + $0x568] sm:$0xff] }
 0x1ae   :  { %6500 = vst [vmem:[#allocation41_spill] sm:$0xff] %v4563_v14  ;;  %1170 = vmatpush.msra.mxu2 %v4575_v51  ;;  %v956_v14 = vld [vmem:[%s5726_s2 + $0x20] sm:$0xff] }
 0x1af   :  { %6501 = vst [vmem:[#allocation42_spill] sm:$0xff] %v4569_v53  ;;  %v4590_v53 = vld [vmem:[%s5723_s4 + $0x460] sm:$0xff]  ;;  %1064 = vmatmul.f32.vlgmr.msrb.gmra.mxu0 %v956_v14  ;;  %v4632_v14 = vld [vmem:[%s5723_s4 + $0x558] sm:$0xff] }
 0x1b0   :  { %6502 = vst [vmem:[#allocation43_spill] sm:$0xff] %v4575_v51  ;;  %1131 = vmatpush.msra.mxu0 %v4590_v53  ;;  %v959_v51 = vld [vmem:[%s5726_s2 + $0x38] sm:$0xff]  ;;  %1171 = vmatpush.msra.mxu2 %v4605_v52 }
 0x1b1   :  { %6503 = vst [vmem:[#allocation44_spill] sm:$0xff] %v4581_v56  ;;  %v4599_v56 = vld [vmem:[%s5723_s4 + $0x4e8] sm:$0xff]  ;;  %1124 = vmatmul.f32.vlgmr.msrb.gmra.mxu3 %v959_v51  ;;  %v4638_v51 = vld [vmem:[%s5723_s4 + $0x5e0] sm:$0xff] }
 0x1b2   :  { %6504 = vst [vmem:[#allocation45_spill] sm:$0xff] %v4590_v53  ;;  %1150 = vmatpush.msra.mxu1 %v4599_v56  ;;  %v4611_v53 = vld [vmem:[%s5723_s4 + $0x5e8] sm:$0xff]  ;;  %1172 = vmatpush.msra.mxu2 %v4632_v14 }
 0x1b3   :  { %6505 = vst [vmem:[#allocation46_spill] sm:$0xff] %v4599_v56  ;;  %1190 = vmatpush.msra.mxu3 %v4611_v53  ;;  %v4620_v56 = vld [vmem:[%s5723_s4 + $0x458] sm:$0xff] }
 0x1b4   :  { %6506 = vst [vmem:[#allocation47_spill] sm:$0xff] %v4605_v52  ;;  %1132 = vmatpush.msra.mxu0 %v4620_v56  ;;  %v4626_v52 = vld [vmem:[%s5723_s4 + $0x4e0] sm:$0xff] }
 0x1b5   :  { %6507 = vst [vmem:[#allocation48_spill] sm:$0xff] %v4611_v53  ;;  %1151 = vmatpush.msra.mxu1 %v4626_v52  ;;  %1191 = vmatpush.msra.mxu3 %v4638_v51  ;;  %v4908_v53 = vld [vmem:[%s5723_s4 + $0x588] sm:$0xff] }
 0x1b6   :  { %6508 = vst [vmem:[#allocation49_spill] sm:$0xff] %v4620_v56  ;;  %v4644_v56 = vld [vmem:[%s5723_s4 + $0x450] sm:$0xff] }
 0x1b7   :  { %6509 = vst [vmem:[#allocation50_spill] sm:$0xff] %v4626_v52  ;;  %1133 = vmatpush.msra.mxu0 %v4644_v56  ;;  %v4650_v52 = vld [vmem:[%s5723_s4 + $0x4d8] sm:$0xff]  ;;  %1192 = vmatpush.msra.mxu3 %v4662_v54 }
 0x1b8   :  { %6510 = vst [vmem:[#allocation51_spill] sm:$0xff] %v4632_v14  ;;  %1152 = vmatpush.msra.mxu1 %v4650_v52  ;;  %v4656_v14 = vld [vmem:[%s5723_s4 + $0x550] sm:$0xff] }
 0x1b9   :  { %6511 = vst [vmem:[#allocation52_spill] sm:$0xff] %v4638_v51  ;;  %1173 = vmatpush.msra.mxu2 %v4656_v14  ;;  %v4890_v51 = vld [vmem:[%s5723_s4 + $0x400] sm:$0xff] }
 0x1ba   :  { %6512 = vst [vmem:[#allocation53_spill] sm:$0xff] %v4644_v56  ;;  %v4668_v56 = vld [vmem:[%s5723_s4 + $0x448] sm:$0xff] }
 0x1bb   :  { %6513 = vst [vmem:[#allocation54_spill] sm:$0xff] %v4650_v52  ;;  %1134 = vmatpush.msra.mxu0 %v4668_v56  ;;  %v4674_v52 = vld [vmem:[%s5723_s4 + $0x4d0] sm:$0xff] }
 0x1bc   :  { %6514 = vst [vmem:[#allocation55_spill] sm:$0xff] %v4656_v14  ;;  %1153 = vmatpush.msra.mxu1 %v4674_v52  ;;  %v4680_v14 = vld [vmem:[%s5723_s4 + $0x548] sm:$0xff] }
 0x1bd   :  { %6515 = vst [vmem:[#allocation56_spill] sm:$0xff] %v4662_v54  ;;  %1174 = vmatpush.msra.mxu2 %v4680_v14  ;;  %v4686_v54 = vld [vmem:[%s5723_s4 + $0x5d0] sm:$0xff] }
 0x1be   :  { %6516 = vst [vmem:[#allocation57_spill] sm:$0xff] %v4668_v56  ;;  %1193 = vmatpush.msra.mxu3 %v4686_v54  ;;  %v4692_v56 = vld [vmem:[%s5723_s4 + $0x440] sm:$0xff] }
 0x1bf   :  { %6517 = vst [vmem:[#allocation58_spill] sm:$0xff] %v4674_v52  ;;  %1135 = vmatpush.msra.mxu0 %v4692_v56  ;;  %v4698_v52 = vld [vmem:[%s5723_s4 + $0x4c8] sm:$0xff] }
 0x1c0   :  { %6518 = vst [vmem:[#allocation59_spill] sm:$0xff] %v4680_v14  ;;  %1154 = vmatpush.msra.mxu1 %v4698_v52  ;;  %v4704_v14 = vld [vmem:[%s5723_s4 + $0x540] sm:$0xff] }
 0x1c1   :  { %6519 = vst [vmem:[#allocation60_spill] sm:$0xff] %v4686_v54  ;;  %1175 = vmatpush.msra.mxu2 %v4704_v14  ;;  %v4710_v54 = vld [vmem:[%s5723_s4 + $0x5c8] sm:$0xff] }
 0x1c2   :  { %6520 = vst [vmem:[#allocation61_spill] sm:$0xff] %v4692_v56  ;;  %1194 = vmatpush.msra.mxu3 %v4710_v54  ;;  %v4716_v56 = vld [vmem:[%s5723_s4 + $0x438] sm:$0xff] }
 0x1c3   :  { %6521 = vst [vmem:[#allocation62_spill] sm:$0xff] %v4698_v52  ;;  %1136 = vmatpush.msra.mxu0 %v4716_v56  ;;  %v4722_v52 = vld [vmem:[%s5723_s4 + $0x4c0] sm:$0xff] }
 0x1c4   :  { %6522 = vst [vmem:[#allocation63_spill] sm:$0xff] %v4704_v14  ;;  %1155 = vmatpush.msra.mxu1 %v4722_v52  ;;  %v4728_v14 = vld [vmem:[%s5723_s4 + $0x538] sm:$0xff] }
 0x1c5   :  { %6523 = vst [vmem:[#allocation64_spill] sm:$0xff] %v4710_v54  ;;  %1176 = vmatpush.msra.mxu2 %v4728_v14  ;;  %v4734_v54 = vld [vmem:[%s5723_s4 + $0x5c0] sm:$0xff] }
 0x1c6   :  { %6524 = vst [vmem:[#allocation65_spill] sm:$0xff] %v4716_v56  ;;  %1195 = vmatpush.msra.mxu3 %v4734_v54  ;;  %v4740_v56 = vld [vmem:[%s5723_s4 + $0x430] sm:$0xff] }
 0x1c7   :  { %6525 = vst [vmem:[#allocation66_spill] sm:$0xff] %v4722_v52  ;;  %1137 = vmatpush.msra.mxu0 %v4740_v56  ;;  %v4746_v52 = vld [vmem:[%s5723_s4 + $0x4b8] sm:$0xff] }
 0x1c8   :  { %6526 = vst [vmem:[#allocation67_spill] sm:$0xff] %v4728_v14  ;;  %1156 = vmatpush.msra.mxu1 %v4746_v52  ;;  %v4752_v14 = vld [vmem:[%s5723_s4 + $0x530] sm:$0xff] }
 0x1c9   :  { %6527 = vst [vmem:[#allocation68_spill] sm:$0xff] %v4734_v54  ;;  %1177 = vmatpush.msra.mxu2 %v4752_v14  ;;  %v4758_v54 = vld [vmem:[%s5723_s4 + $0x5b8] sm:$0xff] }
 0x1ca   :  { %6528 = vst [vmem:[#allocation69_spill] sm:$0xff] %v4740_v56  ;;  %1196 = vmatpush.msra.mxu3 %v4758_v54  ;;  %v4764_v56 = vld [vmem:[%s5723_s4 + $0x428] sm:$0xff] }
 0x1cb   :  { %6529 = vst [vmem:[#allocation70_spill] sm:$0xff] %v4746_v52  ;;  %1138 = vmatpush.msra.mxu0 %v4764_v56  ;;  %v4770_v52 = vld [vmem:[%s5723_s4 + $0x4b0] sm:$0xff] }
 0x1cc   :  { %6530 = vst [vmem:[#allocation71_spill] sm:$0xff] %v4752_v14  ;;  %1157 = vmatpush.msra.mxu1 %v4770_v52  ;;  %v4776_v14 = vld [vmem:[%s5723_s4 + $0x528] sm:$0xff] }
 0x1cd   :  { %6531 = vst [vmem:[#allocation72_spill] sm:$0xff] %v4758_v54  ;;  %1178 = vmatpush.msra.mxu2 %v4776_v14  ;;  %v4782_v54 = vld [vmem:[%s5723_s4 + $0x5b0] sm:$0xff] }
 0x1ce   :  { %6532 = vst [vmem:[#allocation73_spill] sm:$0xff] %v4764_v56  ;;  %1197 = vmatpush.msra.mxu3 %v4782_v54  ;;  %v4788_v56 = vld [vmem:[%s5723_s4 + $0x420] sm:$0xff] }
 0x1cf   :  { %6533 = vst [vmem:[#allocation74_spill] sm:$0xff] %v4770_v52  ;;  %1139 = vmatpush.msra.mxu0 %v4788_v56  ;;  %v4794_v52 = vld [vmem:[%s5723_s4 + $0x4a8] sm:$0xff] }
 0x1d0   :  { %6534 = vst [vmem:[#allocation75_spill] sm:$0xff] %v4776_v14  ;;  %1158 = vmatpush.msra.mxu1 %v4794_v52  ;;  %v4800_v14 = vld [vmem:[%s5723_s4 + $0x520] sm:$0xff] }
 0x1d1   :  { %6535 = vst [vmem:[#allocation76_spill] sm:$0xff] %v4782_v54  ;;  %1179 = vmatpush.msra.mxu2 %v4800_v14  ;;  %v4806_v54 = vld [vmem:[%s5723_s4 + $0x5a8] sm:$0xff] }
 0x1d2   :  { %6536 = vst [vmem:[#allocation77_spill] sm:$0xff] %v4788_v56  ;;  %1198 = vmatpush.msra.mxu3 %v4806_v54  ;;  %v4812_v56 = vld [vmem:[%s5723_s4 + $0x418] sm:$0xff] }
 0x1d3   :  { %6537 = vst [vmem:[#allocation78_spill] sm:$0xff] %v4794_v52  ;;  %1140 = vmatpush.msra.mxu0 %v4812_v56  ;;  %v4818_v52 = vld [vmem:[%s5723_s4 + $0x4a0] sm:$0xff] }
 0x1d4   :  { %6538 = vst [vmem:[#allocation79_spill] sm:$0xff] %v4800_v14  ;;  %1159 = vmatpush.msra.mxu1 %v4818_v52  ;;  %v4824_v14 = vld [vmem:[%s5723_s4 + $0x518] sm:$0xff] }
 0x1d5   :  { %6539 = vst [vmem:[#allocation80_spill] sm:$0xff] %v4806_v54  ;;  %1180 = vmatpush.msra.mxu2 %v4824_v14  ;;  %v4830_v54 = vld [vmem:[%s5723_s4 + $0x5a0] sm:$0xff] }
 0x1d6   :  { %6540 = vst [vmem:[#allocation81_spill] sm:$0xff] %v4812_v56  ;;  %1199 = vmatpush.msra.mxu3 %v4830_v54  ;;  %v4836_v56 = vld [vmem:[%s5723_s4 + $0x410] sm:$0xff] }
 0x1d7   :  { %6541 = vst [vmem:[#allocation82_spill] sm:$0xff] %v4818_v52  ;;  %1141 = vmatpush.msra.mxu0 %v4836_v56  ;;  %v4842_v52 = vld [vmem:[%s5723_s4 + $0x498] sm:$0xff] }
 0x1d8   :  { %6542 = vst [vmem:[#allocation83_spill] sm:$0xff] %v4824_v14  ;;  %1160 = vmatpush.msra.mxu1 %v4842_v52  ;;  %v4848_v14 = vld [vmem:[%s5723_s4 + $0x510] sm:$0xff] }
 0x1d9   :  { %6543 = vst [vmem:[#allocation84_spill] sm:$0xff] %v4830_v54  ;;  %1181 = vmatpush.msra.mxu2 %v4848_v14  ;;  %v4854_v54 = vld [vmem:[%s5723_s4 + $0x598] sm:$0xff] }
 0x1da   :  { %6544 = vst [vmem:[#allocation85_spill] sm:$0xff] %v4836_v56  ;;  %1200 = vmatpush.msra.mxu3 %v4854_v54  ;;  %v4860_v56 = vld [vmem:[%s5723_s4 + $0x408] sm:$0xff] }
 0x1db   :  { %6545 = vst [vmem:[#allocation86_spill] sm:$0xff] %v4842_v52  ;;  %1142 = vmatpush.msra.mxu0 %v4860_v56  ;;  %v4866_v52 = vld [vmem:[%s5723_s4 + $0x490] sm:$0xff] }
 0x1dc   :  { %6546 = vst [vmem:[#allocation87_spill] sm:$0xff] %v4848_v14  ;;  %1161 = vmatpush.msra.mxu1 %v4866_v52  ;;  %v4872_v14 = vld [vmem:[%s5723_s4 + $0x508] sm:$0xff] }
 0x1dd   :  { %6547 = vst [vmem:[#allocation88_spill] sm:$0xff] %v4854_v54  ;;  %1182 = vmatpush.msra.mxu2 %v4872_v14  ;;  %v4878_v54 = vld [vmem:[%s5723_s4 + $0x590] sm:$0xff]  ;;  %1143 = vmatpush.msra.mxu0 %v4890_v51 }
 0x1de   :  { %6548 = vst [vmem:[#allocation89_spill] sm:$0xff] %v4860_v56  ;;  %1201 = vmatpush.msra.mxu3 %v4878_v54  ;;  %v960_v56 = vld [vmem:[%s5726_s2 + $0x40] sm:$0xff] }
 0x1df   :  { %6549 = vst [vmem:[#allocation90_spill] sm:$0xff] %v4866_v52  ;;  %v962_v52 = vld [vmem:[%s5726_s2 + $0x50] sm:$0xff]  ;;  %1144 = vmatmul.f32.vlgmr.msra.gmra.mxu0 %v960_v56  ;;  %v4926_v56 = vld [vmem:[%s5723_s4 + $0x778] sm:$0xff] }
 0x1e0   :  { %6550 = vst [vmem:[#allocation91_spill] sm:$0xff] %v4872_v14  ;;  %v4896_v14 = vld [vmem:[%s5723_s4 + $0x488] sm:$0xff]  ;;  %1202 = vmatpush.msra.mxu3 %v4908_v53 }
 0x1e1   :  { %6551 = vst [vmem:[#allocation92_spill] sm:$0xff] %v4878_v54  ;;  %1162 = vmatpush.msra.mxu1 %v4896_v14  ;;  %v4902_v54 = vld [vmem:[%s5723_s4 + $0x500] sm:$0xff] }
 0x1e2   :  { %6552 = vst [vmem:[#allocation93_spill] sm:$0xff] %v4890_v51  ;;  %1183 = vmatpush.msra.mxu2 %v4902_v54  ;;  %v963_v51 = vld [vmem:[%s5726_s2 + $0x58] sm:$0xff] }
 0x1e3   :  { %6553 = vst [vmem:[#allocation94_spill] sm:$0xff] %v4896_v14  ;;  %1184 = vmatmul.f32.vlgmr.msra.gmra.mxu2 %v962_v52  ;;  %v961_v14 = vld [vmem:[%s5726_s2 + $0x48] sm:$0xff]  ;;  %v4932_v52 = vld [vmem:[%s5723_s4 + $0x480] sm:$0xff] }
 0x1e4   :  { %6554 = vst [vmem:[#allocation95_spill] sm:$0xff] %v4902_v54  ;;  %v4920_v54 = vld [vmem:[%s5723_s4 + $0x678] sm:$0xff]  ;;  %1248 = vmatpush.msrb.mxu2 %v4926_v56  ;;  %1163 = vmatpush.msra.mxu1 %v4932_v52 }
 0x1e5   :  { %6555 = vst [vmem:[#allocation96_spill] sm:$0xff] %v4908_v53  ;;  %1208 = vmatpush.msrb.mxu0 %v4920_v54  ;;  %v4938_v53 = vld [vmem:[%s5723_s4 + $0x580] sm:$0xff]  ;;  %1164 = vmatmul.f32.vlgmr.msra.gmra.mxu1 %v961_v14  ;;  %v4962_v14 = vld [vmem:[%s5723_s4 + $0x7f8] sm:$0xff] }
 0x1e6   :  { %6556 = vst [vmem:[#allocation97_spill] sm:$0xff] %v4920_v54  ;;  %1203 = vmatpush.msra.mxu3 %v4938_v53  ;;  %v5304_v54 = vld [vmem:[%s5723_s4 + $0x788] sm:$0xff] }
 0x1e7   :  { %6557 = vst [vmem:[#allocation98_spill] sm:$0xff] %v4926_v56  ;;  %1204 = vmatmul.f32.vlgmr.msra.gmra.mxu3 %v963_v51  ;;  %v4944_v56 = vld [vmem:[%s5723_s4 + $0x670] sm:$0xff]  ;;  %v4968_v51 = vld [vmem:[%s5723_s4 + $0x668] sm:$0xff] }
 0x1e8   :  { %6558 = vst [vmem:[#allocation99_spill] sm:$0xff] %v4932_v52  ;;  %1209 = vmatpush.msrb.mxu0 %v4944_v56  ;;  %v4950_v52 = vld [vmem:[%s5723_s4 + $0x6f8] sm:$0xff]  ;;  %1268 = vmatpush.msrb.mxu3 %v4962_v14 }
 0x1e9   :  { %6559 = vst [vmem:[#allocation100_spill] sm:$0xff] %v4938_v53  ;;  %1228 = vmatpush.msrb.mxu1 %v4950_v52  ;;  %v4956_v53 = vld [vmem:[%s5723_s4 + $0x770] sm:$0xff] }
 0x1ea   :  { %6560 = vst [vmem:[#allocation101_spill] sm:$0xff] %v4944_v56  ;;  %1249 = vmatpush.msrb.mxu2 %v4956_v53  ;;  %1210 = vmatpush.msrb.mxu0 %v4968_v51  ;;  %v5286_v56 = vld [vmem:[%s5723_s4 + $0x600] sm:$0xff] }
 0x1eb   :  { %6561 = vst [vmem:[#allocation102_spill] sm:$0xff] %v4950_v52  ;;  %v4974_v52 = vld [vmem:[%s5723_s4 + $0x6f0] sm:$0xff] }
 0x1ec   :  { %6562 = vst [vmem:[#allocation103_spill] sm:$0xff] %v4956_v53  ;;  %1229 = vmatpush.msrb.mxu1 %v4974_v52  ;;  %v4980_v53 = vld [vmem:[%s5723_s4 + $0x768] sm:$0xff] }
 0x1ed   :  { %6563 = vst [vmem:[#allocation104_spill] sm:$0xff] %v4962_v14  ;;  %1250 = vmatpush.msrb.mxu2 %v4980_v53  ;;  %v4986_v14 = vld [vmem:[%s5723_s4 + $0x7f0] sm:$0xff] }
 0x1ee   :  { %6564 = vst [vmem:[#allocation105_spill] sm:$0xff] %v4968_v51  ;;  %1269 = vmatpush.msrb.mxu3 %v4986_v14  ;;  %v4992_v51 = vld [vmem:[%s5723_s4 + $0x660] sm:$0xff] }
 0x1ef   :  { %6565 = vst [vmem:[#allocation106_spill] sm:$0xff] %v4974_v52  ;;  %1211 = vmatpush.msrb.mxu0 %v4992_v51  ;;  %v4998_v52 = vld [vmem:[%s5723_s4 + $0x6e8] sm:$0xff] }
 0x1f0   :  { %6566 = vst [vmem:[#allocation107_spill] sm:$0xff] %v4980_v53  ;;  %1230 = vmatpush.msrb.mxu1 %v4998_v52  ;;  %v5004_v53 = vld [vmem:[%s5723_s4 + $0x760] sm:$0xff] }
 0x1f1   :  { %6567 = vst [vmem:[#allocation108_spill] sm:$0xff] %v4986_v14  ;;  %1251 = vmatpush.msrb.mxu2 %v5004_v53  ;;  %v5010_v14 = vld [vmem:[%s5723_s4 + $0x7e8] sm:$0xff] }
 0x1f2   :  { %6568 = vst [vmem:[#allocation109_spill] sm:$0xff] %v4992_v51  ;;  %1270 = vmatpush.msrb.mxu3 %v5010_v14  ;;  %v5016_v51 = vld [vmem:[%s5723_s4 + $0x658] sm:$0xff] }
 0x1f3   :  { %6569 = vst [vmem:[#allocation110_spill] sm:$0xff] %v4998_v52  ;;  %1212 = vmatpush.msrb.mxu0 %v5016_v51  ;;  %v5022_v52 = vld [vmem:[%s5723_s4 + $0x6e0] sm:$0xff] }
 0x1f4   :  { %6570 = vst [vmem:[#allocation111_spill] sm:$0xff] %v5004_v53  ;;  %1231 = vmatpush.msrb.mxu1 %v5022_v52  ;;  %v5028_v53 = vld [vmem:[%s5723_s4 + $0x758] sm:$0xff] }
 0x1f5   :  { %6571 = vst [vmem:[#allocation112_spill] sm:$0xff] %v5010_v14  ;;  %1252 = vmatpush.msrb.mxu2 %v5028_v53  ;;  %v5034_v14 = vld [vmem:[%s5723_s4 + $0x7e0] sm:$0xff] }
 0x1f6   :  { %6572 = vst [vmem:[#allocation113_spill] sm:$0xff] %v5016_v51  ;;  %1271 = vmatpush.msrb.mxu3 %v5034_v14  ;;  %v5040_v51 = vld [vmem:[%s5723_s4 + $0x650] sm:$0xff] }
 0x1f7   :  { %6573 = vst [vmem:[#allocation114_spill] sm:$0xff] %v5022_v52  ;;  %1213 = vmatpush.msrb.mxu0 %v5040_v51  ;;  %v5046_v52 = vld [vmem:[%s5723_s4 + $0x6d8] sm:$0xff] }
 0x1f8   :  { %6574 = vst [vmem:[#allocation115_spill] sm:$0xff] %v5028_v53  ;;  %1232 = vmatpush.msrb.mxu1 %v5046_v52  ;;  %v5052_v53 = vld [vmem:[%s5723_s4 + $0x750] sm:$0xff] }
 0x1f9   :  { %6575 = vst [vmem:[#allocation116_spill] sm:$0xff] %v5034_v14  ;;  %1253 = vmatpush.msrb.mxu2 %v5052_v53  ;;  %v5058_v14 = vld [vmem:[%s5723_s4 + $0x7d8] sm:$0xff] }
 0x1fa   :  { %6576 = vst [vmem:[#allocation117_spill] sm:$0xff] %v5040_v51  ;;  %1272 = vmatpush.msrb.mxu3 %v5058_v14  ;;  %v5064_v51 = vld [vmem:[%s5723_s4 + $0x648] sm:$0xff] }
 0x1fb   :  { %6577 = vst [vmem:[#allocation118_spill] sm:$0xff] %v5046_v52  ;;  %1214 = vmatpush.msrb.mxu0 %v5064_v51  ;;  %v5070_v52 = vld [vmem:[%s5723_s4 + $0x6d0] sm:$0xff] }
 0x1fc   :  { %6578 = vst [vmem:[#allocation119_spill] sm:$0xff] %v5052_v53  ;;  %1233 = vmatpush.msrb.mxu1 %v5070_v52  ;;  %v5076_v53 = vld [vmem:[%s5723_s4 + $0x748] sm:$0xff] }
 0x1fd   :  { %6579 = vst [vmem:[#allocation120_spill] sm:$0xff] %v5058_v14  ;;  %1254 = vmatpush.msrb.mxu2 %v5076_v53  ;;  %v5082_v14 = vld [vmem:[%s5723_s4 + $0x7d0] sm:$0xff] }
 0x1fe   :  { %6580 = vst [vmem:[#allocation121_spill] sm:$0xff] %v5064_v51  ;;  %1273 = vmatpush.msrb.mxu3 %v5082_v14  ;;  %v5088_v51 = vld [vmem:[%s5723_s4 + $0x640] sm:$0xff] }
 0x1ff   :  { %6581 = vst [vmem:[#allocation122_spill] sm:$0xff] %v5070_v52  ;;  %1215 = vmatpush.msrb.mxu0 %v5088_v51  ;;  %v5094_v52 = vld [vmem:[%s5723_s4 + $0x6c8] sm:$0xff] }
 0x200   :  { %6582 = vst [vmem:[#allocation123_spill] sm:$0xff] %v5076_v53  ;;  %1234 = vmatpush.msrb.mxu1 %v5094_v52  ;;  %v5100_v53 = vld [vmem:[%s5723_s4 + $0x740] sm:$0xff] }
 0x201   :  { %6583 = vst [vmem:[#allocation124_spill] sm:$0xff] %v5082_v14  ;;  %1255 = vmatpush.msrb.mxu2 %v5100_v53  ;;  %v5106_v14 = vld [vmem:[%s5723_s4 + $0x7c8] sm:$0xff] }
 0x202   :  { %6584 = vst [vmem:[#allocation125_spill] sm:$0xff] %v5088_v51  ;;  %1274 = vmatpush.msrb.mxu3 %v5106_v14  ;;  %v5112_v51 = vld [vmem:[%s5723_s4 + $0x638] sm:$0xff] }
 0x203   :  { %6585 = vst [vmem:[#allocation126_spill] sm:$0xff] %v5094_v52  ;;  %1216 = vmatpush.msrb.mxu0 %v5112_v51  ;;  %v5118_v52 = vld [vmem:[%s5723_s4 + $0x6c0] sm:$0xff] }
 0x204   :  { %6586 = vst [vmem:[#allocation127_spill] sm:$0xff] %v5100_v53  ;;  %1235 = vmatpush.msrb.mxu1 %v5118_v52  ;;  %v5124_v53 = vld [vmem:[%s5723_s4 + $0x738] sm:$0xff] }
 0x205   :  { %6587 = vst [vmem:[#allocation128_spill] sm:$0xff] %v5106_v14  ;;  %1256 = vmatpush.msrb.mxu2 %v5124_v53  ;;  %v5130_v14 = vld [vmem:[%s5723_s4 + $0x7c0] sm:$0xff] }
 0x206   :  { %6588 = vst [vmem:[#allocation129_spill] sm:$0xff] %v5112_v51  ;;  %1275 = vmatpush.msrb.mxu3 %v5130_v14  ;;  %v5136_v51 = vld [vmem:[%s5723_s4 + $0x630] sm:$0xff] }
 0x207   :  { %6589 = vst [vmem:[#allocation130_spill] sm:$0xff] %v5118_v52  ;;  %1217 = vmatpush.msrb.mxu0 %v5136_v51  ;;  %v5142_v52 = vld [vmem:[%s5723_s4 + $0x6b8] sm:$0xff] }
 0x208   :  { %6590 = vst [vmem:[#allocation131_spill] sm:$0xff] %v5124_v53  ;;  %1236 = vmatpush.msrb.mxu1 %v5142_v52  ;;  %v5148_v53 = vld [vmem:[%s5723_s4 + $0x730] sm:$0xff] }
 0x209   :  { %6591 = vst [vmem:[#allocation132_spill] sm:$0xff] %v5130_v14  ;;  %1257 = vmatpush.msrb.mxu2 %v5148_v53  ;;  %v5154_v14 = vld [vmem:[%s5723_s4 + $0x7b8] sm:$0xff] }
 0x20a   :  { %6592 = vst [vmem:[#allocation133_spill] sm:$0xff] %v5136_v51  ;;  %1276 = vmatpush.msrb.mxu3 %v5154_v14  ;;  %v5160_v51 = vld [vmem:[%s5723_s4 + $0x628] sm:$0xff] }
 0x20b   :  { %6593 = vst [vmem:[#allocation134_spill] sm:$0xff] %v5142_v52  ;;  %1218 = vmatpush.msrb.mxu0 %v5160_v51  ;;  %v5166_v52 = vld [vmem:[%s5723_s4 + $0x6b0] sm:$0xff] }
 0x20c   :  { %6594 = vst [vmem:[#allocation135_spill] sm:$0xff] %v5148_v53  ;;  %1237 = vmatpush.msrb.mxu1 %v5166_v52  ;;  %v5172_v53 = vld [vmem:[%s5723_s4 + $0x728] sm:$0xff] }
 0x20d   :  { %6595 = vst [vmem:[#allocation136_spill] sm:$0xff] %v5154_v14  ;;  %1258 = vmatpush.msrb.mxu2 %v5172_v53  ;;  %v5178_v14 = vld [vmem:[%s5723_s4 + $0x7b0] sm:$0xff] }
 0x20e   :  { %6596 = vst [vmem:[#allocation137_spill] sm:$0xff] %v5160_v51  ;;  %1277 = vmatpush.msrb.mxu3 %v5178_v14  ;;  %v5184_v51 = vld [vmem:[%s5723_s4 + $0x620] sm:$0xff] }
 0x20f   :  { %6597 = vst [vmem:[#allocation138_spill] sm:$0xff] %v5166_v52  ;;  %1219 = vmatpush.msrb.mxu0 %v5184_v51  ;;  %v5190_v52 = vld [vmem:[%s5723_s4 + $0x6a8] sm:$0xff] }
 0x210   :  { %6598 = vst [vmem:[#allocation139_spill] sm:$0xff] %v5172_v53  ;;  %1238 = vmatpush.msrb.mxu1 %v5190_v52  ;;  %v5196_v53 = vld [vmem:[%s5723_s4 + $0x720] sm:$0xff] }
 0x211   :  { %6599 = vst [vmem:[#allocation140_spill] sm:$0xff] %v5178_v14  ;;  %1259 = vmatpush.msrb.mxu2 %v5196_v53  ;;  %v5202_v14 = vld [vmem:[%s5723_s4 + $0x7a8] sm:$0xff] }
 0x212   :  { %6600 = vst [vmem:[#allocation141_spill] sm:$0xff] %v5184_v51  ;;  %1278 = vmatpush.msrb.mxu3 %v5202_v14  ;;  %v5208_v51 = vld [vmem:[%s5723_s4 + $0x618] sm:$0xff] }
 0x213   :  { %6601 = vst [vmem:[#allocation142_spill] sm:$0xff] %v5190_v52  ;;  %1220 = vmatpush.msrb.mxu0 %v5208_v51  ;;  %v5214_v52 = vld [vmem:[%s5723_s4 + $0x6a0] sm:$0xff] }
 0x214   :  { %6602 = vst [vmem:[#allocation143_spill] sm:$0xff] %v5196_v53  ;;  %1239 = vmatpush.msrb.mxu1 %v5214_v52  ;;  %v5220_v53 = vld [vmem:[%s5723_s4 + $0x718] sm:$0xff] }
 0x215   :  { %6603 = vst [vmem:[#allocation144_spill] sm:$0xff] %v5202_v14  ;;  %1260 = vmatpush.msrb.mxu2 %v5220_v53  ;;  %v5226_v14 = vld [vmem:[%s5723_s4 + $0x7a0] sm:$0xff] }
 0x216   :  { %6604 = vst [vmem:[#allocation145_spill] sm:$0xff] %v5208_v51  ;;  %1279 = vmatpush.msrb.mxu3 %v5226_v14  ;;  %v5232_v51 = vld [vmem:[%s5723_s4 + $0x610] sm:$0xff] }
 0x217   :  { %6605 = vst [vmem:[#allocation146_spill] sm:$0xff] %v5214_v52  ;;  %1221 = vmatpush.msrb.mxu0 %v5232_v51  ;;  %v5238_v52 = vld [vmem:[%s5723_s4 + $0x698] sm:$0xff] }
 0x218   :  { %6606 = vst [vmem:[#allocation147_spill] sm:$0xff] %v5220_v53  ;;  %1240 = vmatpush.msrb.mxu1 %v5238_v52  ;;  %v5244_v53 = vld [vmem:[%s5723_s4 + $0x710] sm:$0xff] }
 0x219   :  { %6607 = vst [vmem:[#allocation148_spill] sm:$0xff] %v5226_v14  ;;  %1261 = vmatpush.msrb.mxu2 %v5244_v53  ;;  %v5250_v14 = vld [vmem:[%s5723_s4 + $0x798] sm:$0xff] }
 0x21a   :  { %6608 = vst [vmem:[#allocation149_spill] sm:$0xff] %v5232_v51  ;;  %1280 = vmatpush.msrb.mxu3 %v5250_v14  ;;  %v5256_v51 = vld [vmem:[%s5723_s4 + $0x608] sm:$0xff] }
 0x21b   :  { %6609 = vst [vmem:[#allocation150_spill] sm:$0xff] %v5238_v52  ;;  %1222 = vmatpush.msrb.mxu0 %v5256_v51  ;;  %v5262_v52 = vld [vmem:[%s5723_s4 + $0x690] sm:$0xff] }
 0x21c   :  { %6610 = vst [vmem:[#allocation151_spill] sm:$0xff] %v5244_v53  ;;  %1241 = vmatpush.msrb.mxu1 %v5262_v52  ;;  %v5268_v53 = vld [vmem:[%s5723_s4 + $0x708] sm:$0xff] }
 0x21d   :  { %6611 = vst [vmem:[#allocation152_spill] sm:$0xff] %v5250_v14  ;;  %1262 = vmatpush.msrb.mxu2 %v5268_v53  ;;  %v5274_v14 = vld [vmem:[%s5723_s4 + $0x790] sm:$0xff]  ;;  %1223 = vmatpush.msrb.mxu0 %v5286_v56 }
 0x21e   :  { %6612 = vst [vmem:[#allocation153_spill] sm:$0xff] %v5256_v51  ;;  %1281 = vmatpush.msrb.mxu3 %v5274_v14  ;;  %v964_v51 = vld [vmem:[%s5726_s2 + $0x60] sm:$0xff] }
 0x21f   :  { %6613 = vst [vmem:[#allocation154_spill] sm:$0xff] %v5262_v52  ;;  %v966_v52 = vld [vmem:[%s5726_s2 + $0x70] sm:$0xff]  ;;  %1224 = vmatmul.f32.vlgmr.msrb.gmra.mxu0 %v964_v51  ;;  %v5328_v51 = vld [vmem:[%s5723_s4 + $0x780] sm:$0xff] }
 0x220   :  { %6614 = vst [vmem:[#allocation155_spill] sm:$0xff] %v5268_v53  ;;  %v5292_v53 = vld [vmem:[%s5723_s4 + $0x688] sm:$0xff]  ;;  %1282 = vmatpush.msrb.mxu3 %v5304_v54 }
 0x221   :  { %6615 = vst [vmem:[#allocation156_spill] sm:$0xff] %v5274_v14  ;;  %1242 = vmatpush.msrb.mxu1 %v5292_v53  ;;  %v5298_v14 = vld [vmem:[%s5723_s4 + $0x700] sm:$0xff] }
 0x222   :  { %6616 = vst [vmem:[#allocation157_spill] sm:$0xff] %v5286_v56  ;;  %1263 = vmatpush.msrb.mxu2 %v5298_v14  ;;  %v967_v56 = vld [vmem:[%s5726_s2 + $0x78] sm:$0xff]  ;;  %1283 = vmatpush.msrb.mxu3 %v5328_v51 }
 0x223   :  { %6617 = vst [vmem:[#allocation158_spill] sm:$0xff] %v5292_v53  ;;  %1264 = vmatmul.f32.vlgmr.msrb.gmra.mxu2 %v966_v52  ;;  %v965_v53 = vld [vmem:[%s5726_s2 + $0x68] sm:$0xff]  ;;  %v5322_v52 = vld [vmem:[%s5723_s4 + $0x680] sm:$0xff]  ;;  %1284 = vmatmul.f32.vlgmr.msrb.gmra.mxu3 %v967_v56 }
 0x224   :  { %6618 = vst [vmem:[#allocation159_spill] sm:$0xff] %v5298_v14  ;;  %v1892_v14 = vld [vmem:[%s5723_s4 + $0x78] sm:$0xff]  ;;  %1345 = vmatpush.msra.mxu2 %v1893_v50  ;;  %1243 = vmatpush.msrb.mxu1 %v5322_v52  ;;  %v1896_v50 = vld [vmem:[%s5723_s4 + $0x70] sm:$0xff]  ;;  %v1900_v56 = vld [vmem:[%s5723_s4 + $0x68] sm:$0xff] }
 0x225   :  { %1305 = vmatpush.msra.mxu0 %v1892_v14  ;;  %6619 = vst [vmem:[#allocation161_spill] sm:$0xff] %v5322_v52  ;;  %1244 = vmatmul.f32.vlgmr.msrb.gmra.mxu1 %v965_v53  ;;  %v1897_v14 = vld [vmem:[%s5723_s4 + $0xf8] sm:$0xff]  ;;  %v1898_v52 = vld [vmem:[%s5723_s4 + $0x170] sm:$0xff] }
 0x226   :  { %1325 = vmatpush.msra.mxu1 %v1897_v14  ;;  %1346 = vmatpush.msra.mxu2 %v1898_v52  ;;  %v1899_v53 = vld [vmem:[%s5723_s4 + $0x1f8] sm:$0xff]  ;;  %v1902_v14 = vld [vmem:[%s5723_s4 + $0x168] sm:$0xff]  ;;  %v1903_v52 = vld [vmem:[%s5723_s4 + $0x1f0] sm:$0xff] }
 0x227   :  { %1306 = vmatpush.msra.mxu0 %v1896_v50  ;;  %1365 = vmatpush.msra.mxu3 %v1899_v53  ;;  %v1901_v50 = vld [vmem:[%s5723_s4 + $0xf0] sm:$0xff]  ;;  %v1904_v53 = vld [vmem:[%s5723_s4 + $0x60] sm:$0xff] }
 0x228   :  { %1326 = vmatpush.msra.mxu1 %v1901_v50  ;;  %1347 = vmatpush.msra.mxu2 %v1902_v14  ;;  %v1906_v50 = vld [vmem:[%s5723_s4 + $0x160] sm:$0xff]  ;;  %v1907_v14 = vld [vmem:[%s5723_s4 + $0x1e8] sm:$0xff] }
 0x229   :  { %1307 = vmatpush.msra.mxu0 %v1900_v56  ;;  %1366 = vmatpush.msra.mxu3 %v1903_v52  ;;  %v1905_v56 = vld [vmem:[%s5723_s4 + $0xe8] sm:$0xff]  ;;  %v1908_v52 = vld [vmem:[%s5723_s4 + $0x58] sm:$0xff] }
 0x22a   :  { %1327 = vmatpush.msra.mxu1 %v1905_v56  ;;  %1348 = vmatpush.msra.mxu2 %v1906_v50  ;;  %v1910_v56 = vld [vmem:[%s5723_s4 + $0x158] sm:$0xff]  ;;  %v1911_v50 = vld [vmem:[%s5723_s4 + $0x1e0] sm:$0xff] }
 0x22b   :  { %1308 = vmatpush.msra.mxu0 %v1904_v53  ;;  %1367 = vmatpush.msra.mxu3 %v1907_v14  ;;  %v1909_v53 = vld [vmem:[%s5723_s4 + $0xe0] sm:$0xff]  ;;  %v1912_v14 = vld [vmem:[%s5723_s4 + $0x50] sm:$0xff] }
 0x22c   :  { %1328 = vmatpush.msra.mxu1 %v1909_v53  ;;  %1349 = vmatpush.msra.mxu2 %v1910_v56  ;;  %v1914_v53 = vld [vmem:[%s5723_s4 + $0x150] sm:$0xff]  ;;  %v1915_v56 = vld [vmem:[%s5723_s4 + $0x1d8] sm:$0xff] }
 0x22d   :  { %1309 = vmatpush.msra.mxu0 %v1908_v52  ;;  %1368 = vmatpush.msra.mxu3 %v1911_v50  ;;  %v1913_v52 = vld [vmem:[%s5723_s4 + $0xd8] sm:$0xff]  ;;  %v1916_v50 = vld [vmem:[%s5723_s4 + $0x48] sm:$0xff] }
 0x22e   :  { %1329 = vmatpush.msra.mxu1 %v1913_v52  ;;  %1350 = vmatpush.msra.mxu2 %v1914_v53  ;;  %v1918_v52 = vld [vmem:[%s5723_s4 + $0x148] sm:$0xff]  ;;  %v1919_v53 = vld [vmem:[%s5723_s4 + $0x1d0] sm:$0xff] }
 0x22f   :  { %1310 = vmatpush.msra.mxu0 %v1912_v14  ;;  %1369 = vmatpush.msra.mxu3 %v1915_v56  ;;  %v1917_v14 = vld [vmem:[%s5723_s4 + $0xd0] sm:$0xff]  ;;  %v1920_v56 = vld [vmem:[%s5723_s4 + $0x40] sm:$0xff] }
 0x230   :  { %1330 = vmatpush.msra.mxu1 %v1917_v14  ;;  %1351 = vmatpush.msra.mxu2 %v1918_v52  ;;  %v1922_v14 = vld [vmem:[%s5723_s4 + $0x140] sm:$0xff]  ;;  %v1923_v52 = vld [vmem:[%s5723_s4 + $0x1c8] sm:$0xff] }
 0x231   :  { %1311 = vmatpush.msra.mxu0 %v1916_v50  ;;  %1370 = vmatpush.msra.mxu3 %v1919_v53  ;;  %v1921_v50 = vld [vmem:[%s5723_s4 + $0xc8] sm:$0xff]  ;;  %v1924_v53 = vld [vmem:[%s5723_s4 + $0x38] sm:$0xff] }
 0x232   :  { %1331 = vmatpush.msra.mxu1 %v1921_v50  ;;  %1352 = vmatpush.msra.mxu2 %v1922_v14  ;;  %v1926_v50 = vld [vmem:[%s5723_s4 + $0x138] sm:$0xff]  ;;  %v1927_v14 = vld [vmem:[%s5723_s4 + $0x1c0] sm:$0xff] }
 0x233   :  { %1312 = vmatpush.msra.mxu0 %v1920_v56  ;;  %1371 = vmatpush.msra.mxu3 %v1923_v52  ;;  %v1925_v56 = vld [vmem:[%s5723_s4 + $0xc0] sm:$0xff]  ;;  %v1928_v52 = vld [vmem:[%s5723_s4 + $0xb8] sm:$0xff] }
 0x234   :  { %1332 = vmatpush.msra.mxu1 %v1925_v56  ;;  %1353 = vmatpush.msra.mxu2 %v1926_v50  ;;  %v1930_v56 = vld [vmem:[%s5723_s4 + $0x1b8] sm:$0xff]  ;;  %v1932_v50 = vld [vmem:[%s5723_s4 + $0x1b0] sm:$0xff] }
 0x235   :  { %1313 = vmatpush.msra.mxu0 %v1924_v53  ;;  %1372 = vmatpush.msra.mxu3 %v1927_v14  ;;  %v1929_v53 = vld [vmem:[%s5723_s4 + $0x130] sm:$0xff]  ;;  %v6668_v14 = vld [vmem:[#allocation51_spill] sm:$0xff] }
 0x236   :  { %1333 = vmatpush.msra.mxu1 %v1928_v52  ;;  %1354 = vmatpush.msra.mxu2 %v1929_v53  ;;  %v6669_v52 = vld [vmem:[#allocation52_spill] sm:$0xff]  ;;  %v6670_v53 = vld [vmem:[#allocation53_spill] sm:$0xff] }
 0x237   :  { %1314 = vmatpush.msra.mxu0 %v3973_v55  ;;  %1373 = vmatpush.msra.mxu3 %v1930_v56  ;;  %v1931_v55 = vld [vmem:[%s5723_s4 + $0xb0] sm:$0xff]  ;;  %v6671_v56 = vld [vmem:[#allocation54_spill] sm:$0xff] }
 0x238   :  { %1334 = vmatpush.msra.mxu1 %v1931_v55  ;;  %1355 = vmatpush.msra.mxu2 %v3989_v57  ;;  %v6621_v57 = vld [vmem:[#allocation4_spill] sm:$0xff]  ;;  %v6672_v55 = vld [vmem:[#allocation55_spill] sm:$0xff] }
 0x239   :  { %1315 = vmatpush.msra.mxu0 %v3982_v39  ;;  %1374 = vmatpush.msra.mxu3 %v1932_v50  ;;  %v6620_v39 = vld [vmem:[#allocation3_spill] sm:$0xff]  ;;  %v6673_v50 = vld [vmem:[#allocation56_spill] sm:$0xff] }
 0x23a   :  { %1335 = vmatpush.msra.mxu1 %v4002_v33  ;;  %1356 = vmatpush.msra.mxu2 %v4008_v36  ;;  %v6623_v33 = vld [vmem:[#allocation6_spill] sm:$0xff]  ;;  %v6624_v36 = vld [vmem:[#allocation7_spill] sm:$0xff] }
 0x23b   :  { %1316 = vmatpush.msra.mxu0 %v3996_v30  ;;  %1375 = vmatpush.msra.mxu3 %v4014_v35  ;;  %v6622_v30 = vld [vmem:[#allocation5_spill] sm:$0xff]  ;;  %v6625_v35 = vld [vmem:[#allocation8_spill] sm:$0xff] }
 0x23c   :  { %1336 = vmatpush.msra.mxu1 %v4026_v59  ;;  %1357 = vmatpush.msra.mxu2 %v4032_v61  ;;  %v6627_v59 = vld [vmem:[#allocation10_spill] sm:$0xff]  ;;  %v6628_v61 = vld [vmem:[#allocation11_spill] sm:$0xff] }
 0x23d   :  { %1317 = vmatpush.msra.mxu0 %v4020_v58  ;;  %1376 = vmatpush.msra.mxu3 %v4038_v62  ;;  %v6626_v58 = vld [vmem:[#allocation9_spill] sm:$0xff]  ;;  %v6629_v62 = vld [vmem:[#allocation12_spill] sm:$0xff] }
 0x23e   :  { %1337 = vmatpush.msra.mxu1 %v4050_v0  ;;  %1358 = vmatpush.msra.mxu2 %v4056_v1  ;;  %v6631_v0 = vld [vmem:[#allocation14_spill] sm:$0xff]  ;;  %v6632_v1 = vld [vmem:[#allocation15_spill] sm:$0xff] }
 0x23f   :  { %1318 = vmatpush.msra.mxu0 %v4044_v63  ;;  %1377 = vmatpush.msra.mxu3 %v4062_v2  ;;  %v6630_v63 = vld [vmem:[#allocation13_spill] sm:$0xff]  ;;  %v6633_v2 = vld [vmem:[#allocation16_spill] sm:$0xff] }
 0x240   :  { %1338 = vmatpush.msra.mxu1 %v4074_v3  ;;  %1359 = vmatpush.msra.mxu2 %v4080_v4  ;;  %v6635_v3 = vld [vmem:[#allocation18_spill] sm:$0xff]  ;;  %v6636_v4 = vld [vmem:[#allocation19_spill] sm:$0xff] }
 0x241   :  { %1319 = vmatpush.msra.mxu0 %v4068_v60  ;;  %1378 = vmatpush.msra.mxu3 %v4086_v5  ;;  %v6634_v60 = vld [vmem:[#allocation17_spill] sm:$0xff]  ;;  %v6637_v5 = vld [vmem:[#allocation20_spill] sm:$0xff] }
 0x242   :  { %1339 = vmatpush.msra.mxu1 %v4098_v7  ;;  %1360 = vmatpush.msra.mxu2 %v4104_v8  ;;  %v6639_v7 = vld [vmem:[#allocation22_spill] sm:$0xff]  ;;  %v6640_v8 = vld [vmem:[#allocation23_spill] sm:$0xff] }
 0x243   :  { %1320 = vmatpush.msra.mxu0 %v4092_v6  ;;  %1379 = vmatpush.msra.mxu3 %v4110_v9  ;;  %v6638_v6 = vld [vmem:[#allocation21_spill] sm:$0xff]  ;;  %v6641_v9 = vld [vmem:[#allocation24_spill] sm:$0xff] }
 0x244   :  { %1425 = vmatpush.msrb.mxu2 %v4122_v11  ;;  %1340 = vmatpush.msra.mxu1 %v4128_v12  ;;  %v6642_v11 = vld [vmem:[#allocation25_spill] sm:$0xff]  ;;  %v6643_v12 = vld [vmem:[#allocation26_spill] sm:$0xff] }
 0x245   :  { %1385 = vmatpush.msrb.mxu0 %v4116_v10  ;;  %1380 = vmatpush.msra.mxu3 %v4134_v37  ;;  %v1291_v10 = vld [vmem:[%s5727_s3 + $0x10] sm:$0xff]  ;;  %v6644_v37 = vld [vmem:[#allocation27_spill] sm:$0xff] }
 0x246   :  { %1405 = vmatpush.msrb.mxu1 %v4146_v15  ;;  %1426 = vmatpush.msrb.mxu2 %v4152_v16  ;;  %v1289_v15 = vld [vmem:[%s5727_s3] sm:$0xff]  ;;  %v6646_v16 = vld [vmem:[#allocation29_spill] sm:$0xff] }
 0x247   :  { %1386 = vmatpush.msrb.mxu0 %v4140_v13  ;;  %1445 = vmatpush.msrb.mxu3 %v4158_v38  ;;  %v6645_v13 = vld [vmem:[#allocation28_spill] sm:$0xff]  ;;  %v1292_v38 = vld [vmem:[%s5727_s3 + $0x18] sm:$0xff] }
 0x248   :  { %1406 = vmatpush.msrb.mxu1 %v4170_v18  ;;  %1427 = vmatpush.msrb.mxu2 %v4176_v19  ;;  %v6648_v18 = vld [vmem:[#allocation31_spill] sm:$0xff]  ;;  %v6649_v19 = vld [vmem:[#allocation32_spill] sm:$0xff] }
 0x249   :  { %1387 = vmatpush.msrb.mxu0 %v4164_v17  ;;  %1446 = vmatpush.msrb.mxu3 %v4182_v20  ;;  %v6647_v17 = vld [vmem:[#allocation30_spill] sm:$0xff]  ;;  %v1290_v20 = vld [vmem:[%s5727_s3 + $0x8] sm:$0xff] }
 0x24a   :  { %1407 = vmatpush.msrb.mxu1 %v4194_v22  ;;  %1428 = vmatpush.msrb.mxu2 %v4200_v23  ;;  %v6651_v22 = vld [vmem:[#allocation34_spill] sm:$0xff]  ;;  %v6652_v23 = vld [vmem:[#allocation35_spill] sm:$0xff] }
 0x24b   :  { %1388 = vmatpush.msrb.mxu0 %v4188_v21  ;;  %1447 = vmatpush.msrb.mxu3 %v4206_v31  ;;  %v6650_v21 = vld [vmem:[#allocation33_spill] sm:$0xff]  ;;  %v6653_v31 = vld [vmem:[#allocation36_spill] sm:$0xff] }
 0x24c   :  { %1408 = vmatpush.msrb.mxu1 %v4218_v24  ;;  %1429 = vmatpush.msrb.mxu2 %v4224_v25  ;;  %v6655_v24 = vld [vmem:[#allocation38_spill] sm:$0xff]  ;;  %v6656_v25 = vld [vmem:[#allocation39_spill] sm:$0xff] }
 0x24d   :  { %1389 = vmatpush.msrb.mxu0 %v4212_v32  ;;  %1448 = vmatpush.msrb.mxu3 %v4230_v34  ;;  %v6654_v32 = vld [vmem:[#allocation37_spill] sm:$0xff]  ;;  %v6657_v34 = vld [vmem:[#allocation40_spill] sm:$0xff] }
 0x24e   :  { %1409 = vmatpush.msrb.mxu1 %v4242_v27  ;;  %1430 = vmatpush.msrb.mxu2 %v4248_v28  ;;  %v6658_v27 = vld [vmem:[#allocation41_spill] sm:$0xff]  ;;  %v6659_v28 = vld [vmem:[#allocation42_spill] sm:$0xff] }
 0x24f   :  { %1390 = vmatpush.msrb.mxu0 %v4236_v26  ;;  %1449 = vmatpush.msrb.mxu3 %v4254_v29  ;;  %v1295_v26 = vld [vmem:[%s5727_s3 + $0x30] sm:$0xff]  ;;  %v6660_v29 = vld [vmem:[#allocation43_spill] sm:$0xff] }
 0x250   :  { %1410 = vmatpush.msrb.mxu1 %v4266_v41  ;;  %1431 = vmatpush.msrb.mxu2 %v4272_v42  ;;  %v1293_v41 = vld [vmem:[%s5727_s3 + $0x20] sm:$0xff]  ;;  %v6662_v42 = vld [vmem:[#allocation45_spill] sm:$0xff] }
 0x251   :  { %1391 = vmatpush.msrb.mxu0 %v4260_v40  ;;  %1450 = vmatpush.msrb.mxu3 %v4278_v43  ;;  %v6661_v40 = vld [vmem:[#allocation44_spill] sm:$0xff]  ;;  %v1296_v43 = vld [vmem:[%s5727_s3 + $0x38] sm:$0xff] }
 0x252   :  { %1411 = vmatpush.msrb.mxu1 %v4290_v45  ;;  %1432 = vmatpush.msrb.mxu2 %v4296_v46  ;;  %v6664_v45 = vld [vmem:[#allocation47_spill] sm:$0xff]  ;;  %v6665_v46 = vld [vmem:[#allocation48_spill] sm:$0xff] }
 0x253   :  { %1392 = vmatpush.msrb.mxu0 %v4284_v44  ;;  %1451 = vmatpush.msrb.mxu3 %v4302_v47  ;;  %v6663_v44 = vld [vmem:[#allocation46_spill] sm:$0xff]  ;;  %v1294_v47 = vld [vmem:[%s5727_s3 + $0x28] sm:$0xff] }
 0x254   :  { %1412 = vmatpush.msrb.mxu1 %v4314_v49  ;;  %1433 = vmatpush.msrb.mxu2 %v6620_v39  ;;  %v6667_v49 = vld [vmem:[#allocation50_spill] sm:$0xff]  ;;  %v6674_v39 = vld [vmem:[#allocation57_spill] sm:$0xff] }
 0x255   :  { %1393 = vmatpush.msrb.mxu0 %v4308_v48  ;;  %1452 = vmatpush.msrb.mxu3 %v6621_v57  ;;  %v6666_v48 = vld [vmem:[#allocation49_spill] sm:$0xff]  ;;  %v6675_v57 = vld [vmem:[#allocation58_spill] sm:$0xff] }
 0x256   :  { %1413 = vmatpush.msrb.mxu1 %v6623_v33  ;;  %1434 = vmatpush.msrb.mxu2 %v6624_v36  ;;  %v6677_v33 = vld [vmem:[#allocation60_spill] sm:$0xff]  ;;  %v6678_v36 = vld [vmem:[#allocation61_spill] sm:$0xff] }
 0x257   :  { %1394 = vmatpush.msrb.mxu0 %v6622_v30  ;;  %1453 = vmatpush.msrb.mxu3 %v6625_v35  ;;  %v6676_v30 = vld [vmem:[#allocation59_spill] sm:$0xff]  ;;  %v6679_v35 = vld [vmem:[#allocation62_spill] sm:$0xff] }
 0x258   :  { %1414 = vmatpush.msrb.mxu1 %v6627_v59  ;;  %1435 = vmatpush.msrb.mxu2 %v6628_v61  ;;  %v6681_v59 = vld [vmem:[#allocation64_spill] sm:$0xff]  ;;  %v6682_v61 = vld [vmem:[#allocation65_spill] sm:$0xff] }
 0x259   :  { %1395 = vmatpush.msrb.mxu0 %v6626_v58  ;;  %1454 = vmatpush.msrb.mxu3 %v6629_v62  ;;  %v6680_v58 = vld [vmem:[#allocation63_spill] sm:$0xff]  ;;  %v6683_v62 = vld [vmem:[#allocation66_spill] sm:$0xff] }
 0x25a   :  { %1415 = vmatpush.msrb.mxu1 %v6631_v0  ;;  %1436 = vmatpush.msrb.mxu2 %v6632_v1  ;;  %v6685_v0 = vld [vmem:[#allocation68_spill] sm:$0xff]  ;;  %v6686_v1 = vld [vmem:[#allocation69_spill] sm:$0xff] }
 0x25b   :  { %1396 = vmatpush.msrb.mxu0 %v6630_v63  ;;  %1455 = vmatpush.msrb.mxu3 %v6633_v2  ;;  %v6684_v63 = vld [vmem:[#allocation67_spill] sm:$0xff]  ;;  %v6687_v2 = vld [vmem:[#allocation70_spill] sm:$0xff] }
 0x25c   :  { %1416 = vmatpush.msrb.mxu1 %v6635_v3  ;;  %1437 = vmatpush.msrb.mxu2 %v6636_v4  ;;  %v6689_v3 = vld [vmem:[#allocation72_spill] sm:$0xff]  ;;  %v6690_v4 = vld [vmem:[#allocation73_spill] sm:$0xff] }
 0x25d   :  { %1397 = vmatpush.msrb.mxu0 %v6634_v60  ;;  %1456 = vmatpush.msrb.mxu3 %v6637_v5  ;;  %v6688_v60 = vld [vmem:[#allocation71_spill] sm:$0xff]  ;;  %v6691_v5 = vld [vmem:[#allocation74_spill] sm:$0xff] }
 0x25e   :  { %1417 = vmatpush.msrb.mxu1 %v6639_v7  ;;  %1438 = vmatpush.msrb.mxu2 %v6640_v8  ;;  %v6693_v7 = vld [vmem:[#allocation76_spill] sm:$0xff]  ;;  %v6694_v8 = vld [vmem:[#allocation77_spill] sm:$0xff] }
 0x25f   :  { %1398 = vmatpush.msrb.mxu0 %v6638_v6  ;;  %1457 = vmatpush.msrb.mxu3 %v6641_v9  ;;  %v6692_v6 = vld [vmem:[#allocation75_spill] sm:$0xff]  ;;  %v6695_v9 = vld [vmem:[#allocation78_spill] sm:$0xff] }
 0x260   :  { %1418 = vmatpush.msrb.mxu1 %v6643_v12  ;;  %1439 = vmatpush.msrb.mxu2 %v6644_v37  ;;  %v6698_v12 = vld [vmem:[#allocation81_spill] sm:$0xff]  ;;  %v6699_v37 = vld [vmem:[#allocation82_spill] sm:$0xff] }
 0x261   :  { %1399 = vmatpush.msrb.mxu0 %v6642_v11  ;;  %1458 = vmatpush.msrb.mxu3 %v6645_v13  ;;  %v6697_v11 = vld [vmem:[#allocation80_spill] sm:$0xff]  ;;  %v6700_v13 = vld [vmem:[#allocation83_spill] sm:$0xff] }
 0x262   :  { %1361 = vmatmul.f32.vlgmr.msra.gmra.mxu2 %v1291_v10  ;;  %1419 = vmatpush.msrb.mxu1 %v6647_v17  ;;  %v6696_v10 = vld [vmem:[#allocation79_spill] sm:$0xff] }
 0x263   :  { %1400 = vmatpush.msrb.mxu0 %v6646_v16  ;;  %1440 = vmatpush.msrb.mxu2 %v6648_v18  ;;  %v6702_v16 = vld [vmem:[#allocation85_spill] sm:$0xff]  ;;  %v6704_v17 = vld [vmem:[#allocation87_spill] sm:$0xff]  ;;  %v6705_v18 = vld [vmem:[#allocation88_spill] sm:$0xff] }
 0x264   :  { %1459 = vmatpush.msrb.mxu3 %v6649_v19  ;;  %1321 = vmatmul.f32.vlgmr.msra.gmra.mxu0 %v1289_v15  ;;  %v6701_v15 = vld [vmem:[#allocation84_spill] sm:$0xff]  ;;  %v6706_v19 = vld [vmem:[#allocation89_spill] sm:$0xff] }
 0x265   :  { %1381 = vmatmul.f32.vlgmr.msra.gmra.mxu3 %v1292_v38  ;;  %1465 = vmatpush.msra.mxu0 %v6650_v21  ;;  %v6703_v38 = vld [vmem:[#allocation86_spill] sm:$0xff]  ;;  %v6708_v21 = vld [vmem:[#allocation91_spill] sm:$0xff] }
 0x266   :  { %1505 = vmatpush.msra.mxu2 %v6651_v22  ;;  %1420 = vmatpush.msrb.mxu1 %v6652_v23  ;;  %v6709_v22 = vld [vmem:[#allocation92_spill] sm:$0xff]  ;;  %v1297_v23 = vld [vmem:[%s5727_s3 + $0x40] sm:$0xff] }
 0x267   :  { %1460 = vmatpush.msrb.mxu3 %v6653_v31  ;;  %1341 = vmatmul.f32.vlgmr.msra.gmra.mxu1 %v1290_v20  ;;  %v6707_v20 = vld [vmem:[#allocation90_spill] sm:$0xff]  ;;  %v1299_v31 = vld [vmem:[%s5727_s3 + $0x50] sm:$0xff] }
 0x268   :  { %1466 = vmatpush.msra.mxu0 %v6654_v32  ;;  %1485 = vmatpush.msra.mxu1 %v6655_v24  ;;  %v6710_v32 = vld [vmem:[#allocation93_spill] sm:$0xff]  ;;  %v6711_v24 = vld [vmem:[#allocation94_spill] sm:$0xff] }
 0x269   :  { %1506 = vmatpush.msra.mxu2 %v6656_v25  ;;  %1525 = vmatpush.msra.mxu3 %v6657_v34  ;;  %v6712_v25 = vld [vmem:[#allocation95_spill] sm:$0xff]  ;;  %v6713_v34 = vld [vmem:[#allocation96_spill] sm:$0xff] }
 0x26a   :  { %1467 = vmatpush.msra.mxu0 %v6658_v27  ;;  %1486 = vmatpush.msra.mxu1 %v6659_v28  ;;  %v1300_v27 = vld [vmem:[%s5727_s3 + $0x58] sm:$0xff] }
 0x26b   :  { %1507 = vmatpush.msra.mxu2 %v6660_v29  ;;  %1526 = vmatpush.msra.mxu3 %v6661_v40  ;;  %v6714_v28 = vld [vmem:[#allocation97_spill] sm:$0xff]  ;;  %v6715_v29 = vld [vmem:[#allocation98_spill] sm:$0xff]  ;;  %v6716_v40 = vld [vmem:[#allocation99_spill] sm:$0xff] }
 0x26c   :  { %1441 = vmatmul.f32.vlgmr.msrb.gmra.mxu2 %v1295_v26  ;;  %1468 = vmatpush.msra.mxu0 %v6662_v42  ;;  %v1298_v26 = vld [vmem:[%s5727_s3 + $0x48] sm:$0xff]  ;;  %v6718_v42 = vld [vmem:[#allocation101_spill] sm:$0xff] }
 0x26d   :  { %1487 = vmatpush.msra.mxu1 %v6663_v44  ;;  %1508 = vmatpush.msra.mxu2 %v6664_v45  ;;  %v6720_v44 = vld [vmem:[#allocation103_spill] sm:$0xff]  ;;  %v6721_v45 = vld [vmem:[#allocation104_spill] sm:$0xff] }
 0x26e   :  { %1527 = vmatpush.msra.mxu3 %v6665_v46  ;;  %1401 = vmatmul.f32.vlgmr.msrb.gmra.mxu0 %v1293_v41  ;;  %v6717_v41 = vld [vmem:[#allocation100_spill] sm:$0xff]  ;;  %v6722_v46 = vld [vmem:[#allocation105_spill] sm:$0xff] }
 0x26f   :  { %1461 = vmatmul.f32.vlgmr.msrb.gmra.mxu3 %v1296_v43  ;;  %1469 = vmatpush.msra.mxu0 %v6666_v48  ;;  %v6719_v43 = vld [vmem:[#allocation102_spill] sm:$0xff]  ;;  %v6724_v48 = vld [vmem:[#allocation107_spill] sm:$0xff] }
 0x270   :  { %1488 = vmatpush.msra.mxu1 %v6667_v49  ;;  %1509 = vmatpush.msra.mxu2 %v6668_v14  ;;  %v6725_v49 = vld [vmem:[#allocation108_spill] sm:$0xff]  ;;  %v6726_v14 = vld [vmem:[#allocation109_spill] sm:$0xff] }
 0x271   :  { %1528 = vmatpush.msra.mxu3 %v6669_v52  ;;  %1421 = vmatmul.f32.vlgmr.msrb.gmra.mxu1 %v1294_v47  ;;  %v6723_v47 = vld [vmem:[#allocation106_spill] sm:$0xff] }
 0x272   :  { %1470 = vmatpush.msra.mxu0 %v6670_v53  ;;  %1489 = vmatpush.msra.mxu1 %v6671_v56  ;;  %v6727_v52 = vld [vmem:[#allocation110_spill] sm:$0xff]  ;;  %v6728_v53 = vld [vmem:[#allocation111_spill] sm:$0xff]  ;;  %v6729_v56 = vld [vmem:[#allocation112_spill] sm:$0xff] }
 0x273   :  { %1510 = vmatpush.msra.mxu2 %v6672_v55  ;;  %1529 = vmatpush.msra.mxu3 %v6673_v50  ;;  %v6730_v55 = vld [vmem:[#allocation113_spill] sm:$0xff]  ;;  %v6731_v50 = vld [vmem:[#allocation114_spill] sm:$0xff] }
 0x274   :  { %1471 = vmatpush.msra.mxu0 %v6674_v39  ;;  %1490 = vmatpush.msra.mxu1 %v6675_v57  ;;  %v6732_v39 = vld [vmem:[#allocation115_spill] sm:$0xff]  ;;  %v6733_v57 = vld [vmem:[#allocation116_spill] sm:$0xff] }
 0x275   :  { %1511 = vmatpush.msra.mxu2 %v6676_v30  ;;  %1530 = vmatpush.msra.mxu3 %v6677_v33  ;;  %v6734_v30 = vld [vmem:[#allocation117_spill] sm:$0xff]  ;;  %v6735_v33 = vld [vmem:[#allocation118_spill] sm:$0xff] }
 0x276   :  { %1472 = vmatpush.msra.mxu0 %v6678_v36  ;;  %1491 = vmatpush.msra.mxu1 %v6679_v35  ;;  %v6736_v36 = vld [vmem:[#allocation119_spill] sm:$0xff]  ;;  %v6737_v35 = vld [vmem:[#allocation120_spill] sm:$0xff] }
 0x277   :  { %1512 = vmatpush.msra.mxu2 %v6680_v58  ;;  %1531 = vmatpush.msra.mxu3 %v6681_v59  ;;  %v6738_v58 = vld [vmem:[#allocation121_spill] sm:$0xff]  ;;  %v6739_v59 = vld [vmem:[#allocation122_spill] sm:$0xff] }
 0x278   :  { %1473 = vmatpush.msra.mxu0 %v6682_v61  ;;  %1492 = vmatpush.msra.mxu1 %v6683_v62  ;;  %v6740_v61 = vld [vmem:[#allocation123_spill] sm:$0xff]  ;;  %v6741_v62 = vld [vmem:[#allocation124_spill] sm:$0xff] }
 0x279   :  { %1513 = vmatpush.msra.mxu2 %v6684_v63  ;;  %1532 = vmatpush.msra.mxu3 %v6685_v0  ;;  %v6742_v63 = vld [vmem:[#allocation125_spill] sm:$0xff]  ;;  %v6743_v0 = vld [vmem:[#allocation126_spill] sm:$0xff] }
 0x27a   :  { %1474 = vmatpush.msra.mxu0 %v6686_v1  ;;  %1493 = vmatpush.msra.mxu1 %v6687_v2  ;;  %v6744_v1 = vld [vmem:[#allocation127_spill] sm:$0xff]  ;;  %v6745_v2 = vld [vmem:[#allocation128_spill] sm:$0xff] }
 0x27b   :  { %1514 = vmatpush.msra.mxu2 %v6688_v60  ;;  %1533 = vmatpush.msra.mxu3 %v6689_v3  ;;  %v6746_v60 = vld [vmem:[#allocation129_spill] sm:$0xff]  ;;  %v6747_v3 = vld [vmem:[#allocation130_spill] sm:$0xff] }
 0x27c   :  { %1475 = vmatpush.msra.mxu0 %v6690_v4  ;;  %1494 = vmatpush.msra.mxu1 %v6691_v5  ;;  %v6748_v4 = vld [vmem:[#allocation131_spill] sm:$0xff]  ;;  %v6749_v5 = vld [vmem:[#allocation132_spill] sm:$0xff] }
 0x27d   :  { %1515 = vmatpush.msra.mxu2 %v6692_v6  ;;  %1534 = vmatpush.msra.mxu3 %v6693_v7  ;;  %v6750_v6 = vld [vmem:[#allocation133_spill] sm:$0xff]  ;;  %v6751_v7 = vld [vmem:[#allocation134_spill] sm:$0xff] }
 0x27e   :  { %1476 = vmatpush.msra.mxu0 %v6694_v8  ;;  %1495 = vmatpush.msra.mxu1 %v6695_v9  ;;  %v6752_v8 = vld [vmem:[#allocation135_spill] sm:$0xff]  ;;  %v6753_v9 = vld [vmem:[#allocation136_spill] sm:$0xff] }
 0x27f   :  { %1516 = vmatpush.msra.mxu2 %v6696_v10  ;;  %1535 = vmatpush.msra.mxu3 %v6697_v11  ;;  %v6754_v10 = vld [vmem:[#allocation137_spill] sm:$0xff]  ;;  %v6755_v11 = vld [vmem:[#allocation138_spill] sm:$0xff] }
 0x280   :  { %1477 = vmatpush.msra.mxu0 %v6698_v12  ;;  %1496 = vmatpush.msra.mxu1 %v6699_v37  ;;  %v6756_v12 = vld [vmem:[#allocation139_spill] sm:$0xff]  ;;  %v6757_v37 = vld [vmem:[#allocation140_spill] sm:$0xff] }
 0x281   :  { %1517 = vmatpush.msra.mxu2 %v6700_v13  ;;  %1536 = vmatpush.msra.mxu3 %v6701_v15  ;;  %v6758_v13 = vld [vmem:[#allocation141_spill] sm:$0xff]  ;;  %v6759_v15 = vld [vmem:[#allocation142_spill] sm:$0xff] }
 0x282   :  { %1478 = vmatpush.msra.mxu0 %v6702_v16  ;;  %1497 = vmatpush.msra.mxu1 %v6703_v38  ;;  %v6760_v16 = vld [vmem:[#allocation143_spill] sm:$0xff]  ;;  %v6761_v38 = vld [vmem:[#allocation144_spill] sm:$0xff] }
 0x283   :  { %1518 = vmatpush.msra.mxu2 %v6704_v17  ;;  %1537 = vmatpush.msra.mxu3 %v6705_v18  ;;  %v6762_v17 = vld [vmem:[#allocation145_spill] sm:$0xff]  ;;  %v6763_v18 = vld [vmem:[#allocation146_spill] sm:$0xff] }
 0x284   :  { %1479 = vmatpush.msra.mxu0 %v6706_v19  ;;  %1498 = vmatpush.msra.mxu1 %v6707_v20  ;;  %v6764_v19 = vld [vmem:[#allocation147_spill] sm:$0xff]  ;;  %v6765_v20 = vld [vmem:[#allocation148_spill] sm:$0xff] }
 0x285   :  { %1519 = vmatpush.msra.mxu2 %v6708_v21  ;;  %1538 = vmatpush.msra.mxu3 %v6709_v22  ;;  %v6766_v21 = vld [vmem:[#allocation149_spill] sm:$0xff]  ;;  %v6767_v22 = vld [vmem:[#allocation150_spill] sm:$0xff] }
 0x286   :  { %1480 = vmatpush.msra.mxu0 %v6710_v32  ;;  %1499 = vmatpush.msra.mxu1 %v6711_v24  ;;  %v6770_v32 = vld [vmem:[#allocation153_spill] sm:$0xff]  ;;  %v6771_v24 = vld [vmem:[#allocation154_spill] sm:$0xff] }
 0x287   :  { %1520 = vmatpush.msra.mxu2 %v6712_v25  ;;  %1539 = vmatpush.msra.mxu3 %v6713_v34  ;;  %v6772_v25 = vld [vmem:[#allocation155_spill] sm:$0xff]  ;;  %v6773_v34 = vld [vmem:[#allocation156_spill] sm:$0xff] }
 0x288   :  { %1481 = vmatmul.f32.vlgmr.msra.gmra.mxu0 %v1297_v23  ;;  %1521 = vmatmul.f32.vlgmr.msra.gmra.mxu2 %v1299_v31  ;;  %v6768_v23 = vld [vmem:[#allocation151_spill] sm:$0xff]  ;;  %v6769_v31 = vld [vmem:[#allocation152_spill] sm:$0xff] }
 0x289   :  { %1545 = vmatpush.msrb.mxu0 %v6714_v28  ;;  %1585 = vmatpush.msrb.mxu2 %v6715_v29  ;;  %v6774_v28 = vld [vmem:[#allocation157_spill] sm:$0xff]  ;;  %v6775_v29 = vld [vmem:[#allocation158_spill] sm:$0xff] }
 0x28a   :  { %1500 = vmatpush.msra.mxu1 %v6716_v40  ;;  %1540 = vmatpush.msra.mxu3 %v6717_v41  ;;  %v6776_v40 = vld [vmem:[#allocation159_spill] sm:$0xff] }
 0x28b   :  { %1501 = vmatmul.f32.vlgmr.msra.gmra.mxu1 %v1298_v26  ;;  %1541 = vmatmul.f32.vlgmr.msra.gmra.mxu3 %v1300_v27  ;;  %v1301_v26 = vld [vmem:[%s5727_s3 + $0x60] sm:$0xff]  ;;  %v1303_v27 = vld [vmem:[%s5727_s3 + $0x70] sm:$0xff]  ;;  %v1302_v41 = vld [vmem:[%s5727_s3 + $0x68] sm:$0xff] }
 0x28c   :  { %1546 = vmatpush.msrb.mxu0 %v6718_v42  ;;  %1565 = vmatpush.msrb.mxu1 %v6719_v43  ;;  %v1304_v42 = vld [vmem:[%s5727_s3 + $0x78] sm:$0xff] }
 0x28d   :  { %1586 = vmatpush.msrb.mxu2 %v6720_v44  ;;  %1605 = vmatpush.msrb.mxu3 %v6721_v45  ;;  %v6777_v43 = vld [vmem:[#allocation161_spill] sm:$0xff]  ;;  %v668_v44 = vpop.f32.mrf.mxu1  ;;  %v648_v45 = vpop.f32.mrf.mxu0 }
 0x28e   :  { %1547 = vmatpush.msrb.mxu0 %v6722_v46  ;;  %1566 = vmatpush.msrb.mxu1 %v6723_v47  ;;  %v688_v46 = vpop.f32.mrf.mxu2 }
 0x28f   :  { %1587 = vmatpush.msrb.mxu2 %v6724_v48  ;;  %1606 = vmatpush.msrb.mxu3 %v6725_v49 }
 0x290   :  { %1548 = vmatpush.msrb.mxu0 %v6726_v14  ;;  %1567 = vmatpush.msrb.mxu1 %v6727_v52 }
 0x291   :  { %1588 = vmatpush.msrb.mxu2 %v6728_v53  ;;  %1607 = vmatpush.msrb.mxu3 %v6729_v56 }
 0x292   :  { %1549 = vmatpush.msrb.mxu0 %v6730_v55  ;;  %1568 = vmatpush.msrb.mxu1 %v6731_v50 }
 0x293   :  { %1589 = vmatpush.msrb.mxu2 %v6732_v39  ;;  %1608 = vmatpush.msrb.mxu3 %v6733_v57 }
 0x294   :  { %1550 = vmatpush.msrb.mxu0 %v6734_v30  ;;  %1569 = vmatpush.msrb.mxu1 %v6735_v33 }
 0x295   :  { %1590 = vmatpush.msrb.mxu2 %v6736_v36  ;;  %1609 = vmatpush.msrb.mxu3 %v6737_v35  ;;  %v748_v47 = vpop.f32.mrf.mxu1  ;;  %v728_v48 = vpop.f32.mrf.mxu0 }
 0x296   :  { %1551 = vmatpush.msrb.mxu0 %v6738_v58  ;;  %1570 = vmatpush.msrb.mxu1 %v6739_v59  ;;  %v768_v49 = vpop.f32.mrf.mxu2 }
 0x297   :  { %1591 = vmatpush.msrb.mxu2 %v6740_v61  ;;  %1610 = vmatpush.msrb.mxu3 %v6741_v62 }
 0x298   :  { %1552 = vmatpush.msrb.mxu0 %v6742_v63  ;;  %1571 = vmatpush.msrb.mxu1 %v6743_v0 }
 0x299   :  { %1592 = vmatpush.msrb.mxu2 %v6744_v1  ;;  %1611 = vmatpush.msrb.mxu3 %v6745_v2 }
 0x29a   :  { %1553 = vmatpush.msrb.mxu0 %v6746_v60  ;;  %1572 = vmatpush.msrb.mxu1 %v6747_v3 }
 0x29b   :  { %1593 = vmatpush.msrb.mxu2 %v6748_v4  ;;  %1612 = vmatpush.msrb.mxu3 %v6749_v5  ;;  %v669_v4 = vadd.f32 %v668_v44, %v648_v45 }
 0x29c   :  { %1554 = vmatpush.msrb.mxu0 %v6750_v6  ;;  %1573 = vmatpush.msrb.mxu1 %v6751_v7 }
 0x29d   :  { %1594 = vmatpush.msrb.mxu2 %v6752_v8  ;;  %1613 = vmatpush.msrb.mxu3 %v6753_v9  ;;  %v828_v52 = vpop.f32.mrf.mxu1  ;;  %v808_v53 = vpop.f32.mrf.mxu0  ;;  %v689_v7 = vadd.f32 %v688_v46, %v669_v4 }
 0x29e   :  { %1555 = vmatpush.msrb.mxu0 %v6754_v10  ;;  %1574 = vmatpush.msrb.mxu1 %v6755_v11  ;;  %v848_v56 = vpop.f32.mrf.mxu2 }
 0x29f   :  { %1595 = vmatpush.msrb.mxu2 %v6756_v12  ;;  %1614 = vmatpush.msrb.mxu3 %v6757_v37 }
 0x2a0   :  { %1556 = vmatpush.msrb.mxu0 %v6758_v13  ;;  %1575 = vmatpush.msrb.mxu1 %v6759_v15 }
 0x2a1   :  { %1596 = vmatpush.msrb.mxu2 %v6760_v16  ;;  %1615 = vmatpush.msrb.mxu3 %v6761_v38 }
 0x2a2   :  { %1557 = vmatpush.msrb.mxu0 %v6762_v17  ;;  %1576 = vmatpush.msrb.mxu1 %v6763_v18 }
 0x2a3   :  { %1597 = vmatpush.msrb.mxu2 %v6764_v19  ;;  %1616 = vmatpush.msrb.mxu3 %v6765_v20 }
 0x2a4   :  { %1558 = vmatpush.msrb.mxu0 %v6766_v21  ;;  %1577 = vmatpush.msrb.mxu1 %v6767_v22 }
 0x2a5   :  { %1598 = vmatpush.msrb.mxu2 %v6768_v23  ;;  %1617 = vmatpush.msrb.mxu3 %v6769_v31  ;;  %v5707_v50 = vpop.f32.mrf.mxu1  ;;  %v888_v39 = vpop.f32.mrf.mxu0 }
 0x2a6   :  { %1559 = vmatpush.msrb.mxu0 %v6770_v32  ;;  %1578 = vmatpush.msrb.mxu1 %v6771_v24  ;;  %v5709_v57 = vpop.f32.mrf.mxu2 }
 0x2a7   :  { %1599 = vmatpush.msrb.mxu2 %v6772_v25  ;;  %1618 = vmatpush.msrb.mxu3 %v6773_v34 }
 0x2a8   :  { %1560 = vmatpush.msrb.mxu0 %v6774_v28  ;;  %1579 = vmatpush.msrb.mxu1 %v6775_v29 }
 0x2a9   :  { %1600 = vmatpush.msrb.mxu2 %v6776_v40  ;;  %1619 = vmatpush.msrb.mxu3 %v5304_v54  ;;  %v708_v54 = vpop.f32.mrf.mxu3 }
 0x2aa   :  { %1561 = vmatmul.f32.vlgmr.msrb.gmra.mxu0 %v1301_v26  ;;  %1601 = vmatmul.f32.vlgmr.msrb.gmra.mxu2 %v1303_v27  ;;  %v709_v12 = vadd.f32 %v708_v54, %v689_v7 }
 0x2ab   :  { %1580 = vmatpush.msrb.mxu1 %v6777_v43  ;;  %1620 = vmatpush.msrb.mxu3 %v5328_v51 }
 0x2ac   :  { %1581 = vmatmul.f32.vlgmr.msrb.gmra.mxu1 %v1302_v41  ;;  %1621 = vmatmul.f32.vlgmr.msrb.gmra.mxu3 %v1304_v42  ;;  %v729_v16 = vadd.f32 %v728_v48, %v709_v12 }
 0x2ad   :  { %v1005_v30 = vpop.f32.mrf.mxu1  ;;  %v985_v33 = vpop.f32.mrf.mxu0 }
 0x2ae   :  { %v1025_v36 = vpop.f32.mrf.mxu2  ;;  %v1006_v6 = vadd.f32 %v1005_v30, %v985_v33  ;;  %v749_v19 = vadd.f32 %v748_v47, %v729_v16 }
 0x2b0   :  { %v1026_v10 = vadd.f32 %v1025_v36, %v1006_v6  ;;  %v769_v23 = vadd.f32 %v768_v49, %v749_v19 }
 0x2b1   :  { %v788_v14 = vpop.f32.mrf.mxu3 }
 0x2b2   :  { %v789_v25 = vadd.f32 %v788_v14, %v769_v23 }
 0x2b4   :  { %v809_v27 = vadd.f32 %v808_v53, %v789_v25 }
 0x2b5   :  { %v1085_v58 = vpop.f32.mrf.mxu1  ;;  %v1065_v59 = vpop.f32.mrf.mxu0 }
 0x2b6   :  { %v1105_v61 = vpop.f32.mrf.mxu2  ;;  %v829_v42 = vadd.f32 %v828_v52, %v809_v27 }
 0x2b8   :  { %v849_v44 = vadd.f32 %v848_v56, %v829_v42 }
 0x2b9   :  { %v868_v55 = vpop.f32.mrf.mxu3 }
 0x2ba   :  { %v869_v49 = vadd.f32 %v868_v55, %v849_v44 }
 0x2bc   :  { %v889_v33 = vadd.f32 %v888_v39, %v869_v49 }
 0x2bd   :  { %v1165_v63 = vpop.f32.mrf.mxu1  ;;  %v1145_v0 = vpop.f32.mrf.mxu0 }
 0x2be   :  { %v1185_v1 = vpop.f32.mrf.mxu2 }
 0x2c1   :  { %v5711_v51 = vpop.f32.mrf.mxu3 }
 0x2c5   :  { %v1245_v60 = vpop.f32.mrf.mxu1  ;;  %v1225_v3 = vpop.f32.mrf.mxu0 }
 0x2c6   :  { %v1265_v5 = vpop.f32.mrf.mxu2 }
 0x2c9   :  { %v1045_v35 = vpop.f32.mrf.mxu3 }
 0x2ca   :  { %v1046_v15 = vadd.f32 %v1045_v35, %v1026_v10 }
 0x2cc   :  { %v1066_v18 = vadd.f32 %v1065_v59, %v1046_v15  ;;  %v909_v59 = vadd.f32 %v5707_v50, %v889_v33  ;;  %v1637_v50 = vld [vmem:[%s5728_s5] ss:$0 sm:$0xff] }
 0x2ce   :  { %v1086_v22 = vadd.f32 %v1085_v58, %v1066_v18 }
 0x2d0   :  { %v1106_v24 = vadd.f32 %v1105_v61, %v1086_v22  ;;  %v929_v61 = vadd.f32 %v5709_v57, %v909_v59 }
 0x2d1   :  { %v1125_v62 = vpop.f32.mrf.mxu3 }
 0x2d2   :  { %v1126_v28 = vadd.f32 %v1125_v62, %v1106_v24  ;;  %v949_v4 = vadd.f32 %v5711_v51, %v929_v61 }
 0x2d4   :  { %v1146_v29 = vadd.f32 %v1145_v0, %v1126_v28 }
 0x2d6   :  { %v1166_v45 = vadd.f32 %v1165_v63, %v1146_v29 }
 0x2d8   :  { %v1186_v54 = vadd.f32 %v1185_v1, %v1166_v45 }
 0x2d9   :  { %v1205_v2 = vpop.f32.mrf.mxu3 }
 0x2da   :  { %v1206_v36 = vadd.f32 %v1205_v2, %v1186_v54  ;;  %v6778_v2 = vld [vmem:[#allocation2_spill] sm:$0xff] }
 0x2db   :  { %v951_v7 = vmax.f32 %v6778_v2, %v949_v4 }
 0x2dc   :  { %v1226_v35 = vadd.f32 %v1225_v3, %v1206_v36 }
 0x2de   :  { %v1246_v52 = vadd.f32 %v1245_v60, %v1226_v35 }
 0x2e0   :  { %v1266_v63 = vadd.f32 %v1265_v5, %v1246_v52 }
 0x2e1   :  { %v1285_v8 = vpop.f32.mrf.mxu3  ;;  %v1322_v11 = vpop.f32.mrf.mxu0 }
 0x2e2   :  { %v1286_v55 = vadd.f32 %v1285_v8, %v1266_v63 }
 0x2e4   :  { %v1342_v9 = vpop.f32.mrf.mxu1  ;;  %v1288_v10 = vmax.f32 %v951_v7, %v1286_v55 }
 0x2e5   :  { %v1343_v37 = vadd.f32 %v1342_v9, %v1322_v11  ;;  %v1362_v13 = vpop.f32.mrf.mxu2 }
 0x2e7   :  { %v1363_v38 = vadd.f32 %v1362_v13, %v1343_v37 }
 0x2e9   :  { %v1382_v17 = vpop.f32.mrf.mxu3 }
 0x2ea   :  { %v1383_v20 = vadd.f32 %v1382_v17, %v1363_v38 }
 0x2eb   :  { %v1402_v21 = vpop.f32.mrf.mxu0 }
 0x2ec   :  { %v1403_v31 = vadd.f32 %v1402_v21, %v1383_v20 }
 0x2ee   :  { %v1422_v32 = vpop.f32.mrf.mxu1 }
 0x2ef   :  { %v1423_v34 = vadd.f32 %v1422_v32, %v1403_v31  ;;  %v1442_v26 = vpop.f32.mrf.mxu2 }
 0x2f1   :  { %v1443_v40 = vadd.f32 %v1442_v26, %v1423_v34 }
 0x2f2   :  { %v1462_v41 = vpop.f32.mrf.mxu3 }
 0x2f3   :  { %v1463_v46 = vadd.f32 %v1462_v41, %v1443_v40 }
 0x305   :  { %v1482_v43 = vpop.f32.mrf.mxu0 }
 0x306   :  { %v1483_v47 = vadd.f32 %v1482_v43, %v1463_v46 }
 0x308   :  { %v1502_v48 = vpop.f32.mrf.mxu1 }
 0x309   :  { %v1503_v14 = vadd.f32 %v1502_v48, %v1483_v47 }
 0x30b   :  { %v1522_v30 = vpop.f32.mrf.mxu2 }
 0x30c   :  { %v1523_v58 = vadd.f32 %v1522_v30, %v1503_v14 }
 0x30e   :  { %v1542_v53 = vpop.f32.mrf.mxu3 }
 0x30f   :  { %v1543_v62 = vadd.f32 %v1542_v53, %v1523_v58 }
 0x327   :  { %v1562_v56 = vpop.f32.mrf.mxu0 }
 0x328   :  { %v1563_v0 = vadd.f32 %v1562_v56, %v1543_v62 }
 0x329   :  { %v1582_v1 = vpop.f32.mrf.mxu1 }
 0x32a   :  { %v1583_v6 = vadd.f32 %v1582_v1, %v1563_v0 }
 0x32d   :  { %v1602_v39 = vpop.f32.mrf.mxu2 }
 0x32e   :  { %v1603_v3 = vadd.f32 %v1602_v39, %v1583_v6 }
 0x32f   :  { %v1622_v9 = vpop.f32.mrf.mxu3 }
 0x330   :  { %v1623_v11 = vadd.f32 %v1622_v9, %v1603_v3 }
 0x332   :  { %v1625_v57 = vmax.f32 %v1288_v10, %v1623_v11 }
 0x334   :  { %v1630_v60 = vadd.f32 %v1637_v50, %v1625_v57 }
 0x336   :  { %v1631_v5 = vmax.f32 %v1630_v60, 0.0 }
 0x338   :  { %1632 = vst [vmem:[%s5729_s6] sm:$0xff] %v1631_v5 }

// kernel: convnn_forward.5
= control target key start
LH: loop header
LB: loop body
LE: loop exit
PB: predicated region body
PF: predicated region fallthrough
CT: control target
= control target key end

     0   :  { %s3077_s0 = inlined_call_operand.vmem [shape: f32[2,1152], index: 0, kind: input, shape index: {}]   ;;  %s3078_s1 = inlined_call_operand.vmem [shape: f32[2,1152], index: 1, kind: input, shape index: {}]   ;;  %s3079_s2 = inlined_call_operand.vmem [shape: f32[2,1152], index: 2, kind: input, shape index: {}]   ;;  %s3080_s3 = inlined_call_operand.vmem [shape: f32[2,1152], index: 3, kind: input, shape index: {}]   ;;  %s3081_s4 = inlined_call_operand.vmem [shape: f32[1152,128], index: 4, kind: input, shape index: {}]   ;;  %s3082_s5 = inlined_call_operand.vmem [shape: f32[1,128], index: 5, kind: input, shape index: {}]   ;;  %s3083_s6 = inlined_call_operand.vmem [shape: f32[128,128], index: 6, kind: input, shape index: {}]   ;;  %s3084_s7 = inlined_call_operand.vmem [shape: f32[1,128], index: 7, kind: input, shape index: {}]   ;;  %s3085_s8 = inlined_call_operand.vmem [shape: f32[128,128], index: 8, kind: input, shape index: {}]   ;;  %s3086_s9 = inlined_call_operand.vmem [shape: f32[1,128], index: 9, kind: input, shape index: {}]   ;;  %s3087_s10 = inlined_call_operand.hbm [shape: f32[2,128], index: 10, kind: output, shape index: {}]  }
   0x1   :  { %v1331_v0 = vld [vmem:[%s3081_s4 + $0x78] sm:$0xff]  ;;  %v1341_v2 = vld [vmem:[%s3081_s4 + $0x70] sm:$0xff]  ;;  %v1365_v6 = vld [vmem:[%s3081_s4 + $0x68] sm:$0xff] }
   0x2   :  { %v1336_v1 = vld [vmem:[%s3081_s4 + $0x178] sm:$0xff]  ;;  %208 = vmatpush.msra.mxu0 %v1331_v0  ;;  %v1353_v4 = vld [vmem:[%s3081_s4 + $0x170] sm:$0xff]  ;;  %v1375_v8 = vld [vmem:[%s3081_s4 + $0x168] sm:$0xff] }
   0x3   :  { %248 = vmatpush.msra.mxu2 %v1336_v1  ;;  %v1348_v3 = vld [vmem:[%s3081_s4 + $0xf8] sm:$0xff]  ;;  %v1370_v7 = vld [vmem:[%s3081_s4 + $0xf0] sm:$0xff]  ;;  %v1387_v10 = vld [vmem:[%s3081_s4 + $0xe8] sm:$0xff] }
   0x4   :  { %v1358_v5 = vld [vmem:[%s3081_s4 + $0x1f8] sm:$0xff]  ;;  %228 = vmatpush.msra.mxu1 %v1348_v3  ;;  %209 = vmatpush.msra.mxu0 %v1341_v2  ;;  %v1382_v9 = vld [vmem:[%s3081_s4 + $0x1f0] sm:$0xff]  ;;  %v1394_v11 = vld [vmem:[%s3081_s4 + $0x60] sm:$0xff] }
   0x5   :  { %3254 = vst [vmem:[#allocation5_spill] sm:$0xff] %v1358_v5  ;;  %268 = vmatpush.msra.mxu3 %v1358_v5  ;;  %249 = vmatpush.msra.mxu2 %v1353_v4  ;;  %v1399_v12 = vld [vmem:[%s3081_s4 + $0x160] sm:$0xff]  ;;  %v1404_v13 = vld [vmem:[%s3081_s4 + $0x1e8] sm:$0xff]  ;;  %v1423_v16 = vld [vmem:[%s3081_s4 + $0x58] sm:$0xff] }
   0x6   :  { %3255 = vst [vmem:[#allocation6_spill] sm:$0xff] %v1382_v9  ;;  %229 = vmatpush.msra.mxu1 %v1370_v7  ;;  %210 = vmatpush.msra.mxu0 %v1365_v6  ;;  %v1411_v14 = vld [vmem:[%s3081_s4 + $0xe0] sm:$0xff]  ;;  %v1428_v17 = vld [vmem:[%s3081_s4 + $0x158] sm:$0xff]  ;;  %v1447_v20 = vld [vmem:[%s3081_s4 + $0x50] sm:$0xff] }
   0x7   :  { %269 = vmatpush.msra.mxu3 %v1382_v9  ;;  %3256 = vst [vmem:[#allocation7_spill] sm:$0xff] %v1399_v12  ;;  %250 = vmatpush.msra.mxu2 %v1375_v8  ;;  %v1416_v15 = vld [vmem:[%s3081_s4 + $0x1e0] sm:$0xff]  ;;  %v1435_v18 = vld [vmem:[%s3081_s4 + $0xd8] sm:$0xff]  ;;  %v1452_v21 = vld [vmem:[%s3081_s4 + $0x150] sm:$0xff] }
   0x8   :  { %3257 = vst [vmem:[#allocation8_spill] sm:$0xff] %v1404_v13  ;;  %230 = vmatpush.msra.mxu1 %v1387_v10  ;;  %211 = vmatpush.msra.mxu0 %v1394_v11  ;;  %v1440_v19 = vld [vmem:[%s3081_s4 + $0x1d8] sm:$0xff]  ;;  %v1459_v22 = vld [vmem:[%s3081_s4 + $0xd0] sm:$0xff]  ;;  %v1471_v24 = vld [vmem:[%s3081_s4 + $0x48] sm:$0xff] }
   0x9   :  { %3258 = vst [vmem:[#allocation9_spill] sm:$0xff] %v1416_v15  ;;  %270 = vmatpush.msra.mxu3 %v1404_v13  ;;  %251 = vmatpush.msra.mxu2 %v1399_v12  ;;  %v1464_v23 = vld [vmem:[%s3081_s4 + $0x1d0] sm:$0xff]  ;;  %v1476_v25 = vld [vmem:[%s3081_s4 + $0x148] sm:$0xff]  ;;  %v1495_v28 = vld [vmem:[%s3081_s4 + $0x40] sm:$0xff] }
   0xa   :  { %3259 = vst [vmem:[#allocation10_spill] sm:$0xff] %v1428_v17  ;;  %231 = vmatpush.msra.mxu1 %v1411_v14  ;;  %212 = vmatpush.msra.mxu0 %v1423_v16  ;;  %v1483_v26 = vld [vmem:[%s3081_s4 + $0xc8] sm:$0xff]  ;;  %v1500_v29 = vld [vmem:[%s3081_s4 + $0x140] sm:$0xff]  ;;  %v1519_v32 = vld [vmem:[%s3081_s4 + $0x38] sm:$0xff] }
   0xb   :  { %3260 = vst [vmem:[#allocation11_spill] sm:$0xff] %v1440_v19  ;;  %271 = vmatpush.msra.mxu3 %v1416_v15  ;;  %252 = vmatpush.msra.mxu2 %v1428_v17  ;;  %v1488_v27 = vld [vmem:[%s3081_s4 + $0x1c8] sm:$0xff]  ;;  %v1507_v30 = vld [vmem:[%s3081_s4 + $0xc0] sm:$0xff]  ;;  %v1524_v33 = vld [vmem:[%s3081_s4 + $0x138] sm:$0xff] }
   0xc   :  { %3261 = vst [vmem:[#allocation12_spill] sm:$0xff] %v1452_v21  ;;  %232 = vmatpush.msra.mxu1 %v1435_v18  ;;  %213 = vmatpush.msra.mxu0 %v1447_v20  ;;  %v1512_v31 = vld [vmem:[%s3081_s4 + $0x1c0] sm:$0xff]  ;;  %v1531_v34 = vld [vmem:[%s3081_s4 + $0xb8] sm:$0xff]  ;;  %v1543_v36 = vld [vmem:[%s3081_s4 + $0x30] sm:$0xff] }
   0xd   :  { %3262 = vst [vmem:[#allocation13_spill] sm:$0xff] %v1464_v23  ;;  %272 = vmatpush.msra.mxu3 %v1440_v19  ;;  %253 = vmatpush.msra.mxu2 %v1452_v21  ;;  %v1536_v35 = vld [vmem:[%s3081_s4 + $0x1b8] sm:$0xff]  ;;  %v1548_v37 = vld [vmem:[%s3081_s4 + $0x130] sm:$0xff]  ;;  %v1567_v40 = vld [vmem:[%s3081_s4 + $0x28] sm:$0xff] }
   0xe   :  { %3263 = vst [vmem:[#allocation14_spill] sm:$0xff] %v1476_v25  ;;  %233 = vmatpush.msra.mxu1 %v1459_v22  ;;  %214 = vmatpush.msra.mxu0 %v1471_v24  ;;  %v1555_v38 = vld [vmem:[%s3081_s4 + $0xb0] sm:$0xff]  ;;  %v1572_v41 = vld [vmem:[%s3081_s4 + $0x128] sm:$0xff]  ;;  %v1591_v44 = vld [vmem:[%s3081_s4 + $0x20] sm:$0xff] }
   0xf   :  { %3264 = vst [vmem:[#allocation15_spill] sm:$0xff] %v1488_v27  ;;  %273 = vmatpush.msra.mxu3 %v1464_v23  ;;  %254 = vmatpush.msra.mxu2 %v1476_v25  ;;  %v1560_v39 = vld [vmem:[%s3081_s4 + $0x1b0] sm:$0xff]  ;;  %v1579_v42 = vld [vmem:[%s3081_s4 + $0xa8] sm:$0xff]  ;;  %v1596_v45 = vld [vmem:[%s3081_s4 + $0x120] sm:$0xff] }
  0x10   :  { %3265 = vst [vmem:[#allocation16_spill] sm:$0xff] %v1500_v29  ;;  %234 = vmatpush.msra.mxu1 %v1483_v26  ;;  %215 = vmatpush.msra.mxu0 %v1495_v28  ;;  %v1584_v43 = vld [vmem:[%s3081_s4 + $0x1a8] sm:$0xff]  ;;  %v1603_v46 = vld [vmem:[%s3081_s4 + $0xa0] sm:$0xff]  ;;  %v1615_v48 = vld [vmem:[%s3081_s4 + $0x18] sm:$0xff] }
  0x11   :  { %3266 = vst [vmem:[#allocation17_spill] sm:$0xff] %v1512_v31  ;;  %274 = vmatpush.msra.mxu3 %v1488_v27  ;;  %255 = vmatpush.msra.mxu2 %v1500_v29  ;;  %v1608_v47 = vld [vmem:[%s3081_s4 + $0x1a0] sm:$0xff]  ;;  %v1620_v49 = vld [vmem:[%s3081_s4 + $0x118] sm:$0xff]  ;;  %v1639_v52 = vld [vmem:[%s3081_s4 + $0x10] sm:$0xff] }
  0x12   :  { %3267 = vst [vmem:[#allocation18_spill] sm:$0xff] %v1524_v33  ;;  %235 = vmatpush.msra.mxu1 %v1507_v30  ;;  %216 = vmatpush.msra.mxu0 %v1519_v32  ;;  %v1627_v50 = vld [vmem:[%s3081_s4 + $0x98] sm:$0xff]  ;;  %v1644_v53 = vld [vmem:[%s3081_s4 + $0x110] sm:$0xff]  ;;  %v1663_v56 = vld [vmem:[%s3081_s4 + $0x8] sm:$0xff] }
  0x13   :  { %3268 = vst [vmem:[#allocation19_spill] sm:$0xff] %v1536_v35  ;;  %275 = vmatpush.msra.mxu3 %v1512_v31  ;;  %256 = vmatpush.msra.mxu2 %v1524_v33  ;;  %v1632_v51 = vld [vmem:[%s3081_s4 + $0x198] sm:$0xff]  ;;  %v1651_v54 = vld [vmem:[%s3081_s4 + $0x90] sm:$0xff]  ;;  %v1668_v57 = vld [vmem:[%s3081_s4 + $0x108] sm:$0xff] }
  0x14   :  { %3269 = vst [vmem:[#allocation20_spill] sm:$0xff] %v1548_v37  ;;  %236 = vmatpush.msra.mxu1 %v1531_v34  ;;  %217 = vmatpush.msra.mxu0 %v1543_v36  ;;  %v1656_v55 = vld [vmem:[%s3081_s4 + $0x190] sm:$0xff]  ;;  %v1675_v58 = vld [vmem:[%s3081_s4 + $0x88] sm:$0xff]  ;;  %v1687_v60 = vld [vmem:[%s3081_s4] sm:$0xff] }
  0x15   :  { %3270 = vst [vmem:[#allocation21_spill] sm:$0xff] %v1560_v39  ;;  %276 = vmatpush.msra.mxu3 %v1536_v35  ;;  %257 = vmatpush.msra.mxu2 %v1548_v37  ;;  %v1680_v59 = vld [vmem:[%s3081_s4 + $0x188] sm:$0xff]  ;;  %v1692_v61 = vld [vmem:[%s3081_s4 + $0x100] sm:$0xff]  ;;  %v1699_v62 = vld [vmem:[%s3081_s4 + $0x278] sm:$0xff] }
  0x16   :  { %3271 = vst [vmem:[#allocation22_spill] sm:$0xff] %v1572_v41  ;;  %237 = vmatpush.msra.mxu1 %v1555_v38  ;;  %218 = vmatpush.msra.mxu0 %v1567_v40  ;;  %v1704_v63 = vld [vmem:[%s3081_s4 + $0x378] sm:$0xff]  ;;  %v1747_v35 = vld [vmem:[%s3081_s4 + $0x268] sm:$0xff]  ;;  %v1752_v31 = vld [vmem:[%s3081_s4 + $0x2f0] sm:$0xff] }
  0x17   :  { %3272 = vst [vmem:[#allocation23_spill] sm:$0xff] %v1584_v43  ;;  %277 = vmatpush.msra.mxu3 %v1560_v39  ;;  %258 = vmatpush.msra.mxu2 %v1572_v41  ;;  %v1740_v39 = vld [vmem:[%s3081_s4 + $0x3f8] sm:$0xff]  ;;  %v1759_v27 = vld [vmem:[%s3081_s4 + $0x368] sm:$0xff]  ;;  %v1771_v23 = vld [vmem:[%s3081_s4 + $0x260] sm:$0xff] }
  0x18   :  { %3273 = vst [vmem:[#allocation24_spill] sm:$0xff] %v1596_v45  ;;  %238 = vmatpush.msra.mxu1 %v1579_v42  ;;  %219 = vmatpush.msra.mxu0 %v1591_v44  ;;  %v1776_v19 = vld [vmem:[%s3081_s4 + $0x2e8] sm:$0xff]  ;;  %v1783_v15 = vld [vmem:[%s3081_s4 + $0x360] sm:$0xff]  ;;  %v1922_v9 = vld [vmem:[%s3081_s4 + $0x2b8] sm:$0xff] }
  0x19   :  { %3274 = vst [vmem:[#allocation25_spill] sm:$0xff] %v1608_v47  ;;  %278 = vmatpush.msra.mxu3 %v1584_v43  ;;  %259 = vmatpush.msra.mxu2 %v1596_v45  ;;  %v1735_v43 = vld [vmem:[%s3081_s4 + $0x370] sm:$0xff]  ;;  %v180_v13 = vld [vmem:[%s3077_s0] sm:$0xff] }
  0x1a   :  { %3275 = vst [vmem:[#allocation26_spill] sm:$0xff] %v1620_v49  ;;  %239 = vmatpush.msra.mxu1 %v1603_v46  ;;  %220 = vmatpush.msra.mxu0 %v1615_v48 }
  0x1b   :  { %3276 = vst [vmem:[#allocation27_spill] sm:$0xff] %v1632_v51  ;;  %279 = vmatpush.msra.mxu3 %v1608_v47  ;;  %260 = vmatpush.msra.mxu2 %v1620_v49  ;;  %v1723_v47 = vld [vmem:[%s3081_s4 + $0x270] sm:$0xff] }
  0x1c   :  { %3277 = vst [vmem:[#allocation28_spill] sm:$0xff] %v1644_v53  ;;  %240 = vmatpush.msra.mxu1 %v1627_v50  ;;  %221 = vmatpush.msra.mxu0 %v1639_v52 }
  0x1d   :  { %3278 = vst [vmem:[#allocation29_spill] sm:$0xff] %v1656_v55  ;;  %280 = vmatpush.msra.mxu3 %v1632_v51  ;;  %261 = vmatpush.msra.mxu2 %v1644_v53  ;;  %v1716_v51 = vld [vmem:[%s3081_s4 + $0x180] sm:$0xff] }
  0x1e   :  { %3279 = vst [vmem:[#allocation30_spill] sm:$0xff] %v1668_v57  ;;  %241 = vmatpush.msra.mxu1 %v1651_v54  ;;  %222 = vmatpush.msra.mxu0 %v1663_v56 }
  0x1f   :  { %3280 = vst [vmem:[#allocation31_spill] sm:$0xff] %v1675_v58  ;;  %281 = vmatpush.msra.mxu3 %v1656_v55  ;;  %262 = vmatpush.msra.mxu2 %v1668_v57  ;;  %v1711_v55 = vld [vmem:[%s3081_s4 + $0x80] sm:$0xff] }
  0x20   :  { %3281 = vst [vmem:[#allocation32_spill] sm:$0xff] %v1680_v59  ;;  %242 = vmatpush.msra.mxu1 %v1675_v58  ;;  %223 = vmatpush.msra.mxu0 %v1687_v60 }
  0x21   :  { %3282 = vst [vmem:[#allocation33_spill] sm:$0xff] %v1687_v60  ;;  %282 = vmatpush.msra.mxu3 %v1680_v59  ;;  %263 = vmatpush.msra.mxu2 %v1692_v61  ;;  %v1728_v59 = vld [vmem:[%s3081_s4 + $0x2f8] sm:$0xff] }
  0x22   :  { %3283 = vst [vmem:[#allocation34_spill] sm:$0xff] %v1692_v61  ;;  %288 = vmatpush.msrb.mxu0 %v1699_v62  ;;  %243 = vmatpush.msra.mxu1 %v1711_v55 }
  0x23   :  { %3284 = vst [vmem:[#allocation35_spill] sm:$0xff] %v1699_v62  ;;  %328 = vmatpush.msrb.mxu2 %v1704_v63  ;;  %283 = vmatpush.msra.mxu3 %v1716_v51 }
  0x24   :  { %3285 = vst [vmem:[#allocation36_spill] sm:$0xff] %v1704_v63  ;;  %289 = vmatpush.msrb.mxu0 %v1723_v47  ;;  %308 = vmatpush.msrb.mxu1 %v1728_v59  ;;  %v1873_v63 = vld [vmem:[%s3081_s4 + $0x2c8] sm:$0xff] }
  0x25   :  { %3286 = vst [vmem:[#allocation37_spill] sm:$0xff] %v1711_v55  ;;  %329 = vmatpush.msrb.mxu2 %v1735_v43  ;;  %348 = vmatpush.msrb.mxu3 %v1740_v39 }
  0x26   :  { %3287 = vst [vmem:[#allocation38_spill] sm:$0xff] %v1716_v51  ;;  %v1764_v51 = vld [vmem:[%s3081_s4 + $0x3f0] sm:$0xff]  ;;  %290 = vmatpush.msrb.mxu0 %v1747_v35  ;;  %309 = vmatpush.msrb.mxu1 %v1752_v31 }
  0x27   :  { %3288 = vst [vmem:[#allocation39_spill] sm:$0xff] %v1723_v47  ;;  %330 = vmatpush.msrb.mxu2 %v1759_v27  ;;  %349 = vmatpush.msrb.mxu3 %v1764_v51  ;;  %v1856_v47 = vld [vmem:[%s3081_s4 + $0x348] sm:$0xff] }
  0x28   :  { %3289 = vst [vmem:[#allocation40_spill] sm:$0xff] %v1728_v59  ;;  %291 = vmatpush.msrb.mxu0 %v1771_v23  ;;  %310 = vmatpush.msrb.mxu1 %v1776_v19 }
  0x29   :  { %3290 = vst [vmem:[#allocation41_spill] sm:$0xff] %v1735_v43  ;;  %v1800_v43 = vld [vmem:[%s3081_s4 + $0x2e0] sm:$0xff]  ;;  %331 = vmatpush.msrb.mxu2 %v1783_v15 }
  0x2a   :  { %3291 = vst [vmem:[#allocation42_spill] sm:$0xff] %v1740_v39  ;;  %v1788_v39 = vld [vmem:[%s3081_s4 + $0x3e8] sm:$0xff]  ;;  %311 = vmatpush.msrb.mxu1 %v1800_v43 }
  0x2b   :  { %3292 = vst [vmem:[#allocation43_spill] sm:$0xff] %v1747_v35  ;;  %v1795_v35 = vld [vmem:[%s3081_s4 + $0x258] sm:$0xff]  ;;  %350 = vmatpush.msrb.mxu3 %v1788_v39 }
  0x2c   :  { %3293 = vst [vmem:[#allocation44_spill] sm:$0xff] %v1752_v31  ;;  %292 = vmatpush.msrb.mxu0 %v1795_v35  ;;  %v181_v31 = vld [vmem:[%s3077_s0 + $0x8] sm:$0xff] }
  0x2d   :  { %3294 = vst [vmem:[#allocation45_spill] sm:$0xff] %v1759_v27  ;;  %v1807_v27 = vld [vmem:[%s3081_s4 + $0x358] sm:$0xff] }
  0x2e   :  { %3295 = vst [vmem:[#allocation46_spill] sm:$0xff] %v1764_v51  ;;  %v1812_v51 = vld [vmem:[%s3081_s4 + $0x3e0] sm:$0xff]  ;;  %332 = vmatpush.msrb.mxu2 %v1807_v27 }
  0x2f   :  { %3296 = vst [vmem:[#allocation47_spill] sm:$0xff] %v1771_v23  ;;  %v1819_v23 = vld [vmem:[%s3081_s4 + $0x250] sm:$0xff]  ;;  %351 = vmatpush.msrb.mxu3 %v1812_v51 }
  0x30   :  { %3297 = vst [vmem:[#allocation48_spill] sm:$0xff] %v1776_v19  ;;  %v1824_v19 = vld [vmem:[%s3081_s4 + $0x2d8] sm:$0xff]  ;;  %293 = vmatpush.msrb.mxu0 %v1819_v23 }
  0x31   :  { %3298 = vst [vmem:[#allocation49_spill] sm:$0xff] %v1783_v15  ;;  %v1831_v15 = vld [vmem:[%s3081_s4 + $0x350] sm:$0xff]  ;;  %312 = vmatpush.msrb.mxu1 %v1824_v19 }
  0x32   :  { %3299 = vst [vmem:[#allocation50_spill] sm:$0xff] %v1788_v39  ;;  %v1836_v39 = vld [vmem:[%s3081_s4 + $0x3d8] sm:$0xff]  ;;  %333 = vmatpush.msrb.mxu2 %v1831_v15 }
  0x33   :  { %3300 = vst [vmem:[#allocation51_spill] sm:$0xff] %v1795_v35  ;;  %v1846_v35 = vld [vmem:[%s3081_s4 + $0x248] sm:$0xff]  ;;  %352 = vmatpush.msrb.mxu3 %v1836_v39 }
  0x34   :  { %3301 = vst [vmem:[#allocation52_spill] sm:$0xff] %v1800_v43  ;;  %v1851_v43 = vld [vmem:[%s3081_s4 + $0x2d0] sm:$0xff]  ;;  %294 = vmatpush.msrb.mxu0 %v1846_v35  ;;  %334 = vmatpush.msrb.mxu2 %v1856_v47 }
  0x35   :  { %3302 = vst [vmem:[#allocation53_spill] sm:$0xff] %v1807_v27  ;;  %v1868_v27 = vld [vmem:[%s3081_s4 + $0x240] sm:$0xff]  ;;  %313 = vmatpush.msrb.mxu1 %v1851_v43 }
  0x36   :  { %3303 = vst [vmem:[#allocation54_spill] sm:$0xff] %v1812_v51  ;;  %v1863_v51 = vld [vmem:[%s3081_s4 + $0x3d0] sm:$0xff]  ;;  %295 = vmatpush.msrb.mxu0 %v1868_v27 }
  0x37   :  { %3304 = vst [vmem:[#allocation55_spill] sm:$0xff] %v1819_v23  ;;  %v1885_v23 = vld [vmem:[%s3081_s4 + $0x3c8] sm:$0xff]  ;;  %353 = vmatpush.msrb.mxu3 %v1863_v51  ;;  %314 = vmatpush.msrb.mxu1 %v1873_v63 }
  0x38   :  { %3305 = vst [vmem:[#allocation56_spill] sm:$0xff] %v1824_v19  ;;  %v1890_v19 = vld [vmem:[%s3081_s4 + $0x238] sm:$0xff] }
  0x39   :  { %3306 = vst [vmem:[#allocation57_spill] sm:$0xff] %v1831_v15  ;;  %v1902_v15 = vld [vmem:[%s3081_s4 + $0x338] sm:$0xff]  ;;  %354 = vmatpush.msrb.mxu3 %v1885_v23 }
  0x3a   :  { %3307 = vst [vmem:[#allocation58_spill] sm:$0xff] %v1836_v39  ;;  %v1897_v39 = vld [vmem:[%s3081_s4 + $0x2c0] sm:$0xff] }
  0x3b   :  { %3308 = vst [vmem:[#allocation59_spill] sm:$0xff] %v1846_v35  ;;  %v1912_v35 = vld [vmem:[%s3081_s4 + $0x3c0] sm:$0xff] }
  0x3c   :  { %3309 = vst [vmem:[#allocation60_spill] sm:$0xff] %v1851_v43  ;;  %v1917_v43 = vld [vmem:[%s3081_s4 + $0x230] sm:$0xff] }
  0x3d   :  { %3310 = vst [vmem:[#allocation61_spill] sm:$0xff] %v1856_v47  ;;  %v1934_v47 = vld [vmem:[%s3081_s4 + $0x3b8] sm:$0xff] }
  0x3e   :  { %186 = vst [vmem:[#allocation1] ss:$4 sm:$0xff] %v180_v13  ;;  %v1880_v13 = vld [vmem:[%s3081_s4 + $0x340] sm:$0xff] }
  0x3f   :  { %3311 = vst [vmem:[#allocation62_spill] sm:$0xff] %v1863_v51  ;;  %v1929_v51 = vld [vmem:[%s3081_s4 + $0x330] sm:$0xff]  ;;  %335 = vmatpush.msrb.mxu2 %v1880_v13 }
  0x40   :  { %3312 = vst [vmem:[#allocation63_spill] sm:$0xff] %v1868_v27  ;;  %v1946_v27 = vld [vmem:[%s3081_s4 + $0x2b0] sm:$0xff] }
  0x41   :  { %3313 = vst [vmem:[#allocation64_spill] sm:$0xff] %v1873_v63  ;;  %v182_v63 = vld [vmem:[%s3077_s0 + $0x10] sm:$0x3] }
  0x42   :  { %3314 = vst [vmem:[#allocation65_spill] sm:$0xff] %v1880_v13 }
  0x43   :  { %3315 = vst [vmem:[#allocation66_spill] sm:$0xff] %v1885_v23 }
  0x44   :  { %3316 = vst [vmem:[#allocation67_spill] sm:$0xff] %v1890_v19 }
  0x45   :  { %3317 = vst [vmem:[#allocation68_spill] sm:$0xff] %v1897_v39 }
  0x46   :  { %3318 = vst [vmem:[#allocation69_spill] sm:$0xff] %v1902_v15 }
  0x47   :  { %3319 = vst [vmem:[#allocation70_spill] sm:$0xff] %v1912_v35 }
  0x48   :  { %3320 = vst [vmem:[#allocation71_spill] sm:$0xff] %v1917_v43 }
  0x49   :  { %3321 = vst [vmem:[#allocation72_spill] sm:$0xff] %v1922_v9 }
  0x4a   :  { %188 = vst [vmem:[#allocation1 + $0x20] ss:$4 sm:$0xff] %v181_v31  ;;  %v1941_v31 = vld [vmem:[%s3081_s4 + $0x228] sm:$0xff] }
  0x4b   :  { %3322 = vst [vmem:[#allocation73_spill] sm:$0xff] %v1929_v51 }
  0x4c   :  { %3323 = vst [vmem:[#allocation74_spill] sm:$0xff] %v1934_v47 }
  0x4d   :  { %3324 = vst [vmem:[#allocation75_spill] sm:$0xff] %v1941_v31 }
  0x4e   :  { %3325 = vst [vmem:[#allocation76_spill] sm:$0xff] %v1946_v27 }
  0x4f   :  { %15 = vsyncpa [#allocation3], 0  ;;  %296 = vmatpush.msrb.mxu0 %v1890_v19  ;;  %315 = vmatpush.msrb.mxu1 %v1897_v39  ;;  %v1956_v23 = vld [vmem:[%s3081_s4 + $0x328] sm:$0xff]  ;;  %v1961_v13 = vld [vmem:[%s3081_s4 + $0x3b0] sm:$0xff]  ;;  %s1110_s25 = sshll.u32 %s3087_s10, 4  ;;  %s1111_s25 = int_to_ptr.hbm [resolvable:$true] %s1110_s25 }
  0x50   :  { %3326 = vst [vmem:[#allocation77_spill] sm:$0xff] %v1956_v23  ;;  %v191_v62 = vld.sshfl [vmem:[#allocation1 + $0x10] sm:$0xff pattern:$0x73625140]  ;;  %336 = vmatpush.msrb.mxu2 %v1902_v15  ;;  %355 = vmatpush.msrb.mxu3 %v1912_v35  ;;  %v1968_v19 = vld [vmem:[%s3081_s4 + $0x220] sm:$0xff]  ;;  %v1977_v5 = vld [vmem:[%s3081_s4 + $0x2a8] sm:$0xff] }
  0x51   :  { %3327 = vst [vmem:[#allocation78_spill] sm:$0xff] %v1961_v13  ;;  %v189_v61 = vld.sshfl [vmem:[#allocation1] sm:$0xff pattern:$0x73625140]  ;;  %297 = vmatpush.msrb.mxu0 %v1917_v43  ;;  %316 = vmatpush.msrb.mxu1 %v1922_v9  ;;  %v1987_v15 = vld [vmem:[%s3081_s4 + $0x3a8] sm:$0xff]  ;;  %v1994_v43 = vld [vmem:[%s3081_s4 + $0x218] sm:$0xff] }
  0x52   :  { %3328 = vst [vmem:[#allocation79_spill] sm:$0xff] %v1968_v19  ;;  %v192_v39 = vld.sshfl [vmem:[#allocation1 + $0x18] sm:$0xff pattern:$0x73625140]  ;;  %v1982_v35 = vld [vmem:[%s3081_s4 + $0x320] sm:$0xff]  ;;  %337 = vmatpush.msrb.mxu2 %v1929_v51  ;;  %356 = vmatpush.msrb.mxu3 %v1934_v47  ;;  %v389_v59 = vld [vmem:[%s3078_s1 + $0x8] sm:$0xff] }
  0x53   :  { %v1970_v60 = vld.sshfl [vmem:[#allocation1 + $0x8] sm:$0xff pattern:$0x73625140]  ;;  %3329 = vst [vmem:[#allocation80_spill] sm:$0xff] %v1977_v5  ;;  %v1999_v9 = vld [vmem:[%s3081_s4 + $0x2a0] sm:$0xff]  ;;  %298 = vmatpush.msrb.mxu0 %v1941_v31  ;;  %317 = vmatpush.msrb.mxu1 %v1946_v27  ;;  %v2021_v31 = vld [vmem:[%s3081_s4 + $0x318] sm:$0xff] }
  0x54   :  { %3330 = vst [vmem:[#allocation81_spill] sm:$0xff] %v1982_v35  ;;  %v2008_v47 = vld.sshfl [vmem:[#allocation1 + $0x20] sm:$0xff pattern:$0x73625140]  ;;  %338 = vmatpush.msrb.mxu2 %v1956_v23  ;;  %357 = vmatpush.msrb.mxu3 %v1961_v13  ;;  %v2033_v13 = vld [vmem:[%s3081_s4 + $0x210] sm:$0xff] }
  0x55   :  { %3331 = vst [vmem:[#allocation82_spill] sm:$0xff] %v1987_v15  ;;  %v2012_v51 = vld.sshfl [vmem:[#allocation1 + $0x38] sm:$0xff pattern:$0x73625140]  ;;  %299 = vmatpush.msrb.mxu0 %v1968_v19  ;;  %318 = vmatpush.msrb.mxu1 %v1977_v5  ;;  %v2026_v27 = vld [vmem:[%s3081_s4 + $0x3a0] sm:$0xff] }
  0x56   :  { %197 = vst [vmem:[#allocation1] ss:$4 sm:$0xff] %v182_v63  ;;  %v2006_v63 = vld.sshfl [vmem:[#allocation1 + $0x30] sm:$0xff pattern:$0x73625140]  ;;  %339 = vmatpush.msrb.mxu2 %v1982_v35  ;;  %358 = vmatpush.msrb.mxu3 %v1987_v15  ;;  %v2038_v19 = vld [vmem:[%s3081_s4 + $0x298] sm:$0xff] }
  0x57   :  { %3332 = vst [vmem:[#allocation83_spill] sm:$0xff] %v1994_v43  ;;  %v2014_v57 = vld.sshfl [vmem:[#allocation1 + $0x28] sm:$0xff pattern:$0x73625140]  ;;  %300 = vmatpush.msrb.mxu0 %v1994_v43  ;;  %319 = vmatpush.msrb.mxu1 %v1999_v9  ;;  %v2050_v15 = vld [vmem:[%s3081_s4 + $0x398] sm:$0xff]  ;;  %v2062_v35 = vld [vmem:[%s3081_s4 + $0x290] sm:$0xff] }
  0x58   :  { %3333 = vst [vmem:[#allocation84_spill] sm:$0xff] %v1999_v9  ;;  %340 = vmatpush.msrb.mxu2 %v2021_v31  ;;  %359 = vmatpush.msrb.mxu3 %v2026_v27  ;;  %v2057_v43 = vld [vmem:[%s3081_s4 + $0x208] sm:$0xff] }
  0x59   :  { %3334 = vst [vmem:[#allocation85_spill] sm:$0xff] %v2021_v31  ;;  %301 = vmatpush.msrb.mxu0 %v2033_v13  ;;  %320 = vmatpush.msrb.mxu1 %v2038_v19  ;;  %v2069_v31 = vld [vmem:[%s3081_s4 + $0x308] sm:$0xff] }
  0x5a   :  { %3335 = vst [vmem:[#allocation86_spill] sm:$0xff] %v2026_v27  ;;  %v2074_v27 = vld [vmem:[%s3081_s4 + $0x390] sm:$0xff]  ;;  %360 = vmatpush.msrb.mxu3 %v2050_v15  ;;  %264 = vmatmul.f32.vlgmr.msra.gmra.mxu2 %v191_v62  ;;  %v2119_v62 = vld [vmem:[%s3081_s4 + $0x380] sm:$0xff] }
  0x5b   :  { %396 = vst [vmem:[#allocation1 + $0x20] ss:$4 sm:$0xff] %v389_v59  ;;  %v2045_v59 = vld [vmem:[%s3081_s4 + $0x310] sm:$0xff]  ;;  %302 = vmatpush.msrb.mxu0 %v2057_v43  ;;  %321 = vmatpush.msrb.mxu1 %v2062_v35 }
  0x5c   :  { %3336 = vst [vmem:[#allocation87_spill] sm:$0xff] %v2033_v13  ;;  %341 = vmatpush.msrb.mxu2 %v2045_v59  ;;  %v2081_v13 = vld [vmem:[%s3081_s4 + $0x200] sm:$0xff]  ;;  %361 = vmatpush.msrb.mxu3 %v2074_v27 }
  0x5d   :  { %3337 = vst [vmem:[#allocation88_spill] sm:$0xff] %v2038_v19  ;;  %v2088_v19 = vld [vmem:[%s3081_s4 + $0x288] sm:$0xff]  ;;  %303 = vmatpush.msrb.mxu0 %v2081_v13  ;;  %284 = vmatmul.f32.vlgmr.msra.gmra.mxu3 %v192_v39  ;;  %v2138_v39 = vld.sshfl [vmem:[#allocation1] sm:$0xff pattern:$0x73625140] }
  0x5e   :  { %3338 = vst [vmem:[#allocation89_spill] sm:$0xff] %v2045_v59  ;;  %v2093_v59 = vld [vmem:[%s3081_s4 + $0x300] sm:$0xff]  ;;  %342 = vmatpush.msrb.mxu2 %v2069_v31  ;;  %322 = vmatpush.msrb.mxu1 %v2088_v19 }
  0x5f   :  { %3339 = vst [vmem:[#allocation90_spill] sm:$0xff] %v2050_v15  ;;  %v2100_v15 = vld [vmem:[%s3081_s4 + $0x388] sm:$0xff]  ;;  %224 = vmatmul.f32.vlgmr.msra.gmra.mxu0 %v189_v61  ;;  %244 = vmatmul.f32.vlgmr.msra.gmra.mxu1 %v1970_v60  ;;  %v2148_v60 = vld [vmem:[%s3081_s4 + $0x460] sm:$0xff] }
  0x60   :  { %3340 = vst [vmem:[#allocation91_spill] sm:$0xff] %v2057_v43  ;;  %v2106_v43 = vld [vmem:[%s3081_s4 + $0x478] sm:$0xff]  ;;  %343 = vmatpush.msrb.mxu2 %v2093_v59  ;;  %362 = vmatpush.msrb.mxu3 %v2100_v15  ;;  %v2134_v61 = vld [vmem:[%s3081_s4 + $0x468] sm:$0xff] }
  0x61   :  { %3341 = vst [vmem:[#allocation92_spill] sm:$0xff] %v2062_v35  ;;  %368 = vmatpush.msra.mxu0 %v2106_v43 }
  0x62   :  { %3342 = vst [vmem:[#allocation93_spill] sm:$0xff] %v2074_v27  ;;  %v2113_v27 = vld [vmem:[%s3081_s4 + $0x280] sm:$0xff]  ;;  %436 = vmatpush.msra.mxu2 %v1348_v3  ;;  %363 = vmatpush.msrb.mxu3 %v2119_v62 }
  0x63   :  { %3343 = vst [vmem:[#allocation94_spill] sm:$0xff] %v2088_v19  ;;  %323 = vmatpush.msrb.mxu1 %v2113_v27  ;;  %344 = vmatmul.f32.vlgmr.msrb.gmra.mxu2 %v2006_v63  ;;  %v2224_v63 = vld [vmem:[%s3081_s4 + $0x420] sm:$0xff] }
  0x64   :  { %3344 = vst [vmem:[#allocation95_spill] sm:$0xff] %v2093_v59  ;;  %v2125_v59 = vld [vmem:[%s3081_s4 + $0x470] sm:$0xff]  ;;  %437 = vmatpush.msra.mxu2 %v1370_v7  ;;  %456 = vmatpush.msra.mxu3 %v1336_v1  ;;  %v2159_v1 = vld [vmem:[%s3081_s4 + $0x458] sm:$0xff] }
  0x65   :  { %3345 = vst [vmem:[#allocation96_spill] sm:$0xff] %v2100_v15  ;;  %369 = vmatpush.msra.mxu0 %v2125_v59  ;;  %416 = vmatpush.msra.mxu1 %v1331_v0  ;;  %v388_v15 = vld [vmem:[%s3078_s1] sm:$0xff] }
  0x66   :  { %394 = vst [vmem:[#allocation1] ss:$4 sm:$0xff] %v388_v15  ;;  %438 = vmatpush.msra.mxu2 %v1387_v10  ;;  %457 = vmatpush.msra.mxu3 %v1353_v4  ;;  %v2170_v4 = vld [vmem:[%s3081_s4 + $0x450] sm:$0xff]  ;;  %v2188_v15 = vld [vmem:[%s3081_s4 + $0x440] sm:$0xff] }
  0x67   :  { %370 = vmatpush.msra.mxu0 %v2134_v61  ;;  %417 = vmatpush.msra.mxu1 %v1341_v2 }
  0x68   :  { %439 = vmatpush.msra.mxu2 %v1411_v14  ;;  %458 = vmatpush.msra.mxu3 %v1375_v8  ;;  %v2179_v8 = vld [vmem:[%s3081_s4 + $0x448] sm:$0xff] }
  0x69   :  { %371 = vmatpush.msra.mxu0 %v2148_v60  ;;  %418 = vmatpush.msra.mxu1 %v1365_v6 }
  0x6a   :  { %304 = vmatmul.f32.vlgmr.msrb.gmra.mxu0 %v2008_v47  ;;  %364 = vmatmul.f32.vlgmr.msrb.gmra.mxu3 %v2012_v51  ;;  %v2197_v47 = vld [vmem:[%s3081_s4 + $0x438] sm:$0xff]  ;;  %v2206_v51 = vld [vmem:[%s3081_s4 + $0x430] sm:$0xff] }
  0x6b   :  { %372 = vmatpush.msra.mxu0 %v2159_v1  ;;  %419 = vmatpush.msra.mxu1 %v1394_v11 }
  0x6c   :  { %440 = vmatpush.msra.mxu2 %v1435_v18  ;;  %459 = vmatpush.msra.mxu3 %v1399_v12  ;;  %v3352_v12 = vld [vmem:[#allocation35_spill] sm:$0xff] }
  0x6d   :  { %324 = vmatmul.f32.vlgmr.msrb.gmra.mxu1 %v2014_v57  ;;  %373 = vmatpush.msra.mxu0 %v2170_v4  ;;  %v2215_v57 = vld [vmem:[%s3081_s4 + $0x428] sm:$0xff] }
  0x6e   :  { %420 = vmatpush.msra.mxu1 %v1423_v16  ;;  %441 = vmatpush.msra.mxu2 %v1459_v22 }
  0x6f   :  { %460 = vmatpush.msra.mxu3 %v1428_v17  ;;  %374 = vmatpush.msra.mxu0 %v2179_v8  ;;  %v3351_v17 = vld [vmem:[#allocation34_spill] sm:$0xff] }
  0x70   :  { %421 = vmatpush.msra.mxu1 %v1447_v20  ;;  %442 = vmatpush.msra.mxu2 %v1483_v26 }
  0x71   :  { %461 = vmatpush.msra.mxu3 %v1452_v21  ;;  %375 = vmatpush.msra.mxu0 %v2188_v15  ;;  %v3350_v21 = vld [vmem:[#allocation33_spill] sm:$0xff] }
  0x72   :  { %422 = vmatpush.msra.mxu1 %v1471_v24  ;;  %443 = vmatpush.msra.mxu2 %v1507_v30 }
  0x73   :  { %462 = vmatpush.msra.mxu3 %v1476_v25  ;;  %376 = vmatpush.msra.mxu0 %v2197_v47  ;;  %v3349_v25 = vld [vmem:[#allocation5_spill] sm:$0xff] }
  0x74   :  { %423 = vmatpush.msra.mxu1 %v1495_v28  ;;  %444 = vmatpush.msra.mxu2 %v1531_v34 }
  0x75   :  { %463 = vmatpush.msra.mxu3 %v1500_v29  ;;  %377 = vmatpush.msra.mxu0 %v2206_v51  ;;  %v2233_v29 = vld [vmem:[%s3081_s4 + $0x418] sm:$0xff] }
  0x76   :  { %424 = vmatpush.msra.mxu1 %v1519_v32  ;;  %445 = vmatpush.msra.mxu2 %v1555_v38 }
  0x77   :  { %464 = vmatpush.msra.mxu3 %v1524_v33  ;;  %378 = vmatpush.msra.mxu0 %v2215_v57  ;;  %v2242_v33 = vld [vmem:[%s3081_s4 + $0x410] sm:$0xff] }
  0x78   :  { %425 = vmatpush.msra.mxu1 %v1543_v36  ;;  %446 = vmatpush.msra.mxu2 %v1579_v42 }
  0x79   :  { %465 = vmatpush.msra.mxu3 %v1548_v37  ;;  %379 = vmatpush.msra.mxu0 %v2224_v63  ;;  %v2251_v37 = vld [vmem:[%s3081_s4 + $0x408] sm:$0xff] }
  0x7a   :  { %426 = vmatpush.msra.mxu1 %v1567_v40  ;;  %447 = vmatpush.msra.mxu2 %v1603_v46 }
  0x7b   :  { %466 = vmatpush.msra.mxu3 %v1572_v41  ;;  %380 = vmatpush.msra.mxu0 %v2233_v29  ;;  %v2260_v41 = vld [vmem:[%s3081_s4 + $0x400] sm:$0xff] }
  0x7c   :  { %427 = vmatpush.msra.mxu1 %v1591_v44  ;;  %448 = vmatpush.msra.mxu2 %v1627_v50  ;;  %3346 = vst [vmem:[#allocation97_spill] sm:$0xff] %v2260_v41 }
  0x7d   :  { %467 = vmatpush.msra.mxu3 %v1596_v45  ;;  %381 = vmatpush.msra.mxu0 %v2242_v33  ;;  %v3348_v45 = vld [vmem:[#allocation40_spill] sm:$0xff] }
  0x7e   :  { %428 = vmatpush.msra.mxu1 %v1615_v48  ;;  %449 = vmatpush.msra.mxu2 %v1651_v54 }
  0x7f   :  { %468 = vmatpush.msra.mxu3 %v1620_v49  ;;  %382 = vmatpush.msra.mxu0 %v2251_v37  ;;  %v3347_v49 = vld [vmem:[#allocation30_spill] sm:$0xff] }
  0x80   :  { %429 = vmatpush.msra.mxu1 %v1639_v52  ;;  %450 = vmatpush.msra.mxu2 %v1675_v58  ;;  %v3355_v58 = vld [vmem:[#allocation36_spill] sm:$0xff] }
  0x81   :  { %469 = vmatpush.msra.mxu3 %v1644_v53  ;;  %383 = vmatpush.msra.mxu0 %v2260_v41  ;;  %v3353_v53 = vld [vmem:[#allocation6_spill] sm:$0xff]  ;;  %v3354_v41 = vld [vmem:[#allocation44_spill] sm:$0xff] }
  0x82   :  { %430 = vmatpush.msra.mxu1 %v1663_v56  ;;  %451 = vmatpush.msra.mxu2 %v1711_v55  ;;  %v3356_v55 = vld [vmem:[#allocation39_spill] sm:$0xff] }
  0x83   :  { %470 = vmatpush.msra.mxu3 %v3347_v49  ;;  %384 = vmatmul.f32.vlgmr.msra.gmra.mxu0 %v2138_v39  ;;  %v3357_v49 = vld [vmem:[#allocation8_spill] sm:$0xff] }
  0x84   :  { %516 = vmatpush.msrb.mxu2 %v3348_v45  ;;  %476 = vmatpush.msrb.mxu0 %v3349_v25  ;;  %v3358_v39 = vld [vmem:[#allocation48_spill] sm:$0xff]  ;;  %v3359_v45 = vld [vmem:[#allocation41_spill] sm:$0xff]  ;;  %v3360_v25 = vld [vmem:[#allocation43_spill] sm:$0xff] }
  0x85   :  { %431 = vmatpush.msra.mxu1 %v3350_v21  ;;  %471 = vmatpush.msra.mxu3 %v3351_v17  ;;  %v3361_v21 = vld [vmem:[#allocation9_spill] sm:$0xff]  ;;  %v3362_v17 = vld [vmem:[#allocation52_spill] sm:$0xff] }
  0x86   :  { %477 = vmatpush.msrb.mxu0 %v3353_v53  ;;  %517 = vmatpush.msrb.mxu2 %v3354_v41  ;;  %v3364_v53 = vld [vmem:[#allocation47_spill] sm:$0xff] }
  0x87   :  { %496 = vmatpush.msrb.mxu1 %v3352_v12  ;;  %536 = vmatpush.msrb.mxu3 %v3355_v58  ;;  %v3363_v12 = vld [vmem:[#allocation45_spill] sm:$0xff]  ;;  %v3365_v41 = vld [vmem:[#allocation11_spill] sm:$0xff]  ;;  %v3366_v58 = vld [vmem:[#allocation56_spill] sm:$0xff] }
  0x88   :  { %478 = vmatpush.msrb.mxu0 %v3357_v49  ;;  %518 = vmatpush.msrb.mxu2 %v3358_v39  ;;  %v3368_v49 = vld [vmem:[#allocation51_spill] sm:$0xff]  ;;  %v3369_v39 = vld [vmem:[#allocation13_spill] sm:$0xff] }
  0x89   :  { %497 = vmatpush.msrb.mxu1 %v3356_v55  ;;  %537 = vmatpush.msrb.mxu3 %v3359_v45  ;;  %v3367_v55 = vld [vmem:[#allocation49_spill] sm:$0xff]  ;;  %v3370_v45 = vld [vmem:[#allocation60_spill] sm:$0xff] }
  0x8a   :  { %479 = vmatpush.msrb.mxu0 %v3361_v21  ;;  %519 = vmatpush.msrb.mxu2 %v3362_v17  ;;  %v3372_v21 = vld [vmem:[#allocation55_spill] sm:$0xff] }
  0x8b   :  { %498 = vmatpush.msrb.mxu1 %v3360_v25  ;;  %538 = vmatpush.msrb.mxu3 %v3363_v12  ;;  %v3371_v25 = vld [vmem:[#allocation53_spill] sm:$0xff]  ;;  %v3373_v17 = vld [vmem:[#allocation15_spill] sm:$0xff]  ;;  %v3374_v12 = vld [vmem:[#allocation64_spill] sm:$0xff] }
  0x8c   :  { %480 = vmatpush.msrb.mxu0 %v3365_v41  ;;  %520 = vmatpush.msrb.mxu2 %v3366_v58  ;;  %v3376_v41 = vld [vmem:[#allocation59_spill] sm:$0xff]  ;;  %v3377_v58 = vld [vmem:[#allocation17_spill] sm:$0xff] }
  0x8d   :  { %499 = vmatpush.msrb.mxu1 %v3364_v53  ;;  %539 = vmatpush.msrb.mxu3 %v3367_v55  ;;  %v3375_v53 = vld [vmem:[#allocation57_spill] sm:$0xff]  ;;  %v3378_v55 = vld [vmem:[#allocation68_spill] sm:$0xff] }
  0x8e   :  { %481 = vmatpush.msrb.mxu0 %v3369_v39  ;;  %521 = vmatpush.msrb.mxu2 %v3370_v45  ;;  %v3380_v39 = vld [vmem:[#allocation63_spill] sm:$0xff] }
  0x8f   :  { %500 = vmatpush.msrb.mxu1 %v3368_v49  ;;  %540 = vmatpush.msrb.mxu3 %v3371_v25  ;;  %v3379_v49 = vld [vmem:[#allocation61_spill] sm:$0xff]  ;;  %v3381_v45 = vld [vmem:[#allocation19_spill] sm:$0xff]  ;;  %v3382_v25 = vld [vmem:[#allocation72_spill] sm:$0xff] }
  0x90   :  { %482 = vmatpush.msrb.mxu0 %v3373_v17  ;;  %522 = vmatpush.msrb.mxu2 %v3374_v12  ;;  %v3384_v17 = vld [vmem:[#allocation67_spill] sm:$0xff]  ;;  %v3385_v12 = vld [vmem:[#allocation21_spill] sm:$0xff] }
  0x91   :  { %501 = vmatpush.msrb.mxu1 %v3372_v21  ;;  %541 = vmatpush.msrb.mxu3 %v3375_v53  ;;  %v3383_v21 = vld [vmem:[#allocation65_spill] sm:$0xff]  ;;  %v3386_v53 = vld [vmem:[#allocation76_spill] sm:$0xff] }
  0x92   :  { %483 = vmatpush.msrb.mxu0 %v3377_v58  ;;  %523 = vmatpush.msrb.mxu2 %v3378_v55  ;;  %v3388_v58 = vld [vmem:[#allocation71_spill] sm:$0xff] }
  0x93   :  { %502 = vmatpush.msrb.mxu1 %v3376_v41  ;;  %542 = vmatpush.msrb.mxu3 %v3379_v49  ;;  %v3387_v41 = vld [vmem:[#allocation69_spill] sm:$0xff]  ;;  %v3389_v55 = vld [vmem:[#allocation23_spill] sm:$0xff] }
  0x94   :  { %484 = vmatpush.msrb.mxu0 %v3381_v45  ;;  %524 = vmatpush.msrb.mxu2 %v3382_v25  ;;  %v3390_v49 = vld [vmem:[#allocation73_spill] sm:$0xff]  ;;  %v3391_v45 = vld [vmem:[#allocation75_spill] sm:$0xff] }
  0x95   :  { %503 = vmatpush.msrb.mxu1 %v3380_v39  ;;  %543 = vmatpush.msrb.mxu3 %v3383_v21  ;;  %v3392_v25 = vld [vmem:[#allocation25_spill] sm:$0xff]  ;;  %v3393_v21 = vld [vmem:[#allocation79_spill] sm:$0xff] }
  0x96   :  { %485 = vmatpush.msrb.mxu0 %v3385_v12  ;;  %525 = vmatpush.msrb.mxu2 %v3386_v53  ;;  %v3394_v53 = vld [vmem:[#allocation27_spill] sm:$0xff]  ;;  %v3396_v12 = vld [vmem:[#allocation81_spill] sm:$0xff] }
  0x97   :  { %504 = vmatpush.msrb.mxu1 %v3384_v17  ;;  %544 = vmatpush.msrb.mxu3 %v3387_v41  ;;  %v3395_v41 = vld [vmem:[#allocation88_spill] sm:$0xff] }
  0x98   :  { %486 = vmatpush.msrb.mxu0 %v3389_v55  ;;  %526 = vmatpush.msrb.mxu2 %v1977_v5  ;;  %v3397_v55 = vld [vmem:[#allocation83_spill] sm:$0xff]  ;;  %v3398_v5 = vld [vmem:[#allocation29_spill] sm:$0xff] }
  0x99   :  { %505 = vmatpush.msrb.mxu1 %v3388_v58  ;;  %545 = vmatpush.msrb.mxu3 %v3390_v49  ;;  %v398_v49 = vld.sshfl [vmem:[#allocation1 + $0x8] sm:$0xff pattern:$0x73625140] }
  0x9a   :  { %487 = vmatpush.msrb.mxu0 %v3392_v25  ;;  %527 = vmatpush.msrb.mxu2 %v1999_v9  ;;  %v3399_v25 = vld [vmem:[#allocation85_spill] sm:$0xff]  ;;  %v3400_v9 = vld [vmem:[#allocation87_spill] sm:$0xff] }
  0x9b   :  { %506 = vmatpush.msrb.mxu1 %v3391_v45  ;;  %546 = vmatpush.msrb.mxu3 %v1956_v23  ;;  %v3401_v23 = vld [vmem:[#allocation32_spill] sm:$0xff] }
  0x9c   :  { %488 = vmatpush.msrb.mxu0 %v3394_v53  ;;  %528 = vmatpush.msrb.mxu2 %v3395_v41  ;;  %v399_v53 = vld.sshfl [vmem:[#allocation1 + $0x10] sm:$0xff pattern:$0x73625140] }
  0x9d   :  { %507 = vmatpush.msrb.mxu1 %v3393_v21  ;;  %547 = vmatpush.msrb.mxu3 %v3396_v12  ;;  %v397_v21 = vld.sshfl [vmem:[#allocation1] sm:$0xff pattern:$0x73625140]  ;;  %v3402_v41 = vld [vmem:[#allocation89_spill] sm:$0xff] }
  0x9e   :  { %489 = vmatpush.msrb.mxu0 %v3398_v5  ;;  %529 = vmatpush.msrb.mxu2 %v2062_v35  ;;  %v400_v12 = vld.sshfl [vmem:[#allocation1 + $0x18] sm:$0xff pattern:$0x73625140]  ;;  %v390_v5 = vld [vmem:[%s3078_s1 + $0x10] sm:$0x3] }
  0x9f   :  { %508 = vmatpush.msrb.mxu1 %v3397_v55  ;;  %548 = vmatpush.msrb.mxu3 %v3399_v25  ;;  %v3403_v35 = vld [vmem:[#allocation38_spill] sm:$0xff]  ;;  %v3404_v55 = vld [vmem:[#allocation91_spill] sm:$0xff]  ;;  %405 = vst [vmem:[#allocation1] ss:$4 sm:$0xff] %v390_v5 }
  0xa0   :  { %490 = vmatpush.msrb.mxu0 %v3401_v23  ;;  %530 = vmatpush.msrb.mxu2 %v2088_v19  ;;  %v3405_v25 = vld [vmem:[#allocation42_spill] sm:$0xff] }
  0xa1   :  { %509 = vmatpush.msrb.mxu1 %v3400_v9  ;;  %549 = vmatpush.msrb.mxu3 %v3402_v41  ;;  %v3406_v41 = vld [vmem:[#allocation95_spill] sm:$0xff]  ;;  %v403_v19 = vld.sshfl [vmem:[#allocation1 + $0x30] sm:$0xff pattern:$0x73625140] }
  0xa2   :  { %452 = vmatmul.f32.vlgmr.msra.gmra.mxu2 %v398_v49  ;;  %491 = vmatpush.msrb.mxu0 %v3403_v35  ;;  %v402_v49 = vld.sshfl [vmem:[#allocation1 + $0x28] sm:$0xff pattern:$0x73625140]  ;;  %v401_v35 = vld.sshfl [vmem:[#allocation1 + $0x20] sm:$0xff pattern:$0x73625140] }
  0xa3   :  { %510 = vmatpush.msrb.mxu1 %v3404_v55  ;;  %531 = vmatpush.msrb.mxu2 %v2113_v27  ;;  %v3407_v23 = vld [vmem:[#allocation46_spill] sm:$0xff] }
  0xa4   :  { %550 = vmatpush.msrb.mxu3 %v2069_v31  ;;  %556 = vmatpush.msra.mxu0 %v3405_v25  ;;  %v2344_v5 = vld.sshfl [vmem:[#allocation1 + $0x38] sm:$0xff pattern:$0x73625140] }
  0xa5   :  { %472 = vmatmul.f32.vlgmr.msra.gmra.mxu3 %v399_v53  ;;  %625 = vmatpush.msra.mxu2 %v1331_v0  ;;  %v598_v53 = vld [vmem:[%s3079_s2 + $0x8] sm:$0xff]  ;;  %v3408_v0 = vld [vmem:[#allocation50_spill] sm:$0xff] }
  0xa6   :  { %511 = vmatpush.msrb.mxu1 %v2081_v13  ;;  %551 = vmatpush.msrb.mxu3 %v3406_v41  ;;  %605 = vst [vmem:[#allocation1 + $0x20] ss:$4 sm:$0xff] %v598_v53  ;;  %v3436_v53 = vld [vmem:[#allocation51_spill] sm:$0xff] }
  0xa7   :  { %432 = vmatmul.f32.vlgmr.msra.gmra.mxu1 %v397_v21  ;;  %557 = vmatpush.msra.mxu0 %v3407_v23  ;;  %v3409_v21 = vld [vmem:[#allocation54_spill] sm:$0xff] }
  0xa8   :  { %576 = vmatpush.msra.mxu1 %v2106_v43  ;;  %626 = vmatpush.msra.mxu2 %v1341_v2  ;;  %v3410_v2 = vld [vmem:[#allocation58_spill] sm:$0xff] }
  0xa9   :  { %645 = vmatpush.msra.mxu3 %v1348_v3  ;;  %558 = vmatpush.msra.mxu0 %v3408_v0  ;;  %v3411_v3 = vld [vmem:[#allocation62_spill] sm:$0xff] }
  0xaa   :  { %577 = vmatpush.msra.mxu1 %v2125_v59  ;;  %627 = vmatpush.msra.mxu2 %v1365_v6  ;;  %v3412_v6 = vld [vmem:[#allocation66_spill] sm:$0xff] }
  0xab   :  { %646 = vmatpush.msra.mxu3 %v1370_v7  ;;  %532 = vmatmul.f32.vlgmr.msrb.gmra.mxu2 %v402_v49  ;;  %v3413_v7 = vld [vmem:[#allocation70_spill] sm:$0xff] }
  0xac   :  { %559 = vmatpush.msra.mxu0 %v3409_v21  ;;  %578 = vmatpush.msra.mxu1 %v2134_v61  ;;  %v3434_v49 = vld [vmem:[#allocation10_spill] sm:$0xff] }
  0xad   :  { %628 = vmatpush.msra.mxu2 %v1394_v11  ;;  %647 = vmatpush.msra.mxu3 %v1387_v10  ;;  %v3414_v10 = vld [vmem:[#allocation74_spill] sm:$0xff] }
  0xae   :  { %492 = vmatmul.f32.vlgmr.msrb.gmra.mxu0 %v400_v12  ;;  %552 = vmatmul.f32.vlgmr.msrb.gmra.mxu3 %v403_v19  ;;  %v3415_v11 = vld [vmem:[#allocation78_spill] sm:$0xff] }
  0xaf   :  { %560 = vmatpush.msra.mxu0 %v3410_v2  ;;  %579 = vmatpush.msra.mxu1 %v2148_v60  ;;  %v3416_v12 = vld [vmem:[#allocation82_spill] sm:$0xff] }
  0xb0   :  { %629 = vmatpush.msra.mxu2 %v1423_v16  ;;  %648 = vmatpush.msra.mxu3 %v1411_v14  ;;  %v3417_v14 = vld [vmem:[#allocation86_spill] sm:$0xff]  ;;  %v406_v16 = vld.sshfl [vmem:[#allocation1] sm:$0xff pattern:$0x73625140] }
  0xb1   :  { %512 = vmatmul.f32.vlgmr.msrb.gmra.mxu1 %v401_v35  ;;  %561 = vmatpush.msra.mxu0 %v3411_v3  ;;  %v3418_v19 = vld [vmem:[#allocation90_spill] sm:$0xff] }
  0xb2   :  { %580 = vmatpush.msra.mxu1 %v2159_v1  ;;  %630 = vmatpush.msra.mxu2 %v1447_v20  ;;  %v3419_v20 = vld [vmem:[#allocation93_spill] sm:$0xff] }
  0xb3   :  { %649 = vmatpush.msra.mxu3 %v1435_v18  ;;  %562 = vmatpush.msra.mxu0 %v3412_v6  ;;  %v597_v18 = vld [vmem:[%s3079_s2] sm:$0xff]  ;;  %v2423_v35 = vld [vmem:[%s3081_s4 + $0x170] sm:$0xff] }
  0xb4   :  { %581 = vmatpush.msra.mxu1 %v2170_v4  ;;  %631 = vmatpush.msra.mxu2 %v1471_v24  ;;  %603 = vst [vmem:[#allocation1] ss:$4 sm:$0xff] %v597_v18  ;;  %v3421_v24 = vld [vmem:[#allocation33_spill] sm:$0xff]  ;;  %v3438_v18 = vld [vmem:[#allocation12_spill] sm:$0xff] }
  0xb5   :  { %650 = vmatpush.msra.mxu3 %v1459_v22  ;;  %563 = vmatpush.msra.mxu0 %v3413_v7  ;;  %v3420_v22 = vld [vmem:[#allocation96_spill] sm:$0xff] }
  0xb6   :  { %582 = vmatpush.msra.mxu1 %v2179_v8  ;;  %632 = vmatpush.msra.mxu2 %v1495_v28  ;;  %v3423_v28 = vld [vmem:[#allocation35_spill] sm:$0xff] }
  0xb7   :  { %651 = vmatpush.msra.mxu3 %v1483_v26  ;;  %564 = vmatpush.msra.mxu0 %v3414_v10  ;;  %v3422_v26 = vld [vmem:[#allocation31_spill] sm:$0xff] }
  0xb8   :  { %583 = vmatpush.msra.mxu1 %v2188_v15  ;;  %633 = vmatpush.msra.mxu2 %v1519_v32  ;;  %v3424_v32 = vld [vmem:[#allocation97_spill] sm:$0xff] }
  0xb9   :  { %652 = vmatpush.msra.mxu3 %v1507_v30  ;;  %565 = vmatpush.msra.mxu0 %v3415_v11  ;;  %v2415_v30 = vld [vmem:[%s3081_s4 + $0x178] sm:$0xff] }
  0xba   :  { %584 = vmatpush.msra.mxu1 %v2197_v47  ;;  %634 = vmatpush.msra.mxu2 %v1543_v36  ;;  %v2429_v36 = vld [vmem:[%s3081_s4 + $0x1f8] sm:$0xff] }
  0xbb   :  { %653 = vmatpush.msra.mxu3 %v1531_v34  ;;  %566 = vmatpush.msra.mxu0 %v3416_v12  ;;  %v3425_v34 = vld [vmem:[#allocation37_spill] sm:$0xff] }
  0xbc   :  { %585 = vmatpush.msra.mxu1 %v2206_v51  ;;  %635 = vmatpush.msra.mxu2 %v1567_v40  ;;  %v3427_v40 = vld [vmem:[#allocation40_spill] sm:$0xff] }
  0xbd   :  { %654 = vmatpush.msra.mxu3 %v1555_v38  ;;  %567 = vmatpush.msra.mxu0 %v3417_v14  ;;  %v3426_v38 = vld [vmem:[#allocation39_spill] sm:$0xff] }
  0xbe   :  { %586 = vmatpush.msra.mxu1 %v2215_v57  ;;  %636 = vmatpush.msra.mxu2 %v1591_v44  ;;  %v2443_v44 = vld [vmem:[%s3081_s4 + $0x1f0] sm:$0xff] }
  0xbf   :  { %655 = vmatpush.msra.mxu3 %v1579_v42  ;;  %568 = vmatpush.msra.mxu0 %v3418_v19  ;;  %v2437_v42 = vld [vmem:[%s3081_s4 + $0x168] sm:$0xff] }
  0xc0   :  { %587 = vmatpush.msra.mxu1 %v2224_v63  ;;  %637 = vmatpush.msra.mxu2 %v1615_v48  ;;  %v3429_v48 = vld [vmem:[#allocation44_spill] sm:$0xff] }
  0xc1   :  { %656 = vmatpush.msra.mxu3 %v1603_v46  ;;  %569 = vmatpush.msra.mxu0 %v3419_v20  ;;  %v3428_v46 = vld [vmem:[#allocation43_spill] sm:$0xff] }
  0xc2   :  { %588 = vmatpush.msra.mxu1 %v2233_v29  ;;  %638 = vmatpush.msra.mxu2 %v1639_v52  ;;  %v3431_v52 = vld [vmem:[#allocation8_spill] sm:$0xff] }
  0xc3   :  { %657 = vmatpush.msra.mxu3 %v1627_v50  ;;  %570 = vmatpush.msra.mxu0 %v3420_v22  ;;  %v3430_v50 = vld [vmem:[#allocation7_spill] sm:$0xff] }
  0xc4   :  { %589 = vmatpush.msra.mxu1 %v2242_v33  ;;  %639 = vmatpush.msra.mxu2 %v1663_v56  ;;  %v3433_v56 = vld [vmem:[#allocation48_spill] sm:$0xff] }
  0xc5   :  { %658 = vmatpush.msra.mxu3 %v1651_v54  ;;  %571 = vmatpush.msra.mxu0 %v2119_v62  ;;  %v3432_v54 = vld [vmem:[#allocation47_spill] sm:$0xff] }
  0xc6   :  { %590 = vmatpush.msra.mxu1 %v2251_v37  ;;  %640 = vmatpush.msra.mxu2 %v3421_v24  ;;  %v3439_v24 = vld [vmem:[#allocation11_spill] sm:$0xff] }
  0xc7   :  { %659 = vmatpush.msra.mxu3 %v3422_v26  ;;  %572 = vmatmul.f32.vlgmr.msra.gmra.mxu0 %v2344_v5  ;;  %v3435_v5 = vld [vmem:[#allocation9_spill] sm:$0xff]  ;;  %v3440_v26 = vld [vmem:[#allocation55_spill] sm:$0xff] }
  0xc8   :  { %705 = vmatpush.msrb.mxu2 %v3423_v28  ;;  %665 = vmatpush.msrb.mxu0 %v2415_v30  ;;  %v3441_v28 = vld [vmem:[#allocation56_spill] sm:$0xff] }
  0xc9   :  { %591 = vmatpush.msra.mxu1 %v3424_v32  ;;  %660 = vmatpush.msra.mxu3 %v3425_v34  ;;  %v3442_v34 = vld [vmem:[#allocation14_spill] sm:$0xff] }
  0xca   :  { %592 = vmatmul.f32.vlgmr.msra.gmra.mxu1 %v406_v16  ;;  %666 = vmatpush.msrb.mxu0 %v2423_v35  ;;  %v3437_v16 = vld [vmem:[#allocation52_spill] sm:$0xff] }
  0xcb   :  { %685 = vmatpush.msrb.mxu1 %v2429_v36  ;;  %706 = vmatpush.msrb.mxu2 %v3426_v38  ;;  %v3443_v38 = vld [vmem:[#allocation13_spill] sm:$0xff] }
  0xcc   :  { %725 = vmatpush.msrb.mxu3 %v3427_v40  ;;  %667 = vmatpush.msrb.mxu0 %v2437_v42  ;;  %v3444_v40 = vld [vmem:[#allocation59_spill] sm:$0xff] }
  0xcd   :  { %686 = vmatpush.msrb.mxu1 %v2443_v44  ;;  %707 = vmatpush.msrb.mxu2 %v3428_v46  ;;  %v3445_v46 = vld [vmem:[#allocation60_spill] sm:$0xff] }
  0xce   :  { %726 = vmatpush.msrb.mxu3 %v3429_v48  ;;  %668 = vmatpush.msrb.mxu0 %v3430_v50  ;;  %v3446_v48 = vld [vmem:[#allocation16_spill] sm:$0xff]  ;;  %v3447_v50 = vld [vmem:[#allocation15_spill] sm:$0xff] }
  0xcf   :  { %687 = vmatpush.msrb.mxu1 %v3431_v52  ;;  %708 = vmatpush.msrb.mxu2 %v3432_v54  ;;  %v3448_v52 = vld [vmem:[#allocation64_spill] sm:$0xff]  ;;  %v3449_v54 = vld [vmem:[#allocation18_spill] sm:$0xff] }
  0xd0   :  { %727 = vmatpush.msrb.mxu3 %v3433_v56  ;;  %669 = vmatpush.msrb.mxu0 %v3434_v49  ;;  %v3450_v56 = vld [vmem:[#allocation17_spill] sm:$0xff]  ;;  %v3451_v49 = vld [vmem:[#allocation68_spill] sm:$0xff] }
  0xd1   :  { %688 = vmatpush.msrb.mxu1 %v3435_v5  ;;  %709 = vmatpush.msrb.mxu2 %v3436_v53  ;;  %v3452_v5 = vld [vmem:[#allocation20_spill] sm:$0xff]  ;;  %v3453_v53 = vld [vmem:[#allocation19_spill] sm:$0xff] }
  0xd2   :  { %728 = vmatpush.msrb.mxu3 %v3437_v16  ;;  %670 = vmatpush.msrb.mxu0 %v3438_v18  ;;  %v3454_v16 = vld [vmem:[#allocation72_spill] sm:$0xff]  ;;  %v3455_v18 = vld [vmem:[#allocation22_spill] sm:$0xff] }
  0xd3   :  { %689 = vmatpush.msrb.mxu1 %v3439_v24  ;;  %710 = vmatpush.msrb.mxu2 %v3440_v26  ;;  %v3457_v24 = vld [vmem:[#allocation76_spill] sm:$0xff] }
  0xd4   :  { %729 = vmatpush.msrb.mxu3 %v3441_v28  ;;  %671 = vmatpush.msrb.mxu0 %v3442_v34  ;;  %v3458_v26 = vld [vmem:[#allocation24_spill] sm:$0xff]  ;;  %v3460_v28 = vld [vmem:[#allocation79_spill] sm:$0xff] }
  0xd5   :  { %690 = vmatpush.msrb.mxu1 %v3443_v38  ;;  %711 = vmatpush.msrb.mxu2 %v3444_v40  ;;  %v3461_v34 = vld [vmem:[#allocation80_spill] sm:$0xff]  ;;  %v3462_v38 = vld [vmem:[#allocation26_spill] sm:$0xff] }
  0xd6   :  { %730 = vmatpush.msrb.mxu3 %v3445_v46  ;;  %672 = vmatpush.msrb.mxu0 %v3446_v48  ;;  %v606_v40 = vld.sshfl [vmem:[#allocation1] sm:$0xff pattern:$0x73625140] }
  0xd7   :  { %691 = vmatpush.msrb.mxu1 %v3447_v50  ;;  %712 = vmatpush.msrb.mxu2 %v3380_v39  ;;  %v3456_v39 = vld [vmem:[#allocation21_spill] sm:$0xff]  ;;  %v3464_v46 = vld [vmem:[#allocation83_spill] sm:$0xff]  ;;  %v3465_v48 = vld [vmem:[#allocation84_spill] sm:$0xff] }
  0xd8   :  { %731 = vmatpush.msrb.mxu3 %v3448_v52  ;;  %673 = vmatpush.msrb.mxu0 %v3449_v54  ;;  %v608_v50 = vld.sshfl [vmem:[#allocation1 + $0x10] sm:$0xff pattern:$0x73625140]  ;;  %v3466_v52 = vld [vmem:[#allocation28_spill] sm:$0xff]  ;;  %v3467_v54 = vld [vmem:[#allocation27_spill] sm:$0xff] }
  0xd9   :  { %692 = vmatpush.msrb.mxu1 %v3450_v56  ;;  %713 = vmatpush.msrb.mxu2 %v3384_v17  ;;  %v3459_v17 = vld [vmem:[#allocation23_spill] sm:$0xff] }
  0xda   :  { %732 = vmatpush.msrb.mxu3 %v3451_v49  ;;  %674 = vmatpush.msrb.mxu0 %v3452_v5  ;;  %v609_v56 = vld.sshfl [vmem:[#allocation1 + $0x18] sm:$0xff pattern:$0x73625140]  ;;  %v599_v49 = vld [vmem:[%s3079_s2 + $0x10] sm:$0x3]  ;;  %v3468_v5 = vld [vmem:[#allocation88_spill] sm:$0xff] }
  0xdb   :  { %693 = vmatpush.msrb.mxu1 %v3453_v53  ;;  %714 = vmatpush.msrb.mxu2 %v3388_v58  ;;  %v3463_v58 = vld [vmem:[#allocation25_spill] sm:$0xff]  ;;  %v3469_v53 = vld [vmem:[#allocation30_spill] sm:$0xff]  ;;  %s1272_s2 = smov [#allocation2]  }
  0xdc   :  { %733 = vmatpush.msrb.mxu3 %v3454_v16  ;;  %675 = vmatpush.msrb.mxu0 %v3455_v18  ;;  %v3470_v16 = vld [vmem:[#allocation29_spill] sm:$0xff]  ;;  %v3471_v18 = vld [vmem:[#allocation92_spill] sm:$0xff]  ;;  %s1108_s23 = sshll.u32 %s1272_s2, 4  ;;  %s1109_s23 = int_to_ptr.vmem [resolvable:$true] %s1108_s23 }
  0xdd   :  { %694 = vmatpush.msrb.mxu1 %v3456_v39  ;;  %715 = vmatpush.msrb.mxu2 %v3391_v45  ;;  %v607_v45 = vld.sshfl [vmem:[#allocation1 + $0x8] sm:$0xff pattern:$0x73625140]  ;;  %v3472_v39 = vld [vmem:[#allocation34_spill] sm:$0xff] }
  0xde   :  { %734 = vmatpush.msrb.mxu3 %v3457_v24  ;;  %676 = vmatpush.msrb.mxu0 %v3458_v26  ;;  %614 = vst [vmem:[#allocation1] ss:$4 sm:$0xff] %v599_v49  ;;  %v3473_v24 = vld [vmem:[#allocation32_spill] sm:$0xff]  ;;  %v3474_v26 = vld [vmem:[#allocation94_spill] sm:$0xff]  ;;  %v3483_v49 = vld [vmem:[#allocation65_spill] sm:$0xff] }
  0xdf   :  { %695 = vmatpush.msrb.mxu1 %v3459_v17  ;;  %716 = vmatpush.msrb.mxu2 %v3460_v28  ;;  %v3475_v17 = vld [vmem:[#allocation36_spill] sm:$0xff] }
  0xe0   :  { %735 = vmatpush.msrb.mxu3 %v3461_v34  ;;  %677 = vmatpush.msrb.mxu0 %v3462_v38  ;;  %v3476_v34 = vld [vmem:[#allocation38_spill] sm:$0xff]  ;;  %v3477_v38 = vld [vmem:[#allocation41_spill] sm:$0xff] }
  0xe1   :  { %696 = vmatpush.msrb.mxu1 %v3463_v58  ;;  %717 = vmatpush.msrb.mxu2 %v3464_v46  ;;  %v1128_v58 = vld [vmem:[%s3081_s4 + $0x78] sm:$0xff] }
  0xe2   :  { %736 = vmatpush.msrb.mxu3 %v3465_v48  ;;  %678 = vmatpush.msrb.mxu0 %v3466_v52  ;;  %v3478_v48 = vld [vmem:[#allocation45_spill] sm:$0xff] }
  0xe3   :  { %697 = vmatpush.msrb.mxu1 %v3467_v54  ;;  %718 = vmatpush.msrb.mxu2 %v3400_v9  ;;  %v1130_v52 = vld [vmem:[%s3081_s4 + $0x68] sm:$0xff]  ;;  %v1131_v54 = vld [vmem:[%s3081_s4 + $0x60] sm:$0xff] }
  0xe4   :  { %737 = vmatpush.msrb.mxu3 %v3468_v5  ;;  %679 = vmatpush.msrb.mxu0 %v3469_v53  ;;  %v3484_v5 = vld [vmem:[#allocation69_spill] sm:$0xff] }
  0xe5   :  { %698 = vmatpush.msrb.mxu1 %v3470_v16  ;;  %719 = vmatpush.msrb.mxu2 %v3404_v55  ;;  %v3485_v53 = vld [vmem:[#allocation73_spill] sm:$0xff] }
  0xe6   :  { %738 = vmatpush.msrb.mxu3 %v3471_v18  ;;  %641 = vmatmul.f32.vlgmr.msra.gmra.mxu2 %v606_v40  ;;  %v610_v40 = vld.sshfl [vmem:[#allocation1 + $0x20] sm:$0xff pattern:$0x73625140]  ;;  %v3486_v16 = vld [vmem:[#allocation77_spill] sm:$0xff] }
  0xe7   :  { %680 = vmatpush.msrb.mxu0 %v3472_v39  ;;  %699 = vmatpush.msrb.mxu1 %v3473_v24  ;;  %v3487_v18 = vld [vmem:[#allocation81_spill] sm:$0xff]  ;;  %v615_v24 = vld.sshfl [vmem:[#allocation1] sm:$0xff pattern:$0x73625140] }
  0xe8   :  { %720 = vmatpush.msrb.mxu2 %v2081_v13  ;;  %739 = vmatpush.msrb.mxu3 %v3474_v26  ;;  %v3488_v39 = vld [vmem:[#allocation85_spill] sm:$0xff] }
  0xe9   :  { %745 = vmatpush.msra.mxu0 %v3475_v17  ;;  %661 = vmatmul.f32.vlgmr.msra.gmra.mxu3 %v607_v45  ;;  %v611_v45 = vld.sshfl [vmem:[#allocation1 + $0x28] sm:$0xff pattern:$0x73625140]  ;;  %v1141_v17 = vld [vmem:[%s3081_s4 + $0x10] sm:$0xff] }
  0xea   :  { %785 = vmatpush.msra.mxu2 %v2106_v43  ;;  %700 = vmatpush.msrb.mxu1 %v3476_v34  ;;  %v3489_v26 = vld [vmem:[#allocation89_spill] sm:$0xff]  ;;  %v1143_v34 = vld [vmem:[%s3081_s4 + $0xf8] sm:$0xff] }
  0xeb   :  { %740 = vmatpush.msrb.mxu3 %v2113_v27  ;;  %746 = vmatpush.msra.mxu0 %v3477_v38  ;;  %v1129_v27 = vld [vmem:[%s3081_s4 + $0x70] sm:$0xff]  ;;  %v807_v38 = vld [vmem:[%s3080_s3 + $0x8] sm:$0xff] }
  0xec   :  { %765 = vmatpush.msra.mxu1 %v3405_v25  ;;  %786 = vmatpush.msra.mxu2 %v2125_v59  ;;  %v3479_v25 = vld [vmem:[#allocation49_spill] sm:$0xff] }
  0xed   :  { %834 = vmatpush.msra.mxu3 %v1128_v58  ;;  %747 = vmatpush.msra.mxu0 %v3478_v48  ;;  %v1148_v58 = vld [vmem:[%s3081_s4 + $0x1e8] sm:$0xff]  ;;  %v1153_v48 = vld [vmem:[%s3081_s4 + $0xd8] sm:$0xff] }
  0xee   :  { %766 = vmatpush.msra.mxu1 %v3407_v23  ;;  %787 = vmatpush.msra.mxu2 %v2134_v61  ;;  %v3480_v23 = vld [vmem:[#allocation53_spill] sm:$0xff] }
  0xef   :  { %835 = vmatpush.msra.mxu3 %v1129_v27  ;;  %721 = vmatmul.f32.vlgmr.msrb.gmra.mxu2 %v610_v40  ;;  %v1152_v40 = vld [vmem:[%s3081_s4 + $0x268] sm:$0xff]  ;;  %v1154_v27 = vld [vmem:[%s3081_s4 + $0x160] sm:$0xff] }
  0xf0   :  { %748 = vmatpush.msra.mxu0 %v3479_v25  ;;  %767 = vmatpush.msra.mxu1 %v3408_v0  ;;  %v3481_v0 = vld [vmem:[#allocation57_spill] sm:$0xff]  ;;  %v1156_v25 = vld [vmem:[%s3081_s4 + $0x260] sm:$0xff] }
  0xf1   :  { %788 = vmatpush.msra.mxu2 %v2148_v60  ;;  %836 = vmatpush.msra.mxu3 %v1130_v52  ;;  %v1158_v52 = vld [vmem:[%s3081_s4 + $0x158] sm:$0xff] }
  0xf2   :  { %681 = vmatmul.f32.vlgmr.msrb.gmra.mxu0 %v608_v50  ;;  %741 = vmatmul.f32.vlgmr.msrb.gmra.mxu3 %v611_v45  ;;  %v1132_v50 = vld [vmem:[%s3081_s4 + $0x58] sm:$0xff]  ;;  %v1157_v45 = vld [vmem:[%s3081_s4 + $0xd0] sm:$0xff] }
  0xf3   :  { %749 = vmatpush.msra.mxu0 %v3480_v23  ;;  %768 = vmatpush.msra.mxu1 %v3409_v21  ;;  %v3482_v21 = vld [vmem:[#allocation61_spill] sm:$0xff] }
  0xf4   :  { %789 = vmatpush.msra.mxu2 %v2159_v1  ;;  %837 = vmatpush.msra.mxu3 %v1131_v54  ;;  %v1159_v23 = vld [vmem:[%s3081_s4 + $0x1d0] sm:$0xff]  ;;  %v1160_v54 = vld [vmem:[%s3081_s4 + $0x258] sm:$0xff] }
  0xf5   :  { %701 = vmatmul.f32.vlgmr.msrb.gmra.mxu1 %v609_v56  ;;  %750 = vmatpush.msra.mxu0 %v3481_v0  ;;  %v1133_v56 = vld [vmem:[%s3081_s4 + $0x50] sm:$0xff]  ;;  %v1161_v0 = vld [vmem:[%s3081_s4 + $0xc8] sm:$0xff] }
  0xf6   :  { %769 = vmatpush.msra.mxu1 %v3410_v2  ;;  %790 = vmatpush.msra.mxu2 %v2170_v4  ;;  %v1134_v2 = vld [vmem:[%s3081_s4 + $0x48] sm:$0xff] }
  0xf7   :  { %838 = vmatpush.msra.mxu3 %v1132_v50  ;;  %751 = vmatpush.msra.mxu0 %v3482_v21  ;;  %v1162_v50 = vld [vmem:[%s3081_s4 + $0x150] sm:$0xff]  ;;  %v1163_v21 = vld [vmem:[%s3081_s4 + $0x1c8] sm:$0xff] }
  0xf8   :  { %770 = vmatpush.msra.mxu1 %v3411_v3  ;;  %791 = vmatpush.msra.mxu2 %v2179_v8  ;;  %v1135_v3 = vld [vmem:[%s3081_s4 + $0x40] sm:$0xff] }
  0xf9   :  { %839 = vmatpush.msra.mxu3 %v1133_v56  ;;  %752 = vmatpush.msra.mxu0 %v3483_v49  ;;  %v1164_v56 = vld [vmem:[%s3081_s4 + $0x250] sm:$0xff]  ;;  %v1165_v49 = vld [vmem:[%s3081_s4 + $0xc0] sm:$0xff] }
  0xfa   :  { %771 = vmatpush.msra.mxu1 %v3412_v6  ;;  %792 = vmatpush.msra.mxu2 %v2188_v15  ;;  %v1136_v6 = vld [vmem:[%s3081_s4 + $0x38] sm:$0xff] }
  0xfb   :  { %840 = vmatpush.msra.mxu3 %v1134_v2  ;;  %753 = vmatpush.msra.mxu0 %v3484_v5  ;;  %v1166_v2 = vld [vmem:[%s3081_s4 + $0x148] sm:$0xff]  ;;  %v1167_v5 = vld [vmem:[%s3081_s4 + $0x1c0] sm:$0xff] }
  0xfc   :  { %772 = vmatpush.msra.mxu1 %v3413_v7  ;;  %793 = vmatpush.msra.mxu2 %v2197_v47  ;;  %v1137_v7 = vld [vmem:[%s3081_s4 + $0x30] sm:$0xff] }
  0xfd   :  { %841 = vmatpush.msra.mxu3 %v1135_v3  ;;  %754 = vmatpush.msra.mxu0 %v3485_v53  ;;  %v1168_v3 = vld [vmem:[%s3081_s4 + $0x248] sm:$0xff]  ;;  %v1169_v53 = vld [vmem:[%s3081_s4 + $0xb8] sm:$0xff] }
  0xfe   :  { %773 = vmatpush.msra.mxu1 %v3414_v10  ;;  %794 = vmatpush.msra.mxu2 %v2206_v51  ;;  %v1138_v10 = vld [vmem:[%s3081_s4 + $0x28] sm:$0xff] }
  0xff   :  { %842 = vmatpush.msra.mxu3 %v1136_v6  ;;  %755 = vmatpush.msra.mxu0 %v3486_v16  ;;  %v1170_v6 = vld [vmem:[%s3081_s4 + $0x140] sm:$0xff]  ;;  %v1171_v16 = vld [vmem:[%s3081_s4 + $0x1b8] sm:$0xff] }
 0x100   :  { %774 = vmatpush.msra.mxu1 %v3415_v11  ;;  %795 = vmatpush.msra.mxu2 %v2215_v57  ;;  %v1139_v11 = vld [vmem:[%s3081_s4 + $0x20] sm:$0xff] }
 0x101   :  { %843 = vmatpush.msra.mxu3 %v1137_v7  ;;  %756 = vmatpush.msra.mxu0 %v3487_v18  ;;  %v1172_v7 = vld [vmem:[%s3081_s4 + $0x240] sm:$0xff]  ;;  %v1173_v18 = vld [vmem:[%s3081_s4 + $0xb0] sm:$0xff] }
 0x102   :  { %775 = vmatpush.msra.mxu1 %v3416_v12  ;;  %796 = vmatpush.msra.mxu2 %v2224_v63  ;;  %v806_v12 = vld [vmem:[%s3080_s3] sm:$0xff] }
 0x103   :  { %844 = vmatpush.msra.mxu3 %v1138_v10  ;;  %757 = vmatpush.msra.mxu0 %v3488_v39  ;;  %812 = vst [vmem:[#allocation1] ss:$4 sm:$0xff] %v806_v12  ;;  %v1174_v10 = vld [vmem:[%s3081_s4 + $0x138] sm:$0xff]  ;;  %v1175_v39 = vld [vmem:[%s3081_s4 + $0x1b0] sm:$0xff] }
 0x104   :  { %776 = vmatpush.msra.mxu1 %v3417_v14  ;;  %797 = vmatpush.msra.mxu2 %v2233_v29  ;;  %v1140_v14 = vld [vmem:[%s3081_s4 + $0x18] sm:$0xff]  ;;  %v1178_v12 = vld [vmem:[%s3081_s4 + $0x130] sm:$0xff] }
 0x105   :  { %845 = vmatpush.msra.mxu3 %v1139_v11  ;;  %758 = vmatpush.msra.mxu0 %v3489_v26  ;;  %v1176_v11 = vld [vmem:[%s3081_s4 + $0x238] sm:$0xff]  ;;  %v1179_v26 = vld [vmem:[%s3081_s4 + $0x1a8] sm:$0xff] }
 0x106   :  { %777 = vmatpush.msra.mxu1 %v3418_v19  ;;  %798 = vmatpush.msra.mxu2 %v2242_v33  ;;  %v612_v19 = vld.sshfl [vmem:[#allocation1 + $0x30] sm:$0xff pattern:$0x73625140] }
 0x107   :  { %846 = vmatpush.msra.mxu3 %v1140_v14  ;;  %759 = vmatpush.msra.mxu0 %v2069_v31  ;;  %v1142_v31 = vld [vmem:[%s3081_s4 + $0x8] sm:$0xff]  ;;  %v1180_v14 = vld [vmem:[%s3081_s4 + $0x230] sm:$0xff] }
 0x108   :  { %778 = vmatpush.msra.mxu1 %v3419_v20  ;;  %799 = vmatpush.msra.mxu2 %v2251_v37  ;;  %v613_v20 = vld.sshfl [vmem:[#allocation1 + $0x38] sm:$0xff pattern:$0x73625140] }
 0x109   :  { %847 = vmatpush.msra.mxu3 %v1141_v17  ;;  %760 = vmatpush.msra.mxu0 %v3406_v41  ;;  %v1144_v41 = vld [vmem:[%s3081_s4] sm:$0xff]  ;;  %814 = vst [vmem:[#allocation1 + $0x20] ss:$4 sm:$0xff] %v807_v38  ;;  %v1188_v38 = vld [vmem:[%s3081_s4 + $0x90] sm:$0xff] }
 0x10a   :  { %779 = vmatpush.msra.mxu1 %v3420_v22  ;;  %800 = vmatpush.msra.mxu2 %v3424_v32  ;;  %v1145_v22 = vld [vmem:[%s3081_s4 + $0xf0] sm:$0xff]  ;;  %v1181_v17 = vld [vmem:[%s3081_s4 + $0xa0] sm:$0xff] }
 0x10b   :  { %848 = vmatpush.msra.mxu3 %v1142_v31  ;;  %761 = vmatmul.f32.vlgmr.msra.gmra.mxu0 %v612_v19  ;;  %v1182_v19 = vld [vmem:[%s3081_s4 + $0x128] sm:$0xff]  ;;  %v1183_v31 = vld [vmem:[%s3081_s4 + $0x1a0] sm:$0xff] }
 0x10c   :  { %801 = vmatmul.f32.vlgmr.msra.gmra.mxu2 %v615_v24  ;;  %854 = vmatpush.msrb.mxu0 %v1143_v34  ;;  %v1177_v24 = vld [vmem:[%s3081_s4 + $0xa8] sm:$0xff]  ;;  %v1185_v34 = vld [vmem:[%s3081_s4 + $0x98] sm:$0xff] }
 0x10d   :  { %894 = vmatpush.msrb.mxu2 %v2429_v36  ;;  %780 = vmatpush.msra.mxu1 %v2119_v62  ;;  %v1146_v62 = vld [vmem:[%s3081_s4 + $0x278] sm:$0xff]  ;;  %v1147_v36 = vld [vmem:[%s3081_s4 + $0xe8] sm:$0xff] }
 0x10e   :  { %849 = vmatpush.msra.mxu3 %v1144_v41  ;;  %781 = vmatmul.f32.vlgmr.msra.gmra.mxu1 %v613_v20  ;;  %v1184_v20 = vld [vmem:[%s3081_s4 + $0x228] sm:$0xff]  ;;  %v1186_v41 = vld [vmem:[%s3081_s4 + $0x120] sm:$0xff] }
 0x10f   :  { %855 = vmatpush.msrb.mxu0 %v1145_v22  ;;  %874 = vmatpush.msrb.mxu1 %v2415_v30  ;;  %v1149_v30 = vld [vmem:[%s3081_s4 + $0x270] sm:$0xff]  ;;  %v1187_v22 = vld [vmem:[%s3081_s4 + $0x198] sm:$0xff] }
 0x110   :  { %895 = vmatpush.msrb.mxu2 %v2443_v44  ;;  %914 = vmatpush.msrb.mxu3 %v1146_v62  ;;  %v1150_v44 = vld [vmem:[%s3081_s4 + $0xe0] sm:$0xff] }
 0x111   :  { %856 = vmatpush.msrb.mxu0 %v1147_v36  ;;  %875 = vmatpush.msrb.mxu1 %v2423_v35  ;;  %v1151_v35 = vld [vmem:[%s3081_s4 + $0x1e0] sm:$0xff]  ;;  %v1189_v36 = vld [vmem:[%s3081_s4 + $0x118] sm:$0xff] }
 0x112   :  { %896 = vmatpush.msrb.mxu2 %v1148_v58  ;;  %915 = vmatpush.msrb.mxu3 %v1149_v30  ;;  %v815_v62 = vld.sshfl [vmem:[#allocation1] sm:$0xff pattern:$0x73625140]  ;;  %v1190_v58 = vld [vmem:[%s3081_s4 + $0x190] sm:$0xff] }
 0x113   :  { %857 = vmatpush.msrb.mxu0 %v1150_v44  ;;  %876 = vmatpush.msrb.mxu1 %v2437_v42  ;;  %v1155_v42 = vld [vmem:[%s3081_s4 + $0x1d8] sm:$0xff]  ;;  %v816_v44 = vld.sshfl [vmem:[#allocation1 + $0x8] sm:$0xff pattern:$0x73625140] }
 0x114   :  { %897 = vmatpush.msrb.mxu2 %v1151_v35  ;;  %916 = vmatpush.msrb.mxu3 %v1152_v40  ;;  %v818_v30 = vld.sshfl [vmem:[#allocation1 + $0x18] sm:$0xff pattern:$0x73625140]  ;;  %v817_v35 = vld.sshfl [vmem:[#allocation1 + $0x10] sm:$0xff pattern:$0x73625140] }
 0x115   :  { %858 = vmatpush.msrb.mxu0 %v1153_v48  ;;  %877 = vmatpush.msrb.mxu1 %v1154_v27  ;;  %v808_v40 = vld [vmem:[%s3080_s3 + $0x10] sm:$0x3]  ;;  %v1193_v27 = vld [vmem:[%s3081_s4 + $0x188] sm:$0xff] }
 0x116   :  { %898 = vmatpush.msrb.mxu2 %v1155_v42  ;;  %917 = vmatpush.msrb.mxu3 %v1156_v25  ;;  %v1192_v48 = vld [vmem:[%s3081_s4 + $0x110] sm:$0xff]  ;;  %823 = vst [vmem:[#allocation1] ss:$4 sm:$0xff] %v808_v40  ;;  %v1195_v42 = vld [vmem:[%s3081_s4 + $0x108] sm:$0xff]  ;;  %v1196_v25 = vld [vmem:[%s3081_s4 + $0x180] sm:$0xff]  ;;  %v265_v40 = vpop.f32.mrf.mxu2 }
 0x117   :  { %859 = vmatpush.msrb.mxu0 %v1157_v45  ;;  %878 = vmatpush.msrb.mxu1 %v1158_v52  ;;  %v1198_v45 = vld [vmem:[%s3081_s4 + $0x3f8] sm:$0xff]  ;;  %v1199_v52 = vld [vmem:[%s3081_s4 + $0x100] sm:$0xff] }
 0x118   :  { %899 = vmatpush.msrb.mxu2 %v1159_v23  ;;  %918 = vmatpush.msrb.mxu3 %v1160_v54  ;;  %v1201_v23 = vld [vmem:[%s3081_s4 + $0x378] sm:$0xff]  ;;  %v1202_v54 = vld [vmem:[%s3081_s4 + $0x3f0] sm:$0xff] }
 0x119   :  { %860 = vmatpush.msrb.mxu0 %v1161_v0  ;;  %879 = vmatpush.msrb.mxu1 %v1162_v50  ;;  %v1204_v0 = vld [vmem:[%s3081_s4 + $0x370] sm:$0xff]  ;;  %v1205_v50 = vld [vmem:[%s3081_s4 + $0x3e8] sm:$0xff] }
 0x11a   :  { %900 = vmatpush.msrb.mxu2 %v1163_v21  ;;  %919 = vmatpush.msrb.mxu3 %v1164_v56  ;;  %v819_v21 = vld.sshfl [vmem:[#allocation1 + $0x20] sm:$0xff pattern:$0x73625140]  ;;  %v1207_v56 = vld [vmem:[%s3081_s4 + $0x368] sm:$0xff] }
 0x11b   :  { %861 = vmatpush.msrb.mxu0 %v1165_v49  ;;  %880 = vmatpush.msrb.mxu1 %v1166_v2  ;;  %v1208_v49 = vld [vmem:[%s3081_s4 + $0x3e0] sm:$0xff] }
 0x11c   :  { %901 = vmatpush.msrb.mxu2 %v1167_v5  ;;  %920 = vmatpush.msrb.mxu3 %v1168_v3  ;;  %v1210_v2 = vld [vmem:[%s3081_s4 + $0x360] sm:$0xff]  ;;  %v1211_v5 = vld [vmem:[%s3081_s4 + $0x3d8] sm:$0xff] }
 0x11d   :  { %862 = vmatpush.msrb.mxu0 %v1169_v53  ;;  %881 = vmatpush.msrb.mxu1 %v1170_v6  ;;  %v1213_v3 = vld [vmem:[%s3081_s4 + $0x358] sm:$0xff]  ;;  %v1214_v53 = vld [vmem:[%s3081_s4 + $0x3d0] sm:$0xff] }
 0x11e   :  { %902 = vmatpush.msrb.mxu2 %v1171_v16  ;;  %921 = vmatpush.msrb.mxu3 %v1172_v7  ;;  %v1216_v6 = vld [vmem:[%s3081_s4 + $0x350] sm:$0xff]  ;;  %v1217_v16 = vld [vmem:[%s3081_s4 + $0x3c8] sm:$0xff] }
 0x11f   :  { %863 = vmatpush.msrb.mxu0 %v1173_v18  ;;  %882 = vmatpush.msrb.mxu1 %v1174_v10  ;;  %v1219_v7 = vld [vmem:[%s3081_s4 + $0x348] sm:$0xff]  ;;  %v1220_v18 = vld [vmem:[%s3081_s4 + $0x3c0] sm:$0xff] }
 0x120   :  { %903 = vmatpush.msrb.mxu2 %v1175_v39  ;;  %922 = vmatpush.msrb.mxu3 %v1176_v11  ;;  %v1222_v10 = vld [vmem:[%s3081_s4 + $0x340] sm:$0xff]  ;;  %v1223_v39 = vld [vmem:[%s3081_s4 + $0x3b8] sm:$0xff] }
 0x121   :  { %864 = vmatpush.msrb.mxu0 %v1177_v24  ;;  %883 = vmatpush.msrb.mxu1 %v1178_v12  ;;  %v1225_v11 = vld [vmem:[%s3081_s4 + $0x338] sm:$0xff]  ;;  %v1226_v24 = vld [vmem:[%s3081_s4 + $0x3b0] sm:$0xff] }
 0x122   :  { %904 = vmatpush.msrb.mxu2 %v1179_v26  ;;  %923 = vmatpush.msrb.mxu3 %v1180_v14  ;;  %v1228_v12 = vld [vmem:[%s3081_s4 + $0x330] sm:$0xff]  ;;  %v1229_v26 = vld [vmem:[%s3081_s4 + $0x3a8] sm:$0xff] }
 0x123   :  { %865 = vmatpush.msrb.mxu0 %v1181_v17  ;;  %884 = vmatpush.msrb.mxu1 %v1182_v19  ;;  %v1231_v14 = vld [vmem:[%s3081_s4 + $0x328] sm:$0xff]  ;;  %v1232_v17 = vld [vmem:[%s3081_s4 + $0x3a0] sm:$0xff] }
 0x124   :  { %905 = vmatpush.msrb.mxu2 %v1183_v31  ;;  %924 = vmatpush.msrb.mxu3 %v1184_v20  ;;  %v1234_v19 = vld [vmem:[%s3081_s4 + $0x320] sm:$0xff]  ;;  %v1235_v31 = vld [vmem:[%s3081_s4 + $0x398] sm:$0xff] }
 0x125   :  { %866 = vmatpush.msrb.mxu0 %v1185_v34  ;;  %885 = vmatpush.msrb.mxu1 %v1186_v41  ;;  %v1237_v20 = vld [vmem:[%s3081_s4 + $0x318] sm:$0xff]  ;;  %v1238_v34 = vld [vmem:[%s3081_s4 + $0x390] sm:$0xff] }
 0x126   :  { %906 = vmatpush.msrb.mxu2 %v1187_v22  ;;  %925 = vmatpush.msrb.mxu3 %v3460_v28  ;;  %v1191_v28 = vld [vmem:[%s3081_s4 + $0x88] sm:$0xff]  ;;  %v1240_v41 = vld [vmem:[%s3081_s4 + $0x310] sm:$0xff] }
 0x127   :  { %867 = vmatpush.msrb.mxu0 %v1188_v38  ;;  %886 = vmatpush.msrb.mxu1 %v1189_v36  ;;  %v1241_v22 = vld [vmem:[%s3081_s4 + $0x388] sm:$0xff] }
 0x128   :  { %907 = vmatpush.msrb.mxu2 %v1190_v58  ;;  %926 = vmatpush.msrb.mxu3 %v3464_v46  ;;  %v1194_v46 = vld [vmem:[%s3081_s4 + $0x80] sm:$0xff]  ;;  %v820_v38 = vld.sshfl [vmem:[#allocation1 + $0x28] sm:$0xff pattern:$0x73625140] }
 0x129   :  { %868 = vmatpush.msrb.mxu0 %v1191_v28  ;;  %887 = vmatpush.msrb.mxu1 %v1192_v48  ;;  %v1243_v36 = vld [vmem:[%s3081_s4 + $0x308] sm:$0xff]  ;;  %v1244_v58 = vld [vmem:[%s3081_s4 + $0x380] sm:$0xff]  ;;  %v225_v28 = vpop.f32.mrf.mxu0  ;;  %v2942_v48 = vpop.f32.mrf.mxu3 }
 0x12a   :  { %908 = vmatpush.msrb.mxu2 %v1193_v27  ;;  %927 = vmatpush.msrb.mxu3 %v3400_v9  ;;  %v1197_v9 = vld [vmem:[%s3081_s4 + $0x2f8] sm:$0xff] }
 0x12b   :  { %869 = vmatpush.msrb.mxu0 %v1194_v46  ;;  %888 = vmatpush.msrb.mxu1 %v1195_v42  ;;  %v2948_v46 = vpop.f32.mrf.mxu2 }
 0x12c   :  { %909 = vmatpush.msrb.mxu2 %v1196_v25  ;;  %928 = vmatpush.msrb.mxu3 %v3404_v55  ;;  %v1200_v55 = vld [vmem:[%s3081_s4 + $0x2f0] sm:$0xff] }
 0x12d   :  { %934 = vmatpush.msra.mxu0 %v1197_v9  ;;  %850 = vmatmul.f32.vlgmr.msra.gmra.mxu3 %v815_v62  ;;  %v822_v62 = vld.sshfl [vmem:[#allocation1 + $0x38] sm:$0xff pattern:$0x73625140] }
 0x12e   :  { %974 = vmatpush.msra.mxu2 %v1198_v45  ;;  %889 = vmatpush.msrb.mxu1 %v1199_v52  ;;  %v1036_v52 = vld [vmem:[%s3083_s6 + $0x78] sm:$0xff] }
 0x12f   :  { %929 = vmatpush.msrb.mxu3 %v2081_v13  ;;  %935 = vmatpush.msra.mxu0 %v1200_v55  ;;  %v1203_v13 = vld [vmem:[%s3081_s4 + $0x2e8] sm:$0xff]  ;;  %v1035_v55 = vld [vmem:[%s3083_s6 + $0x70] sm:$0xff] }
 0x130   :  { %954 = vmatpush.msra.mxu1 %v1201_v23  ;;  %975 = vmatpush.msra.mxu2 %v1202_v54  ;;  %v1034_v54 = vld [vmem:[%s3083_s6 + $0x68] sm:$0xff] }
 0x131   :  { %994 = vmatpush.msra.mxu3 %v2106_v43  ;;  %936 = vmatpush.msra.mxu0 %v1203_v13  ;;  %v1206_v43 = vld [vmem:[%s3081_s4 + $0x2e0] sm:$0xff]  ;;  %v2944_v27 = vpop.f32.mrf.mxu0  ;;  %v2950_v42 = vpop.f32.mrf.mxu3 }
 0x132   :  { %955 = vmatpush.msra.mxu1 %v1204_v0  ;;  %976 = vmatpush.msra.mxu2 %v1205_v50  ;;  %v1033_v13 = vld [vmem:[%s3083_s6 + $0x60] sm:$0xff]  ;;  %v1032_v50 = vld [vmem:[%s3083_s6 + $0x58] sm:$0xff] }
 0x133   :  { %995 = vmatpush.msra.mxu3 %v2125_v59  ;;  %910 = vmatmul.f32.vlgmr.msrb.gmra.mxu2 %v818_v30  ;;  %v1209_v59 = vld [vmem:[%s3081_s4 + $0x2d8] sm:$0xff]  ;;  %v824_v30 = vld.sshfl [vmem:[#allocation1] sm:$0xff pattern:$0x73625140]  ;;  %v453_v45 = vpop.f32.mrf.mxu2 }
 0x134   :  { %937 = vmatpush.msra.mxu0 %v1206_v43  ;;  %956 = vmatpush.msra.mxu1 %v1207_v56 }
 0x135   :  { %977 = vmatpush.msra.mxu2 %v1208_v49  ;;  %996 = vmatpush.msra.mxu3 %v2134_v61  ;;  %v1212_v61 = vld [vmem:[%s3081_s4 + $0x2d0] sm:$0xff] }
 0x136   :  { %870 = vmatmul.f32.vlgmr.msrb.gmra.mxu0 %v816_v44  ;;  %930 = vmatmul.f32.vlgmr.msrb.gmra.mxu3 %v819_v21  ;;  %v1245_v44 = vld [vmem:[%s3081_s4 + $0x300] sm:$0xff]  ;;  %v1031_v21 = vld [vmem:[%s3083_s6 + $0x50] sm:$0xff] }
 0x137   :  { %938 = vmatpush.msra.mxu0 %v1209_v59  ;;  %957 = vmatpush.msra.mxu1 %v1210_v2  ;;  %v1030_v59 = vld [vmem:[%s3083_s6 + $0x48] sm:$0xff] }
 0x138   :  { %978 = vmatpush.msra.mxu2 %v1211_v5  ;;  %997 = vmatpush.msra.mxu3 %v2148_v60  ;;  %v1215_v60 = vld [vmem:[%s3081_s4 + $0x2c8] sm:$0xff] }
 0x139   :  { %890 = vmatmul.f32.vlgmr.msrb.gmra.mxu1 %v817_v35  ;;  %939 = vmatpush.msra.mxu0 %v1212_v61  ;;  %v245_v35 = vpop.f32.mrf.mxu1  ;;  %v2952_v25 = vpop.f32.mrf.mxu0  ;;  %v1029_v61 = vld [vmem:[%s3083_s6 + $0x40] sm:$0xff] }
 0x13a   :  { %958 = vmatpush.msra.mxu1 %v1213_v3  ;;  %979 = vmatpush.msra.mxu2 %v1214_v53 }
 0x13b   :  { %998 = vmatpush.msra.mxu3 %v2159_v1  ;;  %940 = vmatpush.msra.mxu0 %v1215_v60  ;;  %v1218_v1 = vld [vmem:[%s3081_s4 + $0x2c0] sm:$0xff]  ;;  %v533_v43 = vpop.f32.mrf.mxu2  ;;  %v1028_v60 = vld [vmem:[%s3083_s6 + $0x38] sm:$0xff] }
 0x13c   :  { %959 = vmatpush.msra.mxu1 %v1216_v6  ;;  %980 = vmatpush.msra.mxu2 %v1217_v16  ;;  %v1027_v6 = vld [vmem:[%s3083_s6 + $0x30] sm:$0xff] }
 0x13d   :  { %999 = vmatpush.msra.mxu3 %v2170_v4  ;;  %941 = vmatpush.msra.mxu0 %v1218_v1  ;;  %v1221_v4 = vld [vmem:[%s3081_s4 + $0x2b8] sm:$0xff]  ;;  %v1026_v1 = vld [vmem:[%s3083_s6 + $0x28] sm:$0xff] }
 0x13e   :  { %960 = vmatpush.msra.mxu1 %v1219_v7  ;;  %981 = vmatpush.msra.mxu2 %v1220_v18  ;;  %v1025_v7 = vld [vmem:[%s3083_s6 + $0x20] sm:$0xff] }
 0x13f   :  { %1000 = vmatpush.msra.mxu3 %v2179_v8  ;;  %942 = vmatpush.msra.mxu0 %v1221_v4  ;;  %v1224_v8 = vld [vmem:[%s3081_s4 + $0x2b0] sm:$0xff] }
 0x140   :  { %961 = vmatpush.msra.mxu1 %v1222_v10  ;;  %982 = vmatpush.msra.mxu2 %v1223_v39  ;;  %v1024_v39 = vld [vmem:[%s3083_s6 + $0x18] sm:$0xff] }
 0x141   :  { %1001 = vmatpush.msra.mxu3 %v2188_v15  ;;  %943 = vmatpush.msra.mxu0 %v1224_v8  ;;  %v1227_v15 = vld [vmem:[%s3081_s4 + $0x2a8] sm:$0xff]  ;;  %v493_v23 = vpop.f32.mrf.mxu0 }
 0x142   :  { %962 = vmatpush.msra.mxu1 %v1225_v11  ;;  %983 = vmatpush.msra.mxu2 %v1226_v24  ;;  %v246_v11 = vadd.f32 %v245_v35, %v225_v28  ;;  %v1023_v24 = vld [vmem:[%s3083_s6 + $0x10] sm:$0xff] }
 0x143   :  { %1002 = vmatpush.msra.mxu3 %v2197_v47  ;;  %944 = vmatpush.msra.mxu0 %v1227_v15  ;;  %v1230_v47 = vld [vmem:[%s3081_s4 + $0x2a0] sm:$0xff] }
 0x144   :  { %963 = vmatpush.msra.mxu1 %v1228_v12  ;;  %984 = vmatpush.msra.mxu2 %v1229_v26 }
 0x145   :  { %1003 = vmatpush.msra.mxu3 %v2206_v51  ;;  %945 = vmatpush.msra.mxu0 %v1230_v47  ;;  %v1233_v51 = vld [vmem:[%s3081_s4 + $0x298] sm:$0xff]  ;;  %v1022_v47 = vld [vmem:[%s3083_s6 + $0x8] sm:$0xff] }
 0x146   :  { %964 = vmatpush.msra.mxu1 %v1231_v14  ;;  %985 = vmatpush.msra.mxu2 %v1232_v17  ;;  %v266_v14 = vadd.f32 %v265_v40, %v246_v11  ;;  %v1021_v17 = vld [vmem:[%s3083_s6] sm:$0xff]  ;;  %v1064_v11 = vld [vmem:[%s3085_s8 + $0x10] sm:$0xff] }
 0x147   :  { %1004 = vmatpush.msra.mxu3 %v2215_v57  ;;  %946 = vmatpush.msra.mxu0 %v1233_v51  ;;  %v1236_v57 = vld [vmem:[%s3081_s4 + $0x290] sm:$0xff] }
 0x148   :  { %965 = vmatpush.msra.mxu1 %v1234_v19  ;;  %986 = vmatpush.msra.mxu2 %v1235_v31 }
 0x149   :  { %1005 = vmatpush.msra.mxu3 %v2224_v63  ;;  %947 = vmatpush.msra.mxu0 %v1236_v57  ;;  %v1239_v63 = vld [vmem:[%s3081_s4 + $0x288] sm:$0xff]  ;;  %v2974_v49 = vpop.f32.mrf.mxu0 }
 0x14a   :  { %966 = vmatpush.msra.mxu1 %v1237_v20  ;;  %987 = vmatpush.msra.mxu2 %v1238_v34  ;;  %v1077_v20 = vld [vmem:[%s3085_s8 + $0x78] sm:$0xff]  ;;  %v1076_v34 = vld [vmem:[%s3085_s8 + $0x70] sm:$0xff] }
 0x14b   :  { %1006 = vmatpush.msra.mxu3 %v2233_v29  ;;  %948 = vmatpush.msra.mxu0 %v1239_v63  ;;  %v1242_v29 = vld [vmem:[%s3081_s4 + $0x280] sm:$0xff] }
 0x14c   :  { %967 = vmatpush.msra.mxu1 %v1240_v41  ;;  %988 = vmatpush.msra.mxu2 %v1241_v22  ;;  %v286_v41 = vadd.f32 %v2942_v48, %v266_v14  ;;  %v1072_v48 = vld [vmem:[%s3085_s8 + $0x50] sm:$0xff] }
 0x14d   :  { %1007 = vmatpush.msra.mxu3 %v2242_v33  ;;  %949 = vmatpush.msra.mxu0 %v1242_v29  ;;  %v821_v33 = vld.sshfl [vmem:[#allocation1 + $0x30] sm:$0xff pattern:$0x73625140] }
 0x14e   :  { %968 = vmatpush.msra.mxu1 %v1243_v36  ;;  %989 = vmatpush.msra.mxu2 %v1244_v58  ;;  %v1074_v58 = vld [vmem:[%s3085_s8 + $0x60] sm:$0xff] }
 0x14f   :  { %1008 = vmatpush.msra.mxu3 %v2251_v37  ;;  %950 = vmatmul.f32.vlgmr.msra.gmra.mxu0 %v820_v38  ;;  %v2946_v37 = vpop.f32.mrf.mxu1  ;;  %v1075_v38 = vld [vmem:[%s3085_s8 + $0x68] sm:$0xff] }
 0x150   :  { %990 = vmatmul.f32.vlgmr.msra.gmra.mxu2 %v822_v62  ;;  %969 = vmatpush.msra.mxu1 %v1245_v44  ;;  %v1073_v44 = vld [vmem:[%s3085_s8 + $0x58] sm:$0xff] }
 0x151   :  { %1009 = vmatpush.msra.mxu3 %v3424_v32  ;;  %970 = vmatmul.f32.vlgmr.msra.gmra.mxu1 %v821_v33  ;;  %v473_v32 = vpop.f32.mrf.mxu3  ;;  %v306_v33 = vadd.f32 %v2944_v27, %v286_v41  ;;  %v1071_v27 = vld [vmem:[%s3085_s8 + $0x48] sm:$0xff] }
 0x152   :  { %1010 = vmatmul.f32.vlgmr.msra.gmra.mxu3 %v824_v30  ;;  %1041 = vmatpush.msrb.mxu0 %v1036_v52 }
 0x153   :  { %1082 = vmatpush.msrb.mxu1 %v1077_v20 }
 0x154   :  { %1042 = vmatpush.msrb.mxu0 %v1035_v55 }
 0x155   :  { %1083 = vmatpush.msrb.mxu1 %v1076_v34 }
 0x156   :  { %1043 = vmatpush.msrb.mxu0 %v1034_v54 }
 0x157   :  { %v433_v9 = vpop.f32.mrf.mxu1  ;;  %1084 = vmatpush.msrb.mxu1 %v1075_v38 }
 0x158   :  { %1044 = vmatpush.msrb.mxu0 %v1033_v13  ;;  %v454_v10 = vadd.f32 %v453_v45, %v433_v9  ;;  %v326_v9 = vadd.f32 %v2946_v37, %v306_v33 }
 0x159   :  { %v2972_v56 = vpop.f32.mrf.mxu3  ;;  %1085 = vmatpush.msrb.mxu1 %v1074_v58 }
 0x15a   :  { %1045 = vmatpush.msrb.mxu0 %v1032_v50  ;;  %v474_v12 = vadd.f32 %v473_v32, %v454_v10  ;;  %v346_v54 = vadd.f32 %v2948_v46, %v326_v9  ;;  %v1069_v50 = vld [vmem:[%s3085_s8 + $0x38] sm:$0xff] }
 0x15b   :  { %1086 = vmatpush.msrb.mxu1 %v1073_v44 }
 0x15c   :  { %1046 = vmatpush.msrb.mxu0 %v1031_v21  ;;  %v494_v31 = vadd.f32 %v493_v23, %v474_v12  ;;  %v1070_v23 = vld [vmem:[%s3085_s8 + $0x40] sm:$0xff] }
 0x15d   :  { %1087 = vmatpush.msrb.mxu1 %v1072_v48  ;;  %v1121_v12 = vld [vmem:[%s3084_s7] ss:$0 sm:$0xff] }
 0x15e   :  { %1047 = vmatpush.msrb.mxu0 %v1030_v59 }
 0x15f   :  { %v513_v0 = vpop.f32.mrf.mxu1  ;;  %1088 = vmatpush.msrb.mxu1 %v1071_v27 }
 0x160   :  { %1048 = vmatpush.msrb.mxu0 %v1029_v61  ;;  %v514_v29 = vadd.f32 %v513_v0, %v494_v31  ;;  %v1067_v61 = vld [vmem:[%s3085_s8 + $0x28] sm:$0xff] }
 0x161   :  { %1089 = vmatpush.msrb.mxu1 %v1070_v23 }
 0x162   :  { %1049 = vmatpush.msrb.mxu0 %v1028_v60  ;;  %v534_v35 = vadd.f32 %v533_v43, %v514_v29 }
 0x163   :  { %1090 = vmatpush.msrb.mxu1 %v1069_v50 }
 0x164   :  { %1050 = vmatpush.msrb.mxu0 %v1027_v6  ;;  %v554_v52 = vadd.f32 %v2972_v56, %v534_v35  ;;  %v1068_v56 = vld [vmem:[%s3085_s8 + $0x30] sm:$0xff]  ;;  %v1066_v6 = vld [vmem:[%s3085_s8 + $0x20] sm:$0xff] }
 0x165   :  { %1091 = vmatpush.msrb.mxu1 %v1068_v56 }
 0x166   :  { %1051 = vmatpush.msrb.mxu0 %v1026_v1  ;;  %v574_v13 = vadd.f32 %v2974_v49, %v554_v52 }
 0x167   :  { %v2979_v2 = vpop.f32.mrf.mxu1  ;;  %1092 = vmatpush.msrb.mxu1 %v1067_v61 }
 0x168   :  { %1052 = vmatpush.msrb.mxu0 %v1025_v7  ;;  %v594_v46 = vadd.f32 %v2979_v2, %v574_v13  ;;  %v1065_v2 = vld [vmem:[%s3085_s8 + $0x18] sm:$0xff] }
 0x169   :  { %v642_v5 = vpop.f32.mrf.mxu2  ;;  %1093 = vmatpush.msrb.mxu1 %v1066_v6 }
 0x16a   :  { %1053 = vmatpush.msrb.mxu0 %v1024_v39 }
 0x16b   :  { %1094 = vmatpush.msrb.mxu1 %v1065_v2 }
 0x16c   :  { %v662_v3 = vpop.f32.mrf.mxu3  ;;  %1054 = vmatpush.msrb.mxu0 %v1023_v24  ;;  %v1063_v24 = vld [vmem:[%s3085_s8 + $0x8] sm:$0xff] }
 0x16d   :  { %v663_v26 = vadd.f32 %v662_v3, %v642_v5  ;;  %v366_v5 = vadd.f32 %v2950_v42, %v346_v54  ;;  %1095 = vmatpush.msrb.mxu1 %v1064_v11 }
 0x16e   :  { %1055 = vmatpush.msrb.mxu0 %v1022_v47 }
 0x16f   :  { %v682_v53 = vpop.f32.mrf.mxu0  ;;  %v386_v3 = vadd.f32 %v2952_v25, %v366_v5  ;;  %v1120_v25 = vld [vmem:[%s3082_s5] ss:$0 sm:$0xff]  ;;  %1096 = vmatpush.msrb.mxu1 %v1063_v24 }
 0x170   :  { %1056 = vmatpush.msrb.mxu0 %v1021_v17  ;;  %v683_v57 = vadd.f32 %v682_v53, %v663_v26  ;;  %v1122_v17 = vld [vmem:[%s3086_s9] ss:$0 sm:$0xff] }
 0x171   :  { %v596_v1 = vmax.f32 %v386_v3, %v594_v46 }
 0x172   :  { %v702_v16 = vpop.f32.mrf.mxu1  ;;  %v722_v18 = vpop.f32.mrf.mxu2 }
 0x173   :  { %v703_v36 = vadd.f32 %v702_v16, %v683_v57 }
 0x175   :  { %v742_v8 = vpop.f32.mrf.mxu3  ;;  %v723_v40 = vadd.f32 %v722_v18, %v703_v36 }
 0x177   :  { %v743_v55 = vadd.f32 %v742_v8, %v723_v40 }
 0x188   :  { %v762_v4 = vpop.f32.mrf.mxu0 }
 0x189   :  { %v763_v37 = vadd.f32 %v762_v4, %v743_v55 }
 0x18b   :  { %v782_v15 = vpop.f32.mrf.mxu1 }
 0x18c   :  { %v783_v49 = vadd.f32 %v782_v15, %v763_v37  ;;  %v1062_v15 = vld [vmem:[%s3085_s8] sm:$0xff] }
 0x18d   :  { %1097 = vmatpush.msrb.mxu1 %v1062_v15 }
 0x18f   :  { %v802_v51 = vpop.f32.mrf.mxu2 }
 0x190   :  { %v803_v53 = vadd.f32 %v802_v51, %v783_v49 }
 0x192   :  { %v805_v18 = vmax.f32 %v596_v1, %v803_v53 }
 0x1b0   :  { %v851_v63 = vpop.f32.mrf.mxu3 }
 0x1b3   :  { %v871_v19 = vpop.f32.mrf.mxu0 }
 0x1b4   :  { %v872_v22 = vadd.f32 %v871_v19, %v851_v63 }
 0x1b6   :  { %v891_v62 = vpop.f32.mrf.mxu1  ;;  %v911_v28 = vpop.f32.mrf.mxu2 }
 0x1b7   :  { %v892_v30 = vadd.f32 %v891_v62, %v872_v22 }
 0x1b9   :  { %v912_v45 = vadd.f32 %v911_v28, %v892_v30  ;;  %v931_v32 = vpop.f32.mrf.mxu3 }
 0x1bb   :  { %v932_v0 = vadd.f32 %v931_v32, %v912_v45 }
 0x1cc   :  { %v951_v43 = vpop.f32.mrf.mxu0 }
 0x1cd   :  { %v952_v21 = vadd.f32 %v951_v43, %v932_v0 }
 0x1ce   :  { %v971_v59 = vpop.f32.mrf.mxu1 }
 0x1cf   :  { %v972_v60 = vadd.f32 %v971_v59, %v952_v21 }
 0x1d3   :  { %v991_v16 = vpop.f32.mrf.mxu2 }
 0x1d4   :  { %v992_v42 = vadd.f32 %v991_v16, %v972_v60 }
 0x1d5   :  { %v1011_v7 = vpop.f32.mrf.mxu3 }
 0x1d6   :  { %v1012_v4 = vadd.f32 %v1011_v7, %v992_v42 }
 0x1d8   :  { %v1014_v10 = vmax.f32 %v805_v18, %v1012_v4 }
 0x1da   :  { %v1019_v39 = vadd.f32 %v1120_v25, %v1014_v10 }
 0x1dc   :  { %v1020_v8 = vmax.f32 %v1019_v39, 0.0 }
 0x1de   :  { %1057 = vmatmul.f32.vlgmr.msrb.gmra.mxu0 %v1020_v8 }
 0x25b   :  { %v1058_v26 = vpop.f32.mrf.mxu0 }
 0x25c   :  { %v1059_v47 = vadd.f32 %v1121_v12, %v1058_v26 }
 0x25e   :  { %v1061_v14 = vmax.f32 %v1059_v47, 0.0 }
 0x260   :  { %1098 = vmatmul.f32.vlgmr.msrb.gmra.mxu1 %v1061_v14 }
 0x2dd   :  { %v1099_v51 = vpop.f32.mrf.mxu1 }
 0x2de   :  { %v1100_v19 = vadd.f32 %v1122_v17, %v1099_v51 }
 0x2e0   :  { %1102 = vst [vmem:[#allocation2] sm:$0x3] %v1100_v19 }
 0x2e1   :  { %1113 = dma.vmem_to_hbm [thread:$0]  %s1109_s23, 32, %s1111_s25, [#allocation3]  }
 0x2e2   :  { %1270 = dma.done.wait [#allocation3], 32  }
 0x2e3   :  { %1271 = vsyncadd [#allocation3], 4294967264 }
 0x2e4   :  { %1118 = vsyncpa [#allocation3], 1 }

</bundles_post_ra>
